<compile_context>
chip_gen: v7x
topology: tpu7x:2x2x1
jax: 0.10.0
libtpu: 0.0.40
codegen_flags: <defaults>
</compile_context>

<pallas_src>
import math
import functools

import jax
import jax.numpy as jnp
from jax import lax
from jax.experimental import pallas as pl
from jax.experimental.pallas import tpu as pltpu

LN_EPS = 1e-5
NEG_BIG = -1e30          # additive mask value; effectively -inf after softmax, safe in f32


# ----------------------------- in-kernel helpers (f32 math) -----------------------------

def _layernorm_f32(x, g, b):
    # x: (N, D) f32; g, b: (1, D) f32
    mean = jnp.mean(x, axis=-1, keepdims=True)
    xc = x - mean
    var = jnp.mean(xc * xc, axis=-1, keepdims=True)
    return xc * lax.rsqrt(var + LN_EPS) * g + b


def _mha_f32(q, k, v, bias, *, num_heads, scale):
    # q: (T, D) f32, k/v: (S, D) f32, bias: (T, S) or (1, S) additive f32 (0 keep, NEG_BIG mask)
    # Heads are batched into a single (H, T, dh) x (H, S, dh) einsum pair (no per-head slices,
    # no concat); scores/softmax stats stay in f32, both matmuls run bf16 on the MXU.
    # TODO(synk): for long sequences, replace the full (H, T, S) scores with flash-style KV
    #             tiling (online softmax over a KV grid axis) instead of materializing them.
    T, D = q.shape
    S = k.shape[0]
    dh = D // num_heads

    qh = q.reshape(T, num_heads, dh).transpose(1, 0, 2).astype(jnp.bfloat16)   # (H, T, dh)
    kh = k.reshape(S, num_heads, dh).transpose(1, 0, 2).astype(jnp.bfloat16)   # (H, S, dh)
    vh = v.reshape(S, num_heads, dh).transpose(1, 0, 2).astype(jnp.bfloat16)   # (H, S, dh)

    s = jnp.einsum("htd,hsd->hts", qh, kh,
                   preferred_element_type=jnp.float32) * scale                 # (H, T, S) f32
    s = s + bias                                                               # single mask add
    m = jnp.max(s, axis=-1, keepdims=True)
    p = jnp.exp(s - m)
    l = jnp.sum(p, axis=-1, keepdims=True)
    ctx = jnp.einsum("hts,hsd->htd", p.astype(jnp.bfloat16), vh,
                     preferred_element_type=jnp.float32)                       # (H, T, dh) f32
    ctx = ctx * pl.reciprocal(l, approx=True)
    return ctx.transpose(1, 0, 2).reshape(T, D)                                # (T, D) f32


# ----------------------------- fused per-layer kernel -----------------------------

def _decoder_layer_kernel(*refs, num_heads, final_ln):
    (x_ref, enc_ref, tbias_ref, mbias_ref,
     ln1g, ln1b, wqkv, bqkv, wo1, bo1,
     ln2g, ln2b, wq, bq, wkv, bkv, wo2, bo2,
     ln3g, ln3b, w1, b1, w2, b2) = refs[:24]
    if final_ln:
        fg, fb, o_ref = refs[24], refs[25], refs[26]
    else:
        o_ref = refs[24]

    x = x_ref[...].astype(jnp.float32)                     # (T, D)
    enc = enc_ref[...].astype(jnp.float32)                 # (S, D)
    T, D = x.shape
    scale = 1.0 / math.sqrt(D // num_heads)

    # ---- sublayer 1: LN1 -> fused QKV proj -> causal self-attention -> out proj -> +residual ----
    xn = _layernorm_f32(x, ln1g[...], ln1b[...])
    qkv = jnp.dot(xn.astype(jnp.bfloat16), wqkv[...],
                  preferred_element_type=jnp.float32) + bqkv[...]              # (T, 3D)
    q, k, v = qkv[:, :D], qkv[:, D:2 * D], qkv[:, 2 * D:]                      # 128-aligned splits
    # causal + key-padding additive bias, computed ONCE (not per head)
    ri = lax.broadcasted_iota(jnp.int32, (T, T), 0)
    ci = lax.broadcasted_iota(jnp.int32, (T, T), 1)
    self_bias = tbias_ref[...] + jnp.where(ci <= ri, 0.0, NEG_BIG)             # (T, T)
    ctx = _mha_f32(q, k, v, self_bias, num_heads=num_heads, scale=scale)
    x = x + (jnp.dot(ctx.astype(jnp.bfloat16), wo1[...],
                     preferred_element_type=jnp.float32) + bo1[...])           # dropout1 = identity (eval)

    # ---- sublayer 2: LN2 -> Q proj / fused KV proj of encoder -> cross-attention -> out proj -> +residual ----
    xn = _layernorm_f32(x, ln2g[...], ln2b[...])
    qc = jnp.dot(xn.astype(jnp.bfloat16), wq[...],
                 preferred_element_type=jnp.float32) + bq[...]                 # (T, D)
    kvc = jnp.dot(enc.astype(jnp.bfloat16), wkv[...],
                  preferred_element_type=jnp.float32) + bkv[...]               # (S, 2D)
    kc, vc = kvc[:, :D], kvc[:, D:]
    ctx = _mha_f32(qc, kc, vc, mbias_ref[...], num_heads=num_heads, scale=scale)
    x = x + (jnp.dot(ctx.astype(jnp.bfloat16), wo2[...],
                     preferred_element_type=jnp.float32) + bo2[...])           # dropout2 = identity (eval)

    # ---- sublayer 3: LN3 -> FFN w1 (ReLU) -> w2 -> +residual ----
    xn = _layernorm_f32(x, ln3g[...], ln3b[...])
    h = jnp.dot(xn.astype(jnp.bfloat16), w1[...],
                preferred_element_type=jnp.float32) + b1[...]
    h = jnp.maximum(h, 0.0)
    x = x + (jnp.dot(h.astype(jnp.bfloat16), w2[...],
                     preferred_element_type=jnp.float32) + b2[...])            # dropout3 = identity (eval)

    # ---- optional final LayerNorm of the stack, fused into the last layer's kernel ----
    if final_ln:
        x = _layernorm_f32(x, fg[...], fb[...])
    o_ref[...] = x.astype(o_ref.dtype)


# ----------------------------- pallas_call wrapper (grid over batch, parallel) -----------------------------

def _compiler_params():
    return pltpu.CompilerParams(
        dimension_semantics=("parallel",),
        vmem_limit_bytes=48 * 1024 * 1024,   # raise above the 16/32 MiB default scoped limit
    )


def _full_spec(shape):
    # Grid-invariant operand (weights / biases): same block for every grid point.
    # TODO(synk): mark with pipeline_mode=pl.Buffered(1) (single buffer) to halve weight VMEM
    #             once single-buffered top-level BlockSpecs are verified on the target toolchain.
    nd = len(shape)
    return pl.BlockSpec(shape, lambda b, _nd=nd: (0,) * _nd)


def _batched_spec(trailing_shape):
    nd = 1 + len(trailing_shape)
    return pl.BlockSpec((None,) + tuple(trailing_shape),
                        lambda b, _nd=nd: (b,) + (0,) * (_nd - 1))


def decoder_layer(x, enc_out, tgt_bias, mem_bias, p, num_heads, final_params=None):
    B, T, D = x.shape
    S = enc_out.shape[1]
    F = p["w1"].shape[1]
    final_ln = final_params is not None
    kern = functools.partial(_decoder_layer_kernel, num_heads=num_heads, final_ln=final_ln)

    in_specs = [
        _batched_spec((T, D)),                                   # x
        _batched_spec((S, D)),                                   # encoder output
        _batched_spec((1, T)),                                   # tgt pad additive bias
        _batched_spec((1, S)),                                   # memory pad additive bias
        _full_spec((1, D)), _full_spec((1, D)),                  # LN1 gamma/beta
        _full_spec((D, 3 * D)), _full_spec((1, 3 * D)),          # Wqkv, bqkv
        _full_spec((D, D)), _full_spec((1, D)),                  # Wo (self), bo
        _full_spec((1, D)), _full_spec((1, D)),                  # LN2 gamma/beta
        _full_spec((D, D)), _full_spec((1, D)),                  # Wq, bq
        _full_spec((D, 2 * D)), _full_spec((1, 2 * D)),          # Wkv, bkv
        _full_spec((D, D)), _full_spec((1, D)),                  # Wo (cross), bo
        _full_spec((1, D)), _full_spec((1, D)),                  # LN3 gamma/beta
        _full_spec((D, F)), _full_spec((1, F)),                  # W1, b1
        _full_spec((F, D)), _full_spec((1, D)),                  # W2, b2
    ]
    args = [x, enc_out, tgt_bias, mem_bias,
            p["ln1_g"], p["ln1_b"], p["wqkv"], p["bqkv"], p["wo1"], p["bo1"],
            p["ln2_g"], p["ln2_b"], p["wq"], p["bq"], p["wkv"], p["bkv"], p["wo2"], p["bo2"],
            p["ln3_g"], p["ln3_b"], p["w1"], p["b1"], p["w2"], p["b2"]]
    if final_ln:
        in_specs += [_full_spec((1, D)), _full_spec((1, D))]
        args += [final_params[0], final_params[1]]

    return pl.pallas_call(
        kern,
        out_shape=jax.ShapeDtypeStruct((B, T, D), x.dtype),
        grid=(B,),
        in_specs=in_specs,
        out_specs=_batched_spec((T, D)),
        compiler_params=_compiler_params(),
    )(*args)


# ----------------------------- model glue -----------------------------

@functools.partial(jax.jit, static_argnames=("num_heads",))
def transformer_decoder(params, x, enc_out, tgt_bias, mem_bias, num_heads):
    n = len(params["layers"])
    for i, p in enumerate(params["layers"]):
        final = (params["final_g"], params["final_b"]) if i == n - 1 else None
        x = decoder_layer(x, enc_out, tgt_bias, mem_bias, p, num_heads, final_params=final)
    return x


def make_additive_pad_bias(padding_mask, B, S):
    # padding_mask: (B, S) bool, True = pad  ->  additive bias (B, 1, S) f32 (0 keep / NEG_BIG pad)
    if padding_mask is None:
        return jnp.zeros((B, 1, S), jnp.float32)
    return jnp.where(padding_mask, NEG_BIG, 0.0).astype(jnp.float32).reshape(B, 1, S)


def run_decoder(params, x, enc_out, tgt_padding_mask=None, memory_padding_mask=None, num_heads=4):
    B, T, _ = x.shape
    S = enc_out.shape[1]
    tgt_bias = make_additive_pad_bias(tgt_padding_mask, B, T)
    mem_bias = make_additive_pad_bias(memory_padding_mask, B, S)
    return transformer_decoder(params, x, enc_out, tgt_bias, mem_bias, num_heads=num_heads)


# ----------------------------- deterministic init -----------------------------

def init_params(key, d_model, num_heads, dim_ff, num_layers):
    def lin(k, din, dout):
        w = (jax.random.normal(k, (din, dout), jnp.float32) * 0.02).astype(jnp.bfloat16)
        b = jnp.zeros((1, dout), jnp.float32)
        return w, b

    ones_d = jnp.ones((1, d_model), jnp.float32)
    zeros_d = jnp.zeros((1, d_model), jnp.float32)

    layers = []
    for _ in range(num_layers):
        keys = jax.random.split(key, 11)
        key = keys[-1]
        wq_s, bq_s = lin(keys[0], d_model, d_model)
        wk_s, bk_s = lin(keys[1], d_model, d_model)
        wv_s, bv_s = lin(keys[2], d_model, d_model)
        wo_s, bo_s = lin(keys[3], d_model, d_model)
        wq_c, bq_c = lin(keys[4], d_model, d_model)
        wk_c, bk_c = lin(keys[5], d_model, d_model)
        wv_c, bv_c = lin(keys[6], d_model, d_model)
        wo_c, bo_c = lin(keys[7], d_model, d_model)
        w1, b1 = lin(keys[8], d_model, dim_ff)
        w2, b2 = lin(keys[9], dim_ff, d_model)
        layers.append(dict(
            ln1_g=ones_d, ln1_b=zeros_d,
            wqkv=jnp.concatenate([wq_s, wk_s, wv_s], axis=1),
            bqkv=jnp.concatenate([bq_s, bk_s, bv_s], axis=1),
            wo1=wo_s, bo1=bo_s,
            ln2_g=ones_d, ln2_b=zeros_d,
            wq=wq_c, bq=bq_c,
            wkv=jnp.concatenate([wk_c, wv_c], axis=1),
            bkv=jnp.concatenate([bk_c, bv_c], axis=1),
            wo2=wo_c, bo2=bo_c,
            ln3_g=ones_d, ln3_b=zeros_d,
            w1=w1, b1=b1, w2=w2, b2=b2))
    return dict(layers=layers, final_g=ones_d, final_b=zeros_d)


# ----------------------------- main -----------------------------

if __name__ == "__main__":
    # Lane-dense small config: d_model = 128 (one full lane width), dim_ff = 256.
    d_model, num_heads, dim_ff, num_layers = 128, 4, 256, 2
    B, tgt_len, src_len = 2, 16, 16

    root = jax.random.PRNGKey(0)
    kx, kenc, kp = jax.random.split(root, 3)
    x = jax.random.normal(kx, (B, tgt_len, d_model), jnp.float32)
    enc_out = jax.random.normal(kenc, (B, src_len, d_model), jnp.float32)
    params = init_params(kp, d_model, num_heads, dim_ff, num_layers)

    # TODO(synk): dropout (p=0.1) is identity (inference/eval mode); training-time RNG dropout not implemented.
    out = run_decoder(params, x, enc_out,
                      tgt_padding_mask=None, memory_padding_mask=None,
                      num_heads=num_heads)
    out = jax.block_until_ready(out)
    assert out.shape == (B, tgt_len, d_model)
    assert bool(jnp.all(jnp.isfinite(out)))
    print("KERNEL_OK")
</pallas_src>

<mosaic_0001>
module attributes {stable_mosaic.version = 11 : i64} {
  func.func @_decoder_layer_kernel(%arg0: i32, %arg1: memref<1x16x128xf32, #tpu.memory_space<vmem>>, %arg2: memref<1x16x128xf32, #tpu.memory_space<vmem>>, %arg3: memref<1x1x16xf32, #tpu.memory_space<vmem>>, %arg4: memref<1x1x16xf32, #tpu.memory_space<vmem>>, %arg5: memref<1x128xf32, #tpu.memory_space<vmem>>, %arg6: memref<1x128xf32, #tpu.memory_space<vmem>>, %arg7: memref<128x384xbf16, #tpu.memory_space<vmem>>, %arg8: memref<1x384xf32, #tpu.memory_space<vmem>>, %arg9: memref<128x128xbf16, #tpu.memory_space<vmem>>, %arg10: memref<1x128xf32, #tpu.memory_space<vmem>>, %arg11: memref<1x128xf32, #tpu.memory_space<vmem>>, %arg12: memref<1x128xf32, #tpu.memory_space<vmem>>, %arg13: memref<128x128xbf16, #tpu.memory_space<vmem>>, %arg14: memref<1x128xf32, #tpu.memory_space<vmem>>, %arg15: memref<128x256xbf16, #tpu.memory_space<vmem>>, %arg16: memref<1x256xf32, #tpu.memory_space<vmem>>, %arg17: memref<128x128xbf16, #tpu.memory_space<vmem>>, %arg18: memref<1x128xf32, #tpu.memory_space<vmem>>, %arg19: memref<1x128xf32, #tpu.memory_space<vmem>>, %arg20: memref<1x128xf32, #tpu.memory_space<vmem>>, %arg21: memref<128x256xbf16, #tpu.memory_space<vmem>>, %arg22: memref<1x256xf32, #tpu.memory_space<vmem>>, %arg23: memref<256x128xbf16, #tpu.memory_space<vmem>>, %arg24: memref<1x128xf32, #tpu.memory_space<vmem>>, %arg25: memref<1x128xf32, #tpu.memory_space<vmem>>, %arg26: memref<1x128xf32, #tpu.memory_space<vmem>>, %arg27: memref<1x16x128xf32, #tpu.memory_space<vmem>>) attributes {dimension_semantics = [#tpu.dimension_semantics<parallel>], iteration_bounds = array<i64: 2>, scalar_prefetch = 0 : i64, scratch_operands = 0 : i64, tpu.core_type = #tpu.core_type<tc>, window_params = [{transform_indices = @transform_0, window_bounds = array<i64: 1, 16, 128>}, {transform_indices = @transform_1, window_bounds = array<i64: 1, 16, 128>}, {transform_indices = @transform_2, window_bounds = array<i64: 1, 1, 16>}, {transform_indices = @transform_3, window_bounds = array<i64: 1, 1, 16>}, {pipeline_mode = #tpu.pipeline_mode<synchronous>, transform_indices = @transform_4, window_bounds = array<i64: 1, 128>}, {pipeline_mode = #tpu.pipeline_mode<synchronous>, transform_indices = @transform_5, window_bounds = array<i64: 1, 128>}, {pipeline_mode = #tpu.pipeline_mode<synchronous>, transform_indices = @transform_6, window_bounds = array<i64: 128, 384>}, {pipeline_mode = #tpu.pipeline_mode<synchronous>, transform_indices = @transform_7, window_bounds = array<i64: 1, 384>}, {pipeline_mode = #tpu.pipeline_mode<synchronous>, transform_indices = @transform_8, window_bounds = array<i64: 128, 128>}, {pipeline_mode = #tpu.pipeline_mode<synchronous>, transform_indices = @transform_9, window_bounds = array<i64: 1, 128>}, {pipeline_mode = #tpu.pipeline_mode<synchronous>, transform_indices = @transform_10, window_bounds = array<i64: 1, 128>}, {pipeline_mode = #tpu.pipeline_mode<synchronous>, transform_indices = @transform_11, window_bounds = array<i64: 1, 128>}, {pipeline_mode = #tpu.pipeline_mode<synchronous>, transform_indices = @transform_12, window_bounds = array<i64: 128, 128>}, {pipeline_mode = #tpu.pipeline_mode<synchronous>, transform_indices = @transform_13, window_bounds = array<i64: 1, 128>}, {pipeline_mode = #tpu.pipeline_mode<synchronous>, transform_indices = @transform_14, window_bounds = array<i64: 128, 256>}, {pipeline_mode = #tpu.pipeline_mode<synchronous>, transform_indices = @transform_15, window_bounds = array<i64: 1, 256>}, {pipeline_mode = #tpu.pipeline_mode<synchronous>, transform_indices = @transform_16, window_bounds = array<i64: 128, 128>}, {pipeline_mode = #tpu.pipeline_mode<synchronous>, transform_indices = @transform_17, window_bounds = array<i64: 1, 128>}, {pipeline_mode = #tpu.pipeline_mode<synchronous>, transform_indices = @transform_18, window_bounds = array<i64: 1, 128>}, {pipeline_mode = #tpu.pipeline_mode<synchronous>, transform_indices = @transform_19, window_bounds = array<i64: 1, 128>}, {pipeline_mode = #tpu.pipeline_mode<synchronous>, transform_indices = @transform_20, window_bounds = array<i64: 128, 256>}, {pipeline_mode = #tpu.pipeline_mode<synchronous>, transform_indices = @transform_21, window_bounds = array<i64: 1, 256>}, {pipeline_mode = #tpu.pipeline_mode<synchronous>, transform_indices = @transform_22, window_bounds = array<i64: 256, 128>}, {pipeline_mode = #tpu.pipeline_mode<synchronous>, transform_indices = @transform_23, window_bounds = array<i64: 1, 128>}, {pipeline_mode = #tpu.pipeline_mode<synchronous>, transform_indices = @transform_24, window_bounds = array<i64: 1, 128>}, {pipeline_mode = #tpu.pipeline_mode<synchronous>, transform_indices = @transform_25, window_bounds = array<i64: 1, 128>}, {transform_indices = @transform_26, window_bounds = array<i64: 1, 16, 128>}]} {
    %c0 = arith.constant 0 : index
    %c0_0 = arith.constant 0 : index
    %c0_1 = arith.constant 0 : index
    %0 = vector.load %arg1[%c0, %c0_0, %c0_1] : memref<1x16x128xf32, #tpu.memory_space<vmem>>, vector<1x16x128xf32>
    %1 = vector.shape_cast %0 : vector<1x16x128xf32> to vector<16x128xf32>
    %c0_2 = arith.constant 0 : index
    %c0_3 = arith.constant 0 : index
    %c0_4 = arith.constant 0 : index
    %2 = vector.load %arg2[%c0_2, %c0_3, %c0_4] : memref<1x16x128xf32, #tpu.memory_space<vmem>>, vector<1x16x128xf32>
    %3 = vector.shape_cast %2 : vector<1x16x128xf32> to vector<16x128xf32>
    %c0_5 = arith.constant 0 : index
    %c0_6 = arith.constant 0 : index
    %4 = vector.load %arg5[%c0_5, %c0_6] : memref<1x128xf32, #tpu.memory_space<vmem>>, vector<1x128xf32>
    %c0_7 = arith.constant 0 : index
    %c0_8 = arith.constant 0 : index
    %5 = vector.load %arg6[%c0_7, %c0_8] : memref<1x128xf32, #tpu.memory_space<vmem>>, vector<1x128xf32>
    %cst = arith.constant dense<0.000000e+00> : vector<16xf32>
    %6 = vector.multi_reduction <add>, %1, %cst [1] : vector<16x128xf32> to vector<16xf32>
    %7 = vector.shape_cast %6 : vector<16xf32> to vector<16x1xf32>
    %cst_9 = arith.constant 1.280000e+02 : f32
    %8 = vector.broadcast %cst_9 : f32 to vector<16x1xf32>
    %9 = arith.divf %7, %8 : vector<16x1xf32>
    %10 = vector.broadcast %9 : vector<16x1xf32> to vector<16x128xf32>
    %11 = arith.subf %1, %10 : vector<16x128xf32>
    %12 = arith.mulf %11, %11 : vector<16x128xf32>
    %cst_10 = arith.constant dense<0.000000e+00> : vector<16xf32>
    %13 = vector.multi_reduction <add>, %12, %cst_10 [1] : vector<16x128xf32> to vector<16xf32>
    %14 = vector.shape_cast %13 : vector<16xf32> to vector<16x1xf32>
    %cst_11 = arith.constant 1.280000e+02 : f32
    %15 = vector.broadcast %cst_11 : f32 to vector<16x1xf32>
    %16 = arith.divf %14, %15 : vector<16x1xf32>
    %cst_12 = arith.constant 9.99999974E-6 : f32
    %17 = vector.broadcast %cst_12 : f32 to vector<16x1xf32>
    %18 = arith.addf %16, %17 : vector<16x1xf32>
    %19 = math.rsqrt %18 : vector<16x1xf32>
    %20 = vector.broadcast %19 : vector<16x1xf32> to vector<16x128xf32>
    %21 = arith.mulf %11, %20 : vector<16x128xf32>
    %22 = vector.broadcast %4 : vector<1x128xf32> to vector<16x128xf32>
    %23 = arith.mulf %21, %22 : vector<16x128xf32>
    %24 = vector.broadcast %5 : vector<1x128xf32> to vector<16x128xf32>
    %25 = arith.addf %23, %24 : vector<16x128xf32>
    %26 = arith.truncf %25 : vector<16x128xf32> to vector<16x128xbf16>
    %c0_13 = arith.constant 0 : index
    %c0_14 = arith.constant 0 : index
    %27 = vector.load %arg7[%c0_13, %c0_14] : memref<128x384xbf16, #tpu.memory_space<vmem>>, vector<128x384xbf16>
    %cst_15 = arith.constant dense<0.000000e+00> : vector<16x384xf32>
    %28 = tpu.matmul %26, %27, %cst_15 {dimension_numbers = #tpu.dot_dimension_numbers<[1], [0], [0], [1], [0, 0, 1, 1], [], []>} : vector<16x128xbf16>, vector<128x384xbf16>, vector<16x384xf32> -> vector<16x384xf32>
    %c0_16 = arith.constant 0 : index
    %c0_17 = arith.constant 0 : index
    %29 = vector.load %arg8[%c0_16, %c0_17] : memref<1x384xf32, #tpu.memory_space<vmem>>, vector<1x384xf32>
    %30 = vector.broadcast %29 : vector<1x384xf32> to vector<16x384xf32>
    %31 = arith.addf %28, %30 : vector<16x384xf32>
    %32 = vector.extract_strided_slice %31 {offsets = [0, 0], sizes = [16, 128], strides = [1, 1]} : vector<16x384xf32> to vector<16x128xf32>
    %33 = vector.extract_strided_slice %31 {offsets = [0, 128], sizes = [16, 128], strides = [1, 1]} : vector<16x384xf32> to vector<16x128xf32>
    %34 = vector.extract_strided_slice %31 {offsets = [0, 256], sizes = [16, 128], strides = [1, 1]} : vector<16x384xf32> to vector<16x128xf32>
    %35 = tpu.iota {dimensions = array<i32: 0>} : vector<16x16xi32>
    %36 = tpu.iota {dimensions = array<i32: 1>} : vector<16x16xi32>
    %c0_18 = arith.constant 0 : index
    %c0_19 = arith.constant 0 : index
    %c0_20 = arith.constant 0 : index
    %37 = vector.load %arg3[%c0_18, %c0_19, %c0_20] : memref<1x1x16xf32, #tpu.memory_space<vmem>>, vector<1x1x16xf32>
    %38 = vector.shape_cast %37 : vector<1x1x16xf32> to vector<1x16xf32>
    %39 = arith.cmpi sle, %36, %35 : vector<16x16xi32>
    %cst_21 = arith.constant 0.000000e+00 : f32
    %cst_22 = arith.constant -1.000000e+30 : f32
    %40 = vector.broadcast %cst_21 : f32 to vector<16x16xf32>
    %41 = vector.broadcast %cst_22 : f32 to vector<16x16xf32>
    %42 = arith.select %39, %40, %41 : vector<16x16xi1>, vector<16x16xf32>
    %43 = vector.broadcast %38 : vector<1x16xf32> to vector<16x16xf32>
    %44 = arith.addf %43, %42 : vector<16x16xf32>
    %45 = vector.shape_cast %32 : vector<16x128xf32> to vector<16x4x32xf32>
    %46 = tpu.transpose %45, [1, 0, 2] : vector<16x4x32xf32> -> vector<4x16x32xf32>
    %47 = arith.truncf %46 : vector<4x16x32xf32> to vector<4x16x32xbf16>
    %48 = vector.shape_cast %33 : vector<16x128xf32> to vector<16x4x32xf32>
    %49 = tpu.transpose %48, [1, 0, 2] : vector<16x4x32xf32> -> vector<4x16x32xf32>
    %50 = arith.truncf %49 : vector<4x16x32xf32> to vector<4x16x32xbf16>
    %51 = vector.shape_cast %34 : vector<16x128xf32> to vector<16x4x32xf32>
    %52 = tpu.transpose %51, [1, 0, 2] : vector<16x4x32xf32> -> vector<4x16x32xf32>
    %53 = arith.truncf %52 : vector<4x16x32xf32> to vector<4x16x32xbf16>
    "tpu.trace_start"() <{level = 10 : i32, message = "htd,hsd->hts"}> : () -> ()
    %cst_23 = arith.constant dense<0.000000e+00> : vector<4x16x16xf32>
    %54 = tpu.matmul %47, %50, %cst_23 {dimension_numbers = #tpu.dot_dimension_numbers<[2], [2], [1], [1], [0, 0, 0, 1, 1, 1], [0], [0]>} : vector<4x16x32xbf16>, vector<4x16x32xbf16>, vector<4x16x16xf32> -> vector<4x16x16xf32>
    "tpu.trace_stop"() : () -> ()
    %cst_24 = arith.constant 0.176776692 : f32
    %55 = vector.broadcast %cst_24 : f32 to vector<4x16x16xf32>
    %56 = arith.mulf %54, %55 : vector<4x16x16xf32>
    %57 = vector.shape_cast %44 : vector<16x16xf32> to vector<1x16x16xf32>
    %58 = vector.broadcast %57 : vector<1x16x16xf32> to vector<4x16x16xf32>
    %59 = arith.addf %56, %58 : vector<4x16x16xf32>
    %cst_25 = arith.constant dense<0xFF800000> : vector<4x16xf32>
    %60 = vector.multi_reduction <maximumf>, %59, %cst_25 [2] : vector<4x16x16xf32> to vector<4x16xf32>
    %61 = vector.shape_cast %60 : vector<4x16xf32> to vector<4x16x1xf32>
    %62 = vector.broadcast %61 : vector<4x16x1xf32> to vector<4x16x16xf32>
    %63 = arith.subf %59, %62 : vector<4x16x16xf32>
    %64 = math.exp %63 : vector<4x16x16xf32>
    %cst_26 = arith.constant dense<0.000000e+00> : vector<4x16xf32>
    %65 = vector.multi_reduction <add>, %64, %cst_26 [2] : vector<4x16x16xf32> to vector<4x16xf32>
    %66 = vector.shape_cast %65 : vector<4x16xf32> to vector<4x16x1xf32>
    %67 = arith.truncf %64 : vector<4x16x16xf32> to vector<4x16x16xbf16>
    "tpu.trace_start"() <{level = 10 : i32, message = "hts,hsd->htd"}> : () -> ()
    %cst_27 = arith.constant dense<0.000000e+00> : vector<4x16x32xf32>
    %68 = tpu.matmul %67, %53, %cst_27 {dimension_numbers = #tpu.dot_dimension_numbers<[2], [1], [1], [2], [0, 0, 0, 1, 1, 2], [0], [0]>} : vector<4x16x16xbf16>, vector<4x16x32xbf16>, vector<4x16x32xf32> -> vector<4x16x32xf32>
    "tpu.trace_stop"() : () -> ()
    %69 = tpu.reciprocal %66 {approx = true} : vector<4x16x1xf32> -> vector<4x16x1xf32>
    %70 = vector.broadcast %69 : vector<4x16x1xf32> to vector<4x16x32xf32>
    %71 = arith.mulf %68, %70 : vector<4x16x32xf32>
    %72 = tpu.transpose %71, [1, 0, 2] : vector<4x16x32xf32> -> vector<16x4x32xf32>
    %73 = vector.shape_cast %72 : vector<16x4x32xf32> to vector<16x128xf32>
    %74 = arith.truncf %73 : vector<16x128xf32> to vector<16x128xbf16>
    %c0_28 = arith.constant 0 : index
    %c0_29 = arith.constant 0 : index
    %75 = vector.load %arg9[%c0_28, %c0_29] : memref<128x128xbf16, #tpu.memory_space<vmem>>, vector<128x128xbf16>
    %cst_30 = arith.constant dense<0.000000e+00> : vector<16x128xf32>
    %76 = tpu.matmul %74, %75, %cst_30 {dimension_numbers = #tpu.dot_dimension_numbers<[1], [0], [0], [1], [0, 0, 1, 1], [], []>} : vector<16x128xbf16>, vector<128x128xbf16>, vector<16x128xf32> -> vector<16x128xf32>
    %c0_31 = arith.constant 0 : index
    %c0_32 = arith.constant 0 : index
    %77 = vector.load %arg10[%c0_31, %c0_32] : memref<1x128xf32, #tpu.memory_space<vmem>>, vector<1x128xf32>
    %78 = vector.broadcast %77 : vector<1x128xf32> to vector<16x128xf32>
    %79 = arith.addf %76, %78 : vector<16x128xf32>
    %80 = arith.addf %1, %79 : vector<16x128xf32>
    %c0_33 = arith.constant 0 : index
    %c0_34 = arith.constant 0 : index
    %81 = vector.load %arg11[%c0_33, %c0_34] : memref<1x128xf32, #tpu.memory_space<vmem>>, vector<1x128xf32>
    %c0_35 = arith.constant 0 : index
    %c0_36 = arith.constant 0 : index
    %82 = vector.load %arg12[%c0_35, %c0_36] : memref<1x128xf32, #tpu.memory_space<vmem>>, vector<1x128xf32>
    %cst_37 = arith.constant dense<0.000000e+00> : vector<16xf32>
    %83 = vector.multi_reduction <add>, %80, %cst_37 [1] : vector<16x128xf32> to vector<16xf32>
    %84 = vector.shape_cast %83 : vector<16xf32> to vector<16x1xf32>
    %cst_38 = arith.constant 1.280000e+02 : f32
    %85 = vector.broadcast %cst_38 : f32 to vector<16x1xf32>
    %86 = arith.divf %84, %85 : vector<16x1xf32>
    %87 = vector.broadcast %86 : vector<16x1xf32> to vector<16x128xf32>
    %88 = arith.subf %80, %87 : vector<16x128xf32>
    %89 = arith.mulf %88, %88 : vector<16x128xf32>
    %cst_39 = arith.constant dense<0.000000e+00> : vector<16xf32>
    %90 = vector.multi_reduction <add>, %89, %cst_39 [1] : vector<16x128xf32> to vector<16xf32>
    %91 = vector.shape_cast %90 : vector<16xf32> to vector<16x1xf32>
    %cst_40 = arith.constant 1.280000e+02 : f32
    %92 = vector.broadcast %cst_40 : f32 to vector<16x1xf32>
    %93 = arith.divf %91, %92 : vector<16x1xf32>
    %cst_41 = arith.constant 9.99999974E-6 : f32
    %94 = vector.broadcast %cst_41 : f32 to vector<16x1xf32>
    %95 = arith.addf %93, %94 : vector<16x1xf32>
    %96 = math.rsqrt %95 : vector<16x1xf32>
    %97 = vector.broadcast %96 : vector<16x1xf32> to vector<16x128xf32>
    %98 = arith.mulf %88, %97 : vector<16x128xf32>
    %99 = vector.broadcast %81 : vector<1x128xf32> to vector<16x128xf32>
    %100 = arith.mulf %98, %99 : vector<16x128xf32>
    %101 = vector.broadcast %82 : vector<1x128xf32> to vector<16x128xf32>
    %102 = arith.addf %100, %101 : vector<16x128xf32>
    %103 = arith.truncf %102 : vector<16x128xf32> to vector<16x128xbf16>
    %c0_42 = arith.constant 0 : index
    %c0_43 = arith.constant 0 : index
    %104 = vector.load %arg13[%c0_42, %c0_43] : memref<128x128xbf16, #tpu.memory_space<vmem>>, vector<128x128xbf16>
    %cst_44 = arith.constant dense<0.000000e+00> : vector<16x128xf32>
    %105 = tpu.matmul %103, %104, %cst_44 {dimension_numbers = #tpu.dot_dimension_numbers<[1], [0], [0], [1], [0, 0, 1, 1], [], []>} : vector<16x128xbf16>, vector<128x128xbf16>, vector<16x128xf32> -> vector<16x128xf32>
    %c0_45 = arith.constant 0 : index
    %c0_46 = arith.constant 0 : index
    %106 = vector.load %arg14[%c0_45, %c0_46] : memref<1x128xf32, #tpu.memory_space<vmem>>, vector<1x128xf32>
    %107 = vector.broadcast %106 : vector<1x128xf32> to vector<16x128xf32>
    %108 = arith.addf %105, %107 : vector<16x128xf32>
    %109 = arith.truncf %3 : vector<16x128xf32> to vector<16x128xbf16>
    %c0_47 = arith.constant 0 : index
    %c0_48 = arith.constant 0 : index
    %110 = vector.load %arg15[%c0_47, %c0_48] : memref<128x256xbf16, #tpu.memory_space<vmem>>, vector<128x256xbf16>
    %cst_49 = arith.constant dense<0.000000e+00> : vector<16x256xf32>
    %111 = tpu.matmul %109, %110, %cst_49 {dimension_numbers = #tpu.dot_dimension_numbers<[1], [0], [0], [1], [0, 0, 1, 1], [], []>} : vector<16x128xbf16>, vector<128x256xbf16>, vector<16x256xf32> -> vector<16x256xf32>
    %c0_50 = arith.constant 0 : index
    %c0_51 = arith.constant 0 : index
    %112 = vector.load %arg16[%c0_50, %c0_51] : memref<1x256xf32, #tpu.memory_space<vmem>>, vector<1x256xf32>
    %113 = vector.broadcast %112 : vector<1x256xf32> to vector<16x256xf32>
    %114 = arith.addf %111, %113 : vector<16x256xf32>
    %115 = vector.extract_strided_slice %114 {offsets = [0, 0], sizes = [16, 128], strides = [1, 1]} : vector<16x256xf32> to vector<16x128xf32>
    %116 = vector.extract_strided_slice %114 {offsets = [0, 128], sizes = [16, 128], strides = [1, 1]} : vector<16x256xf32> to vector<16x128xf32>
    %c0_52 = arith.constant 0 : index
    %c0_53 = arith.constant 0 : index
    %c0_54 = arith.constant 0 : index
    %117 = vector.load %arg4[%c0_52, %c0_53, %c0_54] : memref<1x1x16xf32, #tpu.memory_space<vmem>>, vector<1x1x16xf32>
    %118 = vector.shape_cast %117 : vector<1x1x16xf32> to vector<1x16xf32>
    %119 = vector.shape_cast %108 : vector<16x128xf32> to vector<16x4x32xf32>
    %120 = tpu.transpose %119, [1, 0, 2] : vector<16x4x32xf32> -> vector<4x16x32xf32>
    %121 = arith.truncf %120 : vector<4x16x32xf32> to vector<4x16x32xbf16>
    %122 = vector.shape_cast %115 : vector<16x128xf32> to vector<16x4x32xf32>
    %123 = tpu.transpose %122, [1, 0, 2] : vector<16x4x32xf32> -> vector<4x16x32xf32>
    %124 = arith.truncf %123 : vector<4x16x32xf32> to vector<4x16x32xbf16>
    %125 = vector.shape_cast %116 : vector<16x128xf32> to vector<16x4x32xf32>
    %126 = tpu.transpose %125, [1, 0, 2] : vector<16x4x32xf32> -> vector<4x16x32xf32>
    %127 = arith.truncf %126 : vector<4x16x32xf32> to vector<4x16x32xbf16>
    "tpu.trace_start"() <{level = 10 : i32, message = "htd,hsd->hts"}> : () -> ()
    %cst_55 = arith.constant dense<0.000000e+00> : vector<4x16x16xf32>
    %128 = tpu.matmul %121, %124, %cst_55 {dimension_numbers = #tpu.dot_dimension_numbers<[2], [2], [1], [1], [0, 0, 0, 1, 1, 1], [0], [0]>} : vector<4x16x32xbf16>, vector<4x16x32xbf16>, vector<4x16x16xf32> -> vector<4x16x16xf32>
    "tpu.trace_stop"() : () -> ()
    %cst_56 = arith.constant 0.176776692 : f32
    %129 = vector.broadcast %cst_56 : f32 to vector<4x16x16xf32>
    %130 = arith.mulf %128, %129 : vector<4x16x16xf32>
    %131 = vector.shape_cast %118 : vector<1x16xf32> to vector<1x1x16xf32>
    %132 = vector.broadcast %131 : vector<1x1x16xf32> to vector<4x16x16xf32>
    %133 = arith.addf %130, %132 : vector<4x16x16xf32>
    %cst_57 = arith.constant dense<0xFF800000> : vector<4x16xf32>
    %134 = vector.multi_reduction <maximumf>, %133, %cst_57 [2] : vector<4x16x16xf32> to vector<4x16xf32>
    %135 = vector.shape_cast %134 : vector<4x16xf32> to vector<4x16x1xf32>
    %136 = vector.broadcast %135 : vector<4x16x1xf32> to vector<4x16x16xf32>
    %137 = arith.subf %133, %136 : vector<4x16x16xf32>
    %138 = math.exp %137 : vector<4x16x16xf32>
    %cst_58 = arith.constant dense<0.000000e+00> : vector<4x16xf32>
    %139 = vector.multi_reduction <add>, %138, %cst_58 [2] : vector<4x16x16xf32> to vector<4x16xf32>
    %140 = vector.shape_cast %139 : vector<4x16xf32> to vector<4x16x1xf32>
    %141 = arith.truncf %138 : vector<4x16x16xf32> to vector<4x16x16xbf16>
    "tpu.trace_start"() <{level = 10 : i32, message = "hts,hsd->htd"}> : () -> ()
    %cst_59 = arith.constant dense<0.000000e+00> : vector<4x16x32xf32>
    %142 = tpu.matmul %141, %127, %cst_59 {dimension_numbers = #tpu.dot_dimension_numbers<[2], [1], [1], [2], [0, 0, 0, 1, 1, 2], [0], [0]>} : vector<4x16x16xbf16>, vector<4x16x32xbf16>, vector<4x16x32xf32> -> vector<4x16x32xf32>
    "tpu.trace_stop"() : () -> ()
    %143 = tpu.reciprocal %140 {approx = true} : vector<4x16x1xf32> -> vector<4x16x1xf32>
    %144 = vector.broadcast %143 : vector<4x16x1xf32> to vector<4x16x32xf32>
    %145 = arith.mulf %142, %144 : vector<4x16x32xf32>
    %146 = tpu.transpose %145, [1, 0, 2] : vector<4x16x32xf32> -> vector<16x4x32xf32>
    %147 = vector.shape_cast %146 : vector<16x4x32xf32> to vector<16x128xf32>
    %148 = arith.truncf %147 : vector<16x128xf32> to vector<16x128xbf16>
    %c0_60 = arith.constant 0 : index
    %c0_61 = arith.constant 0 : index
    %149 = vector.load %arg17[%c0_60, %c0_61] : memref<128x128xbf16, #tpu.memory_space<vmem>>, vector<128x128xbf16>
    %cst_62 = arith.constant dense<0.000000e+00> : vector<16x128xf32>
    %150 = tpu.matmul %148, %149, %cst_62 {dimension_numbers = #tpu.dot_dimension_numbers<[1], [0], [0], [1], [0, 0, 1, 1], [], []>} : vector<16x128xbf16>, vector<128x128xbf16>, vector<16x128xf32> -> vector<16x128xf32>
    %c0_63 = arith.constant 0 : index
    %c0_64 = arith.constant 0 : index
    %151 = vector.load %arg18[%c0_63, %c0_64] : memref<1x128xf32, #tpu.memory_space<vmem>>, vector<1x128xf32>
    %152 = vector.broadcast %151 : vector<1x128xf32> to vector<16x128xf32>
    %153 = arith.addf %150, %152 : vector<16x128xf32>
    %154 = arith.addf %80, %153 : vector<16x128xf32>
    %c0_65 = arith.constant 0 : index
    %c0_66 = arith.constant 0 : index
    %155 = vector.load %arg19[%c0_65, %c0_66] : memref<1x128xf32, #tpu.memory_space<vmem>>, vector<1x128xf32>
    %c0_67 = arith.constant 0 : index
    %c0_68 = arith.constant 0 : index
    %156 = vector.load %arg20[%c0_67, %c0_68] : memref<1x128xf32, #tpu.memory_space<vmem>>, vector<1x128xf32>
    %cst_69 = arith.constant dense<0.000000e+00> : vector<16xf32>
    %157 = vector.multi_reduction <add>, %154, %cst_69 [1] : vector<16x128xf32> to vector<16xf32>
    %158 = vector.shape_cast %157 : vector<16xf32> to vector<16x1xf32>
    %cst_70 = arith.constant 1.280000e+02 : f32
    %159 = vector.broadcast %cst_70 : f32 to vector<16x1xf32>
    %160 = arith.divf %158, %159 : vector<16x1xf32>
    %161 = vector.broadcast %160 : vector<16x1xf32> to vector<16x128xf32>
    %162 = arith.subf %154, %161 : vector<16x128xf32>
    %163 = arith.mulf %162, %162 : vector<16x128xf32>
    %cst_71 = arith.constant dense<0.000000e+00> : vector<16xf32>
    %164 = vector.multi_reduction <add>, %163, %cst_71 [1] : vector<16x128xf32> to vector<16xf32>
    %165 = vector.shape_cast %164 : vector<16xf32> to vector<16x1xf32>
    %cst_72 = arith.constant 1.280000e+02 : f32
    %166 = vector.broadcast %cst_72 : f32 to vector<16x1xf32>
    %167 = arith.divf %165, %166 : vector<16x1xf32>
    %cst_73 = arith.constant 9.99999974E-6 : f32
    %168 = vector.broadcast %cst_73 : f32 to vector<16x1xf32>
    %169 = arith.addf %167, %168 : vector<16x1xf32>
    %170 = math.rsqrt %169 : vector<16x1xf32>
    %171 = vector.broadcast %170 : vector<16x1xf32> to vector<16x128xf32>
    %172 = arith.mulf %162, %171 : vector<16x128xf32>
    %173 = vector.broadcast %155 : vector<1x128xf32> to vector<16x128xf32>
    %174 = arith.mulf %172, %173 : vector<16x128xf32>
    %175 = vector.broadcast %156 : vector<1x128xf32> to vector<16x128xf32>
    %176 = arith.addf %174, %175 : vector<16x128xf32>
    %177 = arith.truncf %176 : vector<16x128xf32> to vector<16x128xbf16>
    %c0_74 = arith.constant 0 : index
    %c0_75 = arith.constant 0 : index
    %178 = vector.load %arg21[%c0_74, %c0_75] : memref<128x256xbf16, #tpu.memory_space<vmem>>, vector<128x256xbf16>
    %cst_76 = arith.constant dense<0.000000e+00> : vector<16x256xf32>
    %179 = tpu.matmul %177, %178, %cst_76 {dimension_numbers = #tpu.dot_dimension_numbers<[1], [0], [0], [1], [0, 0, 1, 1], [], []>} : vector<16x128xbf16>, vector<128x256xbf16>, vector<16x256xf32> -> vector<16x256xf32>
    %c0_77 = arith.constant 0 : index
    %c0_78 = arith.constant 0 : index
    %180 = vector.load %arg22[%c0_77, %c0_78] : memref<1x256xf32, #tpu.memory_space<vmem>>, vector<1x256xf32>
    %181 = vector.broadcast %180 : vector<1x256xf32> to vector<16x256xf32>
    %182 = arith.addf %179, %181 : vector<16x256xf32>
    %cst_79 = arith.constant 0.000000e+00 : f32
    %183 = vector.broadcast %cst_79 : f32 to vector<16x256xf32>
    %184 = arith.maximumf %182, %183 : vector<16x256xf32>
    %185 = arith.truncf %184 : vector<16x256xf32> to vector<16x256xbf16>
    %c0_80 = arith.constant 0 : index
    %c0_81 = arith.constant 0 : index
    %186 = vector.load %arg23[%c0_80, %c0_81] : memref<256x128xbf16, #tpu.memory_space<vmem>>, vector<256x128xbf16>
    %cst_82 = arith.constant dense<0.000000e+00> : vector<16x128xf32>
    %187 = tpu.matmul %185, %186, %cst_82 {dimension_numbers = #tpu.dot_dimension_numbers<[1], [0], [0], [1], [0, 0, 1, 1], [], []>} : vector<16x256xbf16>, vector<256x128xbf16>, vector<16x128xf32> -> vector<16x128xf32>
    %c0_83 = arith.constant 0 : index
    %c0_84 = arith.constant 0 : index
    %188 = vector.load %arg24[%c0_83, %c0_84] : memref<1x128xf32, #tpu.memory_space<vmem>>, vector<1x128xf32>
    %189 = vector.broadcast %188 : vector<1x128xf32> to vector<16x128xf32>
    %190 = arith.addf %187, %189 : vector<16x128xf32>
    %191 = arith.addf %154, %190 : vector<16x128xf32>
    %c0_85 = arith.constant 0 : index
    %c0_86 = arith.constant 0 : index
    %192 = vector.load %arg25[%c0_85, %c0_86] : memref<1x128xf32, #tpu.memory_space<vmem>>, vector<1x128xf32>
    %c0_87 = arith.constant 0 : index
    %c0_88 = arith.constant 0 : index
    %193 = vector.load %arg26[%c0_87, %c0_88] : memref<1x128xf32, #tpu.memory_space<vmem>>, vector<1x128xf32>
    %cst_89 = arith.constant dense<0.000000e+00> : vector<16xf32>
    %194 = vector.multi_reduction <add>, %191, %cst_89 [1] : vector<16x128xf32> to vector<16xf32>
    %195 = vector.shape_cast %194 : vector<16xf32> to vector<16x1xf32>
    %cst_90 = arith.constant 1.280000e+02 : f32
    %196 = vector.broadcast %cst_90 : f32 to vector<16x1xf32>
    %197 = arith.divf %195, %196 : vector<16x1xf32>
    %198 = vector.broadcast %197 : vector<16x1xf32> to vector<16x128xf32>
    %199 = arith.subf %191, %198 : vector<16x128xf32>
    %200 = arith.mulf %199, %199 : vector<16x128xf32>
    %cst_91 = arith.constant dense<0.000000e+00> : vector<16xf32>
    %201 = vector.multi_reduction <add>, %200, %cst_91 [1] : vector<16x128xf32> to vector<16xf32>
    %202 = vector.shape_cast %201 : vector<16xf32> to vector<16x1xf32>
    %cst_92 = arith.constant 1.280000e+02 : f32
    %203 = vector.broadcast %cst_92 : f32 to vector<16x1xf32>
    %204 = arith.divf %202, %203 : vector<16x1xf32>
    %cst_93 = arith.constant 9.99999974E-6 : f32
    %205 = vector.broadcast %cst_93 : f32 to vector<16x1xf32>
    %206 = arith.addf %204, %205 : vector<16x1xf32>
    %207 = math.rsqrt %206 : vector<16x1xf32>
    %208 = vector.broadcast %207 : vector<16x1xf32> to vector<16x128xf32>
    %209 = arith.mulf %199, %208 : vector<16x128xf32>
    %210 = vector.broadcast %192 : vector<1x128xf32> to vector<16x128xf32>
    %211 = arith.mulf %209, %210 : vector<16x128xf32>
    %212 = vector.broadcast %193 : vector<1x128xf32> to vector<16x128xf32>
    %213 = arith.addf %211, %212 : vector<16x128xf32>
    %c0_94 = arith.constant 0 : index
    %c0_95 = arith.constant 0 : index
    %c0_96 = arith.constant 0 : index
    %214 = vector.load %arg27[%c0_94, %c0_95, %c0_96] : memref<1x16x128xf32, #tpu.memory_space<vmem>>, vector<1x16x128xf32>
    %215 = vector.shape_cast %214 : vector<1x16x128xf32> to vector<16x128xf32>
    %216 = vector.shape_cast %213 : vector<16x128xf32> to vector<1x16x128xf32>
    tpu.vector_store %arg27[%c0_94, %c0_95, %c0_96], %216 {strides = array<i32>} : memref<1x16x128xf32, #tpu.memory_space<vmem>>, vector<1x16x128xf32>,
    return
  }
  func.func @transform_0(%arg0: i32) -> (i32, i32, i32) {
    %c0_i32 = arith.constant 0 : i32
    %c0_i32_0 = arith.constant 0 : i32
    %c0_i32_1 = arith.constant 0 : i32
    return %arg0, %c0_i32, %c0_i32_0 : i32, i32, i32
  }
  func.func @transform_1(%arg0: i32) -> (i32, i32, i32) {
    %c0_i32 = arith.constant 0 : i32
    %c0_i32_0 = arith.constant 0 : i32
    %c0_i32_1 = arith.constant 0 : i32
    return %arg0, %c0_i32, %c0_i32_0 : i32, i32, i32
  }
  func.func @transform_2(%arg0: i32) -> (i32, i32, i32) {
    %c0_i32 = arith.constant 0 : i32
    %c0_i32_0 = arith.constant 0 : i32
    %c0_i32_1 = arith.constant 0 : i32
    return %arg0, %c0_i32, %c0_i32_0 : i32, i32, i32
  }
  func.func @transform_3(%arg0: i32) -> (i32, i32, i32) {
    %c0_i32 = arith.constant 0 : i32
    %c0_i32_0 = arith.constant 0 : i32
    %c0_i32_1 = arith.constant 0 : i32
    return %arg0, %c0_i32, %c0_i32_0 : i32, i32, i32
  }
  func.func @transform_4(%arg0: i32) -> (i32, i32) {
    %c0_i32 = arith.constant 0 : i32
    %c0_i32_0 = arith.constant 0 : i32
    %c0_i32_1 = arith.constant 0 : i32
    return %c0_i32, %c0_i32_0 : i32, i32
  }
  func.func @transform_5(%arg0: i32) -> (i32, i32) {
    %c0_i32 = arith.constant 0 : i32
    %c0_i32_0 = arith.constant 0 : i32
    %c0_i32_1 = arith.constant 0 : i32
    return %c0_i32, %c0_i32_0 : i32, i32
  }
  func.func @transform_6(%arg0: i32) -> (i32, i32) {
    %c0_i32 = arith.constant 0 : i32
    %c0_i32_0 = arith.constant 0 : i32
    %c0_i32_1 = arith.constant 0 : i32
    return %c0_i32, %c0_i32_0 : i32, i32
  }
  func.func @transform_7(%arg0: i32) -> (i32, i32) {
    %c0_i32 = arith.constant 0 : i32
    %c0_i32_0 = arith.constant 0 : i32
    %c0_i32_1 = arith.constant 0 : i32
    return %c0_i32, %c0_i32_0 : i32, i32
  }
  func.func @transform_8(%arg0: i32) -> (i32, i32) {
    %c0_i32 = arith.constant 0 : i32
    %c0_i32_0 = arith.constant 0 : i32
    %c0_i32_1 = arith.constant 0 : i32
    return %c0_i32, %c0_i32_0 : i32, i32
  }
  func.func @transform_9(%arg0: i32) -> (i32, i32) {
    %c0_i32 = arith.constant 0 : i32
    %c0_i32_0 = arith.constant 0 : i32
    %c0_i32_1 = arith.constant 0 : i32
    return %c0_i32, %c0_i32_0 : i32, i32
  }
  func.func @transform_10(%arg0: i32) -> (i32, i32) {
    %c0_i32 = arith.constant 0 : i32
    %c0_i32_0 = arith.constant 0 : i32
    %c0_i32_1 = arith.constant 0 : i32
    return %c0_i32, %c0_i32_0 : i32, i32
  }
  func.func @transform_11(%arg0: i32) -> (i32, i32) {
    %c0_i32 = arith.constant 0 : i32
    %c0_i32_0 = arith.constant 0 : i32
    %c0_i32_1 = arith.constant 0 : i32
    return %c0_i32, %c0_i32_0 : i32, i32
  }
  func.func @transform_12(%arg0: i32) -> (i32, i32) {
    %c0_i32 = arith.constant 0 : i32
    %c0_i32_0 = arith.constant 0 : i32
    %c0_i32_1 = arith.constant 0 : i32
    return %c0_i32, %c0_i32_0 : i32, i32
  }
  func.func @transform_13(%arg0: i32) -> (i32, i32) {
    %c0_i32 = arith.constant 0 : i32
    %c0_i32_0 = arith.constant 0 : i32
    %c0_i32_1 = arith.constant 0 : i32
    return %c0_i32, %c0_i32_0 : i32, i32
  }
  func.func @transform_14(%arg0: i32) -> (i32, i32) {
    %c0_i32 = arith.constant 0 : i32
    %c0_i32_0 = arith.constant 0 : i32
    %c0_i32_1 = arith.constant 0 : i32
    return %c0_i32, %c0_i32_0 : i32, i32
  }
  func.func @transform_15(%arg0: i32) -> (i32, i32) {
    %c0_i32 = arith.constant 0 : i32
    %c0_i32_0 = arith.constant 0 : i32
    %c0_i32_1 = arith.constant 0 : i32
    return %c0_i32, %c0_i32_0 : i32, i32
  }
  func.func @transform_16(%arg0: i32) -> (i32, i32) {
    %c0_i32 = arith.constant 0 : i32
    %c0_i32_0 = arith.constant 0 : i32
    %c0_i32_1 = arith.constant 0 : i32
    return %c0_i32, %c0_i32_0 : i32, i32
  }
  func.func @transform_17(%arg0: i32) -> (i32, i32) {
    %c0_i32 = arith.constant 0 : i32
    %c0_i32_0 = arith.constant 0 : i32
    %c0_i32_1 = arith.constant 0 : i32
    return %c0_i32, %c0_i32_0 : i32, i32
  }
  func.func @transform_18(%arg0: i32) -> (i32, i32) {
    %c0_i32 = arith.constant 0 : i32
    %c0_i32_0 = arith.constant 0 : i32
    %c0_i32_1 = arith.constant 0 : i32
    return %c0_i32, %c0_i32_0 : i32, i32
  }
  func.func @transform_19(%arg0: i32) -> (i32, i32) {
    %c0_i32 = arith.constant 0 : i32
    %c0_i32_0 = arith.constant 0 : i32
    %c0_i32_1 = arith.constant 0 : i32
    return %c0_i32, %c0_i32_0 : i32, i32
  }
  func.func @transform_20(%arg0: i32) -> (i32, i32) {
    %c0_i32 = arith.constant 0 : i32
    %c0_i32_0 = arith.constant 0 : i32
    %c0_i32_1 = arith.constant 0 : i32
    return %c0_i32, %c0_i32_0 : i32, i32
  }
  func.func @transform_21(%arg0: i32) -> (i32, i32) {
    %c0_i32 = arith.constant 0 : i32
    %c0_i32_0 = arith.constant 0 : i32
    %c0_i32_1 = arith.constant 0 : i32
    return %c0_i32, %c0_i32_0 : i32, i32
  }
  func.func @transform_22(%arg0: i32) -> (i32, i32) {
    %c0_i32 = arith.constant 0 : i32
    %c0_i32_0 = arith.constant 0 : i32
    %c0_i32_1 = arith.constant 0 : i32
    return %c0_i32, %c0_i32_0 : i32, i32
  }
  func.func @transform_23(%arg0: i32) -> (i32, i32) {
    %c0_i32 = arith.constant 0 : i32
    %c0_i32_0 = arith.constant 0 : i32
    %c0_i32_1 = arith.constant 0 : i32
    return %c0_i32, %c0_i32_0 : i32, i32
  }
  func.func @transform_24(%arg0: i32) -> (i32, i32) {
    %c0_i32 = arith.constant 0 : i32
    %c0_i32_0 = arith.constant 0 : i32
    %c0_i32_1 = arith.constant 0 : i32
    return %c0_i32, %c0_i32_0 : i32, i32
  }
  func.func @transform_25(%arg0: i32) -> (i32, i32) {
    %c0_i32 = arith.constant 0 : i32
    %c0_i32_0 = arith.constant 0 : i32
    %c0_i32_1 = arith.constant 0 : i32
    return %c0_i32, %c0_i32_0 : i32, i32
  }
  func.func @transform_26(%arg0: i32) -> (i32, i32, i32) {
    %c0_i32 = arith.constant 0 : i32
    %c0_i32_0 = arith.constant 0 : i32
    %c0_i32_1 = arith.constant 0 : i32
    return %arg0, %c0_i32, %c0_i32_0 : i32, i32, i32
  }
}

module attributes {stable_mosaic.version = 11 : i64} {
  func.func @_decoder_layer_kernel(%arg0: i32, %arg1: memref<1x16x128xf32, #tpu.memory_space<vmem>>, %arg2: memref<1x16x128xf32, #tpu.memory_space<vmem>>, %arg3: memref<1x1x16xf32, #tpu.memory_space<vmem>>, %arg4: memref<1x1x16xf32, #tpu.memory_space<vmem>>, %arg5: memref<1x128xf32, #tpu.memory_space<vmem>>, %arg6: memref<1x128xf32, #tpu.memory_space<vmem>>, %arg7: memref<128x384xbf16, #tpu.memory_space<vmem>>, %arg8: memref<1x384xf32, #tpu.memory_space<vmem>>, %arg9: memref<128x128xbf16, #tpu.memory_space<vmem>>, %arg10: memref<1x128xf32, #tpu.memory_space<vmem>>, %arg11: memref<1x128xf32, #tpu.memory_space<vmem>>, %arg12: memref<1x128xf32, #tpu.memory_space<vmem>>, %arg13: memref<128x128xbf16, #tpu.memory_space<vmem>>, %arg14: memref<1x128xf32, #tpu.memory_space<vmem>>, %arg15: memref<128x256xbf16, #tpu.memory_space<vmem>>, %arg16: memref<1x256xf32, #tpu.memory_space<vmem>>, %arg17: memref<128x128xbf16, #tpu.memory_space<vmem>>, %arg18: memref<1x128xf32, #tpu.memory_space<vmem>>, %arg19: memref<1x128xf32, #tpu.memory_space<vmem>>, %arg20: memref<1x128xf32, #tpu.memory_space<vmem>>, %arg21: memref<128x256xbf16, #tpu.memory_space<vmem>>, %arg22: memref<1x256xf32, #tpu.memory_space<vmem>>, %arg23: memref<256x128xbf16, #tpu.memory_space<vmem>>, %arg24: memref<1x128xf32, #tpu.memory_space<vmem>>, %arg25: memref<1x16x128xf32, #tpu.memory_space<vmem>>) attributes {dimension_semantics = [#tpu.dimension_semantics<parallel>], iteration_bounds = array<i64: 2>, scalar_prefetch = 0 : i64, scratch_operands = 0 : i64, tpu.core_type = #tpu.core_type<tc>, window_params = [{transform_indices = @transform_0, window_bounds = array<i64: 1, 16, 128>}, {transform_indices = @transform_1, window_bounds = array<i64: 1, 16, 128>}, {transform_indices = @transform_2, window_bounds = array<i64: 1, 1, 16>}, {transform_indices = @transform_3, window_bounds = array<i64: 1, 1, 16>}, {pipeline_mode = #tpu.pipeline_mode<synchronous>, transform_indices = @transform_4, window_bounds = array<i64: 1, 128>}, {pipeline_mode = #tpu.pipeline_mode<synchronous>, transform_indices = @transform_5, window_bounds = array<i64: 1, 128>}, {pipeline_mode = #tpu.pipeline_mode<synchronous>, transform_indices = @transform_6, window_bounds = array<i64: 128, 384>}, {pipeline_mode = #tpu.pipeline_mode<synchronous>, transform_indices = @transform_7, window_bounds = array<i64: 1, 384>}, {pipeline_mode = #tpu.pipeline_mode<synchronous>, transform_indices = @transform_8, window_bounds = array<i64: 128, 128>}, {pipeline_mode = #tpu.pipeline_mode<synchronous>, transform_indices = @transform_9, window_bounds = array<i64: 1, 128>}, {pipeline_mode = #tpu.pipeline_mode<synchronous>, transform_indices = @transform_10, window_bounds = array<i64: 1, 128>}, {pipeline_mode = #tpu.pipeline_mode<synchronous>, transform_indices = @transform_11, window_bounds = array<i64: 1, 128>}, {pipeline_mode = #tpu.pipeline_mode<synchronous>, transform_indices = @transform_12, window_bounds = array<i64: 128, 128>}, {pipeline_mode = #tpu.pipeline_mode<synchronous>, transform_indices = @transform_13, window_bounds = array<i64: 1, 128>}, {pipeline_mode = #tpu.pipeline_mode<synchronous>, transform_indices = @transform_14, window_bounds = array<i64: 128, 256>}, {pipeline_mode = #tpu.pipeline_mode<synchronous>, transform_indices = @transform_15, window_bounds = array<i64: 1, 256>}, {pipeline_mode = #tpu.pipeline_mode<synchronous>, transform_indices = @transform_16, window_bounds = array<i64: 128, 128>}, {pipeline_mode = #tpu.pipeline_mode<synchronous>, transform_indices = @transform_17, window_bounds = array<i64: 1, 128>}, {pipeline_mode = #tpu.pipeline_mode<synchronous>, transform_indices = @transform_18, window_bounds = array<i64: 1, 128>}, {pipeline_mode = #tpu.pipeline_mode<synchronous>, transform_indices = @transform_19, window_bounds = array<i64: 1, 128>}, {pipeline_mode = #tpu.pipeline_mode<synchronous>, transform_indices = @transform_20, window_bounds = array<i64: 128, 256>}, {pipeline_mode = #tpu.pipeline_mode<synchronous>, transform_indices = @transform_21, window_bounds = array<i64: 1, 256>}, {pipeline_mode = #tpu.pipeline_mode<synchronous>, transform_indices = @transform_22, window_bounds = array<i64: 256, 128>}, {pipeline_mode = #tpu.pipeline_mode<synchronous>, transform_indices = @transform_23, window_bounds = array<i64: 1, 128>}, {transform_indices = @transform_24, window_bounds = array<i64: 1, 16, 128>}]} {
    %c0 = arith.constant 0 : index
    %c0_0 = arith.constant 0 : index
    %c0_1 = arith.constant 0 : index
    %0 = vector.load %arg1[%c0, %c0_0, %c0_1] : memref<1x16x128xf32, #tpu.memory_space<vmem>>, vector<1x16x128xf32>
    %1 = vector.shape_cast %0 : vector<1x16x128xf32> to vector<16x128xf32>
    %c0_2 = arith.constant 0 : index
    %c0_3 = arith.constant 0 : index
    %c0_4 = arith.constant 0 : index
    %2 = vector.load %arg2[%c0_2, %c0_3, %c0_4] : memref<1x16x128xf32, #tpu.memory_space<vmem>>, vector<1x16x128xf32>
    %3 = vector.shape_cast %2 : vector<1x16x128xf32> to vector<16x128xf32>
    %c0_5 = arith.constant 0 : index
    %c0_6 = arith.constant 0 : index
    %4 = vector.load %arg5[%c0_5, %c0_6] : memref<1x128xf32, #tpu.memory_space<vmem>>, vector<1x128xf32>
    %c0_7 = arith.constant 0 : index
    %c0_8 = arith.constant 0 : index
    %5 = vector.load %arg6[%c0_7, %c0_8] : memref<1x128xf32, #tpu.memory_space<vmem>>, vector<1x128xf32>
    %cst = arith.constant dense<0.000000e+00> : vector<16xf32>
    %6 = vector.multi_reduction <add>, %1, %cst [1] : vector<16x128xf32> to vector<16xf32>
    %7 = vector.shape_cast %6 : vector<16xf32> to vector<16x1xf32>
    %cst_9 = arith.constant 1.280000e+02 : f32
    %8 = vector.broadcast %cst_9 : f32 to vector<16x1xf32>
    %9 = arith.divf %7, %8 : vector<16x1xf32>
    %10 = vector.broadcast %9 : vector<16x1xf32> to vector<16x128xf32>
    %11 = arith.subf %1, %10 : vector<16x128xf32>
    %12 = arith.mulf %11, %11 : vector<16x128xf32>
    %cst_10 = arith.constant dense<0.000000e+00> : vector<16xf32>
    %13 = vector.multi_reduction <add>, %12, %cst_10 [1] : vector<16x128xf32> to vector<16xf32>
    %14 = vector.shape_cast %13 : vector<16xf32> to vector<16x1xf32>
    %cst_11 = arith.constant 1.280000e+02 : f32
    %15 = vector.broadcast %cst_11 : f32 to vector<16x1xf32>
    %16 = arith.divf %14, %15 : vector<16x1xf32>
    %cst_12 = arith.constant 9.99999974E-6 : f32
    %17 = vector.broadcast %cst_12 : f32 to vector<16x1xf32>
    %18 = arith.addf %16, %17 : vector<16x1xf32>
    %19 = math.rsqrt %18 : vector<16x1xf32>
    %20 = vector.broadcast %19 : vector<16x1xf32> to vector<16x128xf32>
    %21 = arith.mulf %11, %20 : vector<16x128xf32>
    %22 = vector.broadcast %4 : vector<1x128xf32> to vector<16x128xf32>
    %23 = arith.mulf %21, %22 : vector<16x128xf32>
    %24 = vector.broadcast %5 : vector<1x128xf32> to vector<16x128xf32>
    %25 = arith.addf %23, %24 : vector<16x128xf32>
    %26 = arith.truncf %25 : vector<16x128xf32> to vector<16x128xbf16>
    %c0_13 = arith.constant 0 : index
    %c0_14 = arith.constant 0 : index
    %27 = vector.load %arg7[%c0_13, %c0_14] : memref<128x384xbf16, #tpu.memory_space<vmem>>, vector<128x384xbf16>
    %cst_15 = arith.constant dense<0.000000e+00> : vector<16x384xf32>
    %28 = tpu.matmul %26, %27, %cst_15 {dimension_numbers = #tpu.dot_dimension_numbers<[1], [0], [0], [1], [0, 0, 1, 1], [], []>} : vector<16x128xbf16>, vector<128x384xbf16>, vector<16x384xf32> -> vector<16x384xf32>
    %c0_16 = arith.constant 0 : index
    %c0_17 = arith.constant 0 : index
    %29 = vector.load %arg8[%c0_16, %c0_17] : memref<1x384xf32, #tpu.memory_space<vmem>>, vector<1x384xf32>
    %30 = vector.broadcast %29 : vector<1x384xf32> to vector<16x384xf32>
    %31 = arith.addf %28, %30 : vector<16x384xf32>
    %32 = vector.extract_strided_slice %31 {offsets = [0, 0], sizes = [16, 128], strides = [1, 1]} : vector<16x384xf32> to vector<16x128xf32>
    %33 = vector.extract_strided_slice %31 {offsets = [0, 128], sizes = [16, 128], strides = [1, 1]} : vector<16x384xf32> to vector<16x128xf32>
    %34 = vector.extract_strided_slice %31 {offsets = [0, 256], sizes = [16, 128], strides = [1, 1]} : vector<16x384xf32> to vector<16x128xf32>
    %35 = tpu.iota {dimensions = array<i32: 0>} : vector<16x16xi32>
    %36 = tpu.iota {dimensions = array<i32: 1>} : vector<16x16xi32>
    %c0_18 = arith.constant 0 : index
    %c0_19 = arith.constant 0 : index
    %c0_20 = arith.constant 0 : index
    %37 = vector.load %arg3[%c0_18, %c0_19, %c0_20] : memref<1x1x16xf32, #tpu.memory_space<vmem>>, vector<1x1x16xf32>
    %38 = vector.shape_cast %37 : vector<1x1x16xf32> to vector<1x16xf32>
    %39 = arith.cmpi sle, %36, %35 : vector<16x16xi32>
    %cst_21 = arith.constant 0.000000e+00 : f32
    %cst_22 = arith.constant -1.000000e+30 : f32
    %40 = vector.broadcast %cst_21 : f32 to vector<16x16xf32>
    %41 = vector.broadcast %cst_22 : f32 to vector<16x16xf32>
    %42 = arith.select %39, %40, %41 : vector<16x16xi1>, vector<16x16xf32>
    %43 = vector.broadcast %38 : vector<1x16xf32> to vector<16x16xf32>
    %44 = arith.addf %43, %42 : vector<16x16xf32>
    %45 = vector.shape_cast %32 : vector<16x128xf32> to vector<16x4x32xf32>
    %46 = tpu.transpose %45, [1, 0, 2] : vector<16x4x32xf32> -> vector<4x16x32xf32>
    %47 = arith.truncf %46 : vector<4x16x32xf32> to vector<4x16x32xbf16>
    %48 = vector.shape_cast %33 : vector<16x128xf32> to vector<16x4x32xf32>
    %49 = tpu.transpose %48, [1, 0, 2] : vector<16x4x32xf32> -> vector<4x16x32xf32>
    %50 = arith.truncf %49 : vector<4x16x32xf32> to vector<4x16x32xbf16>
    %51 = vector.shape_cast %34 : vector<16x128xf32> to vector<16x4x32xf32>
    %52 = tpu.transpose %51, [1, 0, 2] : vector<16x4x32xf32> -> vector<4x16x32xf32>
    %53 = arith.truncf %52 : vector<4x16x32xf32> to vector<4x16x32xbf16>
    "tpu.trace_start"() <{level = 10 : i32, message = "htd,hsd->hts"}> : () -> ()
    %cst_23 = arith.constant dense<0.000000e+00> : vector<4x16x16xf32>
    %54 = tpu.matmul %47, %50, %cst_23 {dimension_numbers = #tpu.dot_dimension_numbers<[2], [2], [1], [1], [0, 0, 0, 1, 1, 1], [0], [0]>} : vector<4x16x32xbf16>, vector<4x16x32xbf16>, vector<4x16x16xf32> -> vector<4x16x16xf32>
    "tpu.trace_stop"() : () -> ()
    %cst_24 = arith.constant 0.176776692 : f32
    %55 = vector.broadcast %cst_24 : f32 to vector<4x16x16xf32>
    %56 = arith.mulf %54, %55 : vector<4x16x16xf32>
    %57 = vector.shape_cast %44 : vector<16x16xf32> to vector<1x16x16xf32>
    %58 = vector.broadcast %57 : vector<1x16x16xf32> to vector<4x16x16xf32>
    %59 = arith.addf %56, %58 : vector<4x16x16xf32>
    %cst_25 = arith.constant dense<0xFF800000> : vector<4x16xf32>
    %60 = vector.multi_reduction <maximumf>, %59, %cst_25 [2] : vector<4x16x16xf32> to vector<4x16xf32>
    %61 = vector.shape_cast %60 : vector<4x16xf32> to vector<4x16x1xf32>
    %62 = vector.broadcast %61 : vector<4x16x1xf32> to vector<4x16x16xf32>
    %63 = arith.subf %59, %62 : vector<4x16x16xf32>
    %64 = math.exp %63 : vector<4x16x16xf32>
    %cst_26 = arith.constant dense<0.000000e+00> : vector<4x16xf32>
    %65 = vector.multi_reduction <add>, %64, %cst_26 [2] : vector<4x16x16xf32> to vector<4x16xf32>
    %66 = vector.shape_cast %65 : vector<4x16xf32> to vector<4x16x1xf32>
    %67 = arith.truncf %64 : vector<4x16x16xf32> to vector<4x16x16xbf16>
    "tpu.trace_start"() <{level = 10 : i32, message = "hts,hsd->htd"}> : () -> ()
    %cst_27 = arith.constant dense<0.000000e+00> : vector<4x16x32xf32>
    %68 = tpu.matmul %67, %53, %cst_27 {dimension_numbers = #tpu.dot_dimension_numbers<[2], [1], [1], [2], [0, 0, 0, 1, 1, 2], [0], [0]>} : vector<4x16x16xbf16>, vector<4x16x32xbf16>, vector<4x16x32xf32> -> vector<4x16x32xf32>
    "tpu.trace_stop"() : () -> ()
    %69 = tpu.reciprocal %66 {approx = true} : vector<4x16x1xf32> -> vector<4x16x1xf32>
    %70 = vector.broadcast %69 : vector<4x16x1xf32> to vector<4x16x32xf32>
    %71 = arith.mulf %68, %70 : vector<4x16x32xf32>
    %72 = tpu.transpose %71, [1, 0, 2] : vector<4x16x32xf32> -> vector<16x4x32xf32>
    %73 = vector.shape_cast %72 : vector<16x4x32xf32> to vector<16x128xf32>
    %74 = arith.truncf %73 : vector<16x128xf32> to vector<16x128xbf16>
    %c0_28 = arith.constant 0 : index
    %c0_29 = arith.constant 0 : index
    %75 = vector.load %arg9[%c0_28, %c0_29] : memref<128x128xbf16, #tpu.memory_space<vmem>>, vector<128x128xbf16>
    %cst_30 = arith.constant dense<0.000000e+00> : vector<16x128xf32>
    %76 = tpu.matmul %74, %75, %cst_30 {dimension_numbers = #tpu.dot_dimension_numbers<[1], [0], [0], [1], [0, 0, 1, 1], [], []>} : vector<16x128xbf16>, vector<128x128xbf16>, vector<16x128xf32> -> vector<16x128xf32>
    %c0_31 = arith.constant 0 : index
    %c0_32 = arith.constant 0 : index
    %77 = vector.load %arg10[%c0_31, %c0_32] : memref<1x128xf32, #tpu.memory_space<vmem>>, vector<1x128xf32>
    %78 = vector.broadcast %77 : vector<1x128xf32> to vector<16x128xf32>
    %79 = arith.addf %76, %78 : vector<16x128xf32>
    %80 = arith.addf %1, %79 : vector<16x128xf32>
    %c0_33 = arith.constant 0 : index
    %c0_34 = arith.constant 0 : index
    %81 = vector.load %arg11[%c0_33, %c0_34] : memref<1x128xf32, #tpu.memory_space<vmem>>, vector<1x128xf32>
    %c0_35 = arith.constant 0 : index
    %c0_36 = arith.constant 0 : index
    %82 = vector.load %arg12[%c0_35, %c0_36] : memref<1x128xf32, #tpu.memory_space<vmem>>, vector<1x128xf32>
    %cst_37 = arith.constant dense<0.000000e+00> : vector<16xf32>
    %83 = vector.multi_reduction <add>, %80, %cst_37 [1] : vector<16x128xf32> to vector<16xf32>
    %84 = vector.shape_cast %83 : vector<16xf32> to vector<16x1xf32>
    %cst_38 = arith.constant 1.280000e+02 : f32
    %85 = vector.broadcast %cst_38 : f32 to vector<16x1xf32>
    %86 = arith.divf %84, %85 : vector<16x1xf32>
    %87 = vector.broadcast %86 : vector<16x1xf32> to vector<16x128xf32>
    %88 = arith.subf %80, %87 : vector<16x128xf32>
    %89 = arith.mulf %88, %88 : vector<16x128xf32>
    %cst_39 = arith.constant dense<0.000000e+00> : vector<16xf32>
    %90 = vector.multi_reduction <add>, %89, %cst_39 [1] : vector<16x128xf32> to vector<16xf32>
    %91 = vector.shape_cast %90 : vector<16xf32> to vector<16x1xf32>
    %cst_40 = arith.constant 1.280000e+02 : f32
    %92 = vector.broadcast %cst_40 : f32 to vector<16x1xf32>
    %93 = arith.divf %91, %92 : vector<16x1xf32>
    %cst_41 = arith.constant 9.99999974E-6 : f32
    %94 = vector.broadcast %cst_41 : f32 to vector<16x1xf32>
    %95 = arith.addf %93, %94 : vector<16x1xf32>
    %96 = math.rsqrt %95 : vector<16x1xf32>
    %97 = vector.broadcast %96 : vector<16x1xf32> to vector<16x128xf32>
    %98 = arith.mulf %88, %97 : vector<16x128xf32>
    %99 = vector.broadcast %81 : vector<1x128xf32> to vector<16x128xf32>
    %100 = arith.mulf %98, %99 : vector<16x128xf32>
    %101 = vector.broadcast %82 : vector<1x128xf32> to vector<16x128xf32>
    %102 = arith.addf %100, %101 : vector<16x128xf32>
    %103 = arith.truncf %102 : vector<16x128xf32> to vector<16x128xbf16>
    %c0_42 = arith.constant 0 : index
    %c0_43 = arith.constant 0 : index
    %104 = vector.load %arg13[%c0_42, %c0_43] : memref<128x128xbf16, #tpu.memory_space<vmem>>, vector<128x128xbf16>
    %cst_44 = arith.constant dense<0.000000e+00> : vector<16x128xf32>
    %105 = tpu.matmul %103, %104, %cst_44 {dimension_numbers = #tpu.dot_dimension_numbers<[1], [0], [0], [1], [0, 0, 1, 1], [], []>} : vector<16x128xbf16>, vector<128x128xbf16>, vector<16x128xf32> -> vector<16x128xf32>
    %c0_45 = arith.constant 0 : index
    %c0_46 = arith.constant 0 : index
    %106 = vector.load %arg14[%c0_45, %c0_46] : memref<1x128xf32, #tpu.memory_space<vmem>>, vector<1x128xf32>
    %107 = vector.broadcast %106 : vector<1x128xf32> to vector<16x128xf32>
    %108 = arith.addf %105, %107 : vector<16x128xf32>
    %109 = arith.truncf %3 : vector<16x128xf32> to vector<16x128xbf16>
    %c0_47 = arith.constant 0 : index
    %c0_48 = arith.constant 0 : index
    %110 = vector.load %arg15[%c0_47, %c0_48] : memref<128x256xbf16, #tpu.memory_space<vmem>>, vector<128x256xbf16>
    %cst_49 = arith.constant dense<0.000000e+00> : vector<16x256xf32>
    %111 = tpu.matmul %109, %110, %cst_49 {dimension_numbers = #tpu.dot_dimension_numbers<[1], [0], [0], [1], [0, 0, 1, 1], [], []>} : vector<16x128xbf16>, vector<128x256xbf16>, vector<16x256xf32> -> vector<16x256xf32>
    %c0_50 = arith.constant 0 : index
    %c0_51 = arith.constant 0 : index
    %112 = vector.load %arg16[%c0_50, %c0_51] : memref<1x256xf32, #tpu.memory_space<vmem>>, vector<1x256xf32>
    %113 = vector.broadcast %112 : vector<1x256xf32> to vector<16x256xf32>
    %114 = arith.addf %111, %113 : vector<16x256xf32>
    %115 = vector.extract_strided_slice %114 {offsets = [0, 0], sizes = [16, 128], strides = [1, 1]} : vector<16x256xf32> to vector<16x128xf32>
    %116 = vector.extract_strided_slice %114 {offsets = [0, 128], sizes = [16, 128], strides = [1, 1]} : vector<16x256xf32> to vector<16x128xf32>
    %c0_52 = arith.constant 0 : index
    %c0_53 = arith.constant 0 : index
    %c0_54 = arith.constant 0 : index
    %117 = vector.load %arg4[%c0_52, %c0_53, %c0_54] : memref<1x1x16xf32, #tpu.memory_space<vmem>>, vector<1x1x16xf32>
    %118 = vector.shape_cast %117 : vector<1x1x16xf32> to vector<1x16xf32>
    %119 = vector.shape_cast %108 : vector<16x128xf32> to vector<16x4x32xf32>
    %120 = tpu.transpose %119, [1, 0, 2] : vector<16x4x32xf32> -> vector<4x16x32xf32>
    %121 = arith.truncf %120 : vector<4x16x32xf32> to vector<4x16x32xbf16>
    %122 = vector.shape_cast %115 : vector<16x128xf32> to vector<16x4x32xf32>
    %123 = tpu.transpose %122, [1, 0, 2] : vector<16x4x32xf32> -> vector<4x16x32xf32>
    %124 = arith.truncf %123 : vector<4x16x32xf32> to vector<4x16x32xbf16>
    %125 = vector.shape_cast %116 : vector<16x128xf32> to vector<16x4x32xf32>
    %126 = tpu.transpose %125, [1, 0, 2] : vector<16x4x32xf32> -> vector<4x16x32xf32>
    %127 = arith.truncf %126 : vector<4x16x32xf32> to vector<4x16x32xbf16>
    "tpu.trace_start"() <{level = 10 : i32, message = "htd,hsd->hts"}> : () -> ()
    %cst_55 = arith.constant dense<0.000000e+00> : vector<4x16x16xf32>
    %128 = tpu.matmul %121, %124, %cst_55 {dimension_numbers = #tpu.dot_dimension_numbers<[2], [2], [1], [1], [0, 0, 0, 1, 1, 1], [0], [0]>} : vector<4x16x32xbf16>, vector<4x16x32xbf16>, vector<4x16x16xf32> -> vector<4x16x16xf32>
    "tpu.trace_stop"() : () -> ()
    %cst_56 = arith.constant 0.176776692 : f32
    %129 = vector.broadcast %cst_56 : f32 to vector<4x16x16xf32>
    %130 = arith.mulf %128, %129 : vector<4x16x16xf32>
    %131 = vector.shape_cast %118 : vector<1x16xf32> to vector<1x1x16xf32>
    %132 = vector.broadcast %131 : vector<1x1x16xf32> to vector<4x16x16xf32>
    %133 = arith.addf %130, %132 : vector<4x16x16xf32>
    %cst_57 = arith.constant dense<0xFF800000> : vector<4x16xf32>
    %134 = vector.multi_reduction <maximumf>, %133, %cst_57 [2] : vector<4x16x16xf32> to vector<4x16xf32>
    %135 = vector.shape_cast %134 : vector<4x16xf32> to vector<4x16x1xf32>
    %136 = vector.broadcast %135 : vector<4x16x1xf32> to vector<4x16x16xf32>
    %137 = arith.subf %133, %136 : vector<4x16x16xf32>
    %138 = math.exp %137 : vector<4x16x16xf32>
    %cst_58 = arith.constant dense<0.000000e+00> : vector<4x16xf32>
    %139 = vector.multi_reduction <add>, %138, %cst_58 [2] : vector<4x16x16xf32> to vector<4x16xf32>
    %140 = vector.shape_cast %139 : vector<4x16xf32> to vector<4x16x1xf32>
    %141 = arith.truncf %138 : vector<4x16x16xf32> to vector<4x16x16xbf16>
    "tpu.trace_start"() <{level = 10 : i32, message = "hts,hsd->htd"}> : () -> ()
    %cst_59 = arith.constant dense<0.000000e+00> : vector<4x16x32xf32>
    %142 = tpu.matmul %141, %127, %cst_59 {dimension_numbers = #tpu.dot_dimension_numbers<[2], [1], [1], [2], [0, 0, 0, 1, 1, 2], [0], [0]>} : vector<4x16x16xbf16>, vector<4x16x32xbf16>, vector<4x16x32xf32> -> vector<4x16x32xf32>
    "tpu.trace_stop"() : () -> ()
    %143 = tpu.reciprocal %140 {approx = true} : vector<4x16x1xf32> -> vector<4x16x1xf32>
    %144 = vector.broadcast %143 : vector<4x16x1xf32> to vector<4x16x32xf32>
    %145 = arith.mulf %142, %144 : vector<4x16x32xf32>
    %146 = tpu.transpose %145, [1, 0, 2] : vector<4x16x32xf32> -> vector<16x4x32xf32>
    %147 = vector.shape_cast %146 : vector<16x4x32xf32> to vector<16x128xf32>
    %148 = arith.truncf %147 : vector<16x128xf32> to vector<16x128xbf16>
    %c0_60 = arith.constant 0 : index
    %c0_61 = arith.constant 0 : index
    %149 = vector.load %arg17[%c0_60, %c0_61] : memref<128x128xbf16, #tpu.memory_space<vmem>>, vector<128x128xbf16>
    %cst_62 = arith.constant dense<0.000000e+00> : vector<16x128xf32>
    %150 = tpu.matmul %148, %149, %cst_62 {dimension_numbers = #tpu.dot_dimension_numbers<[1], [0], [0], [1], [0, 0, 1, 1], [], []>} : vector<16x128xbf16>, vector<128x128xbf16>, vector<16x128xf32> -> vector<16x128xf32>
    %c0_63 = arith.constant 0 : index
    %c0_64 = arith.constant 0 : index
    %151 = vector.load %arg18[%c0_63, %c0_64] : memref<1x128xf32, #tpu.memory_space<vmem>>, vector<1x128xf32>
    %152 = vector.broadcast %151 : vector<1x128xf32> to vector<16x128xf32>
    %153 = arith.addf %150, %152 : vector<16x128xf32>
    %154 = arith.addf %80, %153 : vector<16x128xf32>
    %c0_65 = arith.constant 0 : index
    %c0_66 = arith.constant 0 : index
    %155 = vector.load %arg19[%c0_65, %c0_66] : memref<1x128xf32, #tpu.memory_space<vmem>>, vector<1x128xf32>
    %c0_67 = arith.constant 0 : index
    %c0_68 = arith.constant 0 : index
    %156 = vector.load %arg20[%c0_67, %c0_68] : memref<1x128xf32, #tpu.memory_space<vmem>>, vector<1x128xf32>
    %cst_69 = arith.constant dense<0.000000e+00> : vector<16xf32>
    %157 = vector.multi_reduction <add>, %154, %cst_69 [1] : vector<16x128xf32> to vector<16xf32>
    %158 = vector.shape_cast %157 : vector<16xf32> to vector<16x1xf32>
    %cst_70 = arith.constant 1.280000e+02 : f32
    %159 = vector.broadcast %cst_70 : f32 to vector<16x1xf32>
    %160 = arith.divf %158, %159 : vector<16x1xf32>
    %161 = vector.broadcast %160 : vector<16x1xf32> to vector<16x128xf32>
    %162 = arith.subf %154, %161 : vector<16x128xf32>
    %163 = arith.mulf %162, %162 : vector<16x128xf32>
    %cst_71 = arith.constant dense<0.000000e+00> : vector<16xf32>
    %164 = vector.multi_reduction <add>, %163, %cst_71 [1] : vector<16x128xf32> to vector<16xf32>
    %165 = vector.shape_cast %164 : vector<16xf32> to vector<16x1xf32>
    %cst_72 = arith.constant 1.280000e+02 : f32
    %166 = vector.broadcast %cst_72 : f32 to vector<16x1xf32>
    %167 = arith.divf %165, %166 : vector<16x1xf32>
    %cst_73 = arith.constant 9.99999974E-6 : f32
    %168 = vector.broadcast %cst_73 : f32 to vector<16x1xf32>
    %169 = arith.addf %167, %168 : vector<16x1xf32>
    %170 = math.rsqrt %169 : vector<16x1xf32>
    %171 = vector.broadcast %170 : vector<16x1xf32> to vector<16x128xf32>
    %172 = arith.mulf %162, %171 : vector<16x128xf32>
    %173 = vector.broadcast %155 : vector<1x128xf32> to vector<16x128xf32>
    %174 = arith.mulf %172, %173 : vector<16x128xf32>
    %175 = vector.broadcast %156 : vector<1x128xf32> to vector<16x128xf32>
    %176 = arith.addf %174, %175 : vector<16x128xf32>
    %177 = arith.truncf %176 : vector<16x128xf32> to vector<16x128xbf16>
    %c0_74 = arith.constant 0 : index
    %c0_75 = arith.constant 0 : index
    %178 = vector.load %arg21[%c0_74, %c0_75] : memref<128x256xbf16, #tpu.memory_space<vmem>>, vector<128x256xbf16>
    %cst_76 = arith.constant dense<0.000000e+00> : vector<16x256xf32>
    %179 = tpu.matmul %177, %178, %cst_76 {dimension_numbers = #tpu.dot_dimension_numbers<[1], [0], [0], [1], [0, 0, 1, 1], [], []>} : vector<16x128xbf16>, vector<128x256xbf16>, vector<16x256xf32> -> vector<16x256xf32>
    %c0_77 = arith.constant 0 : index
    %c0_78 = arith.constant 0 : index
    %180 = vector.load %arg22[%c0_77, %c0_78] : memref<1x256xf32, #tpu.memory_space<vmem>>, vector<1x256xf32>
    %181 = vector.broadcast %180 : vector<1x256xf32> to vector<16x256xf32>
    %182 = arith.addf %179, %181 : vector<16x256xf32>
    %cst_79 = arith.constant 0.000000e+00 : f32
    %183 = vector.broadcast %cst_79 : f32 to vector<16x256xf32>
    %184 = arith.maximumf %182, %183 : vector<16x256xf32>
    %185 = arith.truncf %184 : vector<16x256xf32> to vector<16x256xbf16>
    %c0_80 = arith.constant 0 : index
    %c0_81 = arith.constant 0 : index
    %186 = vector.load %arg23[%c0_80, %c0_81] : memref<256x128xbf16, #tpu.memory_space<vmem>>, vector<256x128xbf16>
    %cst_82 = arith.constant dense<0.000000e+00> : vector<16x128xf32>
    %187 = tpu.matmul %185, %186, %cst_82 {dimension_numbers = #tpu.dot_dimension_numbers<[1], [0], [0], [1], [0, 0, 1, 1], [], []>} : vector<16x256xbf16>, vector<256x128xbf16>, vector<16x128xf32> -> vector<16x128xf32>
    %c0_83 = arith.constant 0 : index
    %c0_84 = arith.constant 0 : index
    %188 = vector.load %arg24[%c0_83, %c0_84] : memref<1x128xf32, #tpu.memory_space<vmem>>, vector<1x128xf32>
    %189 = vector.broadcast %188 : vector<1x128xf32> to vector<16x128xf32>
    %190 = arith.addf %187, %189 : vector<16x128xf32>
    %191 = arith.addf %154, %190 : vector<16x128xf32>
    %c0_85 = arith.constant 0 : index
    %c0_86 = arith.constant 0 : index
    %c0_87 = arith.constant 0 : index
    %192 = vector.load %arg25[%c0_85, %c0_86, %c0_87] : memref<1x16x128xf32, #tpu.memory_space<vmem>>, vector<1x16x128xf32>
    %193 = vector.shape_cast %192 : vector<1x16x128xf32> to vector<16x128xf32>
    %194 = vector.shape_cast %191 : vector<16x128xf32> to vector<1x16x128xf32>
    tpu.vector_store %arg25[%c0_85, %c0_86, %c0_87], %194 {strides = array<i32>} : memref<1x16x128xf32, #tpu.memory_space<vmem>>, vector<1x16x128xf32>,
    return
  }
  func.func @transform_0(%arg0: i32) -> (i32, i32, i32) {
    %c0_i32 = arith.constant 0 : i32
    %c0_i32_0 = arith.constant 0 : i32
    %c0_i32_1 = arith.constant 0 : i32
    return %arg0, %c0_i32, %c0_i32_0 : i32, i32, i32
  }
  func.func @transform_1(%arg0: i32) -> (i32, i32, i32) {
    %c0_i32 = arith.constant 0 : i32
    %c0_i32_0 = arith.constant 0 : i32
    %c0_i32_1 = arith.constant 0 : i32
    return %arg0, %c0_i32, %c0_i32_0 : i32, i32, i32
  }
  func.func @transform_2(%arg0: i32) -> (i32, i32, i32) {
    %c0_i32 = arith.constant 0 : i32
    %c0_i32_0 = arith.constant 0 : i32
    %c0_i32_1 = arith.constant 0 : i32
    return %arg0, %c0_i32, %c0_i32_0 : i32, i32, i32
  }
  func.func @transform_3(%arg0: i32) -> (i32, i32, i32) {
    %c0_i32 = arith.constant 0 : i32
    %c0_i32_0 = arith.constant 0 : i32
    %c0_i32_1 = arith.constant 0 : i32
    return %arg0, %c0_i32, %c0_i32_0 : i32, i32, i32
  }
  func.func @transform_4(%arg0: i32) -> (i32, i32) {
    %c0_i32 = arith.constant 0 : i32
    %c0_i32_0 = arith.constant 0 : i32
    %c0_i32_1 = arith.constant 0 : i32
    return %c0_i32, %c0_i32_0 : i32, i32
  }
  func.func @transform_5(%arg0: i32) -> (i32, i32) {
    %c0_i32 = arith.constant 0 : i32
    %c0_i32_0 = arith.constant 0 : i32
    %c0_i32_1 = arith.constant 0 : i32
    return %c0_i32, %c0_i32_0 : i32, i32
  }
  func.func @transform_6(%arg0: i32) -> (i32, i32) {
    %c0_i32 = arith.constant 0 : i32
    %c0_i32_0 = arith.constant 0 : i32
    %c0_i32_1 = arith.constant 0 : i32
    return %c0_i32, %c0_i32_0 : i32, i32
  }
  func.func @transform_7(%arg0: i32) -> (i32, i32) {
    %c0_i32 = arith.constant 0 : i32
    %c0_i32_0 = arith.constant 0 : i32
    %c0_i32_1 = arith.constant 0 : i32
    return %c0_i32, %c0_i32_0 : i32, i32
  }
  func.func @transform_8(%arg0: i32) -> (i32, i32) {
    %c0_i32 = arith.constant 0 : i32
    %c0_i32_0 = arith.constant 0 : i32
    %c0_i32_1 = arith.constant 0 : i32
    return %c0_i32, %c0_i32_0 : i32, i32
  }
  func.func @transform_9(%arg0: i32) -> (i32, i32) {
    %c0_i32 = arith.constant 0 : i32
    %c0_i32_0 = arith.constant 0 : i32
    %c0_i32_1 = arith.constant 0 : i32
    return %c0_i32, %c0_i32_0 : i32, i32
  }
  func.func @transform_10(%arg0: i32) -> (i32, i32) {
    %c0_i32 = arith.constant 0 : i32
    %c0_i32_0 = arith.constant 0 : i32
    %c0_i32_1 = arith.constant 0 : i32
    return %c0_i32, %c0_i32_0 : i32, i32
  }
  func.func @transform_11(%arg0: i32) -> (i32, i32) {
    %c0_i32 = arith.constant 0 : i32
    %c0_i32_0 = arith.constant 0 : i32
    %c0_i32_1 = arith.constant 0 : i32
    return %c0_i32, %c0_i32_0 : i32, i32
  }
  func.func @transform_12(%arg0: i32) -> (i32, i32) {
    %c0_i32 = arith.constant 0 : i32
    %c0_i32_0 = arith.constant 0 : i32
    %c0_i32_1 = arith.constant 0 : i32
    return %c0_i32, %c0_i32_0 : i32, i32
  }
  func.func @transform_13(%arg0: i32) -> (i32, i32) {
    %c0_i32 = arith.constant 0 : i32
    %c0_i32_0 = arith.constant 0 : i32
    %c0_i32_1 = arith.constant 0 : i32
    return %c0_i32, %c0_i32_0 : i32, i32
  }
  func.func @transform_14(%arg0: i32) -> (i32, i32) {
    %c0_i32 = arith.constant 0 : i32
    %c0_i32_0 = arith.constant 0 : i32
    %c0_i32_1 = arith.constant 0 : i32
    return %c0_i32, %c0_i32_0 : i32, i32
  }
  func.func @transform_15(%arg0: i32) -> (i32, i32) {
    %c0_i32 = arith.constant 0 : i32
    %c0_i32_0 = arith.constant 0 : i32
    %c0_i32_1 = arith.constant 0 : i32
    return %c0_i32, %c0_i32_0 : i32, i32
  }
  func.func @transform_16(%arg0: i32) -> (i32, i32) {
    %c0_i32 = arith.constant 0 : i32
    %c0_i32_0 = arith.constant 0 : i32
    %c0_i32_1 = arith.constant 0 : i32
    return %c0_i32, %c0_i32_0 : i32, i32
  }
  func.func @transform_17(%arg0: i32) -> (i32, i32) {
    %c0_i32 = arith.constant 0 : i32
    %c0_i32_0 = arith.constant 0 : i32
    %c0_i32_1 = arith.constant 0 : i32
    return %c0_i32, %c0_i32_0 : i32, i32
  }
  func.func @transform_18(%arg0: i32) -> (i32, i32) {
    %c0_i32 = arith.constant 0 : i32
    %c0_i32_0 = arith.constant 0 : i32
    %c0_i32_1 = arith.constant 0 : i32
    return %c0_i32, %c0_i32_0 : i32, i32
  }
  func.func @transform_19(%arg0: i32) -> (i32, i32) {
    %c0_i32 = arith.constant 0 : i32
    %c0_i32_0 = arith.constant 0 : i32
    %c0_i32_1 = arith.constant 0 : i32
    return %c0_i32, %c0_i32_0 : i32, i32
  }
  func.func @transform_20(%arg0: i32) -> (i32, i32) {
    %c0_i32 = arith.constant 0 : i32
    %c0_i32_0 = arith.constant 0 : i32
    %c0_i32_1 = arith.constant 0 : i32
    return %c0_i32, %c0_i32_0 : i32, i32
  }
  func.func @transform_21(%arg0: i32) -> (i32, i32) {
    %c0_i32 = arith.constant 0 : i32
    %c0_i32_0 = arith.constant 0 : i32
    %c0_i32_1 = arith.constant 0 : i32
    return %c0_i32, %c0_i32_0 : i32, i32
  }
  func.func @transform_22(%arg0: i32) -> (i32, i32) {
    %c0_i32 = arith.constant 0 : i32
    %c0_i32_0 = arith.constant 0 : i32
    %c0_i32_1 = arith.constant 0 : i32
    return %c0_i32, %c0_i32_0 : i32, i32
  }
  func.func @transform_23(%arg0: i32) -> (i32, i32) {
    %c0_i32 = arith.constant 0 : i32
    %c0_i32_0 = arith.constant 0 : i32
    %c0_i32_1 = arith.constant 0 : i32
    return %c0_i32, %c0_i32_0 : i32, i32
  }
  func.func @transform_24(%arg0: i32) -> (i32, i32, i32) {
    %c0_i32 = arith.constant 0 : i32
    %c0_i32_0 = arith.constant 0 : i32
    %c0_i32_1 = arith.constant 0 : i32
    return %arg0, %c0_i32, %c0_i32_0 : i32, i32, i32
  }
}

</mosaic_0001>

<bundles_post_ra>
// kernel: transformer_decoder.2
= control target key start
LH: loop header
LB: loop body
LE: loop exit
PB: predicated region body
PF: predicated region fallthrough
CT: control target
= control target key end

     0   :  { %s8822_s0 = inlined_call_operand.vmem [shape: f32[2,16,128], index: 0, kind: input, shape index: {}]   ;;  %s8823_s1 = inlined_call_operand.vmem [shape: f32[2,16,128], index: 1, kind: input, shape index: {}]   ;;  %s8824_s2 = inlined_call_operand.vmem [shape: f32[2,1,16], index: 2, kind: input, shape index: {}]   ;;  %s8825_s3 = inlined_call_operand.vmem [shape: f32[2,1,16], index: 3, kind: input, shape index: {}]   ;;  %s8826_s4 = inlined_call_operand.hbm [shape: f32[1,128], index: 4, kind: input, shape index: {}]   ;;  %s8827_s5 = inlined_call_operand.hbm [shape: f32[1,128], index: 5, kind: input, shape index: {}]   ;;  %s8828_s6 = inlined_call_operand.hbm [shape: bf16[128,384], index: 6, kind: input, shape index: {}]   ;;  %s8829_s7 = inlined_call_operand.hbm [shape: f32[1,384], index: 7, kind: input, shape index: {}]   ;;  %s8830_s8 = inlined_call_operand.hbm [shape: bf16[128,128], index: 8, kind: input, shape index: {}]   ;;  %s8831_s9 = inlined_call_operand.hbm [shape: f32[1,128], index: 9, kind: input, shape index: {}]   ;;  %s8832_s10 = inlined_call_operand.hbm [shape: f32[1,128], index: 10, kind: input, shape index: {}]   ;;  %s8833_s11 = inlined_call_operand.hbm [shape: f32[1,128], index: 11, kind: input, shape index: {}]   ;;  %s8834_s12 = inlined_call_operand.hbm [shape: bf16[128,128], index: 12, kind: input, shape index: {}]   ;;  %s8835_s13 = inlined_call_operand.hbm [shape: f32[1,128], index: 13, kind: input, shape index: {}]   ;;  %s8836_s14 = inlined_call_operand.hbm [shape: bf16[128,256], index: 14, kind: input, shape index: {}]   ;;  %s8837_s15 = inlined_call_operand.hbm [shape: f32[1,256], index: 15, kind: input, shape index: {}]   ;;  %s8838_s16 = inlined_call_operand.hbm [shape: bf16[128,128], index: 16, kind: input, shape index: {}]   ;;  %s8839_s17 = inlined_call_operand.hbm [shape: f32[1,128], index: 17, kind: input, shape index: {}]   ;;  %s8840_s18 = inlined_call_operand.hbm [shape: f32[1,128], index: 18, kind: input, shape index: {}]   ;;  %s8841_s19 = inlined_call_operand.hbm [shape: f32[1,128], index: 19, kind: input, shape index: {}]   ;;  %s8842_s20 = inlined_call_operand.hbm [shape: bf16[128,256], index: 20, kind: input, shape index: {}]   ;;  %s8843_s21 = inlined_call_operand.hbm [shape: f32[1,256], index: 21, kind: input, shape index: {}]   ;;  %s8844_s22 = inlined_call_operand.hbm [shape: bf16[256,128], index: 22, kind: input, shape index: {}]   ;;  %s8845_s23 = inlined_call_operand.hbm [shape: f32[1,128], index: 23, kind: input, shape index: {}]   ;;  %s8846_s24 = inlined_call_operand.vmem [shape: f32[2,16,128], index: 24, kind: output, shape index: {}]  }
   0x1   :  { %8861 = sst [smem:[#allocation47_spill]] %s8822_s0 }
   0x2   :  { %8862 = sst [smem:[#allocation48_spill]] %s8823_s1 }
   0x3   :  { %8863 = sst [smem:[#allocation49_spill]] %s8824_s2 }
   0x4   :  { %8864 = sst [smem:[#allocation50_spill]] %s8825_s3 }
   0x5   :  { %8865 = sst [smem:[#allocation51_spill]] %s8826_s4 }
   0x6   :  { %8866 = sst [smem:[#allocation52_spill]] %s8827_s5 }
   0x7   :  { %8867 = sst [smem:[#allocation53_spill]] %s8828_s6 }
   0x8   :  { %8868 = sst [smem:[#allocation54_spill]] %s8829_s7 }
   0x9   :  { %8869 = sst [smem:[#allocation55_spill]] %s8830_s8 }
   0xa   :  { %8870 = sst [smem:[#allocation56_spill]] %s8831_s9 }
   0xb   :  { %8871 = sst [smem:[#allocation57_spill]] %s8833_s11 }
   0xc   :  { %8872 = sst [smem:[#allocation58_spill]] %s8835_s13 }
   0xd   :  { %8873 = sst [smem:[#allocation59_spill]] %s8837_s15 }
   0xe   :  { %8874 = sst [smem:[#allocation60_spill]] %s8845_s23 }
   0xf   :  { %8875 = sst [smem:[#allocation61_spill]] %s8846_s24 }
  0x10   :  { %29 = vsyncpa [#allocation3], 0 }
  0x11   :  { %30 = vsyncpa [#allocation5], 0 }
  0x12   :  { %31 = vsyncpa [#allocation8], 0 }
  0x13   :  { %32 = vsyncpa [#allocation11], 0 }
  0x14   :  { %33 = vsyncpa [#allocation14], 0 }
  0x15   :  { %34 = vsyncpa [#allocation17], 0 }
  0x16   :  { %35 = vsyncpa [#allocation20], 0 }
  0x17   :  { %36 = vsyncpa [#allocation23], 0 }
  0x18   :  { %37 = vsyncpa [#allocation26], 0 }
  0x19   :  { %38 = vsyncpa [#allocation29], 0 }
  0x1a   :  { %39 = vsyncpa [#allocation32], 0  ;;  %s7605_s5 = smov 0  }
  0x1b LB: > { %8876 = sst [smem:[#allocation44_spill]] %s7443_s5  ;;  %s7445_s26 = smov [#allocation4]   ;;  %s7443_s5 = sphi %s7605_s5, %s45_s5  }
  0x1c   : > { %s624_s27 = sshll.u32 %s7445_s26, 4  ;;  %s7611_s28 = sadd.s32 4294967295, %s7443_s5   ;;  %s7616_s27 = int_to_ptr.vmem [resolvable:$true] %s624_s27 }
  0x1d   : > { %8877 = sst [smem:[#allocation45_spill]] %s7611_s28  ;;  %p5905_p0 = scmp.ge.s32.totalorder %s7443_s5, 1 }
  0x1e   : > { %p600_p1 = scmp.lt.s32.totalorder %s7443_s5, 3  ;;  %p8857_p2 = scmp.eq.s32.totalorder %s7611_s28, 0 }
  0x1f   : > { %s7446_s2 = smov [#allocation7]   ;;  %s7447_s0 = smov [#allocation10]  }
  0x20   : > { %p7618_p3 = pnand %p5905_p0, %p600_p1  ;;  %s648_s29 = sshll.u32 %s7446_s2, 4  ;;  %s7624_s29 = int_to_ptr.vmem [resolvable:$true] %s648_s29 }
  0x21   : > { %s672_s7 = sshll.u32 %s7447_s0, 4  ;;  %s7448_s3 = smov [#allocation13]   ;;  %s7632_s7 = int_to_ptr.vmem [resolvable:$true] %s672_s7 }
  0x22   : > { %s8878_s6 = scalar_select %p7618_p3, 1, 0 }
  0x23   : > { %p6461_p4 = pneg %p7618_p3  ;;  %s694_s25 = sshll.u32 %s7448_s3, 4  ;;  %s7634_s25 = int_to_ptr.vmem [resolvable:$true] %s694_s25 }
  0x24   : > { %8879 = sst [smem:[#allocation46_spill]] %s8878_s6  ;;  %s8881_s1 = sld [smem:[#allocation52_spill]] }
  0x25   : > { %p7628_p5 = pnand %p8857_p2, %p6461_p4 }
  0x27   : > { %p7644_p7 = pneg %p7628_p5 }
  0x2a   : > { %s6833_s26 = scalar_lea.hbm %s8881_s1, 16 }
  0x2b   : > { %p6834_p6 = scmp.ne.s32.totalorder %s8881_s1, %s6833_s26  ;;  %p6840_p10 = scmp.lt.u32.totalorder %s6833_s26, %s8881_s1 }
  0x2d   : > { %p6836_p8 = pnand %p7644_p7, %p6834_p6 }
  0x2f   : > { %p6837_p9 = pneg %p6836_p8 }
  0x31   : > { %p6842_p11 = pnand %p6840_p10, %p6837_p9 }
  0x33   : > { %6845 = shalt.err (!%p6842_p11)
}
  0x34   : > { %s6846_s5 = scalar_lea.vmem %s7616_s27, 16  ;;  %s6853_s8 = scalar_lea.vmem %s7616_s27, 32 }
  0x35   : > { %p6847_p12 = scmp.ne.s32.totalorder %s7616_s27, %s6846_s5  ;;  %p6854_p1 = scmp.lt.s32.totalorder %s7616_s27, %s7616_s27 }
  0x36   : > { %p6855_p4 = scmp.lt.s32.totalorder %s6853_s8, %s6846_s5 }
  0x37   : > { %p6849_p13 = pnand %p6847_p12, %p7644_p7 }
  0x38   : > { %p6856_p6 = por %p6855_p4, %p6854_p1 }
  0x39   : > { %p6850_p0 = pneg %p6849_p13 }
  0x3b   : > { %p6857_p8 = pnand %p6856_p6, %p6850_p0 }
  0x3d   : > { %6860 = shalt.err (!%p6857_p8)
}
  0x3e   : > { %6467 = dma.hbm_to_vmem [thread:$0]  (!%p7628_p5), %s8881_s1, 16, %s7616_s27, [#allocation5]  }
  0x3f   : > { %s8883_s3 = sld [smem:[#allocation54_spill]] }
  0x45   : > { %s6861_s28 = scalar_lea.hbm %s8883_s3, 48 }
  0x46   : > { %p6862_p9 = scmp.ne.s32.totalorder %s8883_s3, %s6861_s28  ;;  %p6868_p12 = scmp.lt.u32.totalorder %s6861_s28, %s8883_s3 }
  0x48   : > { %p6864_p10 = pnand %p6862_p9, %p7644_p7 }
  0x4a   : > { %p6865_p11 = pneg %p6864_p10 }
  0x4c   : > { %p6870_p13 = pnand %p6868_p12, %p6865_p11 }
  0x4e   : > { %6873 = shalt.err (!%p6870_p13)
}
  0x4f   : > { %s6874_s27 = scalar_lea.vmem %s7624_s29, 48  ;;  %s6881_s23 = scalar_lea.vmem %s7624_s29, 64 }
  0x50   : > { %p6875_p0 = scmp.ne.s32.totalorder %s7624_s29, %s6874_s27  ;;  %p6882_p6 = scmp.lt.s32.totalorder %s7624_s29, %s7624_s29 }
  0x51   : > { %p6883_p8 = scmp.lt.s32.totalorder %s6881_s23, %s6874_s27 }
  0x52   : > { %p6877_p1 = pnand %p6875_p0, %p7644_p7 }
  0x53   : > { %p6884_p9 = por %p6883_p8, %p6882_p6 }
  0x54   : > { %p6878_p4 = pneg %p6877_p1 }
  0x56   : > { %p6885_p10 = pnand %p6884_p9, %p6878_p4 }
  0x58   : > { %6888 = shalt.err (!%p6885_p10)
}
  0x59   : > { %6473 = dma.hbm_to_vmem [thread:$0]  (!%p7628_p5), %s8883_s3, 48, %s7624_s29, [#allocation8]  }
  0x5a   : > { %s8884_s9 = sld [smem:[#allocation56_spill]] }
  0x60   : > { %s6889_s26 = scalar_lea.hbm %s8884_s9, 16 }
  0x61   : > { %p6890_p11 = scmp.ne.s32.totalorder %s8884_s9, %s6889_s26  ;;  %p6896_p0 = scmp.lt.u32.totalorder %s6889_s26, %s8884_s9 }
  0x63   : > { %p6892_p12 = pnand %p6890_p11, %p7644_p7 }
  0x65   : > { %p6893_p13 = pneg %p6892_p12 }
  0x67   : > { %p6898_p1 = pnand %p6896_p0, %p6893_p13 }
  0x69   : > { %6901 = shalt.err (!%p6898_p1)
}
  0x6a   : > { %s6902_s29 = scalar_lea.vmem %s7632_s7, 16  ;;  %s6909_s23 = scalar_lea.vmem %s7632_s7, 32 }
  0x6b   : > { %p6903_p4 = scmp.ne.s32.totalorder %s7632_s7, %s6902_s29  ;;  %p6910_p9 = scmp.lt.s32.totalorder %s7632_s7, %s7632_s7 }
  0x6c   : > { %p6911_p10 = scmp.lt.s32.totalorder %s6909_s23, %s6902_s29 }
  0x6d   : > { %p6905_p6 = pnand %p6903_p4, %p7644_p7 }
  0x6e   : > { %p6912_p11 = por %p6911_p10, %p6910_p9 }
  0x6f   : > { %p6906_p8 = pneg %p6905_p6 }
  0x71   : > { %p6913_p12 = pnand %p6912_p11, %p6906_p8 }
  0x73   : > { %6916 = shalt.err (!%p6913_p12)
}
  0x74   : > { %6479 = dma.hbm_to_vmem [thread:$0]  (!%p7628_p5), %s8884_s9, 16, %s7632_s7, [#allocation11]  }
  0x75   : > { %s8885_s11 = sld [smem:[#allocation57_spill]] }
  0x7b   : > { %s6917_s26 = scalar_lea.hbm %s8885_s11, 16 }
  0x7c   : > { %p6918_p13 = scmp.ne.s32.totalorder %s8885_s11, %s6917_s26  ;;  %p6924_p4 = scmp.lt.u32.totalorder %s6917_s26, %s8885_s11 }
  0x7e   : > { %p6920_p0 = pnand %p6918_p13, %p7644_p7 }
  0x80   : > { %p6921_p1 = pneg %p6920_p0 }
  0x82   : > { %p6926_p6 = pnand %p6924_p4, %p6921_p1 }
  0x84   : > { %6929 = shalt.err (!%p6926_p6)
}
  0x85   : > { %s6930_s7 = scalar_lea.vmem %s7634_s25, 16  ;;  %s6937_s29 = scalar_lea.vmem %s7634_s25, 32 }
  0x86   : > { %p6931_p8 = scmp.ne.s32.totalorder %s7634_s25, %s6930_s7  ;;  %p6938_p11 = scmp.lt.s32.totalorder %s7634_s25, %s7634_s25 }
  0x87   : > { %p6939_p12 = scmp.lt.s32.totalorder %s6937_s29, %s6930_s7 }
  0x88   : > { %p6933_p9 = pnand %p6931_p8, %p7644_p7 }
  0x89   : > { %p6940_p13 = por %p6939_p12, %p6938_p11 }
  0x8a   : > { %p6934_p10 = pneg %p6933_p9 }
  0x8c   : > { %p6941_p0 = pnand %p6940_p13, %p6934_p10 }
  0x8e   : > { %6944 = shalt.err (!%p6941_p0)
}
  0x8f   : > { %6485 = dma.hbm_to_vmem [thread:$0]  (!%p7628_p5), %s8885_s11, 16, %s7634_s25, [#allocation14]  }
  0x90   : > { %s7449_s6 = smov [#allocation16]   ;;  %s7450_s4 = smov [#allocation19]  }
  0x91   : > { %s718_s24 = sshll.u32 %s7449_s6, 4  ;;  %s742_s26 = sshll.u32 %s7450_s4, 4  ;;  %s719_s24 = int_to_ptr.vmem [resolvable:$true] %s718_s24  ;;  %s743_s26 = int_to_ptr.vmem [resolvable:$true] %s742_s26 }
  0x92   : > { %s8886_s13 = sld [smem:[#allocation58_spill]] }
  0x98   : > { %s6945_s8 = scalar_lea.hbm %s8886_s13, 16 }
  0x99   : > { %p6946_p1 = scmp.ne.s32.totalorder %s8886_s13, %s6945_s8  ;;  %p6952_p8 = scmp.lt.u32.totalorder %s6945_s8, %s8886_s13 }
  0x9b   : > { %p6948_p4 = pnand %p6946_p1, %p7644_p7 }
  0x9d   : > { %p6949_p6 = pneg %p6948_p4 }
  0x9f   : > { %p6954_p9 = pnand %p6952_p8, %p6949_p6 }
  0xa1   : > { %6957 = shalt.err (!%p6954_p9)
}
  0xa2   : > { %s6958_s25 = scalar_lea.vmem %s719_s24, 16  ;;  %s6965_s28 = scalar_lea.vmem %s719_s24, 32 }
  0xa3   : > { %p6959_p10 = scmp.ne.s32.totalorder %s719_s24, %s6958_s25  ;;  %p6966_p13 = scmp.lt.s32.totalorder %s719_s24, %s719_s24 }
  0xa4   : > { %p6967_p0 = scmp.lt.s32.totalorder %s6965_s28, %s6958_s25 }
  0xa5   : > { %p6961_p11 = pnand %p6959_p10, %p7644_p7 }
  0xa6   : > { %p6968_p2 = por %p6967_p0, %p6966_p13 }
  0xa7   : > { %p6962_p12 = pneg %p6961_p11 }
  0xa9   : > { %p6969_p3 = pnand %p6968_p2, %p6962_p12 }
  0xab   : > { %6972 = shalt.err (!%p6969_p3)
}
  0xac   : > { %6491 = dma.hbm_to_vmem [thread:$0]  (!%p7628_p5), %s8886_s13, 16, %s719_s24, [#allocation17]  }
  0xad   : > { %s8887_s15 = sld [smem:[#allocation59_spill]] }
  0xb3   : > { %s6973_s8 = scalar_lea.hbm %s8887_s15, 32 }
  0xb4   : > { %p6974_p1 = scmp.ne.s32.totalorder %s8887_s15, %s6973_s8  ;;  %p6980_p3 = scmp.lt.u32.totalorder %s6973_s8, %s8887_s15 }
  0xb6   : > { %p6976_p4 = pnand %p6974_p1, %p7644_p7 }
  0xb8   : > { %p6977_p2 = pneg %p6976_p4 }
  0xba   : > { %p6982_p6 = pnand %p6980_p3, %p6977_p2 }
  0xbc   : > { %6985 = shalt.err (!%p6982_p6)
}
  0xbd   : > { %s6986_s25 = scalar_lea.vmem %s743_s26, 32  ;;  %p6994_p11 = scmp.lt.s32.totalorder %s743_s26, %s743_s26 }
  0xbe   : > { %p6987_p8 = scmp.ne.s32.totalorder %s743_s26, %s6986_s25  ;;  %p6995_p12 = scmp.lt.s32.totalorder %s6986_s25, %s6986_s25 }
  0xc0   : > { %p6989_p9 = pnand %p6987_p8, %p7644_p7  ;;  %p6996_p13 = por %p6995_p12, %p6994_p11 }
  0xc2   : > { %p6990_p10 = pneg %p6989_p9 }
  0xc4   : > { %p6997_p0 = pnand %p6996_p13, %p6990_p10 }
  0xc6   : > { %7000 = shalt.err (!%p6997_p0)
}
  0xc7   : > { %6497 = dma.hbm_to_vmem [thread:$0]  (!%p7628_p5), %s8887_s15, 32, %s743_s26, [#allocation20]  }
  0xc8   : > { %s7451_s6 = smov [#allocation22]   ;;  %s7452_s2 = smov [#allocation25]  }
  0xc9   : > { %s766_s4 = sshll.u32 %s7451_s6, 4  ;;  %s788_s5 = sshll.u32 %s7452_s2, 4  ;;  %s767_s4 = int_to_ptr.vmem [resolvable:$true] %s766_s4  ;;  %s789_s5 = int_to_ptr.vmem [resolvable:$true] %s788_s5 }
  0xca   : > { %s7001_s7 = scalar_lea.hbm %s8839_s17, 16 }
  0xcb   : > { %p7002_p1 = scmp.ne.s32.totalorder %s8839_s17, %s7001_s7  ;;  %p7008_p3 = scmp.lt.u32.totalorder %s7001_s7, %s8839_s17 }
  0xcd   : > { %p7004_p4 = pnand %p7002_p1, %p7644_p7 }
  0xcf   : > { %p7005_p2 = pneg %p7004_p4 }
  0xd1   : > { %p7010_p6 = pnand %p7008_p3, %p7005_p2 }
  0xd3   : > { %7013 = shalt.err (!%p7010_p6)
}
  0xd4   : > { %s7014_s26 = scalar_lea.vmem %s767_s4, 16  ;;  %s7021_s28 = scalar_lea.vmem %s767_s4, 32 }
  0xd5   : > { %p7015_p8 = scmp.ne.s32.totalorder %s767_s4, %s7014_s26  ;;  %p7022_p11 = scmp.lt.s32.totalorder %s767_s4, %s767_s4 }
  0xd6   : > { %p7023_p12 = scmp.lt.s32.totalorder %s7021_s28, %s7014_s26 }
  0xd7   : > { %p7017_p9 = pnand %p7015_p8, %p7644_p7 }
  0xd8   : > { %p7024_p13 = por %p7023_p12, %p7022_p11 }
  0xd9   : > { %p7018_p10 = pneg %p7017_p9 }
  0xdb   : > { %p7025_p0 = pnand %p7024_p13, %p7018_p10 }
  0xdd   : > { %7028 = shalt.err (!%p7025_p0)
}
  0xde   : > { %6503 = dma.hbm_to_vmem [thread:$0]  (!%p7628_p5), %s8839_s17, 16, %s767_s4, [#allocation23]  }
  0xdf   : > { %s7029_s7 = scalar_lea.hbm %s8841_s19, 16 }
  0xe0   : > { %p7030_p1 = scmp.ne.s32.totalorder %s8841_s19, %s7029_s7  ;;  %p7036_p3 = scmp.lt.u32.totalorder %s7029_s7, %s8841_s19 }
  0xe2   : > { %p7032_p4 = pnand %p7030_p1, %p7644_p7 }
  0xe4   : > { %p7033_p2 = pneg %p7032_p4 }
  0xe6   : > { %p7038_p6 = pnand %p7036_p3, %p7033_p2 }
  0xe8   : > { %7041 = shalt.err (!%p7038_p6)
}
  0xe9   : > { %s7042_s26 = scalar_lea.vmem %s789_s5, 16  ;;  %s7049_s4 = scalar_lea.vmem %s789_s5, 32 }
  0xea   : > { %p7043_p8 = scmp.ne.s32.totalorder %s789_s5, %s7042_s26  ;;  %p7050_p11 = scmp.lt.s32.totalorder %s789_s5, %s789_s5 }
  0xeb   : > { %p7051_p12 = scmp.lt.s32.totalorder %s7049_s4, %s7042_s26 }
  0xec   : > { %p7045_p9 = pnand %p7043_p8, %p7644_p7 }
  0xed   : > { %p7052_p13 = por %p7051_p12, %p7050_p11 }
  0xee   : > { %p7046_p10 = pneg %p7045_p9 }
  0xf0   : > { %p7053_p0 = pnand %p7052_p13, %p7046_p10 }
  0xf2   : > { %7056 = shalt.err (!%p7053_p0)
}
  0xf3   : > { %6509 = dma.hbm_to_vmem [thread:$0]  (!%p7628_p5), %s8841_s19, 16, %s789_s5, [#allocation26]  }
  0xf4   : > { %s7453_s2 = smov [#allocation28]   ;;  %s7454_s27 = smov [#allocation2]  }
  0xf5   : > { %s812_s8 = sshll.u32 %s7453_s2, 4  ;;  %s613_s7 = sshll.u32 %s7454_s27, 4  ;;  %s813_s8 = int_to_ptr.vmem [resolvable:$true] %s812_s8  ;;  %s614_s7 = int_to_ptr.vmem [resolvable:$true] %s613_s7 }
  0xf6   : > { %s7057_s25 = scalar_lea.hbm %s8843_s21, 32 }
  0xf7   : > { %p7058_p1 = scmp.ne.s32.totalorder %s8843_s21, %s7057_s25  ;;  %p7064_p3 = scmp.lt.u32.totalorder %s7057_s25, %s8843_s21 }
  0xf9   : > { %p7060_p4 = pnand %p7058_p1, %p7644_p7 }
  0xfb   : > { %p7061_p2 = pneg %p7060_p4 }
  0xfd   : > { %p7066_p6 = pnand %p7064_p3, %p7061_p2 }
  0xff   : > { %7069 = shalt.err (!%p7066_p6)
}
 0x100   : > { %s7070_s5 = scalar_lea.vmem %s813_s8, 32  ;;  %p7078_p11 = scmp.lt.s32.totalorder %s813_s8, %s813_s8 }
 0x101   : > { %p7071_p8 = scmp.ne.s32.totalorder %s813_s8, %s7070_s5  ;;  %p7079_p12 = scmp.lt.s32.totalorder %s7070_s5, %s7070_s5 }
 0x103   : > { %p7073_p9 = pnand %p7071_p8, %p7644_p7  ;;  %p7080_p13 = por %p7079_p12, %p7078_p11 }
 0x105   : > { %p7074_p10 = pneg %p7073_p9 }
 0x107   : > { %p7081_p0 = pnand %p7080_p13, %p7074_p10 }
 0x109   : > { %7084 = shalt.err (!%p7081_p0)
}
 0x10a   : > { %6515 = dma.hbm_to_vmem [thread:$0]  (!%p7628_p5), %s8843_s21, 32, %s813_s8, [#allocation29]  }
 0x10b   : > { %s8888_s23 = sld [smem:[#allocation51_spill]] }
 0x111   : > { %s7085_s25 = scalar_lea.hbm %s8888_s23, 16 }
 0x112   : > { %p7086_p1 = scmp.ne.s32.totalorder %s8888_s23, %s7085_s25  ;;  %p7092_p3 = scmp.lt.u32.totalorder %s7085_s25, %s8888_s23 }
 0x114   : > { %p7088_p4 = pnand %p7086_p1, %p7644_p7 }
 0x116   : > { %p7089_p2 = pneg %p7088_p4 }
 0x118   : > { %p7094_p6 = pnand %p7092_p3, %p7089_p2 }
 0x11a   : > { %7097 = shalt.err (!%p7094_p6)
}
 0x11b   : > { %s7098_s5 = scalar_lea.vmem %s614_s7, 16  ;;  %s7105_s8 = scalar_lea.vmem %s614_s7, 32 }
 0x11c   : > { %p7099_p8 = scmp.ne.s32.totalorder %s614_s7, %s7098_s5  ;;  %p7106_p11 = scmp.lt.s32.totalorder %s614_s7, %s614_s7 }
 0x11d   : > { %p7107_p12 = scmp.lt.s32.totalorder %s7105_s8, %s7098_s5 }
 0x11e   : > { %p7101_p9 = pnand %p7099_p8, %p7644_p7 }
 0x11f   : > { %p7108_p13 = por %p7107_p12, %p7106_p11 }
 0x120   : > { %p7102_p10 = pneg %p7101_p9 }
 0x122   : > { %p7109_p0 = pnand %p7108_p13, %p7102_p10 }
 0x124   : > { %7112 = shalt.err (!%p7109_p0)
}
 0x125   : > { %6464 = dma.hbm_to_vmem [thread:$0]  (!%p7628_p5), %s8888_s23, 16, %s614_s7, [#allocation3]  }
 0x126   : > { %s7455_s27 = smov [#allocation6]   ;;  %s8889_s26 = sld [smem:[#allocation53_spill]] }
 0x127   : > { %s634_s29 = sshll.u32 %s7455_s27, 4  ;;  %s635_s29 = int_to_ptr.vmem [resolvable:$true] %s634_s29 }
 0x12c   : > { %s7113_s4 = scalar_lea.hbm %s8889_s26, 3072 }
 0x12d   : > { %p7114_p1 = scmp.ne.s32.totalorder %s8889_s26, %s7113_s4  ;;  %p7120_p3 = scmp.lt.u32.totalorder %s7113_s4, %s8889_s26 }
 0x12f   : > { %p7116_p4 = pnand %p7114_p1, %p7644_p7 }
 0x131   : > { %p7117_p2 = pneg %p7116_p4 }
 0x133   : > { %p7122_p6 = pnand %p7120_p3, %p7117_p2 }
 0x135   : > { %7125 = shalt.err (!%p7122_p6)
}
 0x136   : > { %s7126_s7 = scalar_lea.vmem %s635_s29, 3072  ;;  %p7134_p11 = scmp.lt.s32.totalorder %s635_s29, %s635_s29 }
 0x137   : > { %p7127_p8 = scmp.ne.s32.totalorder %s635_s29, %s7126_s7  ;;  %p7135_p12 = scmp.lt.s32.totalorder %s7126_s7, %s7126_s7 }
 0x139   : > { %p7129_p9 = pnand %p7127_p8, %p7644_p7  ;;  %p7136_p13 = por %p7135_p12, %p7134_p11 }
 0x13b   : > { %p7130_p10 = pneg %p7129_p9 }
 0x13d   : > { %p7137_p0 = pnand %p7136_p13, %p7130_p10 }
 0x13f   : > { %7140 = shalt.err (!%p7137_p0)
}
 0x140   : > { %s7456_s1 = smov 192   ;;  %s7457_s6 = smov 12  }
 0x141   : > { %6470 = dma.hbm_to_vmem [thread:$0]  (!%p7628_p5), %s8889_s26, 3072, %s635_s29, [#allocation5], %s7456_s1, %s7456_s1, %s7457_s6  }
 0x142   : > { %s7458_s25 = smov [#allocation9]   ;;  %s8890_s5 = sld [smem:[#allocation55_spill]] }
 0x143   : > { %s658_s24 = sshll.u32 %s7458_s25, 4  ;;  %s659_s24 = int_to_ptr.vmem [resolvable:$true] %s658_s24 }
 0x148   : > { %s8891_s8 = smov %s8890_s5  ;;  %s7141_s3 = scalar_lea.hbm %s8890_s5, 1024 }
 0x149   : > { %p7142_p1 = scmp.ne.s32.totalorder %s8891_s8, %s7141_s3  ;;  %p7148_p3 = scmp.lt.u32.totalorder %s7141_s3, %s8891_s8 }
 0x14b   : > { %p7144_p4 = pnand %p7142_p1, %p7644_p7 }
 0x14d   : > { %p7145_p2 = pneg %p7144_p4 }
 0x14f   : > { %p7150_p6 = pnand %p7148_p3, %p7145_p2 }
 0x151   : > { %7153 = shalt.err (!%p7150_p6)
}
 0x152   : > { %s7154_s29 = scalar_lea.vmem %s659_s24, 1024  ;;  %p7162_p11 = scmp.lt.s32.totalorder %s659_s24, %s659_s24 }
 0x153   : > { %p7155_p8 = scmp.ne.s32.totalorder %s659_s24, %s7154_s29  ;;  %p7163_p12 = scmp.lt.s32.totalorder %s7154_s29, %s7154_s29 }
 0x155   : > { %p7157_p9 = pnand %p7155_p8, %p7644_p7  ;;  %p7164_p13 = por %p7163_p12, %p7162_p11 }
 0x157   : > { %p7158_p10 = pneg %p7157_p9 }
 0x159   : > { %p7165_p0 = pnand %p7164_p13, %p7158_p10 }
 0x15b   : > { %7168 = shalt.err (!%p7165_p0)
}
 0x15c   : > { %s7459_s9 = smov 64   ;;  %s7460_s1 = smov 4  }
 0x15d   : > { %6476 = dma.hbm_to_vmem [thread:$0]  (!%p7628_p5), %s8891_s8, 1024, %s659_s24, [#allocation8], %s7459_s9, %s7459_s9, %s7460_s1  }
 0x15e   : > { %s7461_s3 = smov [#allocation12]   ;;  %s7462_s2 = smov [#allocation15]  }
 0x15f   : > { %s683_s6 = sshll.u32 %s7461_s3, 4  ;;  %s704_s27 = sshll.u32 %s7462_s2, 4  ;;  %s684_s6 = int_to_ptr.vmem [resolvable:$true] %s683_s6  ;;  %s705_s27 = int_to_ptr.vmem [resolvable:$true] %s704_s27 }
 0x160   : > { %s7169_s28 = scalar_lea.hbm %s8832_s10, 16 }
 0x161   : > { %p7170_p1 = scmp.ne.s32.totalorder %s8832_s10, %s7169_s28  ;;  %p7176_p3 = scmp.lt.u32.totalorder %s7169_s28, %s8832_s10 }
 0x163   : > { %p7172_p4 = pnand %p7170_p1, %p7644_p7 }
 0x165   : > { %p7173_p2 = pneg %p7172_p4 }
 0x167   : > { %p7178_p6 = pnand %p7176_p3, %p7173_p2 }
 0x169   : > { %7181 = shalt.err (!%p7178_p6)
}
 0x16a   : > { %s7182_s24 = scalar_lea.vmem %s684_s6, 16  ;;  %s7189_s11 = scalar_lea.vmem %s684_s6, 32 }
 0x16b   : > { %p7183_p8 = scmp.ne.s32.totalorder %s684_s6, %s7182_s24  ;;  %p7190_p11 = scmp.lt.s32.totalorder %s684_s6, %s684_s6 }
 0x16c   : > { %p7191_p12 = scmp.lt.s32.totalorder %s7189_s11, %s7182_s24 }
 0x16d   : > { %p7185_p9 = pnand %p7183_p8, %p7644_p7 }
 0x16e   : > { %p7192_p13 = por %p7191_p12, %p7190_p11 }
 0x16f   : > { %p7186_p10 = pneg %p7185_p9 }
 0x171   : > { %p7193_p0 = pnand %p7192_p13, %p7186_p10 }
 0x173   : > { %7196 = shalt.err (!%p7193_p0)
}
 0x174   : > { %6482 = dma.hbm_to_vmem [thread:$0]  (!%p7628_p5), %s8832_s10, 16, %s684_s6, [#allocation11]  }
 0x175   : > { %s7197_s25 = scalar_lea.hbm %s8834_s12, 1024 }
 0x176   : > { %p7198_p1 = scmp.ne.s32.totalorder %s8834_s12, %s7197_s25  ;;  %p7204_p3 = scmp.lt.u32.totalorder %s7197_s25, %s8834_s12 }
 0x178   : > { %p7200_p4 = pnand %p7198_p1, %p7644_p7 }
 0x17a   : > { %p7201_p2 = pneg %p7200_p4 }
 0x17c   : > { %p7206_p6 = pnand %p7204_p3, %p7201_p2 }
 0x17e   : > { %7209 = shalt.err (!%p7206_p6)
}
 0x17f   : > { %s7210_s29 = scalar_lea.vmem %s705_s27, 1024  ;;  %p7218_p11 = scmp.lt.s32.totalorder %s705_s27, %s705_s27 }
 0x180   : > { %p7211_p8 = scmp.ne.s32.totalorder %s705_s27, %s7210_s29  ;;  %p7219_p12 = scmp.lt.s32.totalorder %s7210_s29, %s7210_s29 }
 0x182   : > { %p7213_p9 = pnand %p7211_p8, %p7644_p7  ;;  %p7220_p13 = por %p7219_p12, %p7218_p11 }
 0x184   : > { %p7214_p10 = pneg %p7213_p9 }
 0x186   : > { %p7221_p0 = pnand %p7220_p13, %p7214_p10 }
 0x188   : > { %7224 = shalt.err (!%p7221_p0)
}
 0x189   : > { %6488 = dma.hbm_to_vmem [thread:$0]  (!%p7628_p5), %s8834_s12, 1024, %s705_s27, [#allocation14], %s7459_s9, %s7459_s9, %s7460_s1  }
 0x18a   : > { %s7463_s11 = smov [#allocation18]   ;;  %s7225_s2 = scalar_lea.hbm %s8836_s14, 2048 }
 0x18b   : > { %s728_s13 = sshll.u32 %s7463_s11, 4  ;;  %p7226_p1 = scmp.ne.s32.totalorder %s8836_s14, %s7225_s2  ;;  %s729_s13 = int_to_ptr.vmem [resolvable:$true] %s728_s13 }
 0x18c   : > { %p7232_p3 = scmp.lt.u32.totalorder %s7225_s2, %s8836_s14 }
 0x18d   : > { %p7228_p4 = pnand %p7226_p1, %p7644_p7 }
 0x18f   : > { %p7229_p2 = pneg %p7228_p4 }
 0x191   : > { %p7234_p6 = pnand %p7232_p3, %p7229_p2 }
 0x193   : > { %7237 = shalt.err (!%p7234_p6)
}
 0x194   : > { %s7238_s27 = scalar_lea.vmem %s729_s13, 2048  ;;  %p7246_p11 = scmp.lt.s32.totalorder %s729_s13, %s729_s13 }
 0x195   : > { %p7239_p8 = scmp.ne.s32.totalorder %s729_s13, %s7238_s27  ;;  %p7247_p12 = scmp.lt.s32.totalorder %s7238_s27, %s7238_s27 }
 0x197   : > { %p7241_p9 = pnand %p7239_p8, %p7644_p7  ;;  %p7248_p13 = por %p7247_p12, %p7246_p11 }
 0x199   : > { %p7242_p10 = pneg %p7241_p9 }
 0x19b   : > { %p7249_p0 = pnand %p7248_p13, %p7242_p10 }
 0x19d   : > { %7252 = shalt.err (!%p7249_p0)
}
 0x19e   : > { %s7464_s7 = smov 128   ;;  %s7465_s29 = smov 8  }
 0x19f   : > { %6494 = dma.hbm_to_vmem [thread:$0]  (!%p7628_p5), %s8836_s14, 2048, %s729_s13, [#allocation17], %s7464_s7, %s7464_s7, %s7465_s29  }
 0x1a0   : > { %s7466_s11 = smov [#allocation21]   ;;  %s7467_s15 = smov [#allocation24]  }
 0x1a1   : > { %s752_s3 = sshll.u32 %s7466_s11, 4  ;;  %s777_s2 = sshll.u32 %s7467_s15, 4  ;;  %s753_s3 = int_to_ptr.vmem [resolvable:$true] %s752_s3  ;;  %s7945_s2 = int_to_ptr.vmem [resolvable:$true] %s777_s2 }
 0x1a2   : > { %s7253_s28 = scalar_lea.hbm %s8838_s16, 1024 }
 0x1a3   : > { %p7254_p1 = scmp.ne.s32.totalorder %s8838_s16, %s7253_s28  ;;  %p7260_p3 = scmp.lt.u32.totalorder %s7253_s28, %s8838_s16 }
 0x1a5   : > { %p7256_p4 = pnand %p7254_p1, %p7644_p7 }
 0x1a7   : > { %p7257_p2 = pneg %p7256_p4 }
 0x1a9   : > { %p7262_p6 = pnand %p7260_p3, %p7257_p2 }
 0x1ab   : > { %7265 = shalt.err (!%p7262_p6)
}
 0x1ac   : > { %s7266_s24 = scalar_lea.vmem %s753_s3, 1024  ;;  %p7274_p11 = scmp.lt.s32.totalorder %s753_s3, %s753_s3 }
 0x1ad   : > { %p7267_p8 = scmp.ne.s32.totalorder %s753_s3, %s7266_s24  ;;  %p7275_p12 = scmp.lt.s32.totalorder %s7266_s24, %s7266_s24 }
 0x1af   : > { %p7269_p9 = pnand %p7267_p8, %p7644_p7  ;;  %p7276_p13 = por %p7275_p12, %p7274_p11 }
 0x1b1   : > { %p7270_p10 = pneg %p7269_p9 }
 0x1b3   : > { %p7277_p0 = pnand %p7276_p13, %p7270_p10 }
 0x1b5   : > { %7280 = shalt.err (!%p7277_p0)
}
 0x1b6   : > { %6500 = dma.hbm_to_vmem [thread:$0]  (!%p7628_p5), %s8838_s16, 1024, %s753_s3, [#allocation20], %s7459_s9, %s7459_s9, %s7460_s1  }
 0x1b7   : > { %s7281_s28 = scalar_lea.hbm %s8840_s18, 16 }
 0x1b8   : > { %p7282_p1 = scmp.ne.s32.totalorder %s8840_s18, %s7281_s28  ;;  %p7288_p3 = scmp.lt.u32.totalorder %s7281_s28, %s8840_s18 }
 0x1ba   : > { %p7284_p4 = pnand %p7282_p1, %p7644_p7 }
 0x1bc   : > { %p7285_p2 = pneg %p7284_p4 }
 0x1be   : > { %p7290_p6 = pnand %p7288_p3, %p7285_p2 }
 0x1c0   : > { %7293 = shalt.err (!%p7290_p6)
}
 0x1c1   : > { %s7294_s3 = scalar_lea.vmem %s7945_s2, 16  ;;  %s7301_s24 = scalar_lea.vmem %s7945_s2, 32 }
 0x1c2   : > { %p7295_p8 = scmp.ne.s32.totalorder %s7945_s2, %s7294_s3  ;;  %p7302_p11 = scmp.lt.s32.totalorder %s7945_s2, %s7945_s2 }
 0x1c3   : > { %p7303_p12 = scmp.lt.s32.totalorder %s7301_s24, %s7294_s3 }
 0x1c4   : > { %p7297_p9 = pnand %p7295_p8, %p7644_p7 }
 0x1c5   : > { %p7304_p13 = por %p7303_p12, %p7302_p11 }
 0x1c6   : > { %p7298_p10 = pneg %p7297_p9 }
 0x1c8   : > { %p7305_p0 = pnand %p7304_p13, %p7298_p10 }
 0x1ca   : > { %7308 = shalt.err (!%p7305_p0)
}
 0x1cb   : > { %6506 = dma.hbm_to_vmem [thread:$0]  (!%p7628_p5), %s8840_s18, 16, %s7945_s2, [#allocation23]  }
 0x1cc   : > { %s7468_s25 = smov [#allocation27]   ;;  %s7469_s28 = smov [#allocation30]  }
 0x1cd   : > { %s798_s4 = sshll.u32 %s7468_s25, 4  ;;  %s822_s5 = sshll.u32 %s7469_s28, 4  ;;  %s799_s4 = int_to_ptr.vmem [resolvable:$true] %s798_s4  ;;  %s7992_s5 = int_to_ptr.vmem [resolvable:$true] %s822_s5 }
 0x1ce   : > { %s7309_s13 = scalar_lea.hbm %s8842_s20, 2048 }
 0x1cf   : > { %p7310_p1 = scmp.ne.s32.totalorder %s8842_s20, %s7309_s13  ;;  %p7316_p3 = scmp.lt.u32.totalorder %s7309_s13, %s8842_s20 }
 0x1d1   : > { %p7312_p4 = pnand %p7310_p1, %p7644_p7 }
 0x1d3   : > { %p7313_p2 = pneg %p7312_p4 }
 0x1d5   : > { %p7318_p6 = pnand %p7316_p3, %p7313_p2 }
 0x1d7   : > { %7321 = shalt.err (!%p7318_p6)
}
 0x1d8   : > { %s7322_s15 = scalar_lea.vmem %s799_s4, 2048  ;;  %p7330_p11 = scmp.lt.s32.totalorder %s799_s4, %s799_s4 }
 0x1d9   : > { %p7323_p8 = scmp.ne.s32.totalorder %s799_s4, %s7322_s15  ;;  %p7331_p12 = scmp.lt.s32.totalorder %s7322_s15, %s7322_s15 }
 0x1db   : > { %p7325_p9 = pnand %p7323_p8, %p7644_p7  ;;  %p7332_p13 = por %p7331_p12, %p7330_p11 }
 0x1dd   : > { %p7326_p10 = pneg %p7325_p9 }
 0x1df   : > { %p7333_p0 = pnand %p7332_p13, %p7326_p10 }
 0x1e1   : > { %7336 = shalt.err (!%p7333_p0)
}
 0x1e2   : > { %6512 = dma.hbm_to_vmem [thread:$0]  (!%p7628_p5), %s8842_s20, 2048, %s799_s4, [#allocation26], %s7464_s7, %s7464_s7, %s7465_s29  }
 0x1e3   : > { %s7337_s13 = scalar_lea.hbm %s8844_s22, 2048 }
 0x1e4   : > { %p7338_p1 = scmp.ne.s32.totalorder %s8844_s22, %s7337_s13  ;;  %p7344_p3 = scmp.lt.u32.totalorder %s7337_s13, %s8844_s22 }
 0x1e6   : > { %p7340_p4 = pnand %p7338_p1, %p7644_p7 }
 0x1e8   : > { %p7341_p2 = pneg %p7340_p4 }
 0x1ea   : > { %p7346_p6 = pnand %p7344_p3, %p7341_p2 }
 0x1ec   : > { %7349 = shalt.err (!%p7346_p6)
}
 0x1ed   : > { %s7350_s7 = scalar_lea.vmem %s7992_s5, 2048  ;;  %p7358_p11 = scmp.lt.s32.totalorder %s7992_s5, %s7992_s5 }
 0x1ee   : > { %p7351_p8 = scmp.ne.s32.totalorder %s7992_s5, %s7350_s7  ;;  %p7359_p12 = scmp.lt.s32.totalorder %s7350_s7, %s7350_s7 }
 0x1f0   : > { %p7353_p9 = pnand %p7351_p8, %p7644_p7  ;;  %p7360_p13 = por %p7359_p12, %p7358_p11 }
 0x1f2   : > { %p7354_p10 = pneg %p7353_p9 }
 0x1f4   : > { %p7361_p0 = pnand %p7360_p13, %p7354_p10 }
 0x1f6   : > { %7364 = shalt.err (!%p7361_p0)
}
 0x1f7   : > { %6518 = dma.hbm_to_vmem [thread:$0]  (!%p7628_p5), %s8844_s22, 2048, %s7992_s5, [#allocation29], %s7459_s9, %s7459_s9, %s7460_s1  }
 0x1f8   : > { %s7470_s15 = smov [#allocation31]   ;;  %s8892_s6 = sld [smem:[#allocation60_spill]] }
 0x1f9   : > { %s836_s25 = sshll.u32 %s7470_s15, 4  ;;  %s837_s25 = int_to_ptr.vmem [resolvable:$true] %s836_s25 }
 0x1fe   : > { %s7365_s13 = scalar_lea.hbm %s8892_s6, 16 }
 0x1ff   : > { %p7366_p1 = scmp.ne.s32.totalorder %s8892_s6, %s7365_s13  ;;  %p7372_p3 = scmp.lt.u32.totalorder %s7365_s13, %s8892_s6 }
 0x201   : > { %p7368_p4 = pnand %p7366_p1, %p7644_p7 }
 0x203   : > { %p7369_p2 = pneg %p7368_p4 }
 0x205   : > { %p7374_p6 = pnand %p7372_p3, %p7369_p2 }
 0x207   : > { %7377 = shalt.err (!%p7374_p6)
}
 0x208   : > { %s7378_s9 = scalar_lea.vmem %s837_s25, 16  ;;  %s7385_s1 = scalar_lea.vmem %s837_s25, 32 }
 0x209   : > { %p7379_p8 = scmp.ne.s32.totalorder %s837_s25, %s7378_s9  ;;  %p7386_p11 = scmp.lt.s32.totalorder %s837_s25, %s837_s25 }
 0x20a   : > { %p7387_p12 = scmp.lt.s32.totalorder %s7385_s1, %s7378_s9 }
 0x20b   : > { %p7381_p9 = pnand %p7379_p8, %p7644_p7 }
 0x20c   : > { %p7388_p13 = por %p7387_p12, %p7386_p11 }
 0x20d   : > { %p7382_p10 = pneg %p7381_p9 }
 0x20f   : > { %p7389_p0 = pnand %p7388_p13, %p7382_p10 }
 0x211   : > { %7392 = shalt.err (!%p7389_p0)
}
 0x212   : > { %6521 = dma.hbm_to_vmem [thread:$0]  (!%p7628_p5), %s8892_s6, 16, %s837_s25, [#allocation32]  }
 0x213   : > { %s8893_s29 = sld [smem:[#allocation46_spill]] }
 0x219   : > { %p8894_p1 = scmp.ne.s32.totalorder %s8893_s29, 0 }
 0x21a   : > { %s8895_s4 = sld [smem:[#allocation45_spill]] (!%p8894_p1) }
 0x21b   : > { %877 = sbr.rel (%p8894_p1) target bundleno = 4728 (0x1278), region = 116 }
 0x220   : > { %p8896_p4 = scmp.eq.s32.totalorder (!%p8894_p1), %s8895_s4, 0 }
 0x222   : > { %7398 = dma.done.wait (%p8896_p4), [#allocation3], 16   ;;  %p8897_p7 = pmov %p8896_p4 }
 0x223   : > { %p8898_p2 = pmov %p8896_p4 }
 0x224   : > { %7400 = vsyncadd (%p8897_p7), [#allocation3], 4294967280 }
 0x225   : > { %7402 = dma.done.wait (%p8898_p2), [#allocation5], 3088   ;;  %p8899_p3 = pmov %p8898_p2 }
 0x226   : > { %p8900_p6 = pmov %p8898_p2 }
 0x227   : > { %7404 = vsyncadd (%p8899_p3), [#allocation5], 4294964208 }
 0x228   : > { %7406 = dma.done.wait (%p8900_p6), [#allocation8], 1072   ;;  %p8901_p5 = pmov %p8898_p2 }
 0x229   : > { %p8902_p8 = pmov %p8898_p2 }
 0x22a   : > { %7408 = vsyncadd (%p8901_p5), [#allocation8], 4294966224 }
 0x22b   : > { %7410 = dma.done.wait (%p8902_p8), [#allocation11], 32   ;;  %p8903_p9 = pmov %p8898_p2 }
 0x22c   : > { %p8904_p10 = pmov %p8898_p2 }
 0x22d   : > { %7412 = vsyncadd (%p8903_p9), [#allocation11], 4294967264 }
 0x22e   : > { %7414 = dma.done.wait (%p8904_p10), [#allocation14], 1040   ;;  %p8905_p11 = pmov %p8898_p2 }
 0x22f   : > { %p8906_p12 = pmov %p8898_p2 }
 0x230   : > { %7416 = vsyncadd (%p8905_p11), [#allocation14], 4294966256 }
 0x231   : > { %7418 = dma.done.wait (%p8906_p12), [#allocation17], 2064   ;;  %p8907_p13 = pmov %p8898_p2 }
 0x232   : > { %p8908_p0 = pmov %p8898_p2 }
 0x233   : > { %7420 = vsyncadd (%p8907_p13), [#allocation17], 4294965232 }
 0x234   : > { %7422 = dma.done.wait (%p8908_p0), [#allocation20], 1056   ;;  %p8909_p1 = pmov %p8908_p0 }
 0x235   : > { %p8910_p4 = pmov %p8908_p0 }
 0x236   : > { %7424 = vsyncadd (%p8909_p1), [#allocation20], 4294966240 }
 0x237   : > { %7426 = dma.done.wait (%p8910_p4), [#allocation23], 32   ;;  %p8911_p7 = pmov %p8908_p0 }
 0x238   : > { %p8912_p2 = pmov %p8908_p0 }
 0x239   : > { %7428 = vsyncadd (%p8911_p7), [#allocation23], 4294967264 }
 0x23a   : > { %7430 = dma.done.wait (%p8912_p2), [#allocation26], 2064   ;;  %p8913_p3 = pmov %p8908_p0 }
 0x23b   : > { %p8914_p6 = pmov %p8908_p0 }
 0x23c   : > { %7432 = vsyncadd (%p8913_p3), [#allocation26], 4294965232 }
 0x23d   : > { %7434 = dma.done.wait (%p8914_p6), [#allocation29], 2080   ;;  %p8915_p5 = pmov %p8908_p0 }
 0x23e   : > { %p8916_p8 = pmov %p8908_p0 }
 0x23f   : > { %7436 = vsyncadd (%p8915_p5), [#allocation29], 4294965216 }
 0x240   : > { %7438 = dma.done.wait (%p8916_p8), [#allocation32], 16   ;;  %p8917_p9 = pmov %p8908_p0 }
 0x241   : > { %p1030_p10 = scmp.lt.s32.totalorder %s8895_s4, 1  ;;  %s8918_s25 = sld [smem:[#allocation47_spill]]  ;;  %v6635_v2 = vld [vmem:[#allocation6 + $0x4] ss:$12 sps:$4 sm:$0xff]   ;;  %v6637_v3 = vld [vmem:[#allocation6] ss:$12 sps:$4 sm:$0xff]   ;;  %v1132_v53 = vlaneseq }
 0x242   : > { %7440 = vsyncadd (%p8917_p9), [#allocation32], 4294967280  ;;  %v7471_v4 = vmov 0.0   ;;  %v6638_v5 = vld [vmem:[#allocation6 + $0x8] ss:$12 sps:$4 sm:$0xff]   ;;  %1275 = vmatprep.subr.bf16.mxu0 %v6635_v2  ;;  %v7472_v30 = vmov 0  }
 0x243   : > { %s8925_s4 = smov (!%p1030_p10, %s8895_s4), 1  ;;  %6205 = vmatprep.subr.bf16.mxu1 %v7471_v4  ;;  %v6639_v6 = vld [vmem:[#allocation6 + $0x1c] ss:$12 sps:$4 sm:$0xff]   ;;  %1276 = vmatpush1.bf16.msra.mxu0 %v6637_v3  ;;  %v6641_v15 = vld [vmem:[#allocation6 + $0x18] ss:$12 sps:$4 sm:$0xff]   ;;  %vm7473_vm0 = vmmov 0  }
 0x244   : > { %s8110_s30 = sshll.u32 %s8925_s4, 4  ;;  %6206 = vmatpush3.bf16.msra.mxu1 %v6638_v5  ;;  %1277 = vmatprep.subr.bf16.mxu0 %v6639_v6  ;;  %v6642_v16 = vld [vmem:[#allocation6 + $0x20] ss:$12 sps:$4 sm:$0xff]   ;;  %v6645_v18 = vld [vmem:[#allocation6 + $0x30] ss:$12 sps:$4 sm:$0xff]   ;;  %v8148_v54 = vshrl.u32 %v1132_v53, 7 }
 0x245   : > { %6207 = vmatprep.subr.bf16.mxu1 %v7471_v4  ;;  %v6643_v17 = vld [vmem:[#allocation6 + $0x34] ss:$12 sps:$4 sm:$0xff]   ;;  %v6646_v19 = vld [vmem:[#allocation6 + $0x38] ss:$12 sps:$4 sm:$0xff]   ;;  %v6650_v22 = vld [vmem:[#allocation6 + $0x50] ss:$12 sps:$4 sm:$0xff]   ;;  %1307 = vmatprep.mubr.bf16.mxu0 %v7472_v30 }
 0x246   : > { %v6647_v20 = vld [vmem:[#allocation6 + $0x4c] ss:$12 sps:$4 sm:$0xff]   ;;  %v6649_v21 = vld [vmem:[#allocation6 + $0x48] ss:$12 sps:$4 sm:$0xff]   ;;  %v6651_v23 = vld [vmem:[#allocation6 + $0x64] ss:$12 sps:$4 sm:$0xff]   ;;  %6221 = vmatprep.mubr.msk.bf16.mxu1 %vm7473_vm0, %v7471_v4 }
 0x247   : > { %s8116_s28 = scalar_lea.vmem %s8918_s25, %s8110_s30  ;;  %1278 = vmatpush1.bf16.msra.mxu0 %v6641_v15  ;;  %v6653_v24 = vld [vmem:[#allocation6 + $0x60] ss:$12 sps:$4 sm:$0xff]   ;;  %v6654_v25 = vld [vmem:[#allocation6 + $0x68] ss:$12 sps:$4 sm:$0xff]   ;;  %v6657_v27 = vld [vmem:[#allocation6 + $0x78] ss:$12 sps:$4 sm:$0xff]  }
 0x248   : > { %v1052_v0 = vld [vmem:[%s8116_s28] sm:$0xff]  ;;  %v1053_v1 = vld [vmem:[%s8116_s28 + $0x8] sm:$0xff]  ;;  %6208 = vmatpush3.bf16.msra.mxu1 %v6642_v16  ;;  %1279 = vmatprep.subr.bf16.mxu0 %v6643_v17  ;;  %v6663_v33 = vld [vmem:[#allocation6 + $0xac] ss:$12 sps:$4 sm:$0xff]   ;;  %v8151_v55 = vsub.s32 0, %v8148_v54  ;;  %v8154_v57 = vsub.s32 1, %v8148_v54 }
 0x249   : > { %1058 = vadd.xlane.f32.xlu0 %v1052_v0  ;;  %6209 = vmatprep.subr.bf16.mxu1 %v7471_v4  ;;  %v6655_v26 = vld [vmem:[#allocation6 + $0x7c] ss:$12 sps:$4 sm:$0xff]   ;;  %v6658_v28 = vld [vmem:[#allocation6 + $0x80] ss:$12 sps:$4 sm:$0xff]   ;;  %v6662_v32 = vld [vmem:[#allocation6 + $0x98] ss:$12 sps:$4 sm:$0xff]  }
 0x24a   : > { %v6659_v29 = vld [vmem:[#allocation6 + $0x94] ss:$12 sps:$4 sm:$0xff]   ;;  %v6661_v31 = vld [vmem:[#allocation6 + $0x90] ss:$12 sps:$4 sm:$0xff]   ;;  %s7474_s27 = smov 96   ;;  %s7475_s13 = smov 64  }
 0x24b   : > { %1280 = vmatpush1.bf16.msra.mxu0 %v6645_v18  ;;  %v6665_v34 = vld [vmem:[#allocation6 + $0xa8] ss:$12 sps:$4 sm:$0xff]   ;;  %v6666_v35 = vld [vmem:[#allocation6 + $0xb0] ss:$12 sps:$4 sm:$0xff]   ;;  %v1130_v56 = vld [vmem:[#allocation7] sm:$0x7] }
 0x24c   : > { %6210 = vmatpush3.bf16.msra.mxu1 %v6646_v19  ;;  %1281 = vmatprep.subr.bf16.mxu0 %v6647_v20  ;;  %v5954_v44 = vld [vmem:[#allocation2] ss:$0 sm:$0xff]  ;;  %v5955_v48 = vld [vmem:[#allocation4] ss:$0 sm:$0xff]  ;;  %v1135_v58 = vrot.slane %v1130_v56, %v8151_v55  ;;  %v1139_v59 = vrot.slane %v1130_v56, %v8154_v57  ;;  %s7476_s3 = smov 32   ;;  %vm2265_vm1 = vcmask 261120  }
 0x24d   : > { %1060 = vadd.xlane.f32.xlu0 %v1053_v1  ;;  %6211 = vmatprep.subr.bf16.mxu1 %v7471_v4  ;;  %v7477_v17 = vmov 1983009808   ;;  %s8919_s2 = sld [smem:[#allocation49_spill]]  ;;  %vm2470_vm4 = vcmask 130048   ;;  %vm3037_vm5 = vcmask 523264   ;;  %vm3040_vm6 = vcmask 785408  }
 0x24e   : > { %v1400_v18 = vunpack.c.l.s4 %v7477_v17  ;;  %s8920_s7 = sld [smem:[#allocation48_spill]]  ;;  %s8921_s25 = sld [smem:[#allocation50_spill]] }
 0x24f   : > { %1282 = vmatpush1.bf16.msra.mxu0 %v6649_v21 }
 0x250   : > { %6212 = vmatpush3.bf16.msra.mxu1 %v6650_v22  ;;  %1283 = vmatprep.subr.bf16.mxu0 %v6651_v23  ;;  %v1401_v21 = vunpack.c.0.s8 %v1400_v18  ;;  %v7478_v22 = vmov 1934713408  }
 0x251   : > { %6213 = vmatprep.subr.bf16.mxu1 %v7471_v4  ;;  %v1432_v23 = vunpack.c.l.s4 %v7478_v22 }
 0x253   : > { %1284 = vmatpush1.bf16.msra.mxu0 %v6653_v24  ;;  %s1042_s9 = scalar_lea.vmem %s8919_s2, %s8925_s4 }
 0x254   : > { %6214 = vmatpush3.bf16.msra.mxu1 %v6654_v25  ;;  %1285 = vmatprep.subr.bf16.mxu0 %v6655_v26  ;;  %s1039_s29 = scalar_lea.vmem %s8920_s7, %s8110_s30 }
 0x255   : > { %6215 = vmatprep.subr.bf16.mxu1 %v7471_v4 }
 0x257   : > { %1286 = vmatpush1.bf16.msra.mxu0 %v6657_v27  ;;  %v8198_v27 = vsub.s32 %v1401_v21, %v8148_v54 }
 0x258   : > { %6216 = vmatpush3.bf16.msra.mxu1 %v6658_v28  ;;  %1287 = vmatprep.subr.bf16.mxu0 %v6659_v29 }
 0x259   : > { %6217 = vmatprep.subr.bf16.mxu1 %v7471_v4 }
 0x25b   : > { %1288 = vmatpush1.bf16.msra.mxu0 %v6661_v31  ;;  %v1433_v31 = vunpack.c.0.s8 %v1432_v23 }
 0x25c   : > { %6218 = vmatpush3.bf16.msra.mxu1 %v6662_v32  ;;  %1289 = vmatprep.subr.bf16.mxu0 %v6663_v33 }
 0x25d   : > { %6219 = vmatprep.subr.bf16.mxu1 %v7471_v4 }
 0x25f   : > { %1290 = vmatpush1.bf16.msra.mxu0 %v6665_v34 }
 0x260   : > { %6220 = vmatpush3.bf16.msra.mxu1 %v6666_v35  ;;  %6249 = vmatprep.subr.bf16.mxu0 %v7471_v4 }
 0x261   : > { %6225 = vmatprep.subr.bf16.mxu1 %v7471_v4 }
 0x2d6   : > { %v1059_v7 = vpop.xlane.xlu0 %1058 }
 0x2d7   : > { %v1063_v8 = vmul.f32 0.0078125, %v1059_v7 }
 0x2d9   : > { %v8122_v9 = vsub.f32 %v1052_v0, %v1063_v8 }
 0x2da   : > { %v1061_v10 = vpop.xlane.xlu0 %1060 }
 0x2db   : > { %v1064_v11 = vmul.f32 0.0078125, %v1061_v10  ;;  %v1067_v12 = vmul.f32 %v8122_v9, %v8122_v9 }
 0x2dd   : > { %v8126_v13 = vsub.f32 %v1053_v1, %v1064_v11  ;;  %1069 = vadd.xlane.f32.xlu1 %v1067_v12 }
 0x2df   : > { %v1068_v14 = vmul.f32 %v8126_v13, %v8126_v13 }
 0x2e1   : > { %1071 = vadd.xlane.f32.xlu1 %v1068_v14 }
 0x36a   : > { %v1070_v36 = vpop.xlane.xlu1 %1069 }
 0x36b   : > { %v1073_v37 = vmul.f32 0.0078125, %v1070_v36 }
 0x36d   : > { %v1075_v38 = vadd.f32 1e-05, %v1073_v37 }
 0x36e   : > { %v1072_v39 = vpop.xlane.xlu1 %1071 }
 0x36f   : > { %6755 = vrsqrt.f32 %v1075_v38  ;;  %v1074_v40 = vmul.f32 0.0078125, %v1072_v39 }
 0x371   : > { %v1076_v41 = vadd.f32 1e-05, %v1074_v40 }
 0x373   : > { %6757 = vrsqrt.f32 %v1076_v41 }
 0x379   : > { %v6756_v42 = vpop.eup %6755 }
 0x37a   : > { %v1079_v43 = vmul.f32 %v6756_v42, %v8122_v9  ;;  %v1142_v9 = vsub.s32 2, %v8148_v54  ;;  %v8204_v42 = vsub.s32 %v1433_v31, %v8148_v54 }
 0x37c   : > { %v1087_v47 = vmul.f32 %v5954_v44, %v1079_v43  ;;  %v1143_v10 = vrot.slane %v1130_v56, %v1142_v9 }
 0x37d   : > { %v6758_v45 = vpop.eup %6757 }
 0x37e   : > { %v1080_v46 = vmul.f32 %v6758_v45, %v8126_v13  ;;  %v1095_v50 = vadd.f32 %v5955_v48, %v1087_v47 }
 0x380   : > { %v1088_v49 = vmul.f32 %v5954_v44, %v1080_v46 }
 0x382   : > { %v1096_v51 = vadd.f32 %v5955_v48, %v1088_v49 }
 0x384   : > { %v1097_v52 = vpack.c.bf16 %v1096_v51, %v1095_v50 }
 0x386   : > { %1308 = vmatmul.mubr.bf16.vlgmr.msra.gmra.mrb[0].mxu0 %v1097_v52  ;;  %6222 = vmatmul.mubr.bf16.vlgmr.msra.gmra.mrb[0].mxu1 %v1097_v52 }
 0x387   : > { %6227 = vmatprep.mubr.msk.bf16.mxu1 %vm7473_vm0, %v7471_v4  ;;  %6251 = vmatprep.mubr.msk.bf16.mxu0 %vm7473_vm0, %v7471_v4 }
 0x459   : > { %v1309_v60 = vpop.f32.mrb[0].mxu0  ;;  %v1352_v61 = vpop.f32.mrb[0].mxu1 }
 0x45a   : > { %v8158_v62 = vadd.f32 %v1309_v60, %v1135_v58  ;;  %v1311_v63 = vpop.f32.mrb[1].mxu0  ;;  %v6223_v0 = vpop.f32.mrb[1].mxu1  ;;  %v8177_v11 = vadd.f32 %v1352_v61, %v1143_v10 }
 0x45b   : > { %v1312_v1 = vadd.f32 %v1311_v63, %v1139_v59  ;;  %v1313_v2 = vpop.f32.mrb[2].mxu0  ;;  %v1355_v3 = vpop.f32.mrb[2].mxu1 }
 0x45c   : > { %v1315_v5 = vpop.f32.mrb[3].mxu0  ;;  %v6224_v6 = vpop.f32.mrb[3].mxu1  ;;  %1379 = vrot.lane.b32.xlu0 %v8158_v62, %s7474_s27  ;;  %v8163_v7 = vadd.f32 %v1313_v2, %v1135_v58  ;;  %v8187_v12 = vadd.f32 %v1355_v3, %v1143_v10 }
 0x45d   : > { %1681 = vrot.lane.b32.xlu1 %v1312_v1, %s7475_s13  ;;  %v1316_v8 = vadd.f32 %v1315_v5, %v1139_v59 }
 0x460   : > { %1675 = vrot.lane.b32.xlu0 %v1312_v1, %s7474_s27 }
 0x461   : > { %1381 = vrot.lane.b32.xlu1 %v8163_v7, %s7474_s27 }
 0x464   : > { %1687 = vrot.lane.b32.xlu0 %v1312_v1, %s7476_s3 }
 0x465   : > { %1677 = vrot.lane.b32.xlu1 %v1316_v8, %s7474_s27 }
 0x468   : > { %1385 = vrot.lane.b32.xlu0 %v8158_v62, %s7475_s13 }
 0x469   : > { %1683 = vrot.lane.b32.xlu1 %v1316_v8, %s7475_s13 }
 0x46c   : > { %1391 = vrot.lane.b32.xlu0 %v8158_v62, %s7476_s3 }
 0x46d   : > { %1689 = vrot.lane.b32.xlu1 %v1316_v8, %s7476_s3 }
 0x470   : > { %1971 = vrot.lane.b32.xlu0 %v8177_v11, %s7474_s27 }
 0x471   : > { %1387 = vrot.lane.b32.xlu1 %v8163_v7, %s7475_s13 }
 0x474   : > { %1983 = vrot.lane.b32.xlu0 %v8177_v11, %s7476_s3 }
 0x475   : > { %1393 = vrot.lane.b32.xlu1 %v8163_v7, %s7476_s3 }
 0x479   : > { %1973 = vrot.lane.b32.xlu1 %v8187_v12, %s7474_s27 }
 0x47d   : > { %1977 = vrot.lane.b32.xlu1 %v8177_v11, %s7475_s13 }
 0x481   : > { %1979 = vrot.lane.b32.xlu1 %v8187_v12, %s7475_s13 }
 0x4ce   : > { %v1380_v13 = vpop.permute.xlu0 %1379 }
 0x4cf   : > { %v1682_v14 = vpop.permute.xlu1 %1681 }
 0x4d0   : > { %v1693_v28 = vcombine.low %v1312_v1, %v1682_v14  ;;  %v1694_v32 = vcombine.high %v1312_v1, %v1682_v14 }
 0x4d2   : > { %v1676_v15 = vpop.permute.xlu0 %1675  ;;  %v1701_v37 = vrot.slane %v1693_v28, %v8198_v27  ;;  %v1708_v43 = vrot.slane %v1694_v32, %v8198_v27 }
 0x4d3   : > { %v8195_v16 = vpop.permute.xlu1 %1381 }
 0x4d6   : > { %v1688_v19 = vpop.permute.xlu0 %1687 }
 0x4d7   : > { %v1678_v20 = vpop.permute.xlu1 %1677  ;;  %v1709_v24 = vcombine.low %v1676_v15, %v1688_v19  ;;  %v1710_v29 = vcombine.high %v1676_v15, %v1688_v19 }
 0x4d9   : > { %v1717_v33 = vrot.slane %v1709_v24, %v8198_v27  ;;  %v1724_v38 = vrot.slane %v1710_v29, %v8198_v27 }
 0x4da   : > { %v1386_v25 = vpop.permute.xlu0 %1385 }
 0x4db   : > { %v1684_v26 = vpop.permute.xlu1 %1683  ;;  %v1725_v44 = vcombine.low %v1701_v37, %v1717_v33  ;;  %v1726_v45 = vcombine.high %v1701_v37, %v1717_v33  ;;  %v1741_v52 = vcombine.low %v1708_v43, %v1724_v38  ;;  %v1742_v56 = vcombine.high %v1708_v43, %v1724_v38 }
 0x4dc   : > { %v1761_v34 = vcombine.low %v1316_v8, %v1684_v26  ;;  %v1762_v35 = vcombine.high %v1316_v8, %v1684_v26  ;;  %v1397_v58 = vcombine.low %v8158_v62, %v1386_v25  ;;  %v1398_v59 = vcombine.high %v8158_v62, %v1386_v25 }
 0x4dd   : > { %v1733_v1 = vrot.slane %v1725_v44, %v8204_v42  ;;  %v1740_v2 = vrot.slane %v1726_v45, %v8204_v42  ;;  %v1749_v8 = vrot.slane %v1741_v52, %v8204_v42  ;;  %v1756_v9 = vrot.slane %v1742_v56, %v8204_v42 }
 0x4de   : > { %v1392_v39 = vpop.permute.xlu0 %1391  ;;  %v1769_v48 = vrot.slane %v1761_v34, %v8198_v27  ;;  %v1776_v49 = vrot.slane %v1762_v35, %v8198_v27  ;;  %v1405_v10 = vrot.slane %v1397_v58, %v8198_v27  ;;  %v1412_v62 = vrot.slane %v1398_v59, %v8198_v27 }
 0x4df   : > { %v1690_v36 = vpop.permute.xlu1 %1689  ;;  %v1413_v50 = vcombine.low %v1380_v13, %v1392_v39  ;;  %v1414_v51 = vcombine.high %v1380_v13, %v1392_v39  ;;  %v1829_v18 = vcombine.low %v1733_v1, %v1740_v2  ;;  %v5985_v19 = vcombine.high %v1733_v1, %v1740_v2 }
 0x4e0   : > { %v1777_v40 = vcombine.low %v1678_v20, %v1690_v36  ;;  %v1778_v41 = vcombine.high %v1678_v20, %v1690_v36  ;;  %v1845_v24 = vcombine.low %v1749_v8, %v1756_v9  ;;  %v5986_v25 = vcombine.high %v1749_v8, %v1756_v9 }
 0x4e1   : > { %v1421_v3 = vrot.slane %v1413_v50, %v8198_v27  ;;  %v1428_v5 = vrot.slane %v1414_v51, %v8198_v27  ;;  %v8226_v33 = vrot.slane %v1829_v18, %v8198_v27  ;;  %v8229_v34 = vrot.slane %v5985_v19, %v8198_v27 }
 0x4e2   : > { %v1785_v46 = vrot.slane %v1777_v40, %v8198_v27  ;;  %v1792_v47 = vrot.slane %v1778_v41, %v8198_v27  ;;  %v8238_v41 = vrot.slane %v1845_v24, %v8198_v27  ;;  %v8241_v43 = vrot.slane %v5986_v25, %v8198_v27 }
 0x4e3   : > { %v1388_v6 = vpop.permute.xlu1 %1387  ;;  %v1429_v20 = vcombine.low %v1405_v10, %v1421_v3  ;;  %v1430_v21 = vcombine.high %v1405_v10, %v1421_v3  ;;  %v1445_v22 = vcombine.low %v1412_v62, %v1428_v5  ;;  %v1446_v23 = vcombine.high %v1412_v62, %v1428_v5 }
 0x4e4   : > { %v1793_v60 = vcombine.low %v1769_v48, %v1785_v46  ;;  %v1794_v61 = vcombine.high %v1769_v48, %v1785_v46  ;;  %v1809_v63 = vcombine.low %v1776_v49, %v1792_v47  ;;  %v1810_v0 = vcombine.high %v1776_v49, %v1792_v47 }
 0x4e5   : > { %v1465_v35 = vcombine.low %v8163_v7, %v1388_v6  ;;  %v1466_v36 = vcombine.high %v8163_v7, %v1388_v6  ;;  %v1437_v37 = vrot.slane %v1429_v20, %v8204_v42  ;;  %v1444_v38 = vrot.slane %v1430_v21, %v8204_v42 }
 0x4e6   : > { %v1801_v13 = vrot.slane %v1793_v60, %v8204_v42  ;;  %v1808_v14 = vrot.slane %v1794_v61, %v8204_v42  ;;  %v1817_v15 = vrot.slane %v1809_v63, %v8204_v42  ;;  %v1824_v17 = vrot.slane %v1810_v0, %v8204_v42 }
 0x4e7   : > { %v1394_v32 = vpop.permute.xlu1 %1393  ;;  %v1453_v39 = vrot.slane %v1445_v22, %v8204_v42  ;;  %v1460_v40 = vrot.slane %v1446_v23, %v8204_v42  ;;  %v1473_v49 = vrot.slane %v1465_v35, %v8198_v27  ;;  %v1480_v50 = vrot.slane %v1466_v36, %v8198_v27 }
 0x4e8   : > { %v1897_v26 = vcombine.low %v1801_v13, %v1808_v14  ;;  %v5987_v28 = vcombine.high %v1801_v13, %v1808_v14  ;;  %v1913_v29 = vcombine.low %v1817_v15, %v1824_v17  ;;  %v5988_v31 = vcombine.high %v1817_v15, %v1824_v17 }
 0x4e9   : > { %v1481_v44 = vcombine.low %v8195_v16, %v1394_v32  ;;  %v1482_v45 = vcombine.high %v8195_v16, %v1394_v32  ;;  %v1533_v52 = vcombine.low %v1437_v37, %v1444_v38  ;;  %v5981_v56 = vcombine.high %v1437_v37, %v1444_v38 }
 0x4ea   : > { %v8246_v7 = vrot.slane %v1897_v26, %v8198_v27  ;;  %v8249_v46 = vrot.slane %v5987_v28, %v8198_v27  ;;  %v8252_v47 = vrot.slane %v1913_v29, %v8198_v27  ;;  %v8255_v48 = vrot.slane %v5988_v31, %v8198_v27 }
 0x4eb   : > { %v1489_v51 = vrot.slane %v1481_v44, %v8198_v27  ;;  %v1496_v16 = vrot.slane %v1482_v45, %v8198_v27  ;;  %v1549_v58 = vcombine.low %v1453_v39, %v1460_v40  ;;  %v5982_v59 = vcombine.high %v1453_v39, %v1460_v40 }
 0x4ec   : > { %v1861_v1 = vcombine.low %v8226_v33, %v8229_v34  ;;  %v1877_v2 = vcombine.low %v8238_v41, %v8241_v43  ;;  %v1929_v3 = vcombine.low %v8246_v7, %v8249_v46  ;;  %v1945_v5 = vcombine.low %v8252_v47, %v8255_v48 }
 0x4ed   : > { %v1497_v60 = vcombine.low %v1473_v49, %v1489_v51  ;;  %v1498_v61 = vcombine.high %v1473_v49, %v1489_v51  ;;  %v1513_v63 = vcombine.low %v1480_v50, %v1496_v16  ;;  %v1514_v0 = vcombine.high %v1480_v50, %v1496_v16 }
 0x4ee   : > { %v8274_v62 = vrot.slane %v1533_v52, %v8198_v27  ;;  %v1548_v13 = vrot.slane %v5981_v56, %v8198_v27  ;;  %v1556_v14 = vrot.slane %v1549_v58, %v8198_v27  ;;  %v1564_v15 = vrot.slane %v5982_v59, %v8198_v27 }
 0x4ef   : > { %v1505_v6 = vrot.slane %v1497_v60, %v8204_v42  ;;  %v1512_v8 = vrot.slane %v1498_v61, %v8204_v42  ;;  %v1521_v9 = vrot.slane %v1513_v63, %v8204_v42  ;;  %v1528_v10 = vrot.slane %v1514_v0, %v8204_v42 }
 0x4f0   : > { %v1869_v21 = vrot.slane %v1861_v1, %v8204_v42  ;;  %v1885_v22 = vrot.slane %v1877_v2, %v8204_v42  ;;  %v1937_v23 = vrot.slane %v1929_v3, %v8204_v42  ;;  %v1953_v24 = vrot.slane %v1945_v5, %v8204_v42 }
 0x4f1   : > { %v1601_v17 = vcombine.low %v1505_v6, %v1512_v8  ;;  %v5983_v18 = vcombine.high %v1505_v6, %v1512_v8  ;;  %v1617_v19 = vcombine.low %v1521_v9, %v1528_v10  ;;  %v5984_v20 = vcombine.high %v1521_v9, %v1528_v10 }
 0x4f2   : > { %v1565_v31 = vcombine.low %v8274_v62, %v1548_v13  ;;  %v1581_v32 = vcombine.low %v1556_v14, %v1564_v15  ;;  %v1893_v37 = vcombine.low %v1869_v21, %v1885_v22  ;;  %v1961_v38 = vcombine.low %v1937_v23, %v1953_v24 }
 0x4f3   : > { %v1608_v25 = vrot.slane %v1601_v17, %v8198_v27  ;;  %v1616_v26 = vrot.slane %v5983_v18, %v8198_v27  ;;  %v1624_v28 = vrot.slane %v1617_v19, %v8198_v27  ;;  %v1632_v29 = vrot.slane %v5984_v20, %v8198_v27 }
 0x4f4   : > { %v1573_v44 = vrot.slane %v1565_v31, %v8204_v42  ;;  %v1589_v45 = vrot.slane %v1581_v32, %v8204_v42  ;;  %v1965_v49 = vpack.c.bf16 %v1961_v38, %v1893_v37  ;;  %v1962_v16 = vcombine.high %v1937_v23, %v1953_v24  ;;  %v5980_v31 = vld [vmem:[%s1042_s9] ss:$0 sm:$0xff] }
 0x4f5   : > { %v1633_v35 = vcombine.low %v1608_v25, %v1616_v26  ;;  %v1649_v36 = vcombine.low %v1624_v28, %v1632_v29  ;;  %v1930_v52 = vcombine.high %v8246_v7, %v8249_v46  ;;  %v1946_v56 = vcombine.high %v8252_v47, %v8255_v48 }
 0x4f6   : > { %v2270_v50 = vsel %vm2265_vm1, %v1965_v49, 0  ;;  %v1597_v58 = vcombine.low %v1573_v44, %v1589_v45  ;;  %v1894_v59 = vcombine.high %v1869_v21, %v1885_v22  ;;  %v1862_v60 = vcombine.high %v8226_v33, %v8229_v34 }
 0x4f7   : > { %v1641_v39 = vrot.slane %v1633_v35, %v8204_v42  ;;  %v1657_v40 = vrot.slane %v1649_v36, %v8204_v42  ;;  %6226 = vmatpush3.bf16.xpose.msra.mxu1 %v2270_v50  ;;  %v1878_v61 = vcombine.high %v8238_v41, %v8241_v43  ;;  %v1944_v1 = vrot.slane %v1930_v52, %v8204_v42 }
 0x4f8   : > { %6231 = vmatprep.subr.bf16.mxu1 %v7471_v4  ;;  %v1966_v0 = vpack.c.bf16 %v1962_v16, %v1894_v59  ;;  %v1960_v7 = vrot.slane %v1946_v56, %v8204_v42  ;;  %v1876_v46 = vrot.slane %v1862_v60, %v8204_v42  ;;  %v1634_v33 = vcombine.high %v1608_v25, %v1616_v26 }
 0x4f9   : > { %v1665_v51 = vcombine.low %v1641_v39, %v1657_v40  ;;  %v1892_v47 = vrot.slane %v1878_v61, %v8204_v42  ;;  %v1650_v34 = vcombine.high %v1624_v28, %v1632_v29  ;;  %v1666_v41 = vcombine.high %v1641_v39, %v1657_v40 }
 0x4fa   : > { %v2317_v48 = vsel %vm2265_vm1, %v1966_v0, 0  ;;  %v1963_v2 = vcombine.low %v1944_v1, %v1960_v7  ;;  %v1566_v3 = vcombine.high %v8274_v62, %v1548_v13  ;;  %v1582_v5 = vcombine.high %v1556_v14, %v1564_v15 }
 0x4fb   : > { %v1669_v63 = vpack.c.bf16 %v1665_v51, %v1597_v58  ;;  %v1895_v43 = vcombine.low %v1876_v46, %v1892_v47  ;;  %v1598_v6 = vcombine.high %v1573_v44, %v1589_v45  ;;  %v1648_v9 = vrot.slane %v1634_v33, %v8204_v42 }
 0x4fc   : > { %v1664_v10 = vrot.slane %v1650_v34, %v8204_v42  ;;  %v1580_v18 = vrot.slane %v1566_v3, %v8204_v42  ;;  %v1596_v19 = vrot.slane %v1582_v5, %v8204_v42  ;;  %v1964_v21 = vcombine.high %v1944_v1, %v1960_v7 }
 0x4fd   : > { %v1967_v8 = vpack.c.bf16 %v1963_v2, %v1895_v43  ;;  %v1670_v17 = vpack.c.bf16 %v1666_v41, %v1598_v6  ;;  %v1896_v13 = vcombine.high %v1876_v46, %v1892_v47  ;;  %v1363_v28 = vand.u32 127, %v1132_v53 }
 0x4fe   : > { %6228 = vmatmul.mubr.msk.bf16.vlgmr.msra.gmra.mrb[4].mxu1 %vm2265_vm1, %v1669_v63  ;;  %v1667_v62 = vcombine.low %v1648_v9, %v1664_v10  ;;  %v1599_v14 = vcombine.low %v1580_v18, %v1596_v19  ;;  %v1668_v24 = vcombine.high %v1648_v9, %v1664_v10  ;;  %v1600_v25 = vcombine.high %v1580_v18, %v1596_v19 }
 0x4ff   : > { %6232 = vmatpush3.bf16.xpose.msra.mxu1 %v2317_v48  ;;  %6233 = vmatprep.mubr.msk.bf16.mxu1 %vm7473_vm0, %v7471_v4  ;;  %v2364_v20 = vsel %vm2265_vm1, %v1967_v8, 0  ;;  %v1968_v15 = vpack.c.bf16 %v1964_v21, %v1896_v13  ;;  %v1361_v29 = vadd.s32 8, %v8148_v54  ;;  %vm1365_vm2 = vcmp.le.s32.totalorder %v1363_v28, %v8148_v54  ;;  %v1974_v13 = vpop.permute.xlu1 %1973 }
 0x500   : > { %6237 = vmatprep.subr.bf16.mxu1 %v7471_v4  ;;  %v1671_v22 = vpack.c.bf16 %v1667_v62, %v1599_v14  ;;  %v1672_v26 = vpack.c.bf16 %v1668_v24, %v1600_v25  ;;  %v7479_v32 = vmov -1e+30   ;;  %v1972_v14 = vpop.permute.xlu0 %1971 }
 0x501   : > { %v2411_v23 = vsel %vm2265_vm1, %v1968_v15, 0  ;;  %vm1366_vm3 = vcmp.le.s32.totalorder %v1363_v28, %v1361_v29  ;;  %v1367_v35 = vsel %vm1365_vm2, 0.0, %v7479_v32 }
 0x502   : > { %v1368_v36 = vsel %vm1366_vm3, 0.0, %v7479_v32  ;;  %v1375_v37 = vadd.f32 %v5980_v31, %v1367_v35 }
 0x503   : > { %v1376_v44 = vadd.f32 %v5980_v31, %v1368_v36  ;;  %v1978_v15 = vpop.permute.xlu1 %1977 }
 0x504   : > { %v1990_v25 = vcombine.high %v8177_v11, %v1978_v15 }
 0x506   : > { %6234 = vmatmul.mubr.msk.bf16.vlgmr.msra.gmra.mrb[8].mxu1 %vm2265_vm1, %v1670_v17  ;;  %v2004_v31 = vrot.slane %v1990_v25, %v8198_v27 }
 0x507   : > { %6238 = vmatpush3.bf16.xpose.msra.mxu1 %v2364_v20  ;;  %6239 = vmatprep.mubr.msk.bf16.mxu1 %vm7473_vm0, %v7471_v4 }
 0x508   : > { %6243 = vmatprep.subr.bf16.mxu1 %v7471_v4 }
 0x50e   : > { %6240 = vmatmul.mubr.msk.bf16.vlgmr.msra.gmra.mrb[12].mxu1 %vm2265_vm1, %v1671_v22  ;;  %v1984_v22 = vpop.permute.xlu0 %1983 }
 0x50f   : > { %6244 = vmatpush3.bf16.xpose.msra.mxu1 %v2411_v23  ;;  %6245 = vmatprep.mubr.msk.bf16.mxu1 %vm7473_vm0, %v7471_v4  ;;  %v1989_v23 = vcombine.low %v8177_v11, %v1978_v15  ;;  %v2005_v24 = vcombine.low %v1972_v14, %v1984_v22 }
 0x510   : > { %6255 = vmatprep.subr.bf16.mxu1 %v7471_v4 }
 0x511   : > { %v1997_v28 = vrot.slane %v1989_v23, %v8198_v27  ;;  %v2013_v29 = vrot.slane %v2005_v24, %v8198_v27 }
 0x513   : > { %v2021_v35 = vcombine.low %v1997_v28, %v2013_v29  ;;  %v2022_v36 = vcombine.high %v1997_v28, %v2013_v29 }
 0x516   : > { %6246 = vmatmul.mubr.msk.bf16.vlgmr.msra.gmra.mrb[16].mxu1 %vm2265_vm1, %v1672_v26  ;;  %v2006_v26 = vcombine.high %v1972_v14, %v1984_v22 }
 0x517   : > { %6257 = vmatprep.mubr.msk.bf16.mxu1 %vm7473_vm0, %v7471_v4 }
 0x518   : > { %v2020_v32 = vrot.slane %v2006_v26, %v8198_v27 }
 0x5d1   : > { %v2306_v38 = vpop.f32.mrb[4].mxu1 }
 0x5d2   : > { %v2454_v39 = vmul.f32 0.17677669, %v2306_v38  ;;  %v6229_v40 = vpop.f32.mrb[5].mxu1  ;;  %v2038_v38 = vcombine.high %v2004_v31, %v2020_v32 }
 0x5d3   : > { %v2309_v45 = vpop.f32.mrb[6].mxu1  ;;  %v2029_v40 = vrot.slane %v2021_v35, %v8204_v42 }
 0x5d4   : > { %v2455_v53 = vmul.f32 0.17677669, %v2309_v45  ;;  %v6230_v49 = vpop.f32.mrb[7].mxu1  ;;  %v8336_v50 = vadd.f32 %v2454_v39, %v1375_v37  ;;  %v1980_v39 = vpop.permute.xlu1 %1979 }
 0x5d5   : > { %v2052_v49 = vrot.slane %v2038_v38, %v8204_v42 }
 0x5d6   : > { %v2471_v51 = vsel %vm2470_vm4, %v8336_v50, -inf  ;;  %v8340_v54 = vadd.f32 %v2455_v53, %v1376_v44 }
 0x5d7   : > { %2472 = vmax.xlane.f32.xlu0 %v2471_v51 }
 0x5d8   : > { %v2474_v16 = vsel %vm2470_vm4, %v8340_v54, -inf }
 0x5d9   : > { %2475 = vmax.xlane.f32.xlu1 %v2474_v16  ;;  %v2353_v52 = vpop.f32.mrb[8].mxu1 }
 0x5da   : > { %v2456_v56 = vmul.f32 0.17677669, %v2353_v52  ;;  %v6235_v58 = vpop.f32.mrb[9].mxu1 }
 0x5db   : > { %v2356_v59 = vpop.f32.mrb[10].mxu1 }
 0x5dc   : > { %v2457_v60 = vmul.f32 0.17677669, %v2356_v59  ;;  %v6236_v61 = vpop.f32.mrb[11].mxu1  ;;  %v8344_v63 = vadd.f32 %v2456_v56, %v1375_v37  ;;  %v2057_v59 = vcombine.low %v8187_v12, %v1980_v39 }
 0x5de   : > { %v2477_v0 = vsel %vm2470_vm4, %v8344_v63, -inf  ;;  %v8348_v1 = vadd.f32 %v2457_v60, %v1376_v44  ;;  %v2058_v60 = vcombine.high %v8187_v12, %v1980_v39 }
 0x5df   : > { %2478 = vmax.xlane.f32.xlu0 %v2477_v0 }
 0x5e0   : > { %v2480_v48 = vsel %vm2470_vm4, %v8348_v1, -inf }
 0x5e1   : > { %v2400_v7 = vpop.f32.mrb[12].mxu1 }
 0x5e2   : > { %v2458_v46 = vmul.f32 0.17677669, %v2400_v7  ;;  %v6241_v47 = vpop.f32.mrb[13].mxu1 }
 0x5e3   : > { %2481 = vmax.xlane.f32.xlu0 %v2480_v48  ;;  %v2403_v2 = vpop.f32.mrb[14].mxu1 }
 0x5e4   : > { %v6242_v33 = vpop.f32.mrb[15].mxu1  ;;  %v8352_v34 = vadd.f32 %v2458_v46, %v1375_v37  ;;  %v2459_v20 = vmul.f32 0.17677669, %v2403_v2 }
 0x5e6   : > { %v2483_v41 = vsel %vm2470_vm4, %v8352_v34, -inf  ;;  %v8366_v21 = vadd.f32 %v2459_v20, %v1376_v44 }
 0x5e7   : > { %2484 = vmax.xlane.f32.xlu0 %v2483_v41  ;;  %v2072_v41 = vrot.slane %v2058_v60, %v8198_v27 }
 0x5e8   : > { %v2486_v62 = vsel %vm2470_vm4, %v8366_v21, -inf }
 0x5e9   : > { %v2447_v43 = vpop.f32.mrb[16].mxu1 }
 0x5ea   : > { %v2460_v3 = vmul.f32 0.17677669, %v2447_v43  ;;  %1985 = vrot.lane.b32.xlu1 %v8187_v12, %s7476_s3  ;;  %v6247_v5 = vpop.f32.mrb[17].mxu1 }
 0x5eb   : > { %v2450_v6 = vpop.f32.mrb[18].mxu1 }
 0x5ec   : > { %v2461_v8 = vmul.f32 0.17677669, %v2450_v6  ;;  %v6248_v9 = vpop.f32.mrb[19].mxu1  ;;  %v8358_v10 = vadd.f32 %v2460_v3, %v1375_v37  ;;  %v2037_v37 = vcombine.low %v2004_v31, %v2020_v32 }
 0x5ee   : > { %v2489_v17 = vsel %vm2470_vm4, %v8358_v10, -inf  ;;  %v8362_v18 = vadd.f32 %v2461_v8, %v1376_v44  ;;  %v2036_v44 = vrot.slane %v2022_v36, %v8204_v42  ;;  %v2045_v53 = vrot.slane %v2037_v37, %v8204_v42 }
 0x5ef   : > { %2490 = vmax.xlane.f32.xlu0 %v2489_v17 }
 0x5f0   : > { %v2492_v19 = vsel %vm2470_vm4, %v8362_v18, -inf  ;;  %v2125_v56 = vcombine.low %v2029_v40, %v2036_v44  ;;  %v5989_v58 = vcombine.high %v2029_v40, %v2036_v44  ;;  %v2141_v0 = vcombine.low %v2045_v53, %v2052_v49 }
 0x5f1   : > { %v5990_v7 = vcombine.high %v2045_v53, %v2052_v49 }
 0x5f2   : > { %v2132_v48 = vrot.slane %v2125_v56, %v8198_v27  ;;  %v2140_v2 = vrot.slane %v5989_v58, %v8198_v27  ;;  %v2148_v5 = vrot.slane %v2141_v0, %v8198_v27 }
 0x5f3   : > { %2493 = vmax.xlane.f32.xlu0 %v2492_v19  ;;  %v2156_v6 = vrot.slane %v5990_v7, %v8198_v27 }
 0x5f4   : > { %v2158_v25 = vcombine.high %v2132_v48, %v2140_v2 }
 0x5f5   : > { %v2173_v24 = vcombine.low %v2148_v5, %v2156_v6  ;;  %v2174_v39 = vcombine.high %v2148_v5, %v2156_v6 }
 0x60e   : > { %2487 = vmax.xlane.f32.xlu1 %v2486_v62 }
 0x664   : > { %v2473_v45 = vpop.xlane.xlu0 %2472 }
 0x665   : > { %v2495_v11 = vsub.f32 %v8336_v50, %v2473_v45 }
 0x666   : > { %v2476_v51 = vpop.xlane.xlu1 %2475 }
 0x667   : > { %v2503_v16 = vmul.f32 1.442695, %v2495_v11  ;;  %v2496_v52 = vsub.f32 %v8340_v54, %v2476_v51  ;;  %v2065_v54 = vrot.slane %v2057_v59, %v8198_v27  ;;  %v2181_v51 = vrot.slane %v2173_v24, %v8204_v42 }
 0x669   : > { %6759 = vpow2.f32 %v2503_v16  ;;  %v2505_v61 = vmul.f32 1.442695, %v2496_v52 }
 0x66a   : > { %v1986_v46 = vpop.permute.xlu1 %1985 }
 0x66b   : > { %6761 = vpow2.f32 %v2505_v61  ;;  %v2073_v50 = vcombine.low %v1974_v13, %v1986_v46  ;;  %v2074_v47 = vcombine.high %v1974_v13, %v1986_v46  ;;  %v2157_v13 = vcombine.low %v2132_v48, %v2140_v2 }
 0x66c   : > { %v2479_v33 = vpop.xlane.xlu0 %2478  ;;  %v2188_v46 = vrot.slane %v2174_v39, %v8204_v42  ;;  %v6667_v39 = vld [vmem:[#allocation9] sm:$0xff]  }
 0x66d   : > { %v2081_v43 = vrot.slane %v2073_v50, %v8198_v27  ;;  %v2088_v12 = vrot.slane %v2074_v47, %v8198_v27  ;;  %v2497_v3 = vsub.f32 %v8344_v63, %v2479_v33  ;;  %v2165_v38 = vrot.slane %v2157_v13, %v8204_v42 }
 0x66f   : > { %v2089_v8 = vcombine.low %v2065_v54, %v2081_v43  ;;  %v2090_v9 = vcombine.high %v2065_v54, %v2081_v43  ;;  %v2105_v17 = vcombine.low %v2072_v41, %v2088_v12  ;;  %v2106_v19 = vcombine.high %v2072_v41, %v2088_v12 }
 0x670   : > { %v2507_v20 = vmul.f32 1.442695, %v2497_v3  ;;  %v2482_v62 = vpop.xlane.xlu0 %2481  ;;  %v2189_v50 = vcombine.low %v2165_v38, %v2181_v51  ;;  %v2190_v48 = vcombine.high %v2165_v38, %v2181_v51 }
 0x671   : > { %v2097_v14 = vrot.slane %v2089_v8, %v8204_v42  ;;  %v2104_v15 = vrot.slane %v2090_v9, %v8204_v42  ;;  %v2113_v22 = vrot.slane %v2105_v17, %v8204_v42  ;;  %v2120_v23 = vrot.slane %v2106_v19, %v8204_v42 }
 0x672   : > { %6763 = vpow2.f32 %v2507_v20  ;;  %v2498_v63 = vsub.f32 %v8348_v1, %v2482_v62 }
 0x673   : > { %v8398_v26 = vpop.eup %6759  ;;  %v2193_v28 = vcombine.low %v2097_v14, %v2104_v15  ;;  %v5991_v29 = vcombine.high %v2097_v14, %v2104_v15  ;;  %v2209_v31 = vcombine.low %v2113_v22, %v2120_v23  ;;  %v5992_v32 = vcombine.high %v2113_v22, %v2120_v23 }
 0x674   : > { %v2509_v35 = vmul.f32 1.442695, %v2498_v63  ;;  %v2485_v36 = vpop.xlane.xlu0 %2484  ;;  %v2519_v37 = vsel %vm2470_vm4, %v8398_v26, 0.0 }
 0x675   : > { %v6762_v40 = vpop.eup %6761  ;;  %v2200_v44 = vrot.slane %v2193_v28, %v8198_v27  ;;  %v2208_v1 = vrot.slane %v5991_v29, %v8198_v27  ;;  %v2216_v45 = vrot.slane %v2209_v31, %v8198_v27  ;;  %v2224_v11 = vrot.slane %v5992_v32, %v8198_v27  ;;  %2520 = vadd.xlane.f32.xlu0 %v2519_v37 }
 0x676   : > { %6765 = vpow2.f32 %v2509_v35  ;;  %v2499_v53 = vsub.f32 %v8352_v34, %v2485_v36  ;;  %v2522_v49 = vsel %vm2470_vm4, %v6762_v40, 0.0  ;;  %v2172_v34 = vrot.slane %v2158_v25, %v8204_v42 }
 0x677   : > { %2523 = vadd.xlane.f32.xlu1 %v2522_v49  ;;  %v2225_v16 = vcombine.low %v2200_v44, %v2208_v1  ;;  %v2241_v52 = vcombine.low %v2216_v45, %v2224_v11  ;;  %v2226_v56 = vcombine.high %v2200_v44, %v2208_v1  ;;  %v2242_v58 = vcombine.high %v2216_v45, %v2224_v11  ;;  %v6670_v44 = vld [vmem:[#allocation9 + $0x18] sm:$0xff]   ;;  %v6671_v1 = vld [vmem:[#allocation9 + $0x20] sm:$0xff]   ;;  %v6672_v45 = vld [vmem:[#allocation9 + $0x28] sm:$0xff]  }
 0x678   : > { %v2511_v59 = vmul.f32 1.442695, %v2499_v53  ;;  %v2191_v6 = vcombine.low %v2172_v34, %v2188_v46  ;;  %v2543_v20 = vpack.c.bf16 %v6762_v40, %v8398_v26  ;;  %v6668_v40 = vld [vmem:[#allocation9 + $0x8] sm:$0xff]  }
 0x679   : > { %v2233_v60 = vrot.slane %v2225_v16, %v8204_v42  ;;  %v2249_v61 = vrot.slane %v2241_v52, %v8204_v42  ;;  %v2240_v0 = vrot.slane %v2226_v56, %v8204_v42  ;;  %v2256_v7 = vrot.slane %v2242_v58, %v8204_v42 }
 0x67a   : > { %6767 = vpow2.f32 %v2511_v59 }
 0x67b   : > { %v2257_v47 = vcombine.low %v2233_v60, %v2249_v61  ;;  %v2258_v2 = vcombine.high %v2233_v60, %v2249_v61  ;;  %v2259_v41 = vcombine.low %v2240_v0, %v2256_v7  ;;  %v2260_v8 = vcombine.high %v2240_v0, %v2256_v7 }
 0x67c   : > { %v6764_v54 = vpop.eup %6763  ;;  %v2491_v33 = vpop.xlane.xlu0 %2490 }
 0x67d   : > { %v2501_v43 = vsub.f32 %v8358_v10, %v2491_v33  ;;  %v2525_v12 = vsel %vm2470_vm4, %v6764_v54, 0.0  ;;  %v2261_v3 = vpack.c.bf16 %v2257_v47, %v2189_v50  ;;  %v2262_v5 = vpack.c.bf16 %v2258_v2, %v2190_v48 }
 0x67e   : > { %2526 = vadd.xlane.f32.xlu0 %v2525_v12  ;;  %v2263_v62 = vpack.c.bf16 %v2259_v41, %v2191_v6  ;;  %v2192_v10 = vcombine.high %v2172_v34, %v2188_v46 }
 0x67f   : > { %v2515_v9 = vmul.f32 1.442695, %v2501_v43  ;;  %6250 = vmatpush3.bf16.msra.mxu0 %v2261_v3  ;;  %6256 = vmatpush3.bf16.msra.mxu1 %v2262_v5 }
 0x680   : > { %v6766_v17 = vpop.eup %6765  ;;  %v2494_v19 = vpop.xlane.xlu0 %2493  ;;  %6261 = vmatprep.subr.bf16.mxu0 %v7471_v4  ;;  %6267 = vmatprep.subr.bf16.mxu1 %v7471_v4  ;;  %v2264_v22 = vpack.c.bf16 %v2260_v8, %v2192_v10 }
 0x681   : > { %6769 = vpow2.f32 %v2515_v9  ;;  %v2502_v13 = vsub.f32 %v8362_v18, %v2494_v19  ;;  %v2528_v14 = vsel %vm2470_vm4, %v6766_v17, 0.0  ;;  %v2544_v15 = vpack.c.bf16 %v6766_v17, %v6764_v54 }
 0x682   : > { %2529 = vadd.xlane.f32.xlu1 %v2528_v14  ;;  %6252 = vmatmul.mubr.msk.bf16.vlgmr.msra.gmra.mrb[4].mxu0 %vm2470_vm4, %v2543_v20 }
 0x683   : > { %v2517_v23 = vmul.f32 1.442695, %v2502_v13  ;;  %6258 = vmatmul.mubr.msk.bf16.vlgmr.msra.gmra.mrb[20].mxu1 %vm2470_vm4, %v2544_v15  ;;  %6262 = vmatpush3.bf16.msra.mxu0 %v2263_v62 }
 0x684   : > { %v6768_v63 = vpop.eup %6767  ;;  %6268 = vmatpush3.bf16.msra.mxu1 %v2264_v22  ;;  %6269 = vmatprep.mubr.msk.bf16.mxu1 %vm7473_vm0, %v7471_v4 }
 0x685   : > { %6771 = vpow2.f32 %v2517_v23  ;;  %v2531_v24 = vsel %vm2470_vm4, %v6768_v63, 0.0  ;;  %6263 = vmatprep.mubr.msk.bf16.mxu0 %vm7473_vm0, %v7471_v4  ;;  %6273 = vmatprep.subr.bf16.mxu0 %v7471_v4 }
 0x686   : > { %2532 = vadd.xlane.f32.xlu0 %v2531_v24  ;;  %6293 = vmatprep.subr.bf16.mxu1 %v7471_v4 }
 0x68b   : > { %v6770_v18 = vpop.eup %6769 }
 0x68c   : > { %v2537_v25 = vsel %vm2470_vm4, %v6770_v18, 0.0 }
 0x68d   : > { %2538 = vadd.xlane.f32.xlu0 %v2537_v25 }
 0x68f   : > { %v6772_v26 = vpop.eup %6771 }
 0x690   : > { %v2546_v28 = vpack.c.bf16 %v6772_v26, %v6770_v18  ;;  %v2540_v38 = vsel %vm2470_vm4, %v6772_v26, 0.0 }
 0x692   : > { %6270 = vmatmul.mubr.msk.bf16.vlgmr.msra.gmra.mrb[24].mxu1 %vm2470_vm4, %v2546_v28 }
 0x693   : > { %6309 = vmatprep.mubr.msk.bf16.mxu1 %vm7473_vm0, %v7471_v4 }
 0x69b   : > { %v2488_v29 = vpop.xlane.xlu1 %2487 }
 0x69c   : > { %v2500_v31 = vsub.f32 %v8366_v21, %v2488_v29  ;;  %v6669_v21 = vld [vmem:[#allocation9 + $0x10] sm:$0xff]  }
 0x69e   : > { %v2513_v32 = vmul.f32 1.442695, %v2500_v31 }
 0x6a0   : > { %6773 = vpow2.f32 %v2513_v32 }
 0x6aa   : > { %v6774_v35 = vpop.eup %6773 }
 0x6ab   : > { %v2534_v36 = vsel %vm2470_vm4, %v6774_v35, 0.0  ;;  %v2545_v37 = vpack.c.bf16 %v6774_v35, %v6768_v63 }
 0x6ac   : > { %2535 = vadd.xlane.f32.xlu1 %v2534_v36 }
 0x6ad   : > { %6264 = vmatmul.mubr.msk.bf16.vlgmr.msra.gmra.mrb[8].mxu0 %vm2470_vm4, %v2545_v37 }
 0x6ae   : > { %6289 = vmatprep.mubr.msk.bf16.mxu0 %vm7473_vm0, %v7471_v4  ;;  %6274 = vmatpush3.bf16.msra.mxu0 %v6667_v39 }
 0x6af   : > { %6275 = vmatprep.subr.bf16.mxu0 %v7471_v4 }
 0x6b0   : > { %2541 = vadd.xlane.f32.xlu1 %v2540_v38 }
 0x6b2   : > { %6276 = vmatpush3.bf16.msra.mxu0 %v6668_v40 }
 0x6b3   : > { %6277 = vmatprep.subr.bf16.mxu0 %v7471_v4 }
 0x6b6   : > { %6278 = vmatpush3.bf16.msra.mxu0 %v6669_v21 }
 0x6b7   : > { %6279 = vmatprep.subr.bf16.mxu0 %v7471_v4 }
 0x6ba   : > { %6280 = vmatpush3.bf16.msra.mxu0 %v6670_v44 }
 0x6bb   : > { %6281 = vmatprep.subr.bf16.mxu0 %v7471_v4 }
 0x6be   : > { %6282 = vmatpush3.bf16.msra.mxu0 %v6671_v1 }
 0x6bf   : > { %6283 = vmatprep.subr.bf16.mxu0 %v7471_v4 }
 0x6c2   : > { %6284 = vmatpush3.bf16.msra.mxu0 %v6672_v45 }
 0x6c3   : > { %6285 = vmatprep.subr.bf16.mxu0 %v7471_v4 }
 0x702   : > { %v2521_v11 = vpop.xlane.xlu0 %2520 }
 0x704   : > { %v2524_v53 = vpop.xlane.xlu1 %2523 }
 0x70b   : > { %v2527_v49 = vpop.xlane.xlu0 %2526 }
 0x70c   : > { %6775 = vrcp.f32 %v2527_v49 }
 0x70f   : > { %v2530_v51 = vpop.xlane.xlu1 %2529 }
 0x713   : > { %v2533_v16 = vpop.xlane.xlu0 %2532 }
 0x716   : > { %v6776_v47 = vpop.eup %6775 }
 0x71a   : > { %v2539_v56 = vpop.xlane.xlu0 %2538 }
 0x71b   : > { %6777 = vrcp.f32 %v2539_v56 }
 0x71c   : > { %6779 = vrcp.f32 %v2530_v51 }
 0x725   : > { %v6778_v48 = vpop.eup %6777 }
 0x726   : > { %v6780_v54 = vpop.eup %6779 }
 0x739   : > { %v2536_v52 = vpop.xlane.xlu1 %2535 }
 0x73d   : > { %v2542_v50 = vpop.xlane.xlu1 %2541 }
 0x73e   : > { %6781 = vrcp.f32 %v2542_v50 }
 0x73f   : > { %6783 = vrcp.f32 %v2521_v11 }
 0x740   : > { %6785 = vrcp.f32 %v2533_v16 }
 0x741   : > { %6787 = vrcp.f32 %v2524_v53 }
 0x742   : > { %6789 = vrcp.f32 %v2536_v52 }
 0x748   : > { %v6782_v12 = vpop.eup %6781 }
 0x749   : > { %v6784_v62 = vpop.eup %6783 }
 0x74a   : > { %v6786_v10 = vpop.eup %6785 }
 0x74b   : > { %v6788_v14 = vpop.eup %6787 }
 0x74c   : > { %v6790_v63 = vpop.eup %6789 }
 0x755   : > { %v2584_v58 = vpop.f32.mrb[4].mxu0 }
 0x756   : > { %v2628_v59 = vpop.f32.mrb[20].mxu1  ;;  %v6253_v60 = vpop.f32.mrb[5].mxu0  ;;  %v2731_v15 = vmul.f32 %v6784_v62, %v2584_v58 }
 0x757   : > { %v6259_v61 = vpop.f32.mrb[21].mxu1  ;;  %v2587_v0 = vpop.f32.mrb[6].mxu0  ;;  %v2733_v33 = vmul.f32 %v6776_v47, %v2628_v59 }
 0x758   : > { %v2631_v7 = vpop.f32.mrb[22].mxu1  ;;  %v6254_v34 = vpop.f32.mrb[7].mxu0  ;;  %v2732_v18 = vmul.f32 %v6788_v14, %v2587_v0 }
 0x759   : > { %v6260_v46 = vpop.f32.mrb[23].mxu1  ;;  %v2734_v5 = vmul.f32 %v6780_v54, %v2631_v7 }
 0x765   : > { %v2716_v2 = vpop.f32.mrb[24].mxu1 }
 0x766   : > { %v2737_v41 = vmul.f32 %v6778_v48, %v2716_v2  ;;  %v6271_v43 = vpop.f32.mrb[25].mxu1 }
 0x767   : > { %v2719_v3 = vpop.f32.mrb[26].mxu1 }
 0x768   : > { %v2755_v6 = vcombine.low %v2733_v33, %v2737_v41  ;;  %v2756_v8 = vcombine.high %v2733_v33, %v2737_v41  ;;  %v2738_v9 = vmul.f32 %v6782_v12, %v2719_v3  ;;  %v6272_v17 = vpop.f32.mrb[27].mxu1 }
 0x76a   : > { %v2823_v19 = vcombine.low %v2734_v5, %v2738_v9  ;;  %v2824_v20 = vcombine.high %v2734_v5, %v2738_v9  ;;  %v2763_v31 = vrot.slane %v2755_v6, %v8198_v27  ;;  %v2770_v32 = vrot.slane %v2756_v8, %v8198_v27 }
 0x76c   : > { %v2831_v1 = vrot.slane %v2823_v19, %v8198_v27  ;;  %v2838_v45 = vrot.slane %v2824_v20, %v8198_v27  ;;  %v6673_v19 = vld [vmem:[#allocation9 + $0x30] sm:$0xff]  }
 0x76d   : > { %6286 = vmatpush3.bf16.msra.mxu0 %v6673_v19  ;;  %v6680_v19 = vld [vmem:[#allocation18 + $0x14] ss:$8 sps:$4 sm:$0xff]  }
 0x76e   : > { %6287 = vmatprep.subr.bf16.mxu0 %v7471_v4 }
 0x780   : > { %v2672_v13 = vpop.f32.mrb[8].mxu0 }
 0x781   : > { %v2735_v22 = vmul.f32 %v6786_v10, %v2672_v13  ;;  %v6265_v23 = vpop.f32.mrb[9].mxu0 }
 0x782   : > { %v2675_v24 = vpop.f32.mrb[10].mxu0 }
 0x783   : > { %v2739_v25 = vcombine.low %v2731_v15, %v2735_v22  ;;  %v2740_v26 = vcombine.high %v2731_v15, %v2735_v22  ;;  %v2736_v28 = vmul.f32 %v6790_v63, %v2675_v24  ;;  %v6266_v29 = vpop.f32.mrb[11].mxu0 }
 0x785   : > { %v2747_v35 = vrot.slane %v2739_v25, %v8198_v27  ;;  %v2754_v36 = vrot.slane %v2740_v26, %v8198_v27  ;;  %v2807_v37 = vcombine.low %v2732_v18, %v2736_v28  ;;  %v2808_v38 = vcombine.high %v2732_v18, %v2736_v28 }
 0x787   : > { %v2771_v39 = vcombine.low %v2747_v35, %v2763_v31  ;;  %v2772_v40 = vcombine.high %v2747_v35, %v2763_v31  ;;  %v2787_v21 = vcombine.low %v2754_v36, %v2770_v32  ;;  %v2788_v44 = vcombine.high %v2754_v36, %v2770_v32 }
 0x788   : > { %v2815_v11 = vrot.slane %v2807_v37, %v8198_v27  ;;  %v2822_v53 = vrot.slane %v2808_v38, %v8198_v27  ;;  %v6674_v38 = vld [vmem:[#allocation9 + $0x38] sm:$0xff]  }
 0x789   : > { %v2779_v49 = vrot.slane %v2771_v39, %v8204_v42  ;;  %v2786_v51 = vrot.slane %v2772_v40, %v8204_v42  ;;  %v2795_v16 = vrot.slane %v2787_v21, %v8204_v42  ;;  %v2802_v52 = vrot.slane %v2788_v44, %v8204_v42  ;;  %6288 = vmatpush3.bf16.msra.mxu0 %v6674_v38 }
 0x78a   : > { %v2839_v56 = vcombine.low %v2815_v11, %v2831_v1  ;;  %v2840_v58 = vcombine.high %v2815_v11, %v2831_v1  ;;  %v2855_v59 = vcombine.low %v2822_v53, %v2838_v45  ;;  %v2856_v60 = vcombine.high %v2822_v53, %v2838_v45 }
 0x78b   : > { %v2875_v61 = vcombine.low %v2779_v49, %v2786_v51  ;;  %v6001_v0 = vcombine.high %v2779_v49, %v2786_v51  ;;  %v2891_v7 = vcombine.low %v2795_v16, %v2802_v52  ;;  %v6002_v34 = vcombine.high %v2795_v16, %v2802_v52 }
 0x78c   : > { %v2847_v46 = vrot.slane %v2839_v56, %v8204_v42  ;;  %v2854_v50 = vrot.slane %v2840_v58, %v8204_v42  ;;  %v2863_v47 = vrot.slane %v2855_v59, %v8204_v42  ;;  %v2870_v48 = vrot.slane %v2856_v60, %v8204_v42 }
 0x78d   : > { %v2882_v2 = vrot.slane %v2875_v61, %v8198_v27  ;;  %v2890_v54 = vrot.slane %v6001_v0, %v8198_v27  ;;  %v2898_v33 = vrot.slane %v2891_v7, %v8198_v27  ;;  %v2906_v41 = vrot.slane %v6002_v34, %v8198_v27 }
 0x78e   : > { %v2943_v43 = vcombine.low %v2847_v46, %v2854_v50  ;;  %v6003_v12 = vcombine.high %v2847_v46, %v2854_v50  ;;  %v2959_v3 = vcombine.low %v2863_v47, %v2870_v48  ;;  %v6004_v5 = vcombine.high %v2863_v47, %v2870_v48  ;;  %v6005_v48 = vld [vmem:[#allocation10] ss:$0 sm:$0xff] }
 0x78f   : > { %v2908_v6 = vcombine.high %v2882_v2, %v2890_v54  ;;  %v2924_v8 = vcombine.high %v2898_v33, %v2906_v41  ;;  %v2907_v9 = vcombine.low %v2882_v2, %v2890_v54  ;;  %v2923_v17 = vcombine.low %v2898_v33, %v2906_v41 }
 0x790   : > { %v2950_v20 = vrot.slane %v2943_v43, %v8198_v27  ;;  %v2958_v62 = vrot.slane %v6003_v12, %v8198_v27  ;;  %v2966_v10 = vrot.slane %v2959_v3, %v8198_v27  ;;  %v2974_v13 = vrot.slane %v6004_v5, %v8198_v27  ;;  %v6831_v43 = vld [vmem:[%s8116_s28] sm:$0xff] }
 0x791   : > { %v2922_v14 = vrot.slane %v2908_v6, %v8204_v42  ;;  %v2938_v15 = vrot.slane %v2924_v8, %v8204_v42  ;;  %v2915_v22 = vrot.slane %v2907_v9, %v8204_v42  ;;  %v2931_v23 = vrot.slane %v2923_v17, %v8204_v42  ;;  %v6832_v6 = vld [vmem:[%s8116_s28 + $0x8] sm:$0xff]  ;;  %v6675_v9 = vld [vmem:[#allocation18] ss:$8 sps:$4 sm:$0xff]   ;;  %v6677_v17 = vld [vmem:[#allocation18 + $0x4] ss:$8 sps:$4 sm:$0xff]   ;;  %s1045_s28 = scalar_lea.vmem %s8921_s25, %s8925_s4 }
 0x792   : > { %v2976_v63 = vcombine.high %v2950_v20, %v2958_v62  ;;  %v2992_v24 = vcombine.high %v2966_v10, %v2974_v13  ;;  %v2975_v18 = vcombine.low %v2950_v20, %v2958_v62  ;;  %v2991_v25 = vcombine.low %v2966_v10, %v2974_v13  ;;  %3420 = vmatprep.subr.bf16.mxu0 %v6677_v17  ;;  %v6678_v20 = vld [vmem:[#allocation18 + $0x10] ss:$8 sps:$4 sm:$0xff]   ;;  %v6683_v62 = vld [vmem:[#allocation18 + $0x24] ss:$8 sps:$4 sm:$0xff]   ;;  %v6681_v10 = vld [vmem:[#allocation18 + $0x20] ss:$8 sps:$4 sm:$0xff]  }
 0x793   : > { %v2941_v26 = vcombine.low %v2922_v14, %v2938_v15  ;;  %v2940_v28 = vcombine.high %v2915_v22, %v2931_v23  ;;  %v2939_v29 = vcombine.low %v2915_v22, %v2931_v23  ;;  %v2942_v31 = vcombine.high %v2922_v14, %v2938_v15  ;;  %v6686_v13 = vld [vmem:[#allocation18 + $0x34] ss:$8 sps:$4 sm:$0xff]   ;;  %v6684_v15 = vld [vmem:[#allocation18 + $0x30] ss:$8 sps:$4 sm:$0xff]   ;;  %v6689_v22 = vld [vmem:[#allocation18 + $0x44] ss:$8 sps:$4 sm:$0xff]  }
 0x794   : > { %v2990_v32 = vrot.slane %v2976_v63, %v8204_v42  ;;  %v3006_v35 = vrot.slane %v2992_v24, %v8204_v42  ;;  %v2983_v36 = vrot.slane %v2975_v18, %v8204_v42  ;;  %v2999_v37 = vrot.slane %v2991_v25, %v8204_v42  ;;  %v6699_v14 = vld [vmem:[#allocation15] sm:$0xff]   ;;  %v6690_v24 = vld [vmem:[#allocation18 + $0x50] ss:$8 sps:$4 sm:$0xff]  }
 0x795   : > { %6294 = vmatpush3.bf16.msra.mxu1 %v6699_v14  ;;  %v6687_v23 = vld [vmem:[#allocation18 + $0x40] ss:$8 sps:$4 sm:$0xff]   ;;  %v6692_v63 = vld [vmem:[#allocation18 + $0x54] ss:$8 sps:$4 sm:$0xff]   ;;  %v6695_v18 = vld [vmem:[#allocation18 + $0x64] ss:$8 sps:$4 sm:$0xff]  }
 0x796   : > { %v3009_v39 = vcombine.low %v2990_v32, %v3006_v35  ;;  %v3007_v40 = vcombine.low %v2983_v36, %v2999_v37  ;;  %v3008_v21 = vcombine.high %v2983_v36, %v2999_v37  ;;  %v3010_v44 = vcombine.high %v2990_v32, %v3006_v35  ;;  %6295 = vmatprep.subr.bf16.mxu1 %v7471_v4  ;;  %v6693_v25 = vld [vmem:[#allocation18 + $0x60] ss:$8 sps:$4 sm:$0xff]  }
 0x798   : > { %v6610_v1 = vpack.i.bf16 %v3009_v39, %v2941_v26  ;;  %v6605_v45 = vpack.i.bf16 %v3008_v21, %v2940_v28  ;;  %v6615_v11 = vpack.i.bf16 %v3010_v44, %v2942_v31  ;;  %v6698_v26 = vld [vmem:[#allocation18 + $0x74] ss:$8 sps:$4 sm:$0xff]   ;;  %v6696_v31 = vld [vmem:[#allocation18 + $0x70] ss:$8 sps:$4 sm:$0xff]  }
 0x799   : > { %v1054_v28 = vld [vmem:[%s1039_s29] sm:$0xff] }
 0x79a   : > { %6611 = vrot.lane.b32.xlu1 %v6610_v1, %s7475_s13  ;;  %6606 = vrot.lane.b32.xlu0 %v6605_v45, %s7476_s3  ;;  %v6700_v1 = vld [vmem:[#allocation15 + $0x8] sm:$0xff]   ;;  %v6701_v45 = vld [vmem:[#allocation15 + $0x10] sm:$0xff]  }
 0x79b   : > { %6296 = vmatpush3.bf16.msra.mxu1 %v6700_v1 }
 0x79c   : > { %6297 = vmatprep.subr.bf16.mxu1 %v7471_v4 }
 0x79e   : > { %6616 = vrot.lane.b32.xlu1 %v6615_v11, %s7474_s27  ;;  %v6702_v11 = vld [vmem:[#allocation15 + $0x18] sm:$0xff]  }
 0x79f   : > { %6298 = vmatpush3.bf16.msra.mxu1 %v6701_v45 }
 0x7a0   : > { %6299 = vmatprep.subr.bf16.mxu1 %v7471_v4 }
 0x7a3   : > { %6300 = vmatpush3.bf16.msra.mxu1 %v6702_v11 }
 0x7a4   : > { %6301 = vmatprep.subr.bf16.mxu1 %v7471_v4 }
 0x80c   : > { %v6612_v53 = vpop.permute.xlu1 %6611  ;;  %v6607_v49 = vpop.permute.xlu0 %6606 }
 0x80d   : > { %v6609_v51 = vunpack.i.h.bf16 %v6607_v49  ;;  %v6608_v16 = vunpack.i.l.bf16 %v6607_v49  ;;  %v6614_v52 = vunpack.i.h.bf16 %v6612_v53  ;;  %v6613_v56 = vunpack.i.l.bf16 %v6612_v53  ;;  %v6703_v53 = vld [vmem:[#allocation15 + $0x20] sm:$0xff]   ;;  %v6704_v49 = vld [vmem:[#allocation15 + $0x28] sm:$0xff]  }
 0x80e   : > { %6302 = vmatpush3.bf16.msra.mxu1 %v6703_v53 }
 0x80f   : > { %v3036_v58 = vsel %vm2265_vm1, %v3007_v40, %v6609_v51  ;;  %v3035_v59 = vsel %vm2265_vm1, %v2939_v29, %v6608_v16  ;;  %v1055_v29 = vld [vmem:[%s1039_s29 + $0x8] sm:$0xff]  ;;  %6303 = vmatprep.subr.bf16.mxu1 %v7471_v4  ;;  %v6705_v51 = vld [vmem:[#allocation15 + $0x30] sm:$0xff]  }
 0x810   : > { %v6617_v60 = vpop.permute.xlu1 %6616  ;;  %v3038_v7 = vsel %vm3037_vm5, %v3035_v59, %v6613_v56  ;;  %v3039_v34 = vsel %vm3037_vm5, %v3036_v58, %v6614_v52  ;;  %v3311_v32 = vpack.c.bf16 %v1055_v29, %v1054_v28  ;;  %v6706_v16 = vld [vmem:[#allocation15 + $0x38] sm:$0xff]   ;;  %v3328_v52 = vld [vmem:[#allocation19] sm:$0x3] }
 0x811   : > { %v6619_v61 = vunpack.i.h.bf16 %v6617_v60  ;;  %v6618_v0 = vunpack.i.l.bf16 %v6617_v60  ;;  %v3333_v56 = vrot.slane %v3328_v52, %v8151_v55  ;;  %v3337_v58 = vrot.slane %v3328_v52, %v8154_v57 }
 0x812   : > { %6304 = vmatpush3.bf16.msra.mxu1 %v6704_v49 }
 0x813   : > { %v3041_v46 = vsel %vm3040_vm6, %v3038_v7, %v6618_v0  ;;  %v3042_v50 = vsel %vm3040_vm6, %v3039_v34, %v6619_v61  ;;  %6305 = vmatprep.subr.bf16.mxu1 %v7471_v4 }
 0x814   : > { %v3043_v47 = vpack.c.bf16 %v3042_v50, %v3041_v46 }
 0x816   : > { %6290 = vmatmul.mubr.bf16.vlgmr.msra.gmra.mrb[12].mxu0 %v3043_v47  ;;  %6306 = vmatpush3.bf16.msra.mxu1 %v6705_v51 }
 0x817   : > { %3452 = vmatprep.mubr.bf16.mxu0 %v7472_v30  ;;  %3421 = vmatpush1.bf16.msra.mxu0 %v6675_v9 }
 0x818   : > { %3422 = vmatprep.subr.bf16.mxu0 %v6680_v19  ;;  %6307 = vmatprep.subr.bf16.mxu1 %v7471_v4  ;;  %v6015_v19 = vld [vmem:[#allocation13] ss:$0 sm:$0xff] }
 0x81a   : > { %6308 = vmatpush3.bf16.msra.mxu1 %v6706_v16 }
 0x81b   : > { %3423 = vmatpush1.bf16.msra.mxu0 %v6678_v20  ;;  %6313 = vmatprep.subr.bf16.mxu1 %v7471_v4 }
 0x81c   : > { %3424 = vmatprep.subr.bf16.mxu0 %v6683_v62 }
 0x81f   : > { %3425 = vmatpush1.bf16.msra.mxu0 %v6681_v10 }
 0x820   : > { %3426 = vmatprep.subr.bf16.mxu0 %v6686_v13 }
 0x823   : > { %3427 = vmatpush1.bf16.msra.mxu0 %v6684_v15 }
 0x824   : > { %3428 = vmatprep.subr.bf16.mxu0 %v6689_v22 }
 0x827   : > { %3429 = vmatpush1.bf16.msra.mxu0 %v6687_v23 }
 0x828   : > { %3430 = vmatprep.subr.bf16.mxu0 %v6692_v63 }
 0x82b   : > { %3431 = vmatpush1.bf16.msra.mxu0 %v6690_v24 }
 0x82c   : > { %3432 = vmatprep.subr.bf16.mxu0 %v6695_v18 }
 0x82f   : > { %3433 = vmatpush1.bf16.msra.mxu0 %v6693_v25 }
 0x830   : > { %3434 = vmatprep.subr.bf16.mxu0 %v6698_v26 }
 0x833   : > { %3435 = vmatpush1.bf16.msra.mxu0 %v6696_v31 }
 0x834   : > { %6337 = vmatprep.subr.bf16.mxu0 %v7471_v4 }
 0x836   : > { %3453 = vmatmul.mubr.bf16.vlgmr.msra.gmra.mrb[16].mxu0 %v3311_v32 }
 0x837   : > { %6339 = vmatprep.mubr.msk.bf16.mxu0 %vm7473_vm0, %v7471_v4 }
 0x8e9   : > { %v3149_v2 = vpop.f32.mrb[12].mxu0 }
 0x8ea   : > { %v3150_v54 = vadd.f32 %v6005_v48, %v3149_v2  ;;  %v6291_v33 = vpop.f32.mrb[13].mxu0 }
 0x8eb   : > { %v3152_v41 = vpop.f32.mrb[14].mxu0 }
 0x8ec   : > { %v8492_v12 = vadd.f32 %v6831_v43, %v3150_v54  ;;  %v3153_v3 = vadd.f32 %v6005_v48, %v3152_v41  ;;  %v6292_v5 = vpop.f32.mrb[15].mxu0 }
 0x8ed   : > { %v6014_v5 = vld [vmem:[#allocation12] ss:$0 sm:$0xff] }
 0x8ee   : > { %v8495_v8 = vadd.f32 %v6832_v6, %v3153_v3  ;;  %3160 = vadd.xlane.f32.xlu1 %v8492_v12 }
 0x8f0   : > { %3162 = vadd.xlane.f32.xlu0 %v8495_v8 }
 0x909   : > { %v3454_v59 = vpop.f32.mrb[16].mxu0 }
 0x90a   : > { %v3455_v60 = vadd.f32 %v3454_v59, %v3333_v56  ;;  %v3456_v61 = vpop.f32.mrb[17].mxu0 }
 0x90b   : > { %v8518_v0 = vadd.f32 %v3456_v61, %v3337_v58  ;;  %v3458_v7 = vpop.f32.mrb[18].mxu0 }
 0x90c   : > { %3762 = vrot.lane.b32.xlu1 %v3455_v60, %s7474_s27  ;;  %v3459_v34 = vadd.f32 %v3458_v7, %v3333_v56  ;;  %v3460_v46 = vpop.f32.mrb[19].mxu0 }
 0x90d   : > { %v8521_v50 = vadd.f32 %v3460_v46, %v3337_v58 }
 0x910   : > { %3768 = vrot.lane.b32.xlu1 %v3455_v60, %s7475_s13 }
 0x914   : > { %3770 = vrot.lane.b32.xlu1 %v3459_v34, %s7475_s13 }
 0x918   : > { %3774 = vrot.lane.b32.xlu1 %v3455_v60, %s7476_s3 }
 0x97b   : > { %v3161_v35 = vpop.xlane.xlu1 %3160 }
 0x97c   : > { %v3164_v36 = vmul.f32 0.0078125, %v3161_v35 }
 0x97d   : > { %v3163_v37 = vpop.xlane.xlu0 %3162 }
 0x97e   : > { %v3166_v38 = vsub.f32 %v8492_v12, %v3164_v36  ;;  %v3165_v39 = vmul.f32 0.0078125, %v3163_v37 }
 0x97f   : > { %v3763_v14 = vpop.permute.xlu1 %3762 }
 0x980   : > { %v3167_v40 = vsub.f32 %v8495_v8, %v3165_v39  ;;  %v3168_v21 = vmul.f32 %v3166_v38, %v3166_v38 }
 0x982   : > { %3170 = vadd.xlane.f32.xlu0 %v3168_v21  ;;  %v3169_v44 = vmul.f32 %v3167_v40, %v3167_v40 }
 0x983   : > { %v3769_v22 = vpop.permute.xlu1 %3768 }
 0x984   : > { %v3780_v31 = vcombine.low %v3455_v60, %v3769_v22  ;;  %v3781_v32 = vcombine.high %v3455_v60, %v3769_v22 }
 0x986   : > { %3172 = vadd.xlane.f32.xlu0 %v3169_v44  ;;  %v3788_v44 = vrot.slane %v3780_v31, %v8198_v27  ;;  %v3795_v1 = vrot.slane %v3781_v32, %v8198_v27 }
 0x987   : > { %v3771_v18 = vpop.permute.xlu1 %3770 }
 0x988   : > { %v3848_v25 = vcombine.low %v3459_v34, %v3771_v18  ;;  %v3849_v26 = vcombine.high %v3459_v34, %v3771_v18 }
 0x98a   : > { %v3856_v35 = vrot.slane %v3848_v25, %v8198_v27  ;;  %v3863_v36 = vrot.slane %v3849_v26, %v8198_v27 }
 0x98b   : > { %v3775_v37 = vpop.permute.xlu1 %3774 }
 0x98c   : > { %v3796_v45 = vcombine.low %v3763_v14, %v3775_v37  ;;  %v3797_v11 = vcombine.high %v3763_v14, %v3775_v37 }
 0x98e   : > { %v3804_v53 = vrot.slane %v3796_v45, %v8198_v27  ;;  %v3811_v49 = vrot.slane %v3797_v11, %v8198_v27 }
 0x990   : > { %v3812_v58 = vcombine.low %v3788_v44, %v3804_v53  ;;  %v3813_v59 = vcombine.high %v3788_v44, %v3804_v53  ;;  %v3828_v60 = vcombine.low %v3795_v1, %v3811_v49  ;;  %v3829_v61 = vcombine.high %v3795_v1, %v3811_v49 }
 0x992   : > { %v3820_v7 = vrot.slane %v3812_v58, %v8204_v42  ;;  %v3836_v46 = vrot.slane %v3828_v60, %v8204_v42 }
 0x99c   : > { %3764 = vrot.lane.b32.xlu0 %v3459_v34, %s7474_s27 }
 0x9a0   : > { %3776 = vrot.lane.b32.xlu0 %v3459_v34, %s7476_s3  ;;  %v3827_v34 = vrot.slane %v3813_v59, %v8204_v42 }
 0xa0f   : > { %v3171_v47 = vpop.xlane.xlu0 %3170 }
 0xa10   : > { %v3174_v48 = vmul.f32 0.0078125, %v3171_v47  ;;  %v3843_v47 = vrot.slane %v3829_v61, %v8204_v42 }
 0xa12   : > { %v3176_v2 = vadd.f32 1e-05, %v3174_v48 }
 0xa13   : > { %v3173_v54 = vpop.xlane.xlu0 %3172 }
 0xa14   : > { %6791 = vrsqrt.f32 %v3176_v2  ;;  %v3175_v33 = vmul.f32 0.0078125, %v3173_v54 }
 0xa16   : > { %v3177_v41 = vadd.f32 1e-05, %v3175_v33 }
 0xa17   : > { %v3765_v15 = vpop.permute.xlu0 %3764 }
 0xa18   : > { %6793 = vrsqrt.f32 %v3177_v41  ;;  %v3916_v41 = vcombine.low %v3820_v7, %v3827_v34 }
 0xa1b   : > { %v3777_v23 = vpop.permute.xlu0 %3776 }
 0xa1c   : > { %v3864_v63 = vcombine.low %v3765_v15, %v3777_v23  ;;  %v3865_v24 = vcombine.high %v3765_v15, %v3777_v23 }
 0xa1e   : > { %v6792_v43 = vpop.eup %6791  ;;  %v3872_v28 = vrot.slane %v3864_v63, %v8198_v27  ;;  %v3879_v29 = vrot.slane %v3865_v24, %v8198_v27 }
 0xa1f   : > { %v3180_v3 = vmul.f32 %v6792_v43, %v3166_v38  ;;  %v6045_v43 = vcombine.high %v3820_v7, %v3827_v34 }
 0xa20   : > { %v3880_v38 = vcombine.low %v3856_v35, %v3872_v28  ;;  %v3881_v39 = vcombine.high %v3856_v35, %v3872_v28  ;;  %v3897_v21 = vcombine.high %v3863_v36, %v3879_v29 }
 0xa21   : > { %v3188_v17 = vmul.f32 %v6014_v5, %v3180_v3  ;;  %v3932_v3 = vcombine.low %v3836_v46, %v3843_v47 }
 0xa22   : > { %v6794_v6 = vpop.eup %6793  ;;  %v3888_v51 = vrot.slane %v3880_v38, %v8204_v42  ;;  %v3895_v16 = vrot.slane %v3881_v39, %v8204_v42  ;;  %v3911_v56 = vrot.slane %v3897_v21, %v8204_v42 }
 0xa23   : > { %v3181_v9 = vmul.f32 %v6794_v6, %v3167_v40  ;;  %v3196_v62 = vadd.f32 %v6015_v19, %v3188_v17  ;;  %v3896_v40 = vcombine.low %v3863_v36, %v3879_v29 }
 0xa24   : > { %v3984_v48 = vcombine.low %v3888_v51, %v3895_v16  ;;  %v6047_v2 = vcombine.high %v3888_v51, %v3895_v16 }
 0xa25   : > { %v3189_v20 = vmul.f32 %v6014_v5, %v3181_v9  ;;  %v3904_v52 = vrot.slane %v3896_v40, %v8204_v42  ;;  %v6046_v5 = vcombine.high %v3836_v46, %v3843_v47 }
 0xa26   : > { %v3991_v6 = vrot.slane %v3984_v48, %v8198_v27  ;;  %v3999_v9 = vrot.slane %v6047_v2, %v8198_v27 }
 0xa27   : > { %v3197_v10 = vadd.f32 %v6015_v19, %v3189_v20  ;;  %v4000_v54 = vcombine.low %v3904_v52, %v3911_v56  ;;  %v6048_v33 = vcombine.high %v3904_v52, %v3911_v56  ;;  %v3923_v20 = vrot.slane %v3916_v41, %v8198_v27  ;;  %v6016_v56 = vld [vmem:[#allocation16] ss:$0 sm:$0xff] }
 0xa28   : > { %v4016_v22 = vcombine.low %v3991_v6, %v3999_v9  ;;  %v4017_v32 = vcombine.high %v3991_v6, %v3999_v9 }
 0xa29   : > { %v3198_v13 = vpack.c.bf16 %v3197_v10, %v3196_v62  ;;  %v4007_v17 = vrot.slane %v4000_v54, %v8198_v27  ;;  %v4015_v19 = vrot.slane %v6048_v33, %v8198_v27  ;;  %v3931_v62 = vrot.slane %v6045_v43, %v8198_v27 }
 0xa2a   : > { %v3939_v10 = vrot.slane %v3932_v3, %v8198_v27  ;;  %v4024_v18 = vrot.slane %v4016_v22, %v8204_v42  ;;  %v4031_v39 = vrot.slane %v4017_v32, %v8204_v42 }
 0xa2b   : > { %6310 = vmatmul.mubr.bf16.vlgmr.msra.gmra.mrb[28].mxu1 %v3198_v13  ;;  %v3947_v13 = vrot.slane %v6046_v5, %v8198_v27  ;;  %v3948_v14 = vcombine.low %v3923_v20, %v3931_v62  ;;  %v4032_v23 = vcombine.low %v4007_v17, %v4015_v19  ;;  %v3949_v29 = vcombine.high %v3923_v20, %v3931_v62 }
 0xa2c   : > { %6315 = vmatprep.mubr.msk.bf16.mxu1 %vm7473_vm0, %v7471_v4  ;;  %v4033_v35 = vcombine.high %v4007_v17, %v4015_v19 }
 0xa2d   : > { %v3964_v15 = vcombine.low %v3939_v10, %v3947_v13  ;;  %v3956_v63 = vrot.slane %v3948_v14, %v8204_v42  ;;  %v4040_v25 = vrot.slane %v4032_v23, %v8204_v42  ;;  %v3965_v31 = vcombine.high %v3939_v10, %v3947_v13 }
 0xa2e   : > { %v3963_v37 = vrot.slane %v3949_v29, %v8204_v42  ;;  %v4047_v40 = vrot.slane %v4033_v35, %v8204_v42 }
 0xa2f   : > { %v3972_v24 = vrot.slane %v3964_v15, %v8204_v42  ;;  %v4048_v28 = vcombine.low %v4024_v18, %v4040_v25  ;;  %v3979_v38 = vrot.slane %v3965_v31, %v8204_v42  ;;  %v4049_v1 = vcombine.high %v4024_v18, %v4040_v25 }
 0xa30   : > { %v4050_v11 = vcombine.low %v4031_v39, %v4047_v40  ;;  %v4051_v49 = vcombine.high %v4031_v39, %v4047_v40 }
 0xa31   : > { %v3980_v26 = vcombine.low %v3956_v63, %v3972_v24  ;;  %v3981_v44 = vcombine.high %v3956_v63, %v3972_v24  ;;  %v3982_v45 = vcombine.low %v3963_v37, %v3979_v38  ;;  %v3983_v53 = vcombine.high %v3963_v37, %v3979_v38 }
 0xa33   : > { %v4052_v36 = vpack.c.bf16 %v4048_v28, %v3980_v26  ;;  %v8564_v51 = vpack.c.bf16 %v4049_v1, %v3981_v44  ;;  %v8566_v16 = vpack.c.bf16 %v4050_v11, %v3982_v45  ;;  %v8568_v52 = vpack.c.bf16 %v4051_v49, %v3983_v53 }
 0xa35   : > { %v4356_v21 = vsel %vm2265_vm1, %v4052_v36, 0 }
 0xa36   : > { %6314 = vmatpush3.bf16.xpose.msra.mxu1 %v4356_v21 }
 0xa37   : > { %6319 = vmatprep.subr.bf16.mxu1 %v7471_v4 }
 0xafe   : > { %v3304_v58 = vpop.f32.mrb[28].mxu1 }
 0xaff   : > { %v3305_v59 = vadd.f32 %v6016_v56, %v3304_v58  ;;  %v6311_v60 = vpop.f32.mrb[29].mxu1 }
 0xb00   : > { %v3307_v61 = vpop.f32.mrb[30].mxu1 }
 0xb01   : > { %v3308_v7 = vadd.f32 %v6016_v56, %v3307_v61  ;;  %v6312_v34 = vpop.f32.mrb[31].mxu1  ;;  %3466 = vrot.lane.b32.xlu1 %v3305_v59, %s7474_s27 }
 0xb03   : > { %3468 = vrot.lane.b32.xlu0 %v3308_v7, %s7474_s27 }
 0xb05   : > { %3472 = vrot.lane.b32.xlu1 %v3305_v59, %s7475_s13 }
 0xb07   : > { %3474 = vrot.lane.b32.xlu0 %v3308_v7, %s7475_s13 }
 0xb09   : > { %3478 = vrot.lane.b32.xlu1 %v3305_v59, %s7476_s3 }
 0xb0b   : > { %3480 = vrot.lane.b32.xlu0 %v3308_v7, %s7476_s3 }
 0xb0d   : > { %4058 = vrot.lane.b32.xlu1 %v8518_v0, %s7474_s27 }
 0xb0f   : > { %4060 = vrot.lane.b32.xlu0 %v8521_v50, %s7474_s27 }
 0xb11   : > { %4064 = vrot.lane.b32.xlu1 %v8518_v0, %s7475_s13 }
 0xb13   : > { %4072 = vrot.lane.b32.xlu0 %v8521_v50, %s7476_s3 }
 0xb15   : > { %4066 = vrot.lane.b32.xlu1 %v8521_v50, %s7475_s13 }
 0xb73   : > { %v3467_v46 = vpop.permute.xlu1 %3466 }
 0xb75   : > { %v3469_v47 = vpop.permute.xlu0 %3468 }
 0xb77   : > { %v3473_v48 = vpop.permute.xlu1 %3472 }
 0xb78   : > { %v3484_v2 = vcombine.low %v3305_v59, %v3473_v48  ;;  %v3485_v54 = vcombine.high %v3305_v59, %v3473_v48 }
 0xb79   : > { %v3475_v33 = vpop.permute.xlu0 %3474 }
 0xb7a   : > { %v3492_v5 = vrot.slane %v3484_v2, %v8198_v27  ;;  %v3499_v6 = vrot.slane %v3485_v54, %v8198_v27  ;;  %v3552_v9 = vcombine.low %v3308_v7, %v3475_v33  ;;  %v3553_v17 = vcombine.high %v3308_v7, %v3475_v33 }
 0xb7b   : > { %v3479_v41 = vpop.permute.xlu1 %3478 }
 0xb7c   : > { %v3500_v43 = vcombine.low %v3467_v46, %v3479_v41  ;;  %v3501_v3 = vcombine.high %v3467_v46, %v3479_v41  ;;  %v3560_v63 = vrot.slane %v3552_v9, %v8198_v27  ;;  %v3567_v24 = vrot.slane %v3553_v17, %v8198_v27 }
 0xb7d   : > { %v3481_v19 = vpop.permute.xlu0 %3480 }
 0xb7e   : > { %v3508_v20 = vrot.slane %v3500_v43, %v8198_v27  ;;  %v3515_v62 = vrot.slane %v3501_v3, %v8198_v27  ;;  %v3568_v10 = vcombine.low %v3469_v47, %v3481_v19  ;;  %v3569_v13 = vcombine.high %v3469_v47, %v3481_v19 }
 0xb80   : > { %v3516_v14 = vcombine.low %v3492_v5, %v3508_v20  ;;  %v3517_v15 = vcombine.high %v3492_v5, %v3508_v20  ;;  %v3532_v22 = vcombine.low %v3499_v6, %v3515_v62  ;;  %v3533_v23 = vcombine.high %v3499_v6, %v3515_v62 }
 0xb81   : > { %v3576_v18 = vrot.slane %v3568_v10, %v8198_v27  ;;  %v3583_v25 = vrot.slane %v3569_v13, %v8198_v27  ;;  %v4403_v20 = vsel %vm2265_vm1, %v8564_v51, 0 }
 0xb82   : > { %v3524_v26 = vrot.slane %v3516_v14, %v8204_v42  ;;  %v3531_v28 = vrot.slane %v3517_v15, %v8204_v42  ;;  %v3540_v29 = vrot.slane %v3532_v22, %v8204_v42  ;;  %v3547_v31 = vrot.slane %v3533_v23, %v8204_v42 }
 0xb83   : > { %v3584_v32 = vcombine.low %v3560_v63, %v3576_v18  ;;  %v3585_v35 = vcombine.high %v3560_v63, %v3576_v18  ;;  %v3600_v36 = vcombine.low %v3567_v24, %v3583_v25  ;;  %v3601_v37 = vcombine.high %v3567_v24, %v3583_v25 }
 0xb84   : > { %v3620_v38 = vcombine.low %v3524_v26, %v3531_v28  ;;  %v6041_v39 = vcombine.high %v3524_v26, %v3531_v28  ;;  %v3636_v40 = vcombine.low %v3540_v29, %v3547_v31  ;;  %v6042_v21 = vcombine.high %v3540_v29, %v3547_v31 }
 0xb85   : > { %v3592_v44 = vrot.slane %v3584_v32, %v8204_v42  ;;  %v3599_v1 = vrot.slane %v3585_v35, %v8204_v42  ;;  %v3608_v45 = vrot.slane %v3600_v36, %v8204_v42  ;;  %v3615_v11 = vrot.slane %v3601_v37, %v8204_v42  ;;  %v6057_v36 = vld [vmem:[%s1045_s28] ss:$0 sm:$0xff] }
 0xb86   : > { %v3627_v53 = vrot.slane %v3620_v38, %v8198_v27  ;;  %v3635_v49 = vrot.slane %v6041_v39, %v8198_v27  ;;  %v3643_v56 = vrot.slane %v3636_v40, %v8198_v27  ;;  %v3651_v58 = vrot.slane %v6042_v21, %v8198_v27 }
 0xb87   : > { %v3688_v59 = vcombine.low %v3592_v44, %v3599_v1  ;;  %v6043_v60 = vcombine.high %v3592_v44, %v3599_v1  ;;  %v3704_v61 = vcombine.low %v3608_v45, %v3615_v11  ;;  %v6044_v7 = vcombine.high %v3608_v45, %v3615_v11 }
 0xb88   : > { %v3652_v34 = vcombine.low %v3627_v53, %v3635_v49  ;;  %v3668_v46 = vcombine.low %v3643_v56, %v3651_v58  ;;  %v3653_v14 = vcombine.high %v3627_v53, %v3635_v49  ;;  %v3669_v15 = vcombine.high %v3643_v56, %v3651_v58 }
 0xb89   : > { %v3695_v47 = vrot.slane %v3688_v59, %v8198_v27  ;;  %v3703_v48 = vrot.slane %v6043_v60, %v8198_v27  ;;  %v3711_v2 = vrot.slane %v3704_v61, %v8198_v27  ;;  %v3719_v54 = vrot.slane %v6044_v7, %v8198_v27 }
 0xb8a   : > { %v3660_v33 = vrot.slane %v3652_v34, %v8204_v42  ;;  %v3676_v41 = vrot.slane %v3668_v46, %v8204_v42  ;;  %v3667_v18 = vrot.slane %v3653_v14, %v8204_v42  ;;  %v3683_v51 = vrot.slane %v3669_v15, %v8204_v42 }
 0xb8b   : > { %v3720_v43 = vcombine.low %v3695_v47, %v3703_v48  ;;  %v3736_v3 = vcombine.low %v3711_v2, %v3719_v54  ;;  %v3721_v62 = vcombine.high %v3695_v47, %v3703_v48  ;;  %v3737_v10 = vcombine.high %v3711_v2, %v3719_v54 }
 0xb8c   : > { %v3684_v9 = vcombine.low %v3660_v33, %v3676_v41  ;;  %v3685_v22 = vcombine.high %v3660_v33, %v3676_v41  ;;  %v4450_v25 = vsel %vm2265_vm1, %v8566_v16, 0  ;;  %v3686_v28 = vcombine.low %v3667_v18, %v3683_v51 }
 0xb8d   : > { %v3728_v5 = vrot.slane %v3720_v43, %v8204_v42  ;;  %v3744_v6 = vrot.slane %v3736_v3, %v8204_v42  ;;  %v3735_v23 = vrot.slane %v3721_v62, %v8204_v42  ;;  %v3751_v63 = vrot.slane %v3737_v10, %v8204_v42 }
 0xb8e   : > { %v4497_v31 = vsel %vm2265_vm1, %v8568_v52, 0  ;;  %v3687_v32 = vcombine.high %v3667_v18, %v3683_v51 }
 0xb8f   : > { %v3752_v17 = vcombine.low %v3728_v5, %v3744_v6  ;;  %v3753_v13 = vcombine.high %v3728_v5, %v3744_v6  ;;  %v3754_v26 = vcombine.low %v3735_v23, %v3751_v63  ;;  %v3755_v16 = vcombine.high %v3735_v23, %v3751_v63  ;;  %v4059_v23 = vpop.permute.xlu1 %4058 }
 0xb91   : > { %v3756_v19 = vpack.c.bf16 %v3752_v17, %v3684_v9  ;;  %v3757_v24 = vpack.c.bf16 %v3753_v13, %v3685_v22  ;;  %v3758_v29 = vpack.c.bf16 %v3754_v26, %v3686_v28  ;;  %v3759_v35 = vpack.c.bf16 %v3755_v16, %v3687_v32 }
 0xb93   : > { %6316 = vmatmul.mubr.msk.bf16.vlgmr.msra.gmra.mrb[32].mxu1 %vm2265_vm1, %v3756_v19  ;;  %v4065_v63 = vpop.permute.xlu1 %4064 }
 0xb94   : > { %6320 = vmatpush3.bf16.xpose.msra.mxu1 %v4403_v20  ;;  %6321 = vmatprep.mubr.msk.bf16.mxu1 %vm7473_vm0, %v7471_v4 }
 0xb95   : > { %6325 = vmatprep.subr.bf16.mxu1 %v7471_v4 }
 0xb97   : > { %v4067_v18 = vpop.permute.xlu1 %4066 }
 0xb98   : > { %v4145_v26 = vcombine.high %v8521_v50, %v4067_v18 }
 0xb9a   : > { %v4159_v16 = vrot.slane %v4145_v26, %v8198_v27 }
 0xb9b   : > { %6322 = vmatmul.mubr.msk.bf16.vlgmr.msra.gmra.mrb[36].mxu1 %vm2265_vm1, %v3757_v24  ;;  %v4061_v24 = vpop.permute.xlu0 %4060 }
 0xb9c   : > { %6326 = vmatpush3.bf16.xpose.msra.mxu1 %v4450_v25  ;;  %6327 = vmatprep.mubr.msk.bf16.mxu1 %vm7473_vm0, %v7471_v4  ;;  %v4144_v25 = vcombine.low %v8521_v50, %v4067_v18 }
 0xb9d   : > { %6331 = vmatprep.subr.bf16.mxu1 %v7471_v4 }
 0xb9f   : > { %v4073_v51 = vpop.permute.xlu0 %4072 }
 0xba0   : > { %v4160_v28 = vcombine.low %v4061_v24, %v4073_v51 }
 0xba2   : > { %v4168_v32 = vrot.slane %v4160_v28, %v8198_v27 }
 0xba3   : > { %6328 = vmatmul.mubr.msk.bf16.vlgmr.msra.gmra.mrb[40].mxu1 %vm2265_vm1, %v3758_v29  ;;  %v4161_v29 = vcombine.high %v4061_v24, %v4073_v51 }
 0xba4   : > { %6332 = vmatpush3.bf16.xpose.msra.mxu1 %v4497_v31  ;;  %6333 = vmatprep.mubr.msk.bf16.mxu1 %vm7473_vm0, %v7471_v4  ;;  %v4152_v31 = vrot.slane %v4144_v25, %v8198_v27 }
 0xba5   : > { %6343 = vmatprep.subr.bf16.mxu1 %v7471_v4 }
 0xbab   : > { %6334 = vmatmul.mubr.msk.bf16.vlgmr.msra.gmra.mrb[44].mxu1 %vm2265_vm1, %v3759_v35  ;;  %v4175_v35 = vrot.slane %v4161_v29, %v8198_v27 }
 0xbac   : > { %6345 = vmatprep.mubr.msk.bf16.mxu1 %vm7473_vm0, %v7471_v4 }
 0xc66   : > { %v4392_v52 = vpop.f32.mrb[32].mxu1 }
 0xc67   : > { %v4540_v37 = vmul.f32 0.17677669, %v4392_v52  ;;  %v6317_v38 = vpop.f32.mrb[33].mxu1  ;;  %v4177_v52 = vcombine.high %v4152_v31, %v4168_v32 }
 0xc68   : > { %v4395_v39 = vpop.f32.mrb[34].mxu1  ;;  %v4193_v38 = vcombine.high %v4159_v16, %v4175_v35 }
 0xc69   : > { %v4541_v40 = vmul.f32 0.17677669, %v4395_v39  ;;  %v6318_v21 = vpop.f32.mrb[35].mxu1  ;;  %v8643_v44 = vadd.f32 %v6057_v36, %v4540_v37  ;;  %v4192_v37 = vcombine.low %v4159_v16, %v4175_v35 }
 0xc6a   : > { %v4207_v21 = vrot.slane %v4193_v38, %v8204_v42 }
 0xc6b   : > { %v4562_v1 = vsel %vm2470_vm4, %v8643_v44, -inf  ;;  %v8647_v45 = vadd.f32 %v6057_v36, %v4541_v40  ;;  %v4191_v40 = vrot.slane %v4177_v52, %v8204_v42  ;;  %v4200_v50 = vrot.slane %v4192_v37, %v8204_v42 }
 0xc6c   : > { %4563 = vmax.xlane.f32.xlu1 %v4562_v1 }
 0xc6d   : > { %v4565_v11 = vsel %vm2470_vm4, %v8647_v45, -inf }
 0xc6e   : > { %4566 = vmax.xlane.f32.xlu0 %v4565_v11  ;;  %v4439_v53 = vpop.f32.mrb[36].mxu1 }
 0xc6f   : > { %v4542_v49 = vmul.f32 0.17677669, %v4439_v53  ;;  %v6323_v56 = vpop.f32.mrb[37].mxu1  ;;  %v4076_v53 = vcombine.low %v8518_v0, %v4065_v63 }
 0xc70   : > { %v4442_v58 = vpop.f32.mrb[38].mxu1  ;;  %v4077_v56 = vcombine.high %v8518_v0, %v4065_v63 }
 0xc71   : > { %v4543_v59 = vmul.f32 0.17677669, %v4442_v58  ;;  %v6324_v60 = vpop.f32.mrb[39].mxu1  ;;  %v8651_v61 = vadd.f32 %v6057_v36, %v4542_v49 }
 0xc73   : > { %v4568_v7 = vsel %vm2470_vm4, %v8651_v61, -inf  ;;  %v8655_v34 = vadd.f32 %v6057_v36, %v4543_v59 }
 0xc74   : > { %4569 = vmax.xlane.f32.xlu0 %v4568_v7 }
 0xc75   : > { %v4571_v48 = vsel %vm2470_vm4, %v8655_v34, -inf }
 0xc76   : > { %v4486_v46 = vpop.f32.mrb[40].mxu1 }
 0xc77   : > { %v6329_v47 = vpop.f32.mrb[41].mxu1  ;;  %v4544_v14 = vmul.f32 0.17677669, %v4486_v46  ;;  %v4296_v46 = vcombine.low %v4200_v50, %v4207_v21 }
 0xc78   : > { %4572 = vmax.xlane.f32.xlu0 %v4571_v48  ;;  %v4489_v2 = vpop.f32.mrb[42].mxu1  ;;  %v6052_v47 = vcombine.high %v4200_v50, %v4207_v21 }
 0xc79   : > { %v4545_v54 = vmul.f32 0.17677669, %v4489_v2  ;;  %v6330_v33 = vpop.f32.mrb[43].mxu1  ;;  %v8673_v15 = vadd.f32 %v6057_v36, %v4544_v14 }
 0xc7b   : > { %v8659_v41 = vadd.f32 %v6057_v36, %v4545_v54  ;;  %v4574_v22 = vsel %vm2470_vm4, %v8673_v15, -inf }
 0xc7d   : > { %4070 = vrot.lane.b32.xlu1 %v8518_v0, %s7476_s3  ;;  %v4577_v43 = vsel %vm2470_vm4, %v8659_v41, -inf }
 0xc7e   : > { %4578 = vmax.xlane.f32.xlu0 %v4577_v43  ;;  %v4533_v3 = vpop.f32.mrb[44].mxu1  ;;  %v4084_v43 = vrot.slane %v4076_v53, %v8198_v27 }
 0xc7f   : > { %v4546_v5 = vmul.f32 0.17677669, %v4533_v3  ;;  %v6335_v6 = vpop.f32.mrb[45].mxu1 }
 0xc80   : > { %v4536_v9 = vpop.f32.mrb[46].mxu1  ;;  %v4303_v6 = vrot.slane %v4296_v46, %v8198_v27 }
 0xc81   : > { %v4547_v17 = vmul.f32 0.17677669, %v4536_v9  ;;  %v6336_v19 = vpop.f32.mrb[47].mxu1  ;;  %v8665_v20 = vadd.f32 %v6057_v36, %v4546_v5  ;;  %v4311_v9 = vrot.slane %v6052_v47, %v8198_v27 }
 0xc83   : > { %v4580_v62 = vsel %vm2470_vm4, %v8665_v20, -inf  ;;  %v8669_v10 = vadd.f32 %v6057_v36, %v4547_v17  ;;  %v4176_v36 = vcombine.low %v4152_v31, %v4168_v32  ;;  %v4328_v28 = vcombine.low %v4303_v6, %v4311_v9 }
 0xc84   : > { %4581 = vmax.xlane.f32.xlu0 %v4580_v62 }
 0xc85   : > { %v4583_v13 = vsel %vm2470_vm4, %v8669_v10, -inf  ;;  %v4184_v39 = vrot.slane %v4176_v36, %v8204_v42  ;;  %v4329_v36 = vcombine.high %v4303_v6, %v4311_v9 }
 0xc87   : > { %v4280_v60 = vcombine.low %v4184_v39, %v4191_v40  ;;  %v6051_v7 = vcombine.high %v4184_v39, %v4191_v40 }
 0xc88   : > { %4584 = vmax.xlane.f32.xlu0 %v4583_v13 }
 0xc89   : > { %v4295_v5 = vrot.slane %v6051_v7, %v8198_v27 }
 0xca1   : > { %4575 = vmax.xlane.f32.xlu1 %v4574_v22 }
 0xcf9   : > { %v4564_v1 = vpop.xlane.xlu1 %4563 }
 0xcfa   : > { %v4586_v11 = vsub.f32 %v8643_v44, %v4564_v1  ;;  %v4091_v44 = vrot.slane %v4077_v56, %v8198_v27 }
 0xcfb   : > { %v4567_v49 = vpop.xlane.xlu0 %4566 }
 0xcfc   : > { %v4594_v58 = vmul.f32 1.442695, %v4586_v11  ;;  %v4587_v59 = vsub.f32 %v8647_v45, %v4567_v49  ;;  %v4287_v45 = vrot.slane %v4280_v60, %v8198_v27  ;;  %v4336_v11 = vrot.slane %v4328_v28, %v8204_v42 }
 0xcfd   : > { %v4071_v48 = vpop.permute.xlu1 %4070 }
 0xcfe   : > { %6795 = vpow2.f32 %v4594_v58  ;;  %v4596_v2 = vmul.f32 1.442695, %v4587_v59  ;;  %v4092_v54 = vcombine.low %v4059_v23, %v4071_v48  ;;  %v4093_v33 = vcombine.high %v4059_v23, %v4071_v48 }
 0xcff   : > { %v4312_v26 = vcombine.low %v4287_v45, %v4295_v5 }
 0xd00   : > { %6797 = vpow2.f32 %v4596_v2  ;;  %v4100_v3 = vrot.slane %v4092_v54, %v8198_v27  ;;  %v4107_v0 = vrot.slane %v4093_v33, %v8198_v27 }
 0xd01   : > { %v4570_v17 = vpop.xlane.xlu0 %4569  ;;  %v4320_v1 = vrot.slane %v4312_v26, %v8204_v42 }
 0xd02   : > { %v4108_v19 = vcombine.low %v4084_v43, %v4100_v3  ;;  %v4109_v62 = vcombine.high %v4084_v43, %v4100_v3  ;;  %v4124_v13 = vcombine.low %v4091_v44, %v4107_v0  ;;  %v4125_v14 = vcombine.high %v4091_v44, %v4107_v0 }
 0xd03   : > { %v4588_v22 = vsub.f32 %v8651_v61, %v4570_v17  ;;  %v4313_v61 = vcombine.high %v4287_v45, %v4295_v5  ;;  %v4344_v2 = vcombine.low %v4320_v1, %v4336_v11  ;;  %v4343_v43 = vrot.slane %v4329_v36, %v8204_v42 }
 0xd04   : > { %v4116_v23 = vrot.slane %v4108_v19, %v8204_v42  ;;  %v4123_v63 = vrot.slane %v4109_v62, %v8204_v42  ;;  %v4132_v24 = vrot.slane %v4124_v13, %v8204_v42  ;;  %v4139_v18 = vrot.slane %v4125_v14, %v8204_v42 }
 0xd05   : > { %v4598_v51 = vmul.f32 1.442695, %v4588_v22  ;;  %v4573_v25 = vpop.xlane.xlu0 %4572  ;;  %v4327_v33 = vrot.slane %v4313_v61, %v8204_v42  ;;  %v4345_v45 = vcombine.high %v4320_v1, %v4336_v11  ;;  %v6710_v1 = vld [vmem:[#allocation21 + $0x18] sm:$0xff]   ;;  %v6711_v11 = vld [vmem:[#allocation21 + $0x20] sm:$0xff]  }
 0xd06   : > { %v4212_v29 = vcombine.low %v4116_v23, %v4123_v63  ;;  %v6049_v31 = vcombine.high %v4116_v23, %v4123_v63  ;;  %v4228_v16 = vcombine.low %v4132_v24, %v4139_v18  ;;  %v6050_v32 = vcombine.high %v4132_v24, %v4139_v18 }
 0xd07   : > { %6799 = vpow2.f32 %v4598_v51  ;;  %v4589_v35 = vsub.f32 %v8655_v34, %v4573_v25  ;;  %v4346_v13 = vcombine.low %v4327_v33, %v4343_v43  ;;  %v4347_v51 = vcombine.high %v4327_v33, %v4343_v43 }
 0xd08   : > { %v6796_v52 = vpop.eup %6795  ;;  %v4219_v37 = vrot.slane %v4212_v29, %v8198_v27  ;;  %v4227_v38 = vrot.slane %v6049_v31, %v8198_v27  ;;  %v4235_v39 = vrot.slane %v4228_v16, %v8198_v27  ;;  %v4243_v40 = vrot.slane %v6050_v32, %v8198_v27 }
 0xd09   : > { %v4600_v50 = vmul.f32 1.442695, %v4589_v35  ;;  %v4610_v21 = vsel %vm2470_vm4, %v6796_v52, 0.0 }
 0xd0a   : > { %v6798_v53 = vpop.eup %6797  ;;  %4611 = vadd.xlane.f32.xlu1 %v4610_v21  ;;  %v4244_v34 = vcombine.low %v4219_v37, %v4227_v38  ;;  %v4260_v49 = vcombine.low %v4235_v39, %v4243_v40  ;;  %v4245_v56 = vcombine.high %v4219_v37, %v4227_v38  ;;  %v4261_v58 = vcombine.high %v4235_v39, %v4243_v40  ;;  %v6707_v21 = vld [vmem:[#allocation21] sm:$0xff]  }
 0xd0b   : > { %6801 = vpow2.f32 %v4600_v50  ;;  %v4579_v59 = vpop.xlane.xlu0 %4578  ;;  %v4613_v60 = vsel %vm2470_vm4, %v6798_v53, 0.0  ;;  %v4634_v14 = vpack.c.bf16 %v6798_v53, %v6796_v52  ;;  %v6712_v53 = vld [vmem:[#allocation21 + $0x28] sm:$0xff]  }
 0xd0c   : > { %v4591_v7 = vsub.f32 %v8659_v41, %v4579_v59  ;;  %4614 = vadd.xlane.f32.xlu0 %v4613_v60  ;;  %v4252_v46 = vrot.slane %v4244_v34, %v8204_v42  ;;  %v4268_v47 = vrot.slane %v4260_v49, %v8204_v42  ;;  %v4259_v48 = vrot.slane %v4245_v56, %v8204_v42 }
 0xd0d   : > { %v4275_v54 = vrot.slane %v4261_v58, %v8204_v42 }
 0xd0e   : > { %v4604_v44 = vmul.f32 1.442695, %v4591_v7  ;;  %v4276_v3 = vcombine.low %v4252_v46, %v4268_v47  ;;  %v4277_v0 = vcombine.high %v4252_v46, %v4268_v47 }
 0xd0f   : > { %v4278_v6 = vcombine.low %v4259_v48, %v4275_v54  ;;  %v4279_v22 = vcombine.high %v4259_v48, %v4275_v54 }
 0xd10   : > { %6803 = vpow2.f32 %v4604_v44  ;;  %v4348_v41 = vpack.c.bf16 %v4344_v2, %v4276_v3  ;;  %v4349_v5 = vpack.c.bf16 %v4345_v45, %v4277_v0 }
 0xd11   : > { %v6800_v9 = vpop.eup %6799  ;;  %v4582_v17 = vpop.xlane.xlu0 %4581  ;;  %v4350_v23 = vpack.c.bf16 %v4346_v13, %v4278_v6  ;;  %v4351_v28 = vpack.c.bf16 %v4347_v51, %v4279_v22 }
 0xd12   : > { %v4592_v19 = vsub.f32 %v8665_v20, %v4582_v17  ;;  %v4616_v62 = vsel %vm2470_vm4, %v6800_v9, 0.0  ;;  %6338 = vmatpush3.bf16.msra.mxu0 %v4348_v41  ;;  %6344 = vmatpush3.bf16.msra.mxu1 %v4349_v5 }
 0xd13   : > { %4617 = vadd.xlane.f32.xlu1 %v4616_v62  ;;  %6349 = vmatprep.subr.bf16.mxu0 %v7471_v4 }
 0xd14   : > { %6355 = vmatprep.subr.bf16.mxu1 %v7471_v4  ;;  %v4606_v24 = vmul.f32 1.442695, %v4592_v19 }
 0xd15   : > { %v6802_v63 = vpop.eup %6801  ;;  %v4585_v18 = vpop.xlane.xlu0 %4584  ;;  %6340 = vmatmul.mubr.msk.bf16.vlgmr.msra.gmra.mrb[20].mxu0 %vm2470_vm4, %v4634_v14 }
 0xd16   : > { %v4593_v20 = vsub.f32 %v8669_v10, %v4585_v18  ;;  %v4619_v25 = vsel %vm2470_vm4, %v6802_v63, 0.0  ;;  %6350 = vmatpush3.bf16.msra.mxu0 %v4350_v23  ;;  %v4635_v26 = vpack.c.bf16 %v6802_v63, %v6800_v9  ;;  %6351 = vmatprep.mubr.msk.bf16.mxu0 %vm7473_vm0, %v7471_v4  ;;  %6805 = vpow2.f32 %v4606_v24 }
 0xd17   : > { %4620 = vadd.xlane.f32.xlu0 %v4619_v25  ;;  %6361 = vmatprep.subr.bf16.mxu0 %v7471_v4 }
 0xd18   : > { %v4608_v29 = vmul.f32 1.442695, %v4593_v20  ;;  %6346 = vmatmul.mubr.msk.bf16.vlgmr.msra.gmra.mrb[48].mxu1 %vm2470_vm4, %v4635_v26 }
 0xd19   : > { %6356 = vmatpush3.bf16.msra.mxu1 %v4351_v28  ;;  %6357 = vmatprep.mubr.msk.bf16.mxu1 %vm7473_vm0, %v7471_v4 }
 0xd1a   : > { %v6804_v10 = vpop.eup %6803  ;;  %6807 = vpow2.f32 %v4608_v29 }
 0xd1b   : > { %v4625_v31 = vsel %vm2470_vm4, %v6804_v10, 0.0 }
 0xd1c   : > { %4626 = vadd.xlane.f32.xlu0 %v4625_v31 }
 0xd20   : > { %v6806_v16 = vpop.eup %6805 }
 0xd21   : > { %v4628_v50 = vsel %vm2470_vm4, %v6806_v16, 0.0 }
 0xd24   : > { %v6808_v32 = vpop.eup %6807 }
 0xd25   : > { %v4631_v35 = vsel %vm2470_vm4, %v6808_v32, 0.0  ;;  %v4637_v61 = vpack.c.bf16 %v6808_v32, %v6806_v16 }
 0xd26   : > { %4632 = vadd.xlane.f32.xlu0 %v4631_v35 }
 0xd27   : > { %6358 = vmatmul.mubr.msk.bf16.vlgmr.msra.gmra.mrb[52].mxu1 %vm2470_vm4, %v4637_v61 }
 0xd28   : > { %5428 = vmatprep.mubr.bf16.mxu1 %v7472_v30  ;;  %v6708_v30 = vld [vmem:[#allocation21 + $0x8] sm:$0xff]  }
 0xd2e   : > { %v4576_v36 = vpop.xlane.xlu1 %4575 }
 0xd2f   : > { %v4590_v52 = vsub.f32 %v8673_v15, %v4576_v36  ;;  %v6709_v15 = vld [vmem:[#allocation21 + $0x10] sm:$0xff]  }
 0xd31   : > { %v4602_v37 = vmul.f32 1.442695, %v4590_v52 }
 0xd33   : > { %6809 = vpow2.f32 %v4602_v37 }
 0xd3d   : > { %v6810_v38 = vpop.eup %6809 }
 0xd3e   : > { %v4622_v39 = vsel %vm2470_vm4, %v6810_v38, 0.0  ;;  %v4636_v40 = vpack.c.bf16 %v6804_v10, %v6810_v38 }
 0xd3f   : > { %4623 = vadd.xlane.f32.xlu1 %v4622_v39 }
 0xd40   : > { %6352 = vmatmul.mubr.msk.bf16.vlgmr.msra.gmra.mrb[24].mxu0 %vm2470_vm4, %v4636_v40 }
 0xd41   : > { %6377 = vmatprep.mubr.msk.bf16.mxu0 %vm7473_vm0, %v7471_v4  ;;  %6362 = vmatpush3.bf16.msra.mxu0 %v6707_v21 }
 0xd42   : > { %6363 = vmatprep.subr.bf16.mxu0 %v7471_v4 }
 0xd43   : > { %4629 = vadd.xlane.f32.xlu1 %v4628_v50 }
 0xd45   : > { %6364 = vmatpush3.bf16.msra.mxu0 %v6708_v30 }
 0xd46   : > { %6365 = vmatprep.subr.bf16.mxu0 %v7471_v4 }
 0xd49   : > { %6366 = vmatpush3.bf16.msra.mxu0 %v6709_v15 }
 0xd4a   : > { %6367 = vmatprep.subr.bf16.mxu0 %v7471_v4 }
 0xd4d   : > { %6368 = vmatpush3.bf16.msra.mxu0 %v6710_v1 }
 0xd4e   : > { %6369 = vmatprep.subr.bf16.mxu0 %v7471_v4 }
 0xd51   : > { %6370 = vmatpush3.bf16.msra.mxu0 %v6711_v11 }
 0xd52   : > { %6371 = vmatprep.subr.bf16.mxu0 %v7471_v4 }
 0xd55   : > { %6372 = vmatpush3.bf16.msra.mxu0 %v6712_v53 }
 0xd56   : > { %6373 = vmatprep.subr.bf16.mxu0 %v7471_v4 }
 0xd97   : > { %v4612_v34 = vpop.xlane.xlu1 %4611 }
 0xd99   : > { %v4615_v49 = vpop.xlane.xlu0 %4614 }
 0xda0   : > { %v4618_v56 = vpop.xlane.xlu1 %4617 }
 0xda1   : > { %6811 = vrcp.f32 %v4618_v56 }
 0xda4   : > { %v4621_v58 = vpop.xlane.xlu0 %4620 }
 0xda9   : > { %v4627_v46 = vpop.xlane.xlu0 %4626 }
 0xdab   : > { %v6812_v0 = vpop.eup %6811 }
 0xdb3   : > { %v4633_v3 = vpop.xlane.xlu0 %4632 }
 0xdcc   : > { %v4624_v59 = vpop.xlane.xlu1 %4623 }
 0xdd0   : > { %v4630_v33 = vpop.xlane.xlu1 %4629 }
 0xdd1   : > { %6813 = vrcp.f32 %v4630_v33 }
 0xdd2   : > { %6815 = vrcp.f32 %v4621_v58 }
 0xdd3   : > { %6817 = vrcp.f32 %v4633_v3 }
 0xdd4   : > { %6819 = vrcp.f32 %v4612_v34 }
 0xdd5   : > { %6821 = vrcp.f32 %v4624_v59 }
 0xdd6   : > { %6823 = vrcp.f32 %v4615_v49 }
 0xdd7   : > { %6825 = vrcp.f32 %v4627_v46 }
 0xddb   : > { %v6814_v45 = vpop.eup %6813 }
 0xddc   : > { %v6816_v5 = vpop.eup %6815 }
 0xddd   : > { %v6818_v19 = vpop.eup %6817 }
 0xdde   : > { %v6820_v51 = vpop.eup %6819 }
 0xddf   : > { %v6822_v20 = vpop.eup %6821 }
 0xde0   : > { %v6824_v26 = vpop.eup %6823 }
 0xde1   : > { %v6826_v31 = vpop.eup %6825 }
 0xde8   : > { %v4675_v60 = vpop.f32.mrb[20].mxu0 }
 0xde9   : > { %v6341_v7 = vpop.f32.mrb[21].mxu0  ;;  %v4822_v28 = vmul.f32 %v6820_v51, %v4675_v60 }
 0xdea   : > { %v4678_v47 = vpop.f32.mrb[22].mxu0 }
 0xdeb   : > { %v4719_v48 = vpop.f32.mrb[48].mxu1  ;;  %v6342_v2 = vpop.f32.mrb[23].mxu0  ;;  %v4823_v32 = vmul.f32 %v6824_v26, %v4678_v47 }
 0xdec   : > { %v6347_v54 = vpop.f32.mrb[49].mxu1  ;;  %v4824_v6 = vmul.f32 %v6812_v0, %v4719_v48 }
 0xded   : > { %v4722_v43 = vpop.f32.mrb[50].mxu1 }
 0xdee   : > { %v6348_v44 = vpop.f32.mrb[51].mxu1  ;;  %v4825_v13 = vmul.f32 %v6816_v5, %v4722_v43 }
 0xdfa   : > { %v4807_v41 = vpop.f32.mrb[52].mxu1 }
 0xdfb   : > { %v4828_v9 = vmul.f32 %v6814_v45, %v4807_v41  ;;  %v6359_v17 = vpop.f32.mrb[53].mxu1 }
 0xdfc   : > { %v4810_v62 = vpop.f32.mrb[54].mxu1 }
 0xdfd   : > { %v4846_v14 = vcombine.low %v4824_v6, %v4828_v9  ;;  %v4847_v22 = vcombine.high %v4824_v6, %v4828_v9  ;;  %v4829_v23 = vmul.f32 %v6818_v19, %v4810_v62  ;;  %v6360_v63 = vpop.f32.mrb[55].mxu1 }
 0xdff   : > { %v4914_v24 = vcombine.low %v4825_v13, %v4829_v23  ;;  %v4915_v18 = vcombine.high %v4825_v13, %v4829_v23  ;;  %v4854_v37 = vrot.slane %v4846_v14, %v8198_v27  ;;  %v4861_v38 = vrot.slane %v4847_v22, %v8198_v27 }
 0xe01   : > { %v4922_v53 = vrot.slane %v4914_v24, %v8198_v27  ;;  %v4929_v34 = vrot.slane %v4915_v18, %v8198_v27  ;;  %v6713_v18 = vld [vmem:[#allocation21 + $0x30] sm:$0xff]  }
 0xe02   : > { %6374 = vmatpush3.bf16.msra.mxu0 %v6713_v18 }
 0xe03   : > { %6375 = vmatprep.subr.bf16.mxu0 %v7471_v4 }
 0xe13   : > { %v4763_v25 = vpop.f32.mrb[24].mxu0 }
 0xe14   : > { %v4826_v29 = vmul.f32 %v6822_v20, %v4763_v25  ;;  %v6353_v10 = vpop.f32.mrb[25].mxu0 }
 0xe15   : > { %v4766_v16 = vpop.f32.mrb[26].mxu0 }
 0xe16   : > { %v4830_v35 = vcombine.low %v4822_v28, %v4826_v29  ;;  %v4831_v61 = vcombine.high %v4822_v28, %v4826_v29  ;;  %v4827_v36 = vmul.f32 %v6826_v31, %v4766_v16  ;;  %v6354_v52 = vpop.f32.mrb[27].mxu0 }
 0xe18   : > { %v4838_v39 = vrot.slane %v4830_v35, %v8198_v27  ;;  %v4845_v40 = vrot.slane %v4831_v61, %v8198_v27  ;;  %v4898_v50 = vcombine.low %v4823_v32, %v4827_v36  ;;  %v4899_v21 = vcombine.high %v4823_v32, %v4827_v36 }
 0xe1a   : > { %v4862_v30 = vcombine.low %v4838_v39, %v4854_v37  ;;  %v4863_v15 = vcombine.high %v4838_v39, %v4854_v37  ;;  %v4878_v1 = vcombine.low %v4845_v40, %v4861_v38  ;;  %v4879_v11 = vcombine.high %v4845_v40, %v4861_v38 }
 0xe1b   : > { %v4906_v49 = vrot.slane %v4898_v50, %v8198_v27  ;;  %v4913_v56 = vrot.slane %v4899_v21, %v8198_v27  ;;  %v6714_v21 = vld [vmem:[#allocation21 + $0x38] sm:$0xff]  }
 0xe1c   : > { %v4870_v58 = vrot.slane %v4862_v30, %v8204_v42  ;;  %v4877_v59 = vrot.slane %v4863_v15, %v8204_v42  ;;  %v4886_v60 = vrot.slane %v4878_v1, %v8204_v42  ;;  %v4893_v7 = vrot.slane %v4879_v11, %v8204_v42  ;;  %6376 = vmatpush3.bf16.msra.mxu0 %v6714_v21  ;;  %v6744_v21 = vld [vmem:[#allocation30 + $0x10] sm:$0xff]  }
 0xe1d   : > { %v4930_v46 = vcombine.low %v4906_v49, %v4922_v53  ;;  %v4931_v47 = vcombine.high %v4906_v49, %v4922_v53  ;;  %v4946_v48 = vcombine.low %v4913_v56, %v4929_v34  ;;  %v4947_v2 = vcombine.high %v4913_v56, %v4929_v34 }
 0xe1e   : > { %v4966_v54 = vcombine.low %v4870_v58, %v4877_v59  ;;  %v6062_v33 = vcombine.high %v4870_v58, %v4877_v59  ;;  %v4982_v43 = vcombine.low %v4886_v60, %v4893_v7  ;;  %v6063_v44 = vcombine.high %v4886_v60, %v4893_v7 }
 0xe1f   : > { %v4938_v3 = vrot.slane %v4930_v46, %v8204_v42  ;;  %v4945_v0 = vrot.slane %v4931_v47, %v8204_v42  ;;  %v4954_v45 = vrot.slane %v4946_v48, %v8204_v42  ;;  %v4961_v41 = vrot.slane %v4947_v2, %v8204_v42 }
 0xe20   : > { %v4973_v5 = vrot.slane %v4966_v54, %v8198_v27  ;;  %v4981_v6 = vrot.slane %v6062_v33, %v8198_v27  ;;  %v4989_v9 = vrot.slane %v4982_v43, %v8198_v27  ;;  %v4997_v17 = vrot.slane %v6063_v44, %v8198_v27 }
 0xe21   : > { %v5034_v19 = vcombine.low %v4938_v3, %v4945_v0  ;;  %v6064_v62 = vcombine.high %v4938_v3, %v4945_v0  ;;  %v5050_v13 = vcombine.low %v4954_v45, %v4961_v41  ;;  %v6065_v14 = vcombine.high %v4954_v45, %v4961_v41  ;;  %v6066_v0 = vld [vmem:[#allocation22] ss:$0 sm:$0xff] }
 0xe22   : > { %v4999_v22 = vcombine.high %v4973_v5, %v4981_v6  ;;  %v5015_v23 = vcombine.high %v4989_v9, %v4997_v17  ;;  %v4998_v63 = vcombine.low %v4973_v5, %v4981_v6  ;;  %v5014_v24 = vcombine.low %v4989_v9, %v4997_v17 }
 0xe23   : > { %v5041_v51 = vrot.slane %v5034_v19, %v8198_v27  ;;  %v5049_v20 = vrot.slane %v6064_v62, %v8198_v27  ;;  %v5057_v25 = vrot.slane %v5050_v13, %v8198_v27  ;;  %v5065_v26 = vrot.slane %v6065_v14, %v8198_v27  ;;  %v6715_v13 = vld [vmem:[#allocation27] ss:$8 sps:$4 sm:$0xff]   ;;  %v6717_v14 = vld [vmem:[#allocation27 + $0x4] ss:$8 sps:$4 sm:$0xff]  }
 0xe24   : > { %v5013_v28 = vrot.slane %v4999_v22, %v8204_v42  ;;  %v5029_v29 = vrot.slane %v5015_v23, %v8204_v42  ;;  %v5006_v10 = vrot.slane %v4998_v63, %v8204_v42  ;;  %v5022_v31 = vrot.slane %v5014_v24, %v8204_v42  ;;  %v6720_v22 = vld [vmem:[#allocation27 + $0x14] ss:$8 sps:$4 sm:$0xff]   ;;  %5396 = vmatprep.subr.bf16.mxu1 %v6717_v14  ;;  %v6718_v23 = vld [vmem:[#allocation27 + $0x10] ss:$8 sps:$4 sm:$0xff]  }
 0xe25   : > { %v5067_v16 = vcombine.high %v5041_v51, %v5049_v20  ;;  %v5083_v32 = vcombine.high %v5057_v25, %v5065_v26  ;;  %v5066_v35 = vcombine.low %v5041_v51, %v5049_v20  ;;  %v5082_v61 = vcombine.low %v5057_v25, %v5065_v26  ;;  %5397 = vmatpush1.bf16.msra.mxu1 %v6715_v13  ;;  %v6723_v26 = vld [vmem:[#allocation27 + $0x24] ss:$8 sps:$4 sm:$0xff]  }
 0xe26   : > { %v5032_v36 = vcombine.low %v5013_v28, %v5029_v29  ;;  %v5031_v52 = vcombine.high %v5006_v10, %v5022_v31  ;;  %v5030_v37 = vcombine.low %v5006_v10, %v5022_v31  ;;  %v5033_v38 = vcombine.high %v5013_v28, %v5029_v29  ;;  %5398 = vmatprep.subr.bf16.mxu1 %v6720_v22  ;;  %v6721_v28 = vld [vmem:[#allocation27 + $0x20] ss:$8 sps:$4 sm:$0xff]   ;;  %v6726_v29 = vld [vmem:[#allocation27 + $0x34] ss:$8 sps:$4 sm:$0xff]   ;;  %v6724_v10 = vld [vmem:[#allocation27 + $0x30] ss:$8 sps:$4 sm:$0xff]  }
 0xe27   : > { %v5081_v27 = vrot.slane %v5067_v16, %v8204_v42  ;;  %v5097_v39 = vrot.slane %v5083_v32, %v8204_v42  ;;  %v5074_v40 = vrot.slane %v5066_v35, %v8204_v42  ;;  %v5090_v50 = vrot.slane %v5082_v61, %v8204_v42  ;;  %v6729_v31 = vld [vmem:[#allocation27 + $0x44] ss:$8 sps:$4 sm:$0xff]   ;;  %v6727_v16 = vld [vmem:[#allocation27 + $0x40] ss:$8 sps:$4 sm:$0xff]   ;;  %v6732_v32 = vld [vmem:[#allocation27 + $0x54] ss:$8 sps:$4 sm:$0xff]  }
 0xe28   : > { %v6730_v35 = vld [vmem:[#allocation27 + $0x50] ss:$8 sps:$4 sm:$0xff]   ;;  %v6735_v61 = vld [vmem:[#allocation27 + $0x64] ss:$8 sps:$4 sm:$0xff]  }
 0xe29   : > { %v5100_v30 = vcombine.low %v5081_v27, %v5097_v39  ;;  %v5098_v15 = vcombine.low %v5074_v40, %v5090_v50  ;;  %v5099_v1 = vcombine.high %v5074_v40, %v5090_v50  ;;  %v5101_v11 = vcombine.high %v5081_v27, %v5097_v39  ;;  %5399 = vmatpush1.bf16.msra.mxu1 %v6718_v23  ;;  %v6738_v27 = vld [vmem:[#allocation27 + $0x74] ss:$8 sps:$4 sm:$0xff]   ;;  %v6742_v39 = vld [vmem:[#allocation30 + $0x8] sm:$0xff]  }
 0xe2a   : > { %5400 = vmatprep.subr.bf16.mxu1 %v6723_v26  ;;  %v6743_v40 = vld [vmem:[#allocation30 + $0x50] sm:$0xff]  }
 0xe2b   : > { %v6625_v53 = vpack.i.bf16 %v5100_v30, %v5032_v36  ;;  %v6620_v4 = vpack.i.bf16 %v5099_v1, %v5031_v52  ;;  %v6630_v34 = vpack.i.bf16 %v5101_v11, %v5033_v38  ;;  %v6739_v36 = vld [vmem:[#allocation30 + $0x40] sm:$0xff]   ;;  %v6736_v50 = vld [vmem:[#allocation27 + $0x70] ss:$8 sps:$4 sm:$0xff]  }
 0xe2c   : > { %v6740_v52 = vld [vmem:[#allocation30] sm:$0xff]   ;;  %6183 = vmatprep.subr.bf16.mxu0 %v6739_v36  ;;  %v6745_v30 = vld [vmem:[#allocation30 + $0x58] sm:$0xff]  }
 0xe2d   : > { %6626 = vrot.lane.b32.xlu0 %v6625_v53, %s7475_s13  ;;  %6621 = vrot.lane.b32.xlu1 %v6620_v4, %s7476_s3  ;;  %v6733_v38 = vld [vmem:[#allocation27 + $0x60] ss:$8 sps:$4 sm:$0xff]   ;;  %s8922_s13 = sld [smem:[#allocation61_spill]] }
 0xe2e   : > { %5401 = vmatpush1.bf16.msra.mxu1 %v6721_v28  ;;  %v6747_v1 = vld [vmem:[#allocation30 + $0x60] sm:$0xff]   ;;  %v6749_v53 = vld [vmem:[#allocation30 + $0x68] sm:$0xff]  }
 0xe2f   : > { %5402 = vmatprep.subr.bf16.mxu1 %v6726_v29  ;;  %v6748_v11 = vld [vmem:[#allocation30 + $0x20] sm:$0xff]  }
 0xe30   : > { %v6093_v29 = vld [vmem:[#allocation31] ss:$0 sm:$0xff] }
 0xe31   : > { %6631 = vrot.lane.b32.xlu1 %v6630_v34, %s7474_s27 }
 0xe32   : > { %5403 = vmatpush1.bf16.msra.mxu1 %v6724_v10 }
 0xe33   : > { %5404 = vmatprep.subr.bf16.mxu1 %v6729_v31  ;;  %s1050_s3 = scalar_lea.vmem %s8922_s13, %s8110_s30 }
 0xe36   : > { %5405 = vmatpush1.bf16.msra.mxu1 %v6727_v16 }
 0xe37   : > { %5406 = vmatprep.subr.bf16.mxu1 %v6732_v32 }
 0xe3a   : > { %5407 = vmatpush1.bf16.msra.mxu1 %v6730_v35 }
 0xe3b   : > { %5408 = vmatprep.subr.bf16.mxu1 %v6735_v61 }
 0xe3e   : > { %5409 = vmatpush1.bf16.msra.mxu1 %v6733_v38 }
 0xe3f   : > { %5410 = vmatprep.subr.bf16.mxu1 %v6738_v27 }
 0xe42   : > { %5411 = vmatpush1.bf16.msra.mxu1 %v6736_v50 }
 0xe9f   : > { %v6627_v49 = vpop.permute.xlu0 %6626  ;;  %v6622_v56 = vpop.permute.xlu1 %6621 }
 0xea0   : > { %v6624_v58 = vunpack.i.h.bf16 %v6622_v56  ;;  %v6623_v59 = vunpack.i.l.bf16 %v6622_v56  ;;  %v6629_v42 = vunpack.i.h.bf16 %v6627_v49  ;;  %v6628_v60 = vunpack.i.l.bf16 %v6627_v49 }
 0xea2   : > { %v5127_v7 = vsel %vm2265_vm1, %v5098_v15, %v6624_v58  ;;  %v5126_v46 = vsel %vm2265_vm1, %v5030_v37, %v6623_v59  ;;  %v6741_v37 = vld [vmem:[#allocation30 + $0x48] sm:$0xff]   ;;  %v6746_v15 = vld [vmem:[#allocation30 + $0x18] sm:$0xff]  }
 0xea3   : > { %v6632_v47 = vpop.permute.xlu1 %6631  ;;  %v5128_v54 = vsel %vm3037_vm5, %v5126_v46, %v6628_v60  ;;  %v5129_v33 = vsel %vm3037_vm5, %v5127_v7, %v6629_v42  ;;  %v6075_v60 = vld [vmem:[#allocation24] ss:$0 sm:$0xff] }
 0xea4   : > { %v6634_v48 = vunpack.i.h.bf16 %v6632_v47  ;;  %v6633_v2 = vunpack.i.l.bf16 %v6632_v47 }
 0xea6   : > { %v5130_v43 = vsel %vm3040_vm6, %v5128_v54, %v6633_v2  ;;  %v5131_v44 = vsel %vm3040_vm6, %v5129_v33, %v6634_v48  ;;  %v6076_v2 = vld [vmem:[#allocation25] ss:$0 sm:$0xff] }
 0xea7   : > { %v5132_v3 = vpack.c.bf16 %v5131_v44, %v5130_v43 }
 0xea9   : > { %6378 = vmatmul.mubr.bf16.vlgmr.msra.gmra.mrb[28].mxu0 %v5132_v3  ;;  %v6750_v3 = vld [vmem:[#allocation30 + $0x28] sm:$0xff]  }
 0xeaa   : > { %6184 = vmatpush3.bf16.msra.mxu0 %v6740_v52 }
 0xeab   : > { %6185 = vmatprep.subr.bf16.mxu0 %v6741_v37 }
 0xeae   : > { %6186 = vmatpush3.bf16.msra.mxu0 %v6742_v39 }
 0xeaf   : > { %6187 = vmatprep.subr.bf16.mxu0 %v6743_v40 }
 0xeb2   : > { %6188 = vmatpush3.bf16.msra.mxu0 %v6744_v21 }
 0xeb3   : > { %6189 = vmatprep.subr.bf16.mxu0 %v6745_v30 }
 0xeb6   : > { %6190 = vmatpush3.bf16.msra.mxu0 %v6746_v15 }
 0xeb7   : > { %6191 = vmatprep.subr.bf16.mxu0 %v6747_v1 }
 0xeba   : > { %6192 = vmatpush3.bf16.msra.mxu0 %v6748_v11 }
 0xebb   : > { %6193 = vmatprep.subr.bf16.mxu0 %v6749_v53 }
 0xebe   : > { %6194 = vmatpush3.bf16.msra.mxu0 %v6750_v3 }
 0xf7c   : > { %v5238_v45 = vpop.f32.mrb[28].mxu0 }
 0xf7d   : > { %v5239_v41 = vadd.f32 %v6066_v0, %v5238_v45  ;;  %v6379_v5 = vpop.f32.mrb[29].mxu0  ;;  %v6752_v45 = vld [vmem:[#allocation30 + $0x30] sm:$0xff]  }
 0xf7e   : > { %v5241_v6 = vpop.f32.mrb[30].mxu0  ;;  %v6754_v5 = vld [vmem:[#allocation30 + $0x38] sm:$0xff]  }
 0xf7f   : > { %v8792_v9 = vadd.f32 %v5239_v41, %v8492_v12  ;;  %v5242_v17 = vadd.f32 %v6066_v0, %v5241_v6  ;;  %v6380_v19 = vpop.f32.mrb[31].mxu0  ;;  %v6751_v0 = vld [vmem:[#allocation30 + $0x70] sm:$0xff]   ;;  %v6753_v41 = vld [vmem:[#allocation30 + $0x78] sm:$0xff]  }
 0xf80   : > { %6195 = vmatprep.subr.bf16.mxu0 %v6751_v0  ;;  %v5304_v6 = vld [vmem:[#allocation28] sm:$0x3] }
 0xf81   : > { %v8795_v62 = vadd.f32 %v5242_v17, %v8495_v8  ;;  %5249 = vadd.xlane.f32.xlu1 %v8792_v9  ;;  %6196 = vmatpush3.bf16.msra.mxu0 %v6752_v45  ;;  %v5309_v17 = vrot.slane %v5304_v6, %v8151_v55  ;;  %v5313_v19 = vrot.slane %v5304_v6, %v8154_v57 }
 0xf82   : > { %6197 = vmatprep.subr.bf16.mxu0 %v6753_v41 }
 0xf83   : > { %5251 = vadd.xlane.f32.xlu0 %v8795_v62 }
 0xf85   : > { %6198 = vmatpush3.bf16.msra.mxu0 %v6754_v5 }
0x100e   : > { %v5250_v63 = vpop.xlane.xlu1 %5249 }
0x100f   : > { %v5253_v12 = vmul.f32 0.0078125, %v5250_v63 }
0x1010   : > { %v5252_v24 = vpop.xlane.xlu0 %5251 }
0x1011   : > { %v8800_v18 = vsub.f32 %v8792_v9, %v5253_v12  ;;  %v5254_v8 = vmul.f32 0.0078125, %v5252_v24 }
0x1013   : > { %v8803_v51 = vsub.f32 %v8795_v62, %v5254_v8  ;;  %v5257_v20 = vmul.f32 %v8800_v18, %v8800_v18 }
0x1015   : > { %5259 = vadd.xlane.f32.xlu0 %v5257_v20  ;;  %v5258_v25 = vmul.f32 %v8803_v51, %v8803_v51 }
0x1017   : > { %5261 = vadd.xlane.f32.xlu1 %v5258_v25 }
0x10a2   : > { %v5260_v4 = vpop.xlane.xlu0 %5259 }
0x10a3   : > { %v5263_v34 = vmul.f32 0.0078125, %v5260_v4 }
0x10a4   : > { %v5262_v49 = vpop.xlane.xlu1 %5261 }
0x10a5   : > { %v5265_v56 = vadd.f32 1e-05, %v5263_v34  ;;  %v5264_v58 = vmul.f32 0.0078125, %v5262_v49 }
0x10a7   : > { %6827 = vrsqrt.f32 %v5265_v56  ;;  %v5266_v59 = vadd.f32 1e-05, %v5264_v58 }
0x10a9   : > { %6829 = vrsqrt.f32 %v5266_v59 }
0x10b1   : > { %v6828_v42 = vpop.eup %6827 }
0x10b2   : > { %v5269_v7 = vmul.f32 %v6828_v42, %v8800_v18 }
0x10b3   : > { %v6830_v46 = vpop.eup %6829 }
0x10b4   : > { %v5270_v47 = vmul.f32 %v6830_v46, %v8803_v51  ;;  %v5277_v48 = vmul.f32 %v6075_v60, %v5269_v7 }
0x10b6   : > { %v5278_v54 = vmul.f32 %v6075_v60, %v5270_v47  ;;  %v5285_v33 = vadd.f32 %v6076_v2, %v5277_v48 }
0x10b8   : > { %v5286_v43 = vadd.f32 %v6076_v2, %v5278_v54 }
0x10ba   : > { %v5287_v44 = vpack.c.bf16 %v5286_v43, %v5285_v33 }
0x10bc   : > { %5429 = vmatmul.mubr.bf16.vlgmr.msra.gmra.mrb[56].mxu1 %v5287_v44 }
0x118f   : > { %v5430_v13 = vpop.f32.mrb[56].mxu1 }
0x1190   : > { %v5431_v14 = vadd.f32 %v5430_v13, %v5309_v17  ;;  %v5432_v22 = vpop.f32.mrb[57].mxu1 }
0x1191   : > { %v5433_v23 = vadd.f32 %v5432_v22, %v5313_v19  ;;  %v5434_v63 = vpop.f32.mrb[58].mxu1 }
0x1192   : > { %v5435_v12 = vadd.f32 %v5434_v63, %v5309_v17  ;;  %v5436_v24 = vpop.f32.mrb[59].mxu1  ;;  %v5439_v8 = vmax.f32 %v5431_v14, 0.0 }
0x1193   : > { %v5437_v18 = vadd.f32 %v5436_v24, %v5313_v19  ;;  %v5440_v20 = vmax.f32 %v5433_v23, 0.0 }
0x1194   : > { %v5441_v51 = vmax.f32 %v5435_v12, 0.0 }
0x1195   : > { %v5442_v25 = vmax.f32 %v5437_v18, 0.0 }
0x1196   : > { %v5443_v26 = vpack.c.bf16 %v5441_v51, %v5439_v8 }
0x1197   : > { %v5444_v28 = vpack.c.bf16 %v5442_v25, %v5440_v20 }
0x1199   : > { %5612 = vmatprep.mubr.bf16.mxu0 %v5444_v28 }
0x119a   : > { %5613 = vmatmul.mubr.bf16.vlgmr.msra.gmra.mrb[32].mxu0 %v5443_v26 }
0x126d   : > { %v6199_v55 = vpop.f32.mrb[32].mxu0 }
0x126e   : > { %v6200_v57 = vpop.f32.mrb[33].mxu0 }
0x126f   : > { %v6201_v10 = vadd.f32 %v6200_v57, %v6199_v55  ;;  %v6202_v31 = vpop.f32.mrb[34].mxu0 }
0x1270   : > { %v6203_v16 = vpop.f32.mrb[35].mxu0 }
0x1271   : > { %v5615_v32 = vadd.f32 %v6201_v10, %v6093_v29  ;;  %v6204_v35 = vadd.f32 %v6203_v16, %v6202_v31 }
0x1273   : > { %v5621_v61 = vadd.f32 %v5615_v32, %v8792_v9  ;;  %v5618_v36 = vadd.f32 %v6204_v35, %v6093_v29 }
0x1275   : > { %5623 = vst [vmem:[%s1050_s3] sm:$0xff] %v5621_v61  ;;  %v5622_v52 = vadd.f32 %v5618_v36, %v8795_v62 }
0x1277   : > { %5624 = vst [vmem:[%s1050_s3 + $0x8] sm:$0xff] %v5622_v52 }
0x1278 PF: > { %s8923_s24 = sld [smem:[#allocation44_spill]] }
0x127e   : > { %s45_s5 = sadd.s32 1, %s8923_s24  }
0x127f   : > { %p42_p11 = scmp.ge.s32.totalorder %s45_s5, 4  }
0x1281   :  { %44 = sbr.rel (!%p42_p11) target bundleno = 27 (0x1b), region = 236 }
0x1288   :  { %5646 = vsyncpa [#allocation3], 1 }
0x1289   :  { %5648 = vsyncpa [#allocation3 + $0x1], 1 }
0x128a   :  { %5649 = vsyncpa [#allocation5], 1 }
0x128b   :  { %5650 = vsyncpa [#allocation8], 1 }
0x128c   :  { %5651 = vsyncpa [#allocation11], 1 }
0x128d   :  { %5652 = vsyncpa [#allocation14], 1 }
0x128e   :  { %5653 = vsyncpa [#allocation17], 1 }
0x128f   :  { %5654 = vsyncpa [#allocation20], 1 }
0x1290   :  { %5655 = vsyncpa [#allocation23], 1 }
0x1291   :  { %5656 = vsyncpa [#allocation26], 1 }
0x1292   :  { %5657 = vsyncpa [#allocation29], 1 }
0x1293   :  { %5658 = vsyncpa [#allocation32], 1 }

// kernel: transformer_decoder.3
= control target key start
LH: loop header
LB: loop body
LE: loop exit
PB: predicated region body
PF: predicated region fallthrough
CT: control target
= control target key end

     0   :  { %s7633_s0 = inlined_call_operand.vmem [shape: f32[2,16,128], index: 0, kind: input, shape index: {}]   ;;  %s7634_s1 = inlined_call_operand.vmem [shape: f32[2,16,128], index: 1, kind: input, shape index: {}]   ;;  %s7635_s2 = inlined_call_operand.vmem [shape: f32[2,1,16], index: 2, kind: input, shape index: {}]   ;;  %s7636_s3 = inlined_call_operand.vmem [shape: f32[2,1,16], index: 3, kind: input, shape index: {}]   ;;  %s7637_s4 = inlined_call_operand.vmem [shape: f32[1,128], index: 4, kind: input, shape index: {}]   ;;  %s7638_s5 = inlined_call_operand.vmem [shape: f32[1,128], index: 5, kind: input, shape index: {}]   ;;  %s7639_s6 = inlined_call_operand.vmem [shape: bf16[128,384], index: 6, kind: input, shape index: {}]   ;;  %s7640_s7 = inlined_call_operand.vmem [shape: f32[1,384], index: 7, kind: input, shape index: {}]   ;;  %s7641_s8 = inlined_call_operand.vmem [shape: bf16[128,128], index: 8, kind: input, shape index: {}]   ;;  %s7642_s9 = inlined_call_operand.vmem [shape: f32[1,128], index: 9, kind: input, shape index: {}]   ;;  %s7643_s10 = inlined_call_operand.vmem [shape: f32[1,128], index: 10, kind: input, shape index: {}]   ;;  %s7644_s11 = inlined_call_operand.vmem [shape: f32[1,128], index: 11, kind: input, shape index: {}]   ;;  %s7645_s12 = inlined_call_operand.vmem [shape: bf16[128,128], index: 12, kind: input, shape index: {}]   ;;  %s7646_s13 = inlined_call_operand.vmem [shape: f32[1,128], index: 13, kind: input, shape index: {}]   ;;  %s7647_s14 = inlined_call_operand.vmem [shape: bf16[128,256], index: 14, kind: input, shape index: {}]   ;;  %s7648_s15 = inlined_call_operand.vmem [shape: f32[1,256], index: 15, kind: input, shape index: {}]   ;;  %s7649_s16 = inlined_call_operand.vmem [shape: bf16[128,128], index: 16, kind: input, shape index: {}]   ;;  %s7650_s17 = inlined_call_operand.vmem [shape: f32[1,128], index: 17, kind: input, shape index: {}]   ;;  %s7651_s18 = inlined_call_operand.vmem [shape: f32[1,128], index: 18, kind: input, shape index: {}]   ;;  %s7652_s19 = inlined_call_operand.vmem [shape: f32[1,128], index: 19, kind: input, shape index: {}]   ;;  %s7653_s20 = inlined_call_operand.vmem [shape: bf16[128,256], index: 20, kind: input, shape index: {}]   ;;  %s7654_s21 = inlined_call_operand.vmem [shape: f32[1,256], index: 21, kind: input, shape index: {}]   ;;  %s7655_s22 = inlined_call_operand.vmem [shape: bf16[256,128], index: 22, kind: input, shape index: {}]   ;;  %s7656_s23 = inlined_call_operand.vmem [shape: f32[1,128], index: 23, kind: input, shape index: {}]   ;;  %s7657_s24 = inlined_call_operand.vmem [shape: f32[1,128], index: 24, kind: input, shape index: {}]   ;;  %s7658_s25 = inlined_call_operand.vmem [shape: f32[1,128], index: 25, kind: input, shape index: {}]   ;;  %s7659_s26 = inlined_call_operand.hbm [shape: f32[2,16,128], index: 26, kind: output, shape index: {}]  }
   0x1   :  { %7680 = sst [smem:[#allocation12_spill]] %s7633_s0 }
   0x2   :  { %7681 = sst [smem:[#allocation13_spill]] %s7634_s1 }
   0x3   :  { %7682 = sst [smem:[#allocation14_spill]] %s7635_s2 }
   0x4   :  { %7683 = sst [smem:[#allocation15_spill]] %s7636_s3 }
   0x5   :  { %7684 = sst [smem:[#allocation16_spill]] %s7637_s4 }
   0x6   :  { %7685 = sst [smem:[#allocation17_spill]] %s7638_s5 }
   0x7   :  { %7686 = sst [smem:[#allocation18_spill]] %s7639_s6 }
   0x8   :  { %7687 = sst [smem:[#allocation19_spill]] %s7640_s7 }
   0x9   :  { %7688 = sst [smem:[#allocation20_spill]] %s7641_s8 }
   0xa   :  { %7689 = sst [smem:[#allocation21_spill]] %s7642_s9 }
   0xb   :  { %7690 = sst [smem:[#allocation22_spill]] %s7643_s10 }
   0xc   :  { %7691 = sst [smem:[#allocation23_spill]] %s7657_s24 }
   0xd   :  { %7692 = sst [smem:[#allocation24_spill]] %s7658_s25 }
   0xe   :  { %7693 = sst [smem:[#allocation25_spill]] %s7659_s26 }
   0xf   :  { %31 = vsyncpa [#allocation3], 0 }
  0x10   :  { %33 = vsyncpa [#allocation3 + $0x1], 0  ;;  %s6492_s27 = smov 0   ;;  %s6494_s3 = smov 0  }
  0x11   :  { %s6496_s7 = smov 0   ;;  %s6498_s28 = smov 0  }
  0x12 LB: > { %7694 = sst [smem:[#allocation5_spill]] %s6331_s27  ;;  %s6513_s8 = sadd.s32 4294967295, %s6343_s28   ;;  %s6343_s28 = sphi %s6498_s28, %s7725_s28   ;;  %s6339_s7 = sphi %s6496_s7, %s7727_s7   ;;  %s6335_s3 = sphi %s6494_s3, %s7729_s3   ;;  %s6331_s27 = sphi %s6492_s27, %s7728_s27  }
  0x13   : > { %7695 = sst [smem:[#allocation6_spill]] %s6339_s7  ;;  %s5558_s4 = sadd.s32 4294967294, %s6343_s28  }
  0x14   : > { %7696 = sst [smem:[#allocation7_spill]] %s6343_s28  ;;  %s6517_s29 = sadd.s32 1, %s6343_s28  }
  0x15   : > { %7697 = sst [smem:[#allocation8_spill]] %s6517_s29  ;;  %s612_s0 = sadd.s32 1, %s6339_s7 }
  0x16   : > { %s609_s9 = ssub.s32 %s6343_s28, %s6517_s29  ;;  %p622_p0 = scmp.ne.s32.totalorder %s6339_s7, %s6335_s3 }
  0x17   : > { %p610_p1 = scmp.eq.s32.totalorder %s609_s9, 0  ;;  %p623_p2 = scmp.eq.s32.totalorder %s6513_s8, 1 }
  0x18   : > { %p628_p3 = scmp.ne.s32.totalorder %s6335_s3, %s6331_s27  ;;  %p629_p4 = scmp.eq.s32.totalorder %s5558_s4, 1 }
  0x19   : > { %s6528_s30 = scalar_select %p610_p1, %s6339_s7, %s612_s0  }
  0x1a   : > { %p6530_p5 = por %p623_p2, %p622_p0  ;;  %p6534_p6 = por %p629_p4, %p628_p3 }
  0x1b   : > { %7698 = sst [smem:[#allocation9_spill]] %s6528_s30  ;;  %p5561_p7 = scmp.ge.s32.totalorder %s6343_s28, 1 }
  0x1c   : > { %s7699_s2 = scalar_select %p6530_p5, 1, 0 }
  0x1d   : > { %s7701_s5 = scalar_select %p6534_p6, 1, 0 }
  0x1e   : > { %7700 = sst [smem:[#allocation10_spill]] %s7699_s2  ;;  %p741_p8 = scmp.lt.s32.totalorder %s6343_s28, 3 }
  0x1f   : > { %7702 = sst [smem:[#allocation11_spill]] %s7701_s5 }
  0x20   : > { %p742_p9 = pnand %p5561_p7, %p741_p8 }
  0x21   : > { %p822_p10 = scmp.lt.s32.totalorder (!%p742_p9), %s6513_s8, 1  ;;  %s7703_s0 = sld [smem:[#allocation12_spill]] (!%p742_p9)  ;;  %v6345_v4 = vmov (!%p742_p9), 0.0   ;;  %v6346_v30 = vmov (!%p742_p9), 0   ;;  %vm6347_vm0 = vmmov (!%p742_p9), 0   ;;  %v919_v53 = vlaneseq (!%p742_p9) }
  0x22   : > { %745 = sbr.rel (%p742_p9) target bundleno = 4514 (0x11a2), region = 124  ;;  %s7704_s29 = sld [smem:[#allocation18_spill]] (!%p742_p9)  ;;  %5823 = vmatprep.subr.bf16.mxu1 (!%p742_p9), %v6345_v4  ;;  %1094 = vmatprep.mubr.bf16.mxu0 (!%p742_p9), %v6346_v30  ;;  %vm2052_vm1 = vcmask (!%p742_p9), 261120   ;;  %vm2257_vm4 = vcmask (!%p742_p9), 130048   ;;  %vm2824_vm5 = vcmask (!%p742_p9), 523264   ;;  %vm2827_vm6 = vcmask (!%p742_p9), 785408  }
  0x23   : > { %5839 = vmatprep.mubr.msk.bf16.mxu1 (!%p742_p9), %vm6347_vm0, %v6345_v4  ;;  %s7705_s30 = sld [smem:[#allocation16_spill]] (!%p742_p9)  ;;  %s7706_s1 = sld [smem:[#allocation17_spill]] (!%p742_p9)  ;;  %v6660_v54 = vshrl.u32 (!%p742_p9), %v919_v53, 7 }
  0x24   : > { %s7707_s4 = sld [smem:[#allocation19_spill]] (!%p742_p9)  ;;  %s7674_s27 = smov (!%p742_p9), 64  }
  0x25   : > { %v6663_v55 = vsub.s32 (!%p742_p9), 0, %v6660_v54  ;;  %v6669_v57 = vsub.s32 (!%p742_p9), 1, %v6660_v54  ;;  %s7672_s7 = smov (!%p742_p9), 32   ;;  %s7710_s26 = smov (!%p742_p9), 32  }
  0x26   : > { %s7711_s28 = smov (!%p742_p9), 96   ;;  %s7717_s24 = sld [smem:[#allocation15_spill]] (!%p742_p9) }
  0x27   : > { %s7718_s2 = sld [smem:[#allocation23_spill]] (!%p742_p9) }
  0x28   : > { %v6079_v2 = vld [vmem:[%s7704_s29 + $0x4] ss:$12 sps:$4 sm:$0xff] (!%p742_p9)   ;;  %v6081_v3 = vld [vmem:[%s7704_s29] ss:$12 sps:$4 sm:$0xff] (!%p742_p9)   ;;  %v6082_v5 = vld [vmem:[%s7704_s29 + $0x8] ss:$12 sps:$4 sm:$0xff] (!%p742_p9)  }
  0x29   : > { %s6542_s10 = scalar_select %p822_p10, %s6513_s8, 1  ;;  %v6083_v6 = vld [vmem:[%s7704_s29 + $0x1c] ss:$12 sps:$4 sm:$0xff]   ;;  %1062 = vmatprep.subr.bf16.mxu0 %v6079_v2  ;;  %5824 = vmatpush3.bf16.msra.mxu1 %v6082_v5  ;;  %v6085_v15 = vld [vmem:[%s7704_s29 + $0x18] ss:$12 sps:$4 sm:$0xff]  }
  0x2a   : > { %1063 = vmatpush1.bf16.msra.mxu0 %v6081_v3  ;;  %5825 = vmatprep.subr.bf16.mxu1 %v6345_v4  ;;  %v6086_v16 = vld [vmem:[%s7704_s29 + $0x20] ss:$12 sps:$4 sm:$0xff]   ;;  %v6089_v18 = vld [vmem:[%s7704_s29 + $0x30] ss:$12 sps:$4 sm:$0xff]   ;;  %v6090_v19 = vld [vmem:[%s7704_s29 + $0x38] ss:$12 sps:$4 sm:$0xff]  }
  0x2b   : > { %s7667_s6 = sshll.u32 %s6542_s10, 4  ;;  %1064 = vmatprep.subr.bf16.mxu0 %v6083_v6  ;;  %v6087_v17 = vld [vmem:[%s7704_s29 + $0x34] ss:$12 sps:$4 sm:$0xff]   ;;  %v6091_v20 = vld [vmem:[%s7704_s29 + $0x4c] ss:$12 sps:$4 sm:$0xff]  }
  0x2c   : > { %s6550_s9 = scalar_lea.vmem %s7703_s0, %s7667_s6  ;;  %v6093_v21 = vld [vmem:[%s7704_s29 + $0x48] ss:$12 sps:$4 sm:$0xff]   ;;  %v6094_v22 = vld [vmem:[%s7704_s29 + $0x50] ss:$12 sps:$4 sm:$0xff]   ;;  %v6097_v24 = vld [vmem:[%s7704_s29 + $0x60] ss:$12 sps:$4 sm:$0xff]   ;;  %s837_s25 = scalar_lea.vmem %s7717_s24, %s6542_s10 }
  0x2d   : > { %v839_v0 = vld [vmem:[%s6550_s9] sm:$0xff]  ;;  %v840_v1 = vld [vmem:[%s6550_s9 + $0x8] sm:$0xff]  ;;  %5826 = vmatpush3.bf16.msra.mxu1 %v6086_v16  ;;  %v6105_v31 = vld [vmem:[%s7704_s29 + $0x90] ss:$12 sps:$4 sm:$0xff]   ;;  %s7670_s0 = smov 96   ;;  %s7708_s6 = sld [smem:[#allocation14_spill]] }
  0x2e   : > { %845 = vadd.xlane.f32.xlu0 %v839_v0  ;;  %1065 = vmatpush1.bf16.msra.mxu0 %v6085_v15  ;;  %v6095_v23 = vld [vmem:[%s7704_s29 + $0x64] ss:$12 sps:$4 sm:$0xff]   ;;  %v6098_v25 = vld [vmem:[%s7704_s29 + $0x68] ss:$12 sps:$4 sm:$0xff]   ;;  %v6102_v28 = vld [vmem:[%s7704_s29 + $0x80] ss:$12 sps:$4 sm:$0xff]  }
  0x2f   : > { %5827 = vmatprep.subr.bf16.mxu1 %v6345_v4  ;;  %1066 = vmatprep.subr.bf16.mxu0 %v6087_v17  ;;  %v6099_v26 = vld [vmem:[%s7704_s29 + $0x7c] ss:$12 sps:$4 sm:$0xff]   ;;  %v6101_v27 = vld [vmem:[%s7704_s29 + $0x78] ss:$12 sps:$4 sm:$0xff]   ;;  %v6103_v29 = vld [vmem:[%s7704_s29 + $0x94] ss:$12 sps:$4 sm:$0xff]  }
  0x30   : > { %v6106_v32 = vld [vmem:[%s7704_s29 + $0x98] ss:$12 sps:$4 sm:$0xff]   ;;  %v6109_v34 = vld [vmem:[%s7704_s29 + $0xa8] ss:$12 sps:$4 sm:$0xff]   ;;  %v6110_v35 = vld [vmem:[%s7704_s29 + $0xb0] ss:$12 sps:$4 sm:$0xff]  }
  0x31   : > { %5828 = vmatpush3.bf16.msra.mxu1 %v6090_v19  ;;  %v6107_v33 = vld [vmem:[%s7704_s29 + $0xac] ss:$12 sps:$4 sm:$0xff]   ;;  %v5567_v44 = vld [vmem:[%s7705_s30] ss:$0 sm:$0xff]  ;;  %v6351_v17 = vmov 1983009808  }
  0x32   : > { %847 = vadd.xlane.f32.xlu0 %v840_v1  ;;  %1067 = vmatpush1.bf16.msra.mxu0 %v6089_v18  ;;  %v5568_v48 = vld [vmem:[%s7706_s1] ss:$0 sm:$0xff]  ;;  %v1187_v18 = vunpack.c.l.s4 %v6351_v17  ;;  %s5732_s29 = sshll.u32 %s6513_s8, 8 }
  0x33   : > { %5829 = vmatprep.subr.bf16.mxu1 %v6345_v4  ;;  %1068 = vmatprep.subr.bf16.mxu0 %v6091_v20  ;;  %v917_v56 = vld [vmem:[%s7707_s4] sm:$0x7]  ;;  %s834_s1 = scalar_lea.vmem %s7708_s6, %s6542_s10  ;;  %s7709_s4 = sld [smem:[#allocation20_spill]] }
  0x34   : > { %v922_v58 = vrot.slane %v917_v56, %v6663_v55  ;;  %v926_v59 = vrot.slane %v917_v56, %v6669_v57 }
  0x35   : > { %5830 = vmatpush3.bf16.msra.mxu1 %v6094_v22  ;;  %v6352_v22 = vmov 1934713408  }
  0x36   : > { %1069 = vmatpush1.bf16.msra.mxu0 %v6093_v21  ;;  %5831 = vmatprep.subr.bf16.mxu1 %v6345_v4  ;;  %v1188_v21 = vunpack.c.0.s8 %v1187_v18 }
  0x37   : > { %1070 = vmatprep.subr.bf16.mxu0 %v6095_v23  ;;  %v1219_v23 = vunpack.c.l.s4 %v6352_v22 }
  0x39   : > { %5832 = vmatpush3.bf16.msra.mxu1 %v6098_v25 }
  0x3a   : > { %1071 = vmatpush1.bf16.msra.mxu0 %v6097_v24  ;;  %5833 = vmatprep.subr.bf16.mxu1 %v6345_v4 }
  0x3b   : > { %1072 = vmatprep.subr.bf16.mxu0 %v6099_v26 }
  0x3d   : > { %5834 = vmatpush3.bf16.msra.mxu1 %v6102_v28 }
  0x3e   : > { %1073 = vmatpush1.bf16.msra.mxu0 %v6101_v27  ;;  %5835 = vmatprep.subr.bf16.mxu1 %v6345_v4  ;;  %v6713_v27 = vsub.s32 %v1188_v21, %v6660_v54 }
  0x3f   : > { %1074 = vmatprep.subr.bf16.mxu0 %v6103_v29 }
  0x41   : > { %5836 = vmatpush3.bf16.msra.mxu1 %v6106_v32 }
  0x42   : > { %1075 = vmatpush1.bf16.msra.mxu0 %v6105_v31  ;;  %5837 = vmatprep.subr.bf16.mxu1 %v6345_v4  ;;  %v1220_v31 = vunpack.c.0.s8 %v1219_v23 }
  0x43   : > { %1076 = vmatprep.subr.bf16.mxu0 %v6107_v33 }
  0x45   : > { %5838 = vmatpush3.bf16.msra.mxu1 %v6110_v35 }
  0x46   : > { %1077 = vmatpush1.bf16.msra.mxu0 %v6109_v34  ;;  %5843 = vmatprep.subr.bf16.mxu1 %v6345_v4 }
  0x47   : > { %5867 = vmatprep.subr.bf16.mxu0 %v6345_v4 }
  0xbb   : > { %v846_v7 = vpop.xlane.xlu0 %845 }
  0xbc   : > { %v850_v8 = vmul.f32 0.0078125, %v846_v7 }
  0xbe   : > { %v6568_v9 = vsub.f32 %v839_v0, %v850_v8 }
  0xbf   : > { %v848_v10 = vpop.xlane.xlu0 %847 }
  0xc0   : > { %v851_v11 = vmul.f32 0.0078125, %v848_v10  ;;  %v854_v12 = vmul.f32 %v6568_v9, %v6568_v9 }
  0xc2   : > { %v6572_v13 = vsub.f32 %v840_v1, %v851_v11  ;;  %856 = vadd.xlane.f32.xlu1 %v854_v12 }
  0xc4   : > { %v855_v14 = vmul.f32 %v6572_v13, %v6572_v13 }
  0xc6   : > { %858 = vadd.xlane.f32.xlu1 %v855_v14 }
 0x14f   : > { %v857_v36 = vpop.xlane.xlu1 %856 }
 0x150   : > { %v860_v37 = vmul.f32 0.0078125, %v857_v36 }
 0x152   : > { %v862_v38 = vadd.f32 1e-05, %v860_v37 }
 0x153   : > { %v859_v39 = vpop.xlane.xlu1 %858 }
 0x154   : > { %6199 = vrsqrt.f32 %v862_v38  ;;  %v861_v40 = vmul.f32 0.0078125, %v859_v39 }
 0x156   : > { %v863_v41 = vadd.f32 1e-05, %v861_v40 }
 0x158   : > { %6201 = vrsqrt.f32 %v863_v41 }
 0x15e   : > { %v6200_v42 = vpop.eup %6199 }
 0x15f   : > { %v866_v43 = vmul.f32 %v6200_v42, %v6568_v9  ;;  %v929_v9 = vsub.s32 2, %v6660_v54  ;;  %v6719_v42 = vsub.s32 %v1220_v31, %v6660_v54 }
 0x161   : > { %v874_v47 = vmul.f32 %v5567_v44, %v866_v43  ;;  %v930_v10 = vrot.slane %v917_v56, %v929_v9 }
 0x162   : > { %v6202_v45 = vpop.eup %6201 }
 0x163   : > { %v867_v46 = vmul.f32 %v6202_v45, %v6572_v13  ;;  %v882_v50 = vadd.f32 %v5568_v48, %v874_v47 }
 0x165   : > { %v875_v49 = vmul.f32 %v5567_v44, %v867_v46 }
 0x167   : > { %v883_v51 = vadd.f32 %v5568_v48, %v875_v49 }
 0x169   : > { %v884_v52 = vpack.c.bf16 %v883_v51, %v882_v50 }
 0x16b   : > { %1095 = vmatmul.mubr.bf16.vlgmr.msra.gmra.mrb[0].mxu0 %v884_v52  ;;  %5840 = vmatmul.mubr.bf16.vlgmr.msra.gmra.mrb[0].mxu1 %v884_v52 }
 0x16c   : > { %5845 = vmatprep.mubr.msk.bf16.mxu1 %vm6347_vm0, %v6345_v4  ;;  %5869 = vmatprep.mubr.msk.bf16.mxu0 %vm6347_vm0, %v6345_v4 }
 0x23e   : > { %v1096_v60 = vpop.f32.mrb[0].mxu0  ;;  %v1139_v61 = vpop.f32.mrb[0].mxu1 }
 0x23f   : > { %v6673_v62 = vadd.f32 %v1096_v60, %v922_v58  ;;  %v1098_v63 = vpop.f32.mrb[1].mxu0  ;;  %v5841_v0 = vpop.f32.mrb[1].mxu1  ;;  %v6692_v11 = vadd.f32 %v1139_v61, %v930_v10 }
 0x240   : > { %v1099_v1 = vadd.f32 %v1098_v63, %v926_v59  ;;  %v1100_v2 = vpop.f32.mrb[2].mxu0  ;;  %v1142_v3 = vpop.f32.mrb[2].mxu1 }
 0x241   : > { %v1102_v5 = vpop.f32.mrb[3].mxu0  ;;  %v5842_v6 = vpop.f32.mrb[3].mxu1  ;;  %1166 = vrot.lane.b32.xlu0 %v6673_v62, %s7670_s0  ;;  %v6678_v7 = vadd.f32 %v1100_v2, %v922_v58  ;;  %v6702_v12 = vadd.f32 %v1142_v3, %v930_v10 }
 0x242   : > { %1468 = vrot.lane.b32.xlu1 %v1099_v1, %s7674_s27  ;;  %v1103_v8 = vadd.f32 %v1102_v5, %v926_v59 }
 0x245   : > { %1462 = vrot.lane.b32.xlu0 %v1099_v1, %s7670_s0 }
 0x246   : > { %1168 = vrot.lane.b32.xlu1 %v6678_v7, %s7670_s0 }
 0x249   : > { %1474 = vrot.lane.b32.xlu0 %v1099_v1, %s7672_s7 }
 0x24a   : > { %1464 = vrot.lane.b32.xlu1 %v1103_v8, %s7670_s0 }
 0x24d   : > { %1172 = vrot.lane.b32.xlu0 %v6673_v62, %s7674_s27 }
 0x24e   : > { %1470 = vrot.lane.b32.xlu1 %v1103_v8, %s7674_s27 }
 0x251   : > { %1178 = vrot.lane.b32.xlu0 %v6673_v62, %s7672_s7 }
 0x252   : > { %1476 = vrot.lane.b32.xlu1 %v1103_v8, %s7672_s7 }
 0x255   : > { %1758 = vrot.lane.b32.xlu0 %v6692_v11, %s7670_s0 }
 0x256   : > { %1174 = vrot.lane.b32.xlu1 %v6678_v7, %s7674_s27 }
 0x259   : > { %1770 = vrot.lane.b32.xlu0 %v6692_v11, %s7672_s7 }
 0x25a   : > { %1180 = vrot.lane.b32.xlu1 %v6678_v7, %s7672_s7 }
 0x25e   : > { %1760 = vrot.lane.b32.xlu1 %v6702_v12, %s7670_s0  ;;  %s7712_s0 = sld [smem:[#allocation21_spill]] }
 0x262   : > { %1764 = vrot.lane.b32.xlu1 %v6692_v11, %s7674_s27 }
 0x266   : > { %1766 = vrot.lane.b32.xlu1 %v6702_v12, %s7674_s27 }
 0x2b3   : > { %v1167_v13 = vpop.permute.xlu0 %1166 }
 0x2b4   : > { %v1469_v14 = vpop.permute.xlu1 %1468 }
 0x2b5   : > { %v1480_v28 = vcombine.low %v1099_v1, %v1469_v14  ;;  %v1481_v32 = vcombine.high %v1099_v1, %v1469_v14 }
 0x2b7   : > { %v1463_v15 = vpop.permute.xlu0 %1462  ;;  %v1488_v37 = vrot.slane %v1480_v28, %v6713_v27  ;;  %v1495_v43 = vrot.slane %v1481_v32, %v6713_v27 }
 0x2b8   : > { %v6710_v16 = vpop.permute.xlu1 %1168 }
 0x2bb   : > { %v1475_v19 = vpop.permute.xlu0 %1474 }
 0x2bc   : > { %v1465_v20 = vpop.permute.xlu1 %1464  ;;  %v1496_v24 = vcombine.low %v1463_v15, %v1475_v19  ;;  %v1497_v29 = vcombine.high %v1463_v15, %v1475_v19 }
 0x2be   : > { %v1504_v33 = vrot.slane %v1496_v24, %v6713_v27  ;;  %v1511_v38 = vrot.slane %v1497_v29, %v6713_v27 }
 0x2bf   : > { %v1173_v25 = vpop.permute.xlu0 %1172 }
 0x2c0   : > { %v1471_v26 = vpop.permute.xlu1 %1470  ;;  %v1512_v44 = vcombine.low %v1488_v37, %v1504_v33  ;;  %v1513_v45 = vcombine.high %v1488_v37, %v1504_v33  ;;  %v1528_v52 = vcombine.low %v1495_v43, %v1511_v38  ;;  %v1529_v56 = vcombine.high %v1495_v43, %v1511_v38 }
 0x2c1   : > { %v1548_v34 = vcombine.low %v1103_v8, %v1471_v26  ;;  %v1549_v35 = vcombine.high %v1103_v8, %v1471_v26  ;;  %v1184_v58 = vcombine.low %v6673_v62, %v1173_v25  ;;  %v1185_v59 = vcombine.high %v6673_v62, %v1173_v25 }
 0x2c2   : > { %v1520_v1 = vrot.slane %v1512_v44, %v6719_v42  ;;  %v1527_v2 = vrot.slane %v1513_v45, %v6719_v42  ;;  %v1536_v8 = vrot.slane %v1528_v52, %v6719_v42  ;;  %v1543_v9 = vrot.slane %v1529_v56, %v6719_v42 }
 0x2c3   : > { %v1179_v39 = vpop.permute.xlu0 %1178  ;;  %v1556_v48 = vrot.slane %v1548_v34, %v6713_v27  ;;  %v1563_v49 = vrot.slane %v1549_v35, %v6713_v27  ;;  %v1192_v10 = vrot.slane %v1184_v58, %v6713_v27  ;;  %v1199_v62 = vrot.slane %v1185_v59, %v6713_v27 }
 0x2c4   : > { %v1477_v36 = vpop.permute.xlu1 %1476  ;;  %v1200_v50 = vcombine.low %v1167_v13, %v1179_v39  ;;  %v1201_v51 = vcombine.high %v1167_v13, %v1179_v39  ;;  %v1616_v18 = vcombine.low %v1520_v1, %v1527_v2  ;;  %v5598_v19 = vcombine.high %v1520_v1, %v1527_v2 }
 0x2c5   : > { %v1564_v40 = vcombine.low %v1465_v20, %v1477_v36  ;;  %v1565_v41 = vcombine.high %v1465_v20, %v1477_v36  ;;  %v1632_v24 = vcombine.low %v1536_v8, %v1543_v9  ;;  %v5599_v25 = vcombine.high %v1536_v8, %v1543_v9 }
 0x2c6   : > { %v1208_v3 = vrot.slane %v1200_v50, %v6713_v27  ;;  %v1215_v5 = vrot.slane %v1201_v51, %v6713_v27  ;;  %v6741_v33 = vrot.slane %v1616_v18, %v6713_v27  ;;  %v6744_v34 = vrot.slane %v5598_v19, %v6713_v27 }
 0x2c7   : > { %v1572_v46 = vrot.slane %v1564_v40, %v6713_v27  ;;  %v1579_v47 = vrot.slane %v1565_v41, %v6713_v27  ;;  %v6753_v41 = vrot.slane %v1632_v24, %v6713_v27  ;;  %v6756_v43 = vrot.slane %v5599_v25, %v6713_v27 }
 0x2c8   : > { %v1175_v6 = vpop.permute.xlu1 %1174  ;;  %v1216_v20 = vcombine.low %v1192_v10, %v1208_v3  ;;  %v1217_v21 = vcombine.high %v1192_v10, %v1208_v3  ;;  %v1232_v22 = vcombine.low %v1199_v62, %v1215_v5  ;;  %v1233_v23 = vcombine.high %v1199_v62, %v1215_v5 }
 0x2c9   : > { %v1580_v60 = vcombine.low %v1556_v48, %v1572_v46  ;;  %v1581_v61 = vcombine.high %v1556_v48, %v1572_v46  ;;  %v1596_v63 = vcombine.low %v1563_v49, %v1579_v47  ;;  %v1597_v0 = vcombine.high %v1563_v49, %v1579_v47 }
 0x2ca   : > { %v1252_v35 = vcombine.low %v6678_v7, %v1175_v6  ;;  %v1253_v36 = vcombine.high %v6678_v7, %v1175_v6  ;;  %v1224_v37 = vrot.slane %v1216_v20, %v6719_v42  ;;  %v1231_v38 = vrot.slane %v1217_v21, %v6719_v42 }
 0x2cb   : > { %v1588_v13 = vrot.slane %v1580_v60, %v6719_v42  ;;  %v1595_v14 = vrot.slane %v1581_v61, %v6719_v42  ;;  %v1604_v15 = vrot.slane %v1596_v63, %v6719_v42  ;;  %v1611_v17 = vrot.slane %v1597_v0, %v6719_v42 }
 0x2cc   : > { %v1181_v32 = vpop.permute.xlu1 %1180  ;;  %v1240_v39 = vrot.slane %v1232_v22, %v6719_v42  ;;  %v1247_v40 = vrot.slane %v1233_v23, %v6719_v42  ;;  %v1260_v49 = vrot.slane %v1252_v35, %v6713_v27  ;;  %v1267_v50 = vrot.slane %v1253_v36, %v6713_v27 }
 0x2cd   : > { %v1684_v26 = vcombine.low %v1588_v13, %v1595_v14  ;;  %v5600_v28 = vcombine.high %v1588_v13, %v1595_v14  ;;  %v1700_v29 = vcombine.low %v1604_v15, %v1611_v17  ;;  %v5601_v31 = vcombine.high %v1604_v15, %v1611_v17 }
 0x2ce   : > { %v1268_v44 = vcombine.low %v6710_v16, %v1181_v32  ;;  %v1269_v45 = vcombine.high %v6710_v16, %v1181_v32  ;;  %v1320_v52 = vcombine.low %v1224_v37, %v1231_v38  ;;  %v5594_v56 = vcombine.high %v1224_v37, %v1231_v38 }
 0x2cf   : > { %v6761_v7 = vrot.slane %v1684_v26, %v6713_v27  ;;  %v6764_v46 = vrot.slane %v5600_v28, %v6713_v27  ;;  %v6767_v47 = vrot.slane %v1700_v29, %v6713_v27  ;;  %v6770_v48 = vrot.slane %v5601_v31, %v6713_v27 }
 0x2d0   : > { %v1276_v51 = vrot.slane %v1268_v44, %v6713_v27  ;;  %v1283_v16 = vrot.slane %v1269_v45, %v6713_v27  ;;  %v1336_v58 = vcombine.low %v1240_v39, %v1247_v40  ;;  %v5595_v59 = vcombine.high %v1240_v39, %v1247_v40 }
 0x2d1   : > { %v1648_v1 = vcombine.low %v6741_v33, %v6744_v34  ;;  %v1664_v2 = vcombine.low %v6753_v41, %v6756_v43  ;;  %v1716_v3 = vcombine.low %v6761_v7, %v6764_v46  ;;  %v1732_v5 = vcombine.low %v6767_v47, %v6770_v48 }
 0x2d2   : > { %v1284_v60 = vcombine.low %v1260_v49, %v1276_v51  ;;  %v1285_v61 = vcombine.high %v1260_v49, %v1276_v51  ;;  %v1300_v63 = vcombine.low %v1267_v50, %v1283_v16  ;;  %v1301_v0 = vcombine.high %v1267_v50, %v1283_v16 }
 0x2d3   : > { %v6789_v62 = vrot.slane %v1320_v52, %v6713_v27  ;;  %v1335_v13 = vrot.slane %v5594_v56, %v6713_v27  ;;  %v1343_v14 = vrot.slane %v1336_v58, %v6713_v27  ;;  %v1351_v15 = vrot.slane %v5595_v59, %v6713_v27 }
 0x2d4   : > { %v1292_v6 = vrot.slane %v1284_v60, %v6719_v42  ;;  %v1299_v8 = vrot.slane %v1285_v61, %v6719_v42  ;;  %v1308_v9 = vrot.slane %v1300_v63, %v6719_v42  ;;  %v1315_v10 = vrot.slane %v1301_v0, %v6719_v42 }
 0x2d5   : > { %v1656_v21 = vrot.slane %v1648_v1, %v6719_v42  ;;  %v1672_v22 = vrot.slane %v1664_v2, %v6719_v42  ;;  %v1724_v23 = vrot.slane %v1716_v3, %v6719_v42  ;;  %v1740_v24 = vrot.slane %v1732_v5, %v6719_v42 }
 0x2d6   : > { %v1388_v17 = vcombine.low %v1292_v6, %v1299_v8  ;;  %v5596_v18 = vcombine.high %v1292_v6, %v1299_v8  ;;  %v1404_v19 = vcombine.low %v1308_v9, %v1315_v10  ;;  %v5597_v20 = vcombine.high %v1308_v9, %v1315_v10 }
 0x2d7   : > { %v1352_v31 = vcombine.low %v6789_v62, %v1335_v13  ;;  %v1368_v32 = vcombine.low %v1343_v14, %v1351_v15  ;;  %v1680_v37 = vcombine.low %v1656_v21, %v1672_v22  ;;  %v1748_v38 = vcombine.low %v1724_v23, %v1740_v24 }
 0x2d8   : > { %v1395_v25 = vrot.slane %v1388_v17, %v6713_v27  ;;  %v1403_v26 = vrot.slane %v5596_v18, %v6713_v27  ;;  %v1411_v28 = vrot.slane %v1404_v19, %v6713_v27  ;;  %v1419_v29 = vrot.slane %v5597_v20, %v6713_v27 }
 0x2d9   : > { %v1360_v44 = vrot.slane %v1352_v31, %v6719_v42  ;;  %v1376_v45 = vrot.slane %v1368_v32, %v6719_v42  ;;  %v1752_v49 = vpack.c.bf16 %v1748_v38, %v1680_v37  ;;  %v1749_v16 = vcombine.high %v1724_v23, %v1740_v24  ;;  %v5593_v31 = vld [vmem:[%s834_s1] ss:$0 sm:$0xff]  ;;  %s7714_s1 = sld [smem:[#allocation13_spill]] }
 0x2da   : > { %v1420_v35 = vcombine.low %v1395_v25, %v1403_v26  ;;  %v1436_v36 = vcombine.low %v1411_v28, %v1419_v29  ;;  %v1717_v52 = vcombine.high %v6761_v7, %v6764_v46  ;;  %v1733_v56 = vcombine.high %v6767_v47, %v6770_v48 }
 0x2db   : > { %v2057_v50 = vsel %vm2052_vm1, %v1752_v49, 0  ;;  %v1384_v58 = vcombine.low %v1360_v44, %v1376_v45  ;;  %v1681_v59 = vcombine.high %v1656_v21, %v1672_v22  ;;  %v1649_v60 = vcombine.high %v6741_v33, %v6744_v34 }
 0x2dc   : > { %v1428_v39 = vrot.slane %v1420_v35, %v6719_v42  ;;  %v1444_v40 = vrot.slane %v1436_v36, %v6719_v42  ;;  %5844 = vmatpush3.bf16.xpose.msra.mxu1 %v2057_v50  ;;  %v1665_v61 = vcombine.high %v6753_v41, %v6756_v43  ;;  %v1731_v1 = vrot.slane %v1717_v52, %v6719_v42 }
 0x2dd   : > { %5849 = vmatprep.subr.bf16.mxu1 %v6345_v4  ;;  %v1753_v0 = vpack.c.bf16 %v1749_v16, %v1681_v59  ;;  %v1747_v7 = vrot.slane %v1733_v56, %v6719_v42  ;;  %v1663_v46 = vrot.slane %v1649_v60, %v6719_v42  ;;  %v1421_v33 = vcombine.high %v1395_v25, %v1403_v26 }
 0x2de   : > { %v1452_v51 = vcombine.low %v1428_v39, %v1444_v40  ;;  %v1679_v47 = vrot.slane %v1665_v61, %v6719_v42  ;;  %v1437_v34 = vcombine.high %v1411_v28, %v1419_v29  ;;  %v1453_v41 = vcombine.high %v1428_v39, %v1444_v40 }
 0x2df   : > { %v2104_v48 = vsel %vm2052_vm1, %v1753_v0, 0  ;;  %v1750_v2 = vcombine.low %v1731_v1, %v1747_v7  ;;  %v1353_v3 = vcombine.high %v6789_v62, %v1335_v13  ;;  %v1369_v5 = vcombine.high %v1343_v14, %v1351_v15 }
 0x2e0   : > { %v1456_v63 = vpack.c.bf16 %v1452_v51, %v1384_v58  ;;  %v1682_v43 = vcombine.low %v1663_v46, %v1679_v47  ;;  %v1385_v6 = vcombine.high %v1360_v44, %v1376_v45  ;;  %v1435_v9 = vrot.slane %v1421_v33, %v6719_v42 }
 0x2e1   : > { %v1451_v10 = vrot.slane %v1437_v34, %v6719_v42  ;;  %v1367_v18 = vrot.slane %v1353_v3, %v6719_v42  ;;  %v1383_v19 = vrot.slane %v1369_v5, %v6719_v42  ;;  %v1751_v21 = vcombine.high %v1731_v1, %v1747_v7 }
 0x2e2   : > { %v1754_v8 = vpack.c.bf16 %v1750_v2, %v1682_v43  ;;  %v1457_v17 = vpack.c.bf16 %v1453_v41, %v1385_v6  ;;  %v1683_v13 = vcombine.high %v1663_v46, %v1679_v47  ;;  %v1150_v28 = vand.u32 127, %v919_v53 }
 0x2e3   : > { %5846 = vmatmul.mubr.msk.bf16.vlgmr.msra.gmra.mrb[4].mxu1 %vm2052_vm1, %v1456_v63  ;;  %v1454_v62 = vcombine.low %v1435_v9, %v1451_v10  ;;  %v1386_v14 = vcombine.low %v1367_v18, %v1383_v19  ;;  %v1455_v24 = vcombine.high %v1435_v9, %v1451_v10  ;;  %v1387_v25 = vcombine.high %v1367_v18, %v1383_v19 }
 0x2e4   : > { %5850 = vmatpush3.bf16.xpose.msra.mxu1 %v2104_v48  ;;  %5851 = vmatprep.mubr.msk.bf16.mxu1 %vm6347_vm0, %v6345_v4  ;;  %v2151_v20 = vsel %vm2052_vm1, %v1754_v8, 0  ;;  %v1755_v15 = vpack.c.bf16 %v1751_v21, %v1683_v13  ;;  %v1148_v29 = vadd.s32 8, %v6660_v54  ;;  %vm1152_vm2 = vcmp.le.s32.totalorder %v1150_v28, %v6660_v54  ;;  %v1761_v13 = vpop.permute.xlu1 %1760 }
 0x2e5   : > { %5855 = vmatprep.subr.bf16.mxu1 %v6345_v4  ;;  %v1458_v22 = vpack.c.bf16 %v1454_v62, %v1386_v14  ;;  %v1459_v26 = vpack.c.bf16 %v1455_v24, %v1387_v25  ;;  %v6353_v32 = vmov -1e+30   ;;  %v1759_v14 = vpop.permute.xlu0 %1758 }
 0x2e6   : > { %v2198_v23 = vsel %vm2052_vm1, %v1755_v15, 0  ;;  %vm1153_vm3 = vcmp.le.s32.totalorder %v1150_v28, %v1148_v29  ;;  %v1154_v35 = vsel %vm1152_vm2, 0.0, %v6353_v32 }
 0x2e7   : > { %v1155_v36 = vsel %vm1153_vm3, 0.0, %v6353_v32  ;;  %v1162_v37 = vadd.f32 %v5593_v31, %v1154_v35 }
 0x2e8   : > { %v1163_v44 = vadd.f32 %v5593_v31, %v1155_v36  ;;  %v1765_v15 = vpop.permute.xlu1 %1764 }
 0x2e9   : > { %v1777_v25 = vcombine.high %v6692_v11, %v1765_v15 }
 0x2eb   : > { %5852 = vmatmul.mubr.msk.bf16.vlgmr.msra.gmra.mrb[8].mxu1 %vm2052_vm1, %v1457_v17  ;;  %v1791_v31 = vrot.slane %v1777_v25, %v6713_v27 }
 0x2ec   : > { %5856 = vmatpush3.bf16.xpose.msra.mxu1 %v2151_v20  ;;  %5857 = vmatprep.mubr.msk.bf16.mxu1 %vm6347_vm0, %v6345_v4 }
 0x2ed   : > { %5861 = vmatprep.subr.bf16.mxu1 %v6345_v4 }
 0x2f3   : > { %5858 = vmatmul.mubr.msk.bf16.vlgmr.msra.gmra.mrb[12].mxu1 %vm2052_vm1, %v1458_v22  ;;  %v1771_v22 = vpop.permute.xlu0 %1770 }
 0x2f4   : > { %5862 = vmatpush3.bf16.xpose.msra.mxu1 %v2198_v23  ;;  %5863 = vmatprep.mubr.msk.bf16.mxu1 %vm6347_vm0, %v6345_v4  ;;  %v1776_v23 = vcombine.low %v6692_v11, %v1765_v15  ;;  %v1792_v24 = vcombine.low %v1759_v14, %v1771_v22 }
 0x2f5   : > { %5873 = vmatprep.subr.bf16.mxu1 %v6345_v4 }
 0x2f6   : > { %v1784_v28 = vrot.slane %v1776_v23, %v6713_v27  ;;  %v1800_v29 = vrot.slane %v1792_v24, %v6713_v27 }
 0x2f8   : > { %v1808_v35 = vcombine.low %v1784_v28, %v1800_v29  ;;  %v1809_v36 = vcombine.high %v1784_v28, %v1800_v29 }
 0x2fb   : > { %5864 = vmatmul.mubr.msk.bf16.vlgmr.msra.gmra.mrb[16].mxu1 %vm2052_vm1, %v1459_v26  ;;  %v1793_v26 = vcombine.high %v1759_v14, %v1771_v22 }
 0x2fc   : > { %5875 = vmatprep.mubr.msk.bf16.mxu1 %vm6347_vm0, %v6345_v4 }
 0x2fd   : > { %v1807_v32 = vrot.slane %v1793_v26, %v6713_v27 }
 0x3b6   : > { %v2093_v38 = vpop.f32.mrb[4].mxu1 }
 0x3b7   : > { %v2241_v39 = vmul.f32 0.17677669, %v2093_v38  ;;  %v5847_v40 = vpop.f32.mrb[5].mxu1  ;;  %v1825_v38 = vcombine.high %v1791_v31, %v1807_v32 }
 0x3b8   : > { %v2096_v45 = vpop.f32.mrb[6].mxu1  ;;  %v1816_v40 = vrot.slane %v1808_v35, %v6719_v42 }
 0x3b9   : > { %v2242_v53 = vmul.f32 0.17677669, %v2096_v45  ;;  %v5848_v49 = vpop.f32.mrb[7].mxu1  ;;  %v6851_v50 = vadd.f32 %v2241_v39, %v1162_v37  ;;  %v1767_v39 = vpop.permute.xlu1 %1766 }
 0x3ba   : > { %v1839_v49 = vrot.slane %v1825_v38, %v6719_v42 }
 0x3bb   : > { %v2258_v51 = vsel %vm2257_vm4, %v6851_v50, -inf  ;;  %v6855_v54 = vadd.f32 %v2242_v53, %v1163_v44 }
 0x3bc   : > { %2259 = vmax.xlane.f32.xlu0 %v2258_v51 }
 0x3bd   : > { %v2261_v16 = vsel %vm2257_vm4, %v6855_v54, -inf }
 0x3be   : > { %2262 = vmax.xlane.f32.xlu1 %v2261_v16  ;;  %v2140_v52 = vpop.f32.mrb[8].mxu1 }
 0x3bf   : > { %v2243_v56 = vmul.f32 0.17677669, %v2140_v52  ;;  %v5853_v58 = vpop.f32.mrb[9].mxu1 }
 0x3c0   : > { %v2143_v59 = vpop.f32.mrb[10].mxu1 }
 0x3c1   : > { %v2244_v60 = vmul.f32 0.17677669, %v2143_v59  ;;  %v5854_v61 = vpop.f32.mrb[11].mxu1  ;;  %v6859_v63 = vadd.f32 %v2243_v56, %v1162_v37  ;;  %v1844_v59 = vcombine.low %v6702_v12, %v1767_v39 }
 0x3c3   : > { %v2264_v0 = vsel %vm2257_vm4, %v6859_v63, -inf  ;;  %v6863_v1 = vadd.f32 %v2244_v60, %v1163_v44  ;;  %v1845_v60 = vcombine.high %v6702_v12, %v1767_v39 }
 0x3c4   : > { %2265 = vmax.xlane.f32.xlu0 %v2264_v0 }
 0x3c5   : > { %v2267_v48 = vsel %vm2257_vm4, %v6863_v1, -inf }
 0x3c6   : > { %v2187_v7 = vpop.f32.mrb[12].mxu1 }
 0x3c7   : > { %v2245_v46 = vmul.f32 0.17677669, %v2187_v7  ;;  %v5859_v47 = vpop.f32.mrb[13].mxu1 }
 0x3c8   : > { %2268 = vmax.xlane.f32.xlu0 %v2267_v48  ;;  %v2190_v2 = vpop.f32.mrb[14].mxu1 }
 0x3c9   : > { %v5860_v33 = vpop.f32.mrb[15].mxu1  ;;  %v6867_v34 = vadd.f32 %v2245_v46, %v1162_v37  ;;  %v2246_v20 = vmul.f32 0.17677669, %v2190_v2 }
 0x3cb   : > { %v2270_v41 = vsel %vm2257_vm4, %v6867_v34, -inf  ;;  %v6881_v21 = vadd.f32 %v2246_v20, %v1163_v44 }
 0x3cc   : > { %2271 = vmax.xlane.f32.xlu0 %v2270_v41  ;;  %v1859_v41 = vrot.slane %v1845_v60, %v6713_v27 }
 0x3cd   : > { %v2273_v62 = vsel %vm2257_vm4, %v6881_v21, -inf }
 0x3ce   : > { %v2234_v43 = vpop.f32.mrb[16].mxu1 }
 0x3cf   : > { %v2247_v3 = vmul.f32 0.17677669, %v2234_v43  ;;  %1772 = vrot.lane.b32.xlu1 %v6702_v12, %s7672_s7  ;;  %v5865_v5 = vpop.f32.mrb[17].mxu1  ;;  %s7713_s7 = sshll.u32 %s6542_s10, 4 }
 0x3d0   : > { %v2237_v6 = vpop.f32.mrb[18].mxu1  ;;  %s831_s30 = scalar_lea.vmem %s7714_s1, %s7713_s7 }
 0x3d1   : > { %v2248_v8 = vmul.f32 0.17677669, %v2237_v6  ;;  %v5866_v9 = vpop.f32.mrb[19].mxu1  ;;  %v6873_v10 = vadd.f32 %v2247_v3, %v1162_v37  ;;  %v1824_v37 = vcombine.low %v1791_v31, %v1807_v32 }
 0x3d3   : > { %v2276_v17 = vsel %vm2257_vm4, %v6873_v10, -inf  ;;  %v6877_v18 = vadd.f32 %v2248_v8, %v1163_v44  ;;  %v1823_v44 = vrot.slane %v1809_v36, %v6719_v42  ;;  %v1832_v53 = vrot.slane %v1824_v37, %v6719_v42 }
 0x3d4   : > { %2277 = vmax.xlane.f32.xlu0 %v2276_v17 }
 0x3d5   : > { %v2279_v19 = vsel %vm2257_vm4, %v6877_v18, -inf  ;;  %v1912_v56 = vcombine.low %v1816_v40, %v1823_v44  ;;  %v5602_v58 = vcombine.high %v1816_v40, %v1823_v44  ;;  %v1928_v0 = vcombine.low %v1832_v53, %v1839_v49 }
 0x3d6   : > { %v5603_v7 = vcombine.high %v1832_v53, %v1839_v49 }
 0x3d7   : > { %v1919_v48 = vrot.slane %v1912_v56, %v6713_v27  ;;  %v1927_v2 = vrot.slane %v5602_v58, %v6713_v27  ;;  %v1935_v5 = vrot.slane %v1928_v0, %v6713_v27 }
 0x3d8   : > { %2280 = vmax.xlane.f32.xlu0 %v2279_v19  ;;  %v1943_v6 = vrot.slane %v5603_v7, %v6713_v27 }
 0x3d9   : > { %v1945_v25 = vcombine.high %v1919_v48, %v1927_v2 }
 0x3da   : > { %v1960_v24 = vcombine.low %v1935_v5, %v1943_v6  ;;  %v1961_v39 = vcombine.high %v1935_v5, %v1943_v6 }
 0x3f3   : > { %2274 = vmax.xlane.f32.xlu1 %v2273_v62 }
 0x449   : > { %v2260_v45 = vpop.xlane.xlu0 %2259 }
 0x44a   : > { %v2282_v11 = vsub.f32 %v6851_v50, %v2260_v45 }
 0x44b   : > { %v2263_v51 = vpop.xlane.xlu1 %2262 }
 0x44c   : > { %v2290_v16 = vmul.f32 1.442695, %v2282_v11  ;;  %v2283_v52 = vsub.f32 %v6855_v54, %v2263_v51  ;;  %v1852_v54 = vrot.slane %v1844_v59, %v6713_v27  ;;  %v1968_v51 = vrot.slane %v1960_v24, %v6719_v42 }
 0x44e   : > { %6203 = vpow2.f32 %v2290_v16  ;;  %v2292_v61 = vmul.f32 1.442695, %v2283_v52 }
 0x44f   : > { %v1773_v46 = vpop.permute.xlu1 %1772 }
 0x450   : > { %6205 = vpow2.f32 %v2292_v61  ;;  %v1860_v50 = vcombine.low %v1761_v13, %v1773_v46  ;;  %v1861_v47 = vcombine.high %v1761_v13, %v1773_v46  ;;  %v1944_v13 = vcombine.low %v1919_v48, %v1927_v2 }
 0x451   : > { %v2266_v33 = vpop.xlane.xlu0 %2265  ;;  %v1975_v46 = vrot.slane %v1961_v39, %v6719_v42  ;;  %v6111_v39 = vld [vmem:[%s7709_s4] sm:$0xff]  }
 0x452   : > { %v1868_v43 = vrot.slane %v1860_v50, %v6713_v27  ;;  %v1875_v12 = vrot.slane %v1861_v47, %v6713_v27  ;;  %v2284_v3 = vsub.f32 %v6859_v63, %v2266_v33  ;;  %v1952_v38 = vrot.slane %v1944_v13, %v6719_v42 }
 0x454   : > { %v1876_v8 = vcombine.low %v1852_v54, %v1868_v43  ;;  %v1877_v9 = vcombine.high %v1852_v54, %v1868_v43  ;;  %v1892_v17 = vcombine.low %v1859_v41, %v1875_v12  ;;  %v1893_v19 = vcombine.high %v1859_v41, %v1875_v12 }
 0x455   : > { %v2294_v20 = vmul.f32 1.442695, %v2284_v3  ;;  %v2269_v62 = vpop.xlane.xlu0 %2268  ;;  %v1976_v50 = vcombine.low %v1952_v38, %v1968_v51  ;;  %v1977_v48 = vcombine.high %v1952_v38, %v1968_v51 }
 0x456   : > { %v1884_v14 = vrot.slane %v1876_v8, %v6719_v42  ;;  %v1891_v15 = vrot.slane %v1877_v9, %v6719_v42  ;;  %v1900_v22 = vrot.slane %v1892_v17, %v6719_v42  ;;  %v1907_v23 = vrot.slane %v1893_v19, %v6719_v42 }
 0x457   : > { %6207 = vpow2.f32 %v2294_v20  ;;  %v2285_v63 = vsub.f32 %v6863_v1, %v2269_v62 }
 0x458   : > { %v6913_v26 = vpop.eup %6203  ;;  %v1980_v28 = vcombine.low %v1884_v14, %v1891_v15  ;;  %v5604_v29 = vcombine.high %v1884_v14, %v1891_v15  ;;  %v1996_v31 = vcombine.low %v1900_v22, %v1907_v23  ;;  %v5605_v32 = vcombine.high %v1900_v22, %v1907_v23 }
 0x459   : > { %v2296_v35 = vmul.f32 1.442695, %v2285_v63  ;;  %v2272_v36 = vpop.xlane.xlu0 %2271  ;;  %v2306_v37 = vsel %vm2257_vm4, %v6913_v26, 0.0 }
 0x45a   : > { %v6206_v40 = vpop.eup %6205  ;;  %v1987_v44 = vrot.slane %v1980_v28, %v6713_v27  ;;  %v1995_v1 = vrot.slane %v5604_v29, %v6713_v27  ;;  %v2003_v45 = vrot.slane %v1996_v31, %v6713_v27  ;;  %v2011_v11 = vrot.slane %v5605_v32, %v6713_v27  ;;  %2307 = vadd.xlane.f32.xlu0 %v2306_v37 }
 0x45b   : > { %6209 = vpow2.f32 %v2296_v35  ;;  %v2286_v53 = vsub.f32 %v6867_v34, %v2272_v36  ;;  %v2309_v49 = vsel %vm2257_vm4, %v6206_v40, 0.0  ;;  %v1959_v34 = vrot.slane %v1945_v25, %v6719_v42 }
 0x45c   : > { %2310 = vadd.xlane.f32.xlu1 %v2309_v49  ;;  %v2012_v16 = vcombine.low %v1987_v44, %v1995_v1  ;;  %v2028_v52 = vcombine.low %v2003_v45, %v2011_v11  ;;  %v2013_v56 = vcombine.high %v1987_v44, %v1995_v1  ;;  %v2029_v58 = vcombine.high %v2003_v45, %v2011_v11  ;;  %v6114_v44 = vld [vmem:[%s7709_s4 + $0x18] sm:$0xff]   ;;  %v6115_v1 = vld [vmem:[%s7709_s4 + $0x20] sm:$0xff]   ;;  %v6116_v45 = vld [vmem:[%s7709_s4 + $0x28] sm:$0xff]  }
 0x45d   : > { %v2298_v59 = vmul.f32 1.442695, %v2286_v53  ;;  %v1978_v6 = vcombine.low %v1959_v34, %v1975_v46  ;;  %v2330_v20 = vpack.c.bf16 %v6206_v40, %v6913_v26  ;;  %v6113_v40 = vld [vmem:[%s7709_s4 + $0x10] sm:$0xff]  }
 0x45e   : > { %v2020_v60 = vrot.slane %v2012_v16, %v6719_v42  ;;  %v2036_v61 = vrot.slane %v2028_v52, %v6719_v42  ;;  %v2027_v0 = vrot.slane %v2013_v56, %v6719_v42  ;;  %v2043_v7 = vrot.slane %v2029_v58, %v6719_v42 }
 0x45f   : > { %6211 = vpow2.f32 %v2298_v59 }
 0x460   : > { %v2044_v47 = vcombine.low %v2020_v60, %v2036_v61  ;;  %v2045_v2 = vcombine.high %v2020_v60, %v2036_v61  ;;  %v2046_v41 = vcombine.low %v2027_v0, %v2043_v7  ;;  %v2047_v8 = vcombine.high %v2027_v0, %v2043_v7 }
 0x461   : > { %v6208_v54 = vpop.eup %6207  ;;  %v2278_v33 = vpop.xlane.xlu0 %2277 }
 0x462   : > { %v2288_v43 = vsub.f32 %v6873_v10, %v2278_v33  ;;  %v2312_v12 = vsel %vm2257_vm4, %v6208_v54, 0.0  ;;  %v2048_v3 = vpack.c.bf16 %v2044_v47, %v1976_v50  ;;  %v2049_v5 = vpack.c.bf16 %v2045_v2, %v1977_v48 }
 0x463   : > { %2313 = vadd.xlane.f32.xlu0 %v2312_v12  ;;  %v2050_v62 = vpack.c.bf16 %v2046_v41, %v1978_v6  ;;  %v1979_v10 = vcombine.high %v1959_v34, %v1975_v46 }
 0x464   : > { %v2302_v9 = vmul.f32 1.442695, %v2288_v43  ;;  %5868 = vmatpush3.bf16.msra.mxu0 %v2048_v3  ;;  %5874 = vmatpush3.bf16.msra.mxu1 %v2049_v5 }
 0x465   : > { %v6210_v17 = vpop.eup %6209  ;;  %v2281_v19 = vpop.xlane.xlu0 %2280  ;;  %5879 = vmatprep.subr.bf16.mxu0 %v6345_v4  ;;  %5885 = vmatprep.subr.bf16.mxu1 %v6345_v4  ;;  %v2051_v22 = vpack.c.bf16 %v2047_v8, %v1979_v10 }
 0x466   : > { %6213 = vpow2.f32 %v2302_v9  ;;  %v2289_v13 = vsub.f32 %v6877_v18, %v2281_v19  ;;  %v2315_v14 = vsel %vm2257_vm4, %v6210_v17, 0.0  ;;  %v2331_v15 = vpack.c.bf16 %v6210_v17, %v6208_v54 }
 0x467   : > { %2316 = vadd.xlane.f32.xlu1 %v2315_v14  ;;  %5870 = vmatmul.mubr.msk.bf16.vlgmr.msra.gmra.mrb[4].mxu0 %vm2257_vm4, %v2330_v20 }
 0x468   : > { %v2304_v23 = vmul.f32 1.442695, %v2289_v13  ;;  %5876 = vmatmul.mubr.msk.bf16.vlgmr.msra.gmra.mrb[20].mxu1 %vm2257_vm4, %v2331_v15  ;;  %5880 = vmatpush3.bf16.msra.mxu0 %v2050_v62 }
 0x469   : > { %v6212_v63 = vpop.eup %6211  ;;  %5886 = vmatpush3.bf16.msra.mxu1 %v2051_v22  ;;  %5887 = vmatprep.mubr.msk.bf16.mxu1 %vm6347_vm0, %v6345_v4 }
 0x46a   : > { %6215 = vpow2.f32 %v2304_v23  ;;  %v2318_v24 = vsel %vm2257_vm4, %v6212_v63, 0.0  ;;  %5881 = vmatprep.mubr.msk.bf16.mxu0 %vm6347_vm0, %v6345_v4  ;;  %5891 = vmatprep.subr.bf16.mxu0 %v6345_v4 }
 0x46b   : > { %2319 = vadd.xlane.f32.xlu0 %v2318_v24  ;;  %5911 = vmatprep.subr.bf16.mxu1 %v6345_v4 }
 0x470   : > { %v6214_v18 = vpop.eup %6213 }
 0x471   : > { %v2324_v25 = vsel %vm2257_vm4, %v6214_v18, 0.0 }
 0x472   : > { %2325 = vadd.xlane.f32.xlu0 %v2324_v25 }
 0x474   : > { %v6216_v26 = vpop.eup %6215 }
 0x475   : > { %v2333_v28 = vpack.c.bf16 %v6216_v26, %v6214_v18  ;;  %v2327_v38 = vsel %vm2257_vm4, %v6216_v26, 0.0 }
 0x477   : > { %5888 = vmatmul.mubr.msk.bf16.vlgmr.msra.gmra.mrb[24].mxu1 %vm2257_vm4, %v2333_v28 }
 0x478   : > { %5927 = vmatprep.mubr.msk.bf16.mxu1 %vm6347_vm0, %v6345_v4 }
 0x480   : > { %v2275_v29 = vpop.xlane.xlu1 %2274 }
 0x481   : > { %v2287_v31 = vsub.f32 %v6881_v21, %v2275_v29  ;;  %v6112_v21 = vld [vmem:[%s7709_s4 + $0x8] sm:$0xff]  }
 0x483   : > { %v2300_v32 = vmul.f32 1.442695, %v2287_v31 }
 0x485   : > { %6217 = vpow2.f32 %v2300_v32 }
 0x48f   : > { %v6218_v35 = vpop.eup %6217 }
 0x490   : > { %v2321_v36 = vsel %vm2257_vm4, %v6218_v35, 0.0  ;;  %v2332_v37 = vpack.c.bf16 %v6218_v35, %v6212_v63 }
 0x491   : > { %2322 = vadd.xlane.f32.xlu1 %v2321_v36 }
 0x492   : > { %5882 = vmatmul.mubr.msk.bf16.vlgmr.msra.gmra.mrb[8].mxu0 %vm2257_vm4, %v2332_v37 }
 0x493   : > { %5907 = vmatprep.mubr.msk.bf16.mxu0 %vm6347_vm0, %v6345_v4  ;;  %5892 = vmatpush3.bf16.msra.mxu0 %v6111_v39 }
 0x494   : > { %5893 = vmatprep.subr.bf16.mxu0 %v6345_v4 }
 0x495   : > { %2328 = vadd.xlane.f32.xlu1 %v2327_v38 }
 0x497   : > { %5894 = vmatpush3.bf16.msra.mxu0 %v6112_v21 }
 0x498   : > { %5895 = vmatprep.subr.bf16.mxu0 %v6345_v4 }
 0x49b   : > { %5896 = vmatpush3.bf16.msra.mxu0 %v6113_v40 }
 0x49c   : > { %5897 = vmatprep.subr.bf16.mxu0 %v6345_v4 }
 0x49f   : > { %5898 = vmatpush3.bf16.msra.mxu0 %v6114_v44 }
 0x4a0   : > { %5899 = vmatprep.subr.bf16.mxu0 %v6345_v4 }
 0x4a3   : > { %5900 = vmatpush3.bf16.msra.mxu0 %v6115_v1 }
 0x4a4   : > { %5901 = vmatprep.subr.bf16.mxu0 %v6345_v4 }
 0x4a7   : > { %5902 = vmatpush3.bf16.msra.mxu0 %v6116_v45 }
 0x4a8   : > { %5903 = vmatprep.subr.bf16.mxu0 %v6345_v4 }
 0x4e7   : > { %v2308_v11 = vpop.xlane.xlu0 %2307 }
 0x4e9   : > { %v2311_v53 = vpop.xlane.xlu1 %2310 }
 0x4f0   : > { %v2314_v49 = vpop.xlane.xlu0 %2313 }
 0x4f1   : > { %6219 = vrcp.f32 %v2314_v49 }
 0x4f4   : > { %v2317_v51 = vpop.xlane.xlu1 %2316 }
 0x4f8   : > { %v2320_v16 = vpop.xlane.xlu0 %2319 }
 0x4fb   : > { %v6220_v47 = vpop.eup %6219 }
 0x4ff   : > { %v2326_v56 = vpop.xlane.xlu0 %2325 }
 0x500   : > { %6221 = vrcp.f32 %v2326_v56 }
 0x501   : > { %6223 = vrcp.f32 %v2317_v51 }
 0x50a   : > { %v6222_v48 = vpop.eup %6221 }
 0x50b   : > { %v6224_v54 = vpop.eup %6223 }
 0x51e   : > { %v2323_v52 = vpop.xlane.xlu1 %2322 }
 0x522   : > { %v2329_v50 = vpop.xlane.xlu1 %2328 }
 0x523   : > { %6225 = vrcp.f32 %v2329_v50 }
 0x524   : > { %6227 = vrcp.f32 %v2308_v11 }
 0x525   : > { %6229 = vrcp.f32 %v2320_v16 }
 0x526   : > { %6231 = vrcp.f32 %v2311_v53 }
 0x527   : > { %6233 = vrcp.f32 %v2323_v52 }
 0x52d   : > { %v6226_v12 = vpop.eup %6225 }
 0x52e   : > { %v6228_v62 = vpop.eup %6227 }
 0x52f   : > { %v6230_v10 = vpop.eup %6229 }
 0x530   : > { %v6232_v14 = vpop.eup %6231 }
 0x531   : > { %v6234_v63 = vpop.eup %6233 }
 0x53a   : > { %v2371_v58 = vpop.f32.mrb[4].mxu0 }
 0x53b   : > { %v2415_v59 = vpop.f32.mrb[20].mxu1  ;;  %v5871_v60 = vpop.f32.mrb[5].mxu0  ;;  %v2518_v15 = vmul.f32 %v6228_v62, %v2371_v58 }
 0x53c   : > { %v5877_v61 = vpop.f32.mrb[21].mxu1  ;;  %v2374_v0 = vpop.f32.mrb[6].mxu0  ;;  %v2520_v33 = vmul.f32 %v6220_v47, %v2415_v59 }
 0x53d   : > { %v2418_v7 = vpop.f32.mrb[22].mxu1  ;;  %v5872_v34 = vpop.f32.mrb[7].mxu0  ;;  %v2519_v18 = vmul.f32 %v6232_v14, %v2374_v0 }
 0x53e   : > { %v5878_v46 = vpop.f32.mrb[23].mxu1  ;;  %v2521_v5 = vmul.f32 %v6224_v54, %v2418_v7 }
 0x54a   : > { %v2503_v2 = vpop.f32.mrb[24].mxu1 }
 0x54b   : > { %v2524_v41 = vmul.f32 %v6222_v48, %v2503_v2  ;;  %v5889_v43 = vpop.f32.mrb[25].mxu1 }
 0x54c   : > { %v2506_v3 = vpop.f32.mrb[26].mxu1 }
 0x54d   : > { %v2542_v6 = vcombine.low %v2520_v33, %v2524_v41  ;;  %v2543_v8 = vcombine.high %v2520_v33, %v2524_v41  ;;  %v2525_v9 = vmul.f32 %v6226_v12, %v2506_v3  ;;  %v5890_v17 = vpop.f32.mrb[27].mxu1 }
 0x54f   : > { %v2610_v19 = vcombine.low %v2521_v5, %v2525_v9  ;;  %v2611_v20 = vcombine.high %v2521_v5, %v2525_v9  ;;  %v2550_v31 = vrot.slane %v2542_v6, %v6713_v27  ;;  %v2557_v32 = vrot.slane %v2543_v8, %v6713_v27 }
 0x551   : > { %v2618_v1 = vrot.slane %v2610_v19, %v6713_v27  ;;  %v2625_v45 = vrot.slane %v2611_v20, %v6713_v27  ;;  %v6117_v19 = vld [vmem:[%s7709_s4 + $0x30] sm:$0xff]  }
 0x552   : > { %5904 = vmatpush3.bf16.msra.mxu0 %v6117_v19  ;;  %v6124_v19 = vld [vmem:[%s7647_s14 + $0x14] ss:$8 sps:$4 sm:$0xff]  }
 0x553   : > { %5905 = vmatprep.subr.bf16.mxu0 %v6345_v4 }
 0x565   : > { %v2459_v13 = vpop.f32.mrb[8].mxu0 }
 0x566   : > { %v2522_v22 = vmul.f32 %v6230_v10, %v2459_v13  ;;  %v5883_v23 = vpop.f32.mrb[9].mxu0 }
 0x567   : > { %v2462_v24 = vpop.f32.mrb[10].mxu0 }
 0x568   : > { %v2526_v25 = vcombine.low %v2518_v15, %v2522_v22  ;;  %v2527_v26 = vcombine.high %v2518_v15, %v2522_v22  ;;  %v2523_v28 = vmul.f32 %v6234_v63, %v2462_v24  ;;  %v5884_v29 = vpop.f32.mrb[11].mxu0 }
 0x56a   : > { %v2534_v35 = vrot.slane %v2526_v25, %v6713_v27  ;;  %v2541_v36 = vrot.slane %v2527_v26, %v6713_v27  ;;  %v2594_v37 = vcombine.low %v2519_v18, %v2523_v28  ;;  %v2595_v38 = vcombine.high %v2519_v18, %v2523_v28 }
 0x56c   : > { %v2558_v39 = vcombine.low %v2534_v35, %v2550_v31  ;;  %v2559_v21 = vcombine.high %v2534_v35, %v2550_v31  ;;  %v2574_v40 = vcombine.low %v2541_v36, %v2557_v32  ;;  %v2575_v44 = vcombine.high %v2541_v36, %v2557_v32 }
 0x56d   : > { %v2602_v11 = vrot.slane %v2594_v37, %v6713_v27  ;;  %v2609_v53 = vrot.slane %v2595_v38, %v6713_v27  ;;  %v6118_v38 = vld [vmem:[%s7709_s4 + $0x38] sm:$0xff]   ;;  %s7716_s4 = sld [smem:[#allocation22_spill]] }
 0x56e   : > { %v2566_v49 = vrot.slane %v2558_v39, %v6719_v42  ;;  %v2573_v51 = vrot.slane %v2559_v21, %v6719_v42  ;;  %v2582_v16 = vrot.slane %v2574_v40, %v6719_v42  ;;  %v2589_v52 = vrot.slane %v2575_v44, %v6719_v42  ;;  %5906 = vmatpush3.bf16.msra.mxu0 %v6118_v38 }
 0x56f   : > { %v2626_v56 = vcombine.low %v2602_v11, %v2618_v1  ;;  %v2627_v58 = vcombine.high %v2602_v11, %v2618_v1  ;;  %v2642_v59 = vcombine.low %v2609_v53, %v2625_v45  ;;  %v2643_v60 = vcombine.high %v2609_v53, %v2625_v45 }
 0x570   : > { %v2662_v61 = vcombine.low %v2566_v49, %v2573_v51  ;;  %v5614_v0 = vcombine.high %v2566_v49, %v2573_v51  ;;  %v2678_v7 = vcombine.low %v2582_v16, %v2589_v52  ;;  %v5615_v34 = vcombine.high %v2582_v16, %v2589_v52 }
 0x571   : > { %v2634_v46 = vrot.slane %v2626_v56, %v6719_v42  ;;  %v2641_v50 = vrot.slane %v2627_v58, %v6719_v42  ;;  %v2650_v47 = vrot.slane %v2642_v59, %v6719_v42  ;;  %v2657_v48 = vrot.slane %v2643_v60, %v6719_v42 }
 0x572   : > { %v2669_v2 = vrot.slane %v2662_v61, %v6713_v27  ;;  %v2677_v54 = vrot.slane %v5614_v0, %v6713_v27  ;;  %v2685_v33 = vrot.slane %v2678_v7, %v6713_v27  ;;  %v2693_v41 = vrot.slane %v5615_v34, %v6713_v27 }
 0x573   : > { %v2730_v43 = vcombine.low %v2634_v46, %v2641_v50  ;;  %v5616_v12 = vcombine.high %v2634_v46, %v2641_v50  ;;  %v2746_v3 = vcombine.low %v2650_v47, %v2657_v48  ;;  %v5617_v5 = vcombine.high %v2650_v47, %v2657_v48  ;;  %v5618_v48 = vld [vmem:[%s7712_s0] ss:$0 sm:$0xff]  ;;  %s819_s0 = sand.u32 1, %s6335_s3  }
 0x574   : > { %v2695_v6 = vcombine.high %v2669_v2, %v2677_v54  ;;  %v2711_v8 = vcombine.high %v2685_v33, %v2693_v41  ;;  %v2694_v9 = vcombine.low %v2669_v2, %v2677_v54  ;;  %v2710_v17 = vcombine.low %v2685_v33, %v2693_v41  ;;  %s5562_s24 = sshll.u32 %s819_s0, 4 }
 0x575   : > { %v2737_v20 = vrot.slane %v2730_v43, %v6713_v27  ;;  %v2745_v62 = vrot.slane %v5616_v12, %v6713_v27  ;;  %v2753_v10 = vrot.slane %v2746_v3, %v6713_v27  ;;  %v2761_v13 = vrot.slane %v5617_v5, %v6713_v27  ;;  %v6279_v43 = vld [vmem:[%s6550_s9] sm:$0xff] }
 0x576   : > { %v2709_v14 = vrot.slane %v2695_v6, %v6719_v42  ;;  %v2725_v15 = vrot.slane %v2711_v8, %v6719_v42  ;;  %v2702_v22 = vrot.slane %v2694_v9, %v6719_v42  ;;  %v2718_v23 = vrot.slane %v2710_v17, %v6719_v42  ;;  %v6280_v6 = vld [vmem:[%s6550_s9 + $0x8] sm:$0xff] }
 0x577   : > { %v2763_v63 = vcombine.high %v2737_v20, %v2745_v62  ;;  %v2779_v24 = vcombine.high %v2753_v10, %v2761_v13  ;;  %v2762_v18 = vcombine.low %v2737_v20, %v2745_v62  ;;  %v2778_v25 = vcombine.low %v2753_v10, %v2761_v13  ;;  %v6119_v9 = vld [vmem:[%s7647_s14] ss:$8 sps:$4 sm:$0xff]   ;;  %v6121_v17 = vld [vmem:[%s7647_s14 + $0x4] ss:$8 sps:$4 sm:$0xff]   ;;  %v6122_v20 = vld [vmem:[%s7647_s14 + $0x10] ss:$8 sps:$4 sm:$0xff]  }
 0x578   : > { %v2728_v26 = vcombine.low %v2709_v14, %v2725_v15  ;;  %v2727_v28 = vcombine.high %v2702_v22, %v2718_v23  ;;  %v2726_v29 = vcombine.low %v2702_v22, %v2718_v23  ;;  %v2729_v31 = vcombine.high %v2709_v14, %v2725_v15  ;;  %3207 = vmatprep.subr.bf16.mxu0 %v6121_v17  ;;  %v6127_v62 = vld [vmem:[%s7647_s14 + $0x24] ss:$8 sps:$4 sm:$0xff]   ;;  %v6125_v10 = vld [vmem:[%s7647_s14 + $0x20] ss:$8 sps:$4 sm:$0xff]   ;;  %v6130_v13 = vld [vmem:[%s7647_s14 + $0x34] ss:$8 sps:$4 sm:$0xff]  }
 0x579   : > { %v2777_v32 = vrot.slane %v2763_v63, %v6719_v42  ;;  %v2793_v35 = vrot.slane %v2779_v24, %v6719_v42  ;;  %v2770_v36 = vrot.slane %v2762_v18, %v6719_v42  ;;  %v2786_v37 = vrot.slane %v2778_v25, %v6719_v42  ;;  %v6143_v14 = vld [vmem:[%s7645_s12] sm:$0xff]   ;;  %v6128_v15 = vld [vmem:[%s7647_s14 + $0x30] ss:$8 sps:$4 sm:$0xff]   ;;  %v6136_v63 = vld [vmem:[%s7647_s14 + $0x54] ss:$8 sps:$4 sm:$0xff]  }
 0x57a   : > { %v6133_v22 = vld [vmem:[%s7647_s14 + $0x44] ss:$8 sps:$4 sm:$0xff]   ;;  %5912 = vmatpush3.bf16.msra.mxu1 %v6143_v14  ;;  %v6131_v23 = vld [vmem:[%s7647_s14 + $0x40] ss:$8 sps:$4 sm:$0xff]   ;;  %v6134_v24 = vld [vmem:[%s7647_s14 + $0x50] ss:$8 sps:$4 sm:$0xff]  }
 0x57b   : > { %v2796_v39 = vcombine.low %v2777_v32, %v2793_v35  ;;  %v2794_v21 = vcombine.low %v2770_v36, %v2786_v37  ;;  %v2795_v40 = vcombine.high %v2770_v36, %v2786_v37  ;;  %v2797_v44 = vcombine.high %v2777_v32, %v2793_v35  ;;  %5913 = vmatprep.subr.bf16.mxu1 %v6345_v4  ;;  %v6139_v18 = vld [vmem:[%s7647_s14 + $0x64] ss:$8 sps:$4 sm:$0xff]   ;;  %v6137_v25 = vld [vmem:[%s7647_s14 + $0x60] ss:$8 sps:$4 sm:$0xff]  }
 0x57d   : > { %v6054_v1 = vpack.i.bf16 %v2796_v39, %v2728_v26  ;;  %v6049_v45 = vpack.i.bf16 %v2795_v40, %v2727_v28  ;;  %v6059_v11 = vpack.i.bf16 %v2797_v44, %v2729_v31  ;;  %v6142_v26 = vld [vmem:[%s7647_s14 + $0x74] ss:$8 sps:$4 sm:$0xff]   ;;  %v841_v28 = vld [vmem:[%s831_s30] sm:$0xff]  ;;  %v6140_v31 = vld [vmem:[%s7647_s14 + $0x70] ss:$8 sps:$4 sm:$0xff]  }
 0x57f   : > { %6055 = vrot.lane.b32.xlu1 %v6054_v1, %s7674_s27  ;;  %6050 = vrot.lane.b32.xlu0 %v6049_v45, %s7710_s26  ;;  %v6144_v1 = vld [vmem:[%s7645_s12 + $0x8] sm:$0xff]   ;;  %v6145_v45 = vld [vmem:[%s7645_s12 + $0x10] sm:$0xff]   ;;  %s7715_s27 = smov 64  }
 0x580   : > { %5914 = vmatpush3.bf16.msra.mxu1 %v6144_v1 }
 0x581   : > { %5915 = vmatprep.subr.bf16.mxu1 %v6345_v4 }
 0x583   : > { %6060 = vrot.lane.b32.xlu1 %v6059_v11, %s7711_s28  ;;  %v6146_v11 = vld [vmem:[%s7645_s12 + $0x18] sm:$0xff]  }
 0x584   : > { %5916 = vmatpush3.bf16.msra.mxu1 %v6145_v45 }
 0x585   : > { %5917 = vmatprep.subr.bf16.mxu1 %v6345_v4 }
 0x588   : > { %5918 = vmatpush3.bf16.msra.mxu1 %v6146_v11 }
 0x589   : > { %5919 = vmatprep.subr.bf16.mxu1 %v6345_v4 }
 0x5f1   : > { %v6056_v53 = vpop.permute.xlu1 %6055  ;;  %v6051_v49 = vpop.permute.xlu0 %6050 }
 0x5f2   : > { %v6053_v51 = vunpack.i.h.bf16 %v6051_v49  ;;  %v6052_v16 = vunpack.i.l.bf16 %v6051_v49  ;;  %v6058_v52 = vunpack.i.h.bf16 %v6056_v53  ;;  %v6057_v56 = vunpack.i.l.bf16 %v6056_v53  ;;  %v6147_v53 = vld [vmem:[%s7645_s12 + $0x20] sm:$0xff]   ;;  %v6148_v49 = vld [vmem:[%s7645_s12 + $0x28] sm:$0xff]  }
 0x5f3   : > { %5920 = vmatpush3.bf16.msra.mxu1 %v6147_v53 }
 0x5f4   : > { %v2823_v58 = vsel %vm2052_vm1, %v2794_v21, %v6053_v51  ;;  %v2822_v59 = vsel %vm2052_vm1, %v2726_v29, %v6052_v16  ;;  %v842_v29 = vld [vmem:[%s831_s30 + $0x8] sm:$0xff]  ;;  %5921 = vmatprep.subr.bf16.mxu1 %v6345_v4  ;;  %v6149_v51 = vld [vmem:[%s7645_s12 + $0x30] sm:$0xff]   ;;  %v6150_v16 = vld [vmem:[%s7645_s12 + $0x38] sm:$0xff]   ;;  %s7721_s30 = sld [smem:[#allocation25_spill]] }
 0x5f5   : > { %v6061_v60 = vpop.permute.xlu1 %6060  ;;  %v2825_v7 = vsel %vm2824_vm5, %v2822_v59, %v6057_v56  ;;  %v2826_v34 = vsel %vm2824_vm5, %v2823_v58, %v6058_v52  ;;  %v3098_v32 = vpack.c.bf16 %v842_v29, %v841_v28  ;;  %v3115_v52 = vld [vmem:[%s7648_s15] sm:$0x3] }
 0x5f6   : > { %v6063_v61 = vunpack.i.h.bf16 %v6061_v60  ;;  %v6062_v0 = vunpack.i.l.bf16 %v6061_v60  ;;  %v3120_v56 = vrot.slane %v3115_v52, %v6663_v55  ;;  %v3124_v58 = vrot.slane %v3115_v52, %v6669_v57 }
 0x5f7   : > { %5922 = vmatpush3.bf16.msra.mxu1 %v6148_v49 }
 0x5f8   : > { %v2828_v46 = vsel %vm2827_vm6, %v2825_v7, %v6062_v0  ;;  %v2829_v50 = vsel %vm2827_vm6, %v2826_v34, %v6063_v61  ;;  %5923 = vmatprep.subr.bf16.mxu1 %v6345_v4 }
 0x5f9   : > { %v2830_v47 = vpack.c.bf16 %v2829_v50, %v2828_v46 }
 0x5fa   : > { %s7588_s5 = scalar_lea.hbm %s7721_s30, %s5732_s29 }
 0x5fb   : > { %5908 = vmatmul.mubr.bf16.vlgmr.msra.gmra.mrb[12].mxu0 %v2830_v47  ;;  %5924 = vmatpush3.bf16.msra.mxu1 %v6149_v51 }
 0x5fc   : > { %3239 = vmatprep.mubr.bf16.mxu0 %v6346_v30  ;;  %3208 = vmatpush1.bf16.msra.mxu0 %v6119_v9 }
 0x5fd   : > { %3209 = vmatprep.subr.bf16.mxu0 %v6124_v19  ;;  %5925 = vmatprep.subr.bf16.mxu1 %v6345_v4  ;;  %v5628_v19 = vld [vmem:[%s7644_s11] ss:$0 sm:$0xff] }
 0x5ff   : > { %5926 = vmatpush3.bf16.msra.mxu1 %v6150_v16 }
 0x600   : > { %3210 = vmatpush1.bf16.msra.mxu0 %v6122_v20  ;;  %5931 = vmatprep.subr.bf16.mxu1 %v6345_v4 }
 0x601   : > { %3211 = vmatprep.subr.bf16.mxu0 %v6127_v62 }
 0x604   : > { %3212 = vmatpush1.bf16.msra.mxu0 %v6125_v10 }
 0x605   : > { %3213 = vmatprep.subr.bf16.mxu0 %v6130_v13 }
 0x608   : > { %3214 = vmatpush1.bf16.msra.mxu0 %v6128_v15 }
 0x609   : > { %3215 = vmatprep.subr.bf16.mxu0 %v6133_v22 }
 0x60c   : > { %3216 = vmatpush1.bf16.msra.mxu0 %v6131_v23 }
 0x60d   : > { %3217 = vmatprep.subr.bf16.mxu0 %v6136_v63 }
 0x610   : > { %3218 = vmatpush1.bf16.msra.mxu0 %v6134_v24 }
 0x611   : > { %3219 = vmatprep.subr.bf16.mxu0 %v6139_v18 }
 0x614   : > { %3220 = vmatpush1.bf16.msra.mxu0 %v6137_v25 }
 0x615   : > { %3221 = vmatprep.subr.bf16.mxu0 %v6142_v26 }
 0x618   : > { %3222 = vmatpush1.bf16.msra.mxu0 %v6140_v31 }
 0x619   : > { %5955 = vmatprep.subr.bf16.mxu0 %v6345_v4 }
 0x61b   : > { %3240 = vmatmul.mubr.bf16.vlgmr.msra.gmra.mrb[16].mxu0 %v3098_v32 }
 0x61c   : > { %5957 = vmatprep.mubr.msk.bf16.mxu0 %vm6347_vm0, %v6345_v4 }
 0x6ce   : > { %v2936_v2 = vpop.f32.mrb[12].mxu0 }
 0x6cf   : > { %v2937_v54 = vadd.f32 %v5618_v48, %v2936_v2  ;;  %v5909_v33 = vpop.f32.mrb[13].mxu0 }
 0x6d0   : > { %v2939_v41 = vpop.f32.mrb[14].mxu0 }
 0x6d1   : > { %v7034_v12 = vadd.f32 %v6279_v43, %v2937_v54  ;;  %v2940_v3 = vadd.f32 %v5618_v48, %v2939_v41  ;;  %v5910_v5 = vpop.f32.mrb[15].mxu0 }
 0x6d2   : > { %v5627_v5 = vld [vmem:[%s7716_s4] ss:$0 sm:$0xff]  ;;  %s821_s4 = scalar_lea.vmem [#allocation2], %s5562_s24  ;;  %s6354_s24 = smov [#allocation2]  }
 0x6d3   : > { %v7037_v8 = vadd.f32 %v6280_v6, %v2940_v3  ;;  %2947 = vadd.xlane.f32.xlu1 %v7034_v12  ;;  %s5466_s7 = sshll.u32 %s821_s4, 4  ;;  %s6285_s10 = sshll.u32 %s6354_s24, 4  ;;  %s7590_s7 = int_to_ptr.vmem [resolvable:$true] %s5466_s7  ;;  %s6286_s10 = int_to_ptr.vmem [resolvable:$false] %s6285_s10 }
 0x6d4   : > { %s6281_s8 = scalar_lea.vmem %s7590_s7, 256  ;;  %p6288_p0 = scmp.lt.s32.totalorder %s7590_s7, %s6286_s10 }
 0x6d5   : > { %2949 = vadd.xlane.f32.xlu0 %v7037_v8  ;;  %p6282_p11 = scmp.ne.s32.totalorder %s7590_s7, %s6281_s8 }
 0x6d7   : > { %p6283_p12 = pnand %p6282_p11, %p6530_p5 }
 0x6d9   : > { %p6284_p13 = pneg %p6283_p12 }
 0x6ee   : > { %v3241_v59 = vpop.f32.mrb[16].mxu0 }
 0x6ef   : > { %v3242_v60 = vadd.f32 %v3241_v59, %v3120_v56  ;;  %v3243_v61 = vpop.f32.mrb[17].mxu0 }
 0x6f0   : > { %v7136_v0 = vadd.f32 %v3243_v61, %v3124_v58  ;;  %v3245_v7 = vpop.f32.mrb[18].mxu0 }
 0x6f1   : > { %3549 = vrot.lane.b32.xlu1 %v3242_v60, %s7711_s28  ;;  %v3246_v34 = vadd.f32 %v3245_v7, %v3120_v56  ;;  %v3247_v46 = vpop.f32.mrb[19].mxu0 }
 0x6f2   : > { %v7139_v50 = vadd.f32 %v3247_v46, %v3124_v58 }
 0x6f5   : > { %3555 = vrot.lane.b32.xlu1 %v3242_v60, %s7715_s27 }
 0x6f9   : > { %3557 = vrot.lane.b32.xlu1 %v3246_v34, %s7715_s27 }
 0x6fd   : > { %3561 = vrot.lane.b32.xlu1 %v3242_v60, %s7710_s26 }
 0x760   : > { %v2948_v35 = vpop.xlane.xlu1 %2947 }
 0x761   : > { %v2951_v36 = vmul.f32 0.0078125, %v2948_v35 }
 0x762   : > { %v2950_v37 = vpop.xlane.xlu0 %2949 }
 0x763   : > { %v2953_v38 = vsub.f32 %v7034_v12, %v2951_v36  ;;  %v2952_v39 = vmul.f32 0.0078125, %v2950_v37 }
 0x764   : > { %v3550_v14 = vpop.permute.xlu1 %3549 }
 0x765   : > { %v2954_v21 = vsub.f32 %v7037_v8, %v2952_v39  ;;  %v2955_v40 = vmul.f32 %v2953_v38, %v2953_v38 }
 0x767   : > { %2957 = vadd.xlane.f32.xlu0 %v2955_v40  ;;  %v2956_v44 = vmul.f32 %v2954_v21, %v2954_v21 }
 0x768   : > { %v3556_v22 = vpop.permute.xlu1 %3555 }
 0x769   : > { %v3567_v31 = vcombine.low %v3242_v60, %v3556_v22  ;;  %v3568_v32 = vcombine.high %v3242_v60, %v3556_v22 }
 0x76b   : > { %2959 = vadd.xlane.f32.xlu0 %v2956_v44  ;;  %v3575_v44 = vrot.slane %v3567_v31, %v6713_v27  ;;  %v3582_v1 = vrot.slane %v3568_v32, %v6713_v27 }
 0x76c   : > { %v3558_v18 = vpop.permute.xlu1 %3557 }
 0x76d   : > { %v3635_v25 = vcombine.low %v3246_v34, %v3558_v18  ;;  %v3636_v26 = vcombine.high %v3246_v34, %v3558_v18 }
 0x76f   : > { %v3643_v35 = vrot.slane %v3635_v25, %v6713_v27  ;;  %v3650_v36 = vrot.slane %v3636_v26, %v6713_v27 }
 0x770   : > { %v3562_v37 = vpop.permute.xlu1 %3561 }
 0x771   : > { %v3583_v45 = vcombine.low %v3550_v14, %v3562_v37  ;;  %v3584_v11 = vcombine.high %v3550_v14, %v3562_v37 }
 0x773   : > { %v3591_v53 = vrot.slane %v3583_v45, %v6713_v27  ;;  %v3598_v49 = vrot.slane %v3584_v11, %v6713_v27 }
 0x775   : > { %v3599_v58 = vcombine.low %v3575_v44, %v3591_v53  ;;  %v3600_v59 = vcombine.high %v3575_v44, %v3591_v53  ;;  %v3615_v60 = vcombine.low %v3582_v1, %v3598_v49  ;;  %v3616_v61 = vcombine.high %v3582_v1, %v3598_v49 }
 0x777   : > { %v3607_v7 = vrot.slane %v3599_v58, %v6719_v42  ;;  %v3623_v46 = vrot.slane %v3615_v60, %v6719_v42 }
 0x781   : > { %3551 = vrot.lane.b32.xlu0 %v3246_v34, %s7711_s28 }
 0x785   : > { %3563 = vrot.lane.b32.xlu0 %v3246_v34, %s7710_s26  ;;  %v3614_v34 = vrot.slane %v3600_v59, %v6719_v42 }
 0x7f4   : > { %v2958_v47 = vpop.xlane.xlu0 %2957 }
 0x7f5   : > { %v2961_v48 = vmul.f32 0.0078125, %v2958_v47  ;;  %v3630_v47 = vrot.slane %v3616_v61, %v6719_v42 }
 0x7f7   : > { %v2963_v2 = vadd.f32 1e-05, %v2961_v48 }
 0x7f8   : > { %v2960_v54 = vpop.xlane.xlu0 %2959 }
 0x7f9   : > { %6235 = vrsqrt.f32 %v2963_v2  ;;  %v2962_v33 = vmul.f32 0.0078125, %v2960_v54 }
 0x7fb   : > { %v2964_v41 = vadd.f32 1e-05, %v2962_v33 }
 0x7fc   : > { %v3552_v15 = vpop.permute.xlu0 %3551 }
 0x7fd   : > { %6237 = vrsqrt.f32 %v2964_v41  ;;  %v3703_v41 = vcombine.low %v3607_v7, %v3614_v34 }
 0x800   : > { %v3564_v23 = vpop.permute.xlu0 %3563 }
 0x801   : > { %v3651_v63 = vcombine.low %v3552_v15, %v3564_v23  ;;  %v3652_v24 = vcombine.high %v3552_v15, %v3564_v23 }
 0x803   : > { %v6236_v43 = vpop.eup %6235  ;;  %v3659_v28 = vrot.slane %v3651_v63, %v6713_v27  ;;  %v3666_v29 = vrot.slane %v3652_v24, %v6713_v27 }
 0x804   : > { %v2967_v3 = vmul.f32 %v6236_v43, %v2953_v38  ;;  %v5658_v43 = vcombine.high %v3607_v7, %v3614_v34 }
 0x805   : > { %v3667_v38 = vcombine.low %v3643_v35, %v3659_v28  ;;  %v3668_v39 = vcombine.high %v3643_v35, %v3659_v28  ;;  %v3684_v40 = vcombine.high %v3650_v36, %v3666_v29 }
 0x806   : > { %v2975_v17 = vmul.f32 %v5627_v5, %v2967_v3  ;;  %v3719_v3 = vcombine.low %v3623_v46, %v3630_v47 }
 0x807   : > { %v6238_v6 = vpop.eup %6237  ;;  %v3675_v51 = vrot.slane %v3667_v38, %v6719_v42  ;;  %v3682_v16 = vrot.slane %v3668_v39, %v6719_v42  ;;  %v3698_v56 = vrot.slane %v3684_v40, %v6719_v42 }
 0x808   : > { %v2968_v9 = vmul.f32 %v6238_v6, %v2954_v21  ;;  %v2983_v62 = vadd.f32 %v5628_v19, %v2975_v17  ;;  %v3683_v21 = vcombine.low %v3650_v36, %v3666_v29 }
 0x809   : > { %v3771_v48 = vcombine.low %v3675_v51, %v3682_v16  ;;  %v5660_v2 = vcombine.high %v3675_v51, %v3682_v16 }
 0x80a   : > { %v2976_v20 = vmul.f32 %v5627_v5, %v2968_v9  ;;  %v3691_v52 = vrot.slane %v3683_v21, %v6719_v42  ;;  %v5659_v5 = vcombine.high %v3623_v46, %v3630_v47 }
 0x80b   : > { %v3778_v6 = vrot.slane %v3771_v48, %v6713_v27  ;;  %v3786_v9 = vrot.slane %v5660_v2, %v6713_v27 }
 0x80c   : > { %v2984_v10 = vadd.f32 %v5628_v19, %v2976_v20  ;;  %v3787_v54 = vcombine.low %v3691_v52, %v3698_v56  ;;  %v5661_v33 = vcombine.high %v3691_v52, %v3698_v56  ;;  %v3710_v20 = vrot.slane %v3703_v41, %v6713_v27  ;;  %v5629_v56 = vld [vmem:[%s7646_s13] ss:$0 sm:$0xff] }
 0x80d   : > { %v3803_v22 = vcombine.low %v3778_v6, %v3786_v9  ;;  %v3804_v32 = vcombine.high %v3778_v6, %v3786_v9 }
 0x80e   : > { %v2985_v13 = vpack.c.bf16 %v2984_v10, %v2983_v62  ;;  %v3794_v17 = vrot.slane %v3787_v54, %v6713_v27  ;;  %v3802_v19 = vrot.slane %v5661_v33, %v6713_v27  ;;  %v3718_v62 = vrot.slane %v5658_v43, %v6713_v27 }
 0x80f   : > { %v3726_v10 = vrot.slane %v3719_v3, %v6713_v27  ;;  %v3811_v18 = vrot.slane %v3803_v22, %v6719_v42  ;;  %v3818_v39 = vrot.slane %v3804_v32, %v6719_v42 }
 0x810   : > { %5928 = vmatmul.mubr.bf16.vlgmr.msra.gmra.mrb[28].mxu1 %v2985_v13  ;;  %v3734_v13 = vrot.slane %v5659_v5, %v6713_v27  ;;  %v3735_v14 = vcombine.low %v3710_v20, %v3718_v62  ;;  %v3819_v23 = vcombine.low %v3794_v17, %v3802_v19  ;;  %v3736_v29 = vcombine.high %v3710_v20, %v3718_v62 }
 0x811   : > { %5933 = vmatprep.mubr.msk.bf16.mxu1 %vm6347_vm0, %v6345_v4  ;;  %v3820_v35 = vcombine.high %v3794_v17, %v3802_v19 }
 0x812   : > { %v3751_v15 = vcombine.low %v3726_v10, %v3734_v13  ;;  %v3743_v63 = vrot.slane %v3735_v14, %v6719_v42  ;;  %v3827_v25 = vrot.slane %v3819_v23, %v6719_v42  ;;  %v3752_v31 = vcombine.high %v3726_v10, %v3734_v13 }
 0x813   : > { %v3750_v37 = vrot.slane %v3736_v29, %v6719_v42  ;;  %v3834_v21 = vrot.slane %v3820_v35, %v6719_v42 }
 0x814   : > { %v3759_v24 = vrot.slane %v3751_v15, %v6719_v42  ;;  %v3835_v28 = vcombine.low %v3811_v18, %v3827_v25  ;;  %v3766_v38 = vrot.slane %v3752_v31, %v6719_v42  ;;  %v3836_v1 = vcombine.high %v3811_v18, %v3827_v25 }
 0x815   : > { %v3837_v11 = vcombine.low %v3818_v39, %v3834_v21  ;;  %v3838_v49 = vcombine.high %v3818_v39, %v3834_v21 }
 0x816   : > { %v3767_v26 = vcombine.low %v3743_v63, %v3759_v24  ;;  %v3768_v44 = vcombine.high %v3743_v63, %v3759_v24  ;;  %v3769_v45 = vcombine.low %v3750_v37, %v3766_v38  ;;  %v3770_v53 = vcombine.high %v3750_v37, %v3766_v38 }
 0x818   : > { %v3839_v36 = vpack.c.bf16 %v3835_v28, %v3767_v26  ;;  %v7188_v51 = vpack.c.bf16 %v3836_v1, %v3768_v44  ;;  %v7190_v16 = vpack.c.bf16 %v3837_v11, %v3769_v45  ;;  %v7192_v52 = vpack.c.bf16 %v3838_v49, %v3770_v53 }
 0x81a   : > { %v4143_v40 = vsel %vm2052_vm1, %v3839_v36, 0 }
 0x81b   : > { %5932 = vmatpush3.bf16.xpose.msra.mxu1 %v4143_v40 }
 0x81c   : > { %5937 = vmatprep.subr.bf16.mxu1 %v6345_v4 }
 0x8e3   : > { %v3091_v58 = vpop.f32.mrb[28].mxu1 }
 0x8e4   : > { %v3092_v59 = vadd.f32 %v5629_v56, %v3091_v58  ;;  %v5929_v60 = vpop.f32.mrb[29].mxu1 }
 0x8e5   : > { %v3094_v61 = vpop.f32.mrb[30].mxu1 }
 0x8e6   : > { %v3095_v7 = vadd.f32 %v5629_v56, %v3094_v61  ;;  %v5930_v34 = vpop.f32.mrb[31].mxu1  ;;  %3253 = vrot.lane.b32.xlu1 %v3092_v59, %s7711_s28 }
 0x8e8   : > { %3255 = vrot.lane.b32.xlu0 %v3095_v7, %s7711_s28 }
 0x8ea   : > { %3259 = vrot.lane.b32.xlu1 %v3092_v59, %s7715_s27 }
 0x8ec   : > { %3261 = vrot.lane.b32.xlu0 %v3095_v7, %s7715_s27 }
 0x8ee   : > { %3265 = vrot.lane.b32.xlu1 %v3092_v59, %s7710_s26 }
 0x8f0   : > { %3267 = vrot.lane.b32.xlu0 %v3095_v7, %s7710_s26 }
 0x8f2   : > { %3845 = vrot.lane.b32.xlu1 %v7136_v0, %s7711_s28 }
 0x8f4   : > { %3847 = vrot.lane.b32.xlu0 %v7139_v50, %s7711_s28 }
 0x8f6   : > { %3851 = vrot.lane.b32.xlu1 %v7136_v0, %s7715_s27 }
 0x8f8   : > { %3859 = vrot.lane.b32.xlu0 %v7139_v50, %s7710_s26 }
 0x8fa   : > { %3853 = vrot.lane.b32.xlu1 %v7139_v50, %s7715_s27 }
 0x958   : > { %v3254_v46 = vpop.permute.xlu1 %3253 }
 0x95a   : > { %v3256_v47 = vpop.permute.xlu0 %3255 }
 0x95c   : > { %v3260_v48 = vpop.permute.xlu1 %3259 }
 0x95d   : > { %v3271_v2 = vcombine.low %v3092_v59, %v3260_v48  ;;  %v3272_v54 = vcombine.high %v3092_v59, %v3260_v48 }
 0x95e   : > { %v3262_v33 = vpop.permute.xlu0 %3261 }
 0x95f   : > { %v3279_v5 = vrot.slane %v3271_v2, %v6713_v27  ;;  %v3286_v6 = vrot.slane %v3272_v54, %v6713_v27  ;;  %v3339_v9 = vcombine.low %v3095_v7, %v3262_v33  ;;  %v3340_v17 = vcombine.high %v3095_v7, %v3262_v33 }
 0x960   : > { %v3266_v41 = vpop.permute.xlu1 %3265 }
 0x961   : > { %v3287_v43 = vcombine.low %v3254_v46, %v3266_v41  ;;  %v3288_v3 = vcombine.high %v3254_v46, %v3266_v41  ;;  %v3347_v63 = vrot.slane %v3339_v9, %v6713_v27  ;;  %v3354_v24 = vrot.slane %v3340_v17, %v6713_v27 }
 0x962   : > { %v3268_v19 = vpop.permute.xlu0 %3267 }
 0x963   : > { %v3295_v20 = vrot.slane %v3287_v43, %v6713_v27  ;;  %v3302_v62 = vrot.slane %v3288_v3, %v6713_v27  ;;  %v3355_v10 = vcombine.low %v3256_v47, %v3268_v19  ;;  %v3356_v13 = vcombine.high %v3256_v47, %v3268_v19 }
 0x965   : > { %v3303_v14 = vcombine.low %v3279_v5, %v3295_v20  ;;  %v3304_v15 = vcombine.high %v3279_v5, %v3295_v20  ;;  %v3319_v22 = vcombine.low %v3286_v6, %v3302_v62  ;;  %v3320_v23 = vcombine.high %v3286_v6, %v3302_v62 }
 0x966   : > { %v3363_v18 = vrot.slane %v3355_v10, %v6713_v27  ;;  %v3370_v25 = vrot.slane %v3356_v13, %v6713_v27  ;;  %v4190_v20 = vsel %vm2052_vm1, %v7188_v51, 0 }
 0x967   : > { %v3311_v26 = vrot.slane %v3303_v14, %v6719_v42  ;;  %v3318_v28 = vrot.slane %v3304_v15, %v6719_v42  ;;  %v3327_v29 = vrot.slane %v3319_v22, %v6719_v42  ;;  %v3334_v31 = vrot.slane %v3320_v23, %v6719_v42 }
 0x968   : > { %v3371_v32 = vcombine.low %v3347_v63, %v3363_v18  ;;  %v3372_v35 = vcombine.high %v3347_v63, %v3363_v18  ;;  %v3387_v36 = vcombine.low %v3354_v24, %v3370_v25  ;;  %v3388_v37 = vcombine.high %v3354_v24, %v3370_v25 }
 0x969   : > { %v3407_v38 = vcombine.low %v3311_v26, %v3318_v28  ;;  %v5654_v39 = vcombine.high %v3311_v26, %v3318_v28  ;;  %v3423_v21 = vcombine.low %v3327_v29, %v3334_v31  ;;  %v5655_v40 = vcombine.high %v3327_v29, %v3334_v31 }
 0x96a   : > { %v3379_v44 = vrot.slane %v3371_v32, %v6719_v42  ;;  %v3386_v1 = vrot.slane %v3372_v35, %v6719_v42  ;;  %v3395_v45 = vrot.slane %v3387_v36, %v6719_v42  ;;  %v3402_v11 = vrot.slane %v3388_v37, %v6719_v42  ;;  %v5670_v36 = vld [vmem:[%s837_s25] ss:$0 sm:$0xff]  ;;  %s7592_s25 = scalar_lea.sflag [#allocation3], %s819_s0 }
 0x96b   : > { %v3414_v53 = vrot.slane %v3407_v38, %v6713_v27  ;;  %v3422_v49 = vrot.slane %v5654_v39, %v6713_v27  ;;  %v3430_v56 = vrot.slane %v3423_v21, %v6713_v27  ;;  %v3438_v58 = vrot.slane %v5655_v40, %v6713_v27 }
 0x96c   : > { %v3475_v59 = vcombine.low %v3379_v44, %v3386_v1  ;;  %v5656_v60 = vcombine.high %v3379_v44, %v3386_v1  ;;  %v3491_v61 = vcombine.low %v3395_v45, %v3402_v11  ;;  %v5657_v7 = vcombine.high %v3395_v45, %v3402_v11 }
 0x96d   : > { %v3439_v34 = vcombine.low %v3414_v53, %v3422_v49  ;;  %v3455_v46 = vcombine.low %v3430_v56, %v3438_v58  ;;  %v3440_v14 = vcombine.high %v3414_v53, %v3422_v49  ;;  %v3456_v15 = vcombine.high %v3430_v56, %v3438_v58 }
 0x96e   : > { %v3482_v47 = vrot.slane %v3475_v59, %v6713_v27  ;;  %v3490_v48 = vrot.slane %v5656_v60, %v6713_v27  ;;  %v3498_v2 = vrot.slane %v3491_v61, %v6713_v27  ;;  %v3506_v54 = vrot.slane %v5657_v7, %v6713_v27 }
 0x96f   : > { %v3447_v33 = vrot.slane %v3439_v34, %v6719_v42  ;;  %v3463_v41 = vrot.slane %v3455_v46, %v6719_v42  ;;  %v3454_v18 = vrot.slane %v3440_v14, %v6719_v42  ;;  %v3470_v51 = vrot.slane %v3456_v15, %v6719_v42 }
 0x970   : > { %v3507_v43 = vcombine.low %v3482_v47, %v3490_v48  ;;  %v3523_v3 = vcombine.low %v3498_v2, %v3506_v54  ;;  %v3508_v62 = vcombine.high %v3482_v47, %v3490_v48  ;;  %v3524_v10 = vcombine.high %v3498_v2, %v3506_v54 }
 0x971   : > { %v3471_v9 = vcombine.low %v3447_v33, %v3463_v41  ;;  %v3472_v22 = vcombine.high %v3447_v33, %v3463_v41  ;;  %v4237_v25 = vsel %vm2052_vm1, %v7190_v16, 0  ;;  %v3473_v28 = vcombine.low %v3454_v18, %v3470_v51 }
 0x972   : > { %v3515_v5 = vrot.slane %v3507_v43, %v6719_v42  ;;  %v3531_v6 = vrot.slane %v3523_v3, %v6719_v42  ;;  %v3522_v23 = vrot.slane %v3508_v62, %v6719_v42  ;;  %v3538_v63 = vrot.slane %v3524_v10, %v6719_v42 }
 0x973   : > { %v4284_v31 = vsel %vm2052_vm1, %v7192_v52, 0  ;;  %v3474_v32 = vcombine.high %v3454_v18, %v3470_v51 }
 0x974   : > { %v3539_v17 = vcombine.low %v3515_v5, %v3531_v6  ;;  %v3540_v13 = vcombine.high %v3515_v5, %v3531_v6  ;;  %v3541_v26 = vcombine.low %v3522_v23, %v3538_v63  ;;  %v3542_v16 = vcombine.high %v3522_v23, %v3538_v63  ;;  %v3846_v23 = vpop.permute.xlu1 %3845 }
 0x976   : > { %v3543_v19 = vpack.c.bf16 %v3539_v17, %v3471_v9  ;;  %v3544_v24 = vpack.c.bf16 %v3540_v13, %v3472_v22  ;;  %v3545_v29 = vpack.c.bf16 %v3541_v26, %v3473_v28  ;;  %v3546_v35 = vpack.c.bf16 %v3542_v16, %v3474_v32 }
 0x978   : > { %5934 = vmatmul.mubr.msk.bf16.vlgmr.msra.gmra.mrb[32].mxu1 %vm2052_vm1, %v3543_v19  ;;  %v3852_v63 = vpop.permute.xlu1 %3851 }
 0x979   : > { %5938 = vmatpush3.bf16.xpose.msra.mxu1 %v4190_v20  ;;  %5939 = vmatprep.mubr.msk.bf16.mxu1 %vm6347_vm0, %v6345_v4 }
 0x97a   : > { %5943 = vmatprep.subr.bf16.mxu1 %v6345_v4 }
 0x97c   : > { %v3854_v18 = vpop.permute.xlu1 %3853 }
 0x97d   : > { %v3932_v26 = vcombine.high %v7139_v50, %v3854_v18 }
 0x97f   : > { %v3946_v16 = vrot.slane %v3932_v26, %v6713_v27 }
 0x980   : > { %5940 = vmatmul.mubr.msk.bf16.vlgmr.msra.gmra.mrb[36].mxu1 %vm2052_vm1, %v3544_v24  ;;  %v3848_v24 = vpop.permute.xlu0 %3847 }
 0x981   : > { %5944 = vmatpush3.bf16.xpose.msra.mxu1 %v4237_v25  ;;  %5945 = vmatprep.mubr.msk.bf16.mxu1 %vm6347_vm0, %v6345_v4  ;;  %v3931_v25 = vcombine.low %v7139_v50, %v3854_v18 }
 0x982   : > { %5949 = vmatprep.subr.bf16.mxu1 %v6345_v4 }
 0x984   : > { %v3860_v51 = vpop.permute.xlu0 %3859 }
 0x985   : > { %v3947_v28 = vcombine.low %v3848_v24, %v3860_v51 }
 0x987   : > { %v3955_v32 = vrot.slane %v3947_v28, %v6713_v27 }
 0x988   : > { %5946 = vmatmul.mubr.msk.bf16.vlgmr.msra.gmra.mrb[40].mxu1 %vm2052_vm1, %v3545_v29  ;;  %v3948_v29 = vcombine.high %v3848_v24, %v3860_v51 }
 0x989   : > { %5950 = vmatpush3.bf16.xpose.msra.mxu1 %v4284_v31  ;;  %5951 = vmatprep.mubr.msk.bf16.mxu1 %vm6347_vm0, %v6345_v4  ;;  %v3939_v31 = vrot.slane %v3931_v25, %v6713_v27 }
 0x98a   : > { %5961 = vmatprep.subr.bf16.mxu1 %v6345_v4 }
 0x990   : > { %5952 = vmatmul.mubr.msk.bf16.vlgmr.msra.gmra.mrb[44].mxu1 %vm2052_vm1, %v3546_v35  ;;  %v3962_v35 = vrot.slane %v3948_v29, %v6713_v27 }
 0x991   : > { %5963 = vmatprep.mubr.msk.bf16.mxu1 %vm6347_vm0, %v6345_v4 }
 0xa4b   : > { %v4179_v52 = vpop.f32.mrb[32].mxu1 }
 0xa4c   : > { %v4327_v37 = vmul.f32 0.17677669, %v4179_v52  ;;  %v5935_v38 = vpop.f32.mrb[33].mxu1  ;;  %v3964_v52 = vcombine.high %v3939_v31, %v3955_v32 }
 0xa4d   : > { %v4182_v39 = vpop.f32.mrb[34].mxu1  ;;  %v3980_v38 = vcombine.high %v3946_v16, %v3962_v35 }
 0xa4e   : > { %v4328_v21 = vmul.f32 0.17677669, %v4182_v39  ;;  %v5936_v40 = vpop.f32.mrb[35].mxu1  ;;  %v7270_v44 = vadd.f32 %v5670_v36, %v4327_v37  ;;  %v3979_v37 = vcombine.low %v3946_v16, %v3962_v35 }
 0xa4f   : > { %v3994_v40 = vrot.slane %v3980_v38, %v6719_v42 }
 0xa50   : > { %v4349_v1 = vsel %vm2257_vm4, %v7270_v44, -inf  ;;  %v7274_v45 = vadd.f32 %v5670_v36, %v4328_v21  ;;  %v3978_v21 = vrot.slane %v3964_v52, %v6719_v42  ;;  %v3987_v50 = vrot.slane %v3979_v37, %v6719_v42 }
 0xa51   : > { %4350 = vmax.xlane.f32.xlu1 %v4349_v1 }
 0xa52   : > { %v4352_v11 = vsel %vm2257_vm4, %v7274_v45, -inf }
 0xa53   : > { %4353 = vmax.xlane.f32.xlu0 %v4352_v11  ;;  %v4226_v53 = vpop.f32.mrb[36].mxu1 }
 0xa54   : > { %v4329_v49 = vmul.f32 0.17677669, %v4226_v53  ;;  %v5941_v56 = vpop.f32.mrb[37].mxu1  ;;  %v3863_v53 = vcombine.low %v7136_v0, %v3852_v63 }
 0xa55   : > { %v4229_v58 = vpop.f32.mrb[38].mxu1  ;;  %v3864_v56 = vcombine.high %v7136_v0, %v3852_v63 }
 0xa56   : > { %v4330_v59 = vmul.f32 0.17677669, %v4229_v58  ;;  %v5942_v60 = vpop.f32.mrb[39].mxu1  ;;  %v7278_v61 = vadd.f32 %v5670_v36, %v4329_v49 }
 0xa58   : > { %v4355_v7 = vsel %vm2257_vm4, %v7278_v61, -inf  ;;  %v7282_v34 = vadd.f32 %v5670_v36, %v4330_v59 }
 0xa59   : > { %4356 = vmax.xlane.f32.xlu0 %v4355_v7 }
 0xa5a   : > { %v4358_v48 = vsel %vm2257_vm4, %v7282_v34, -inf }
 0xa5b   : > { %v4273_v46 = vpop.f32.mrb[40].mxu1 }
 0xa5c   : > { %v5947_v47 = vpop.f32.mrb[41].mxu1  ;;  %v4331_v14 = vmul.f32 0.17677669, %v4273_v46  ;;  %v4083_v46 = vcombine.low %v3987_v50, %v3994_v40 }
 0xa5d   : > { %4359 = vmax.xlane.f32.xlu0 %v4358_v48  ;;  %v4276_v2 = vpop.f32.mrb[42].mxu1  ;;  %v5665_v47 = vcombine.high %v3987_v50, %v3994_v40 }
 0xa5e   : > { %v4332_v54 = vmul.f32 0.17677669, %v4276_v2  ;;  %v5948_v33 = vpop.f32.mrb[43].mxu1  ;;  %v7300_v15 = vadd.f32 %v5670_v36, %v4331_v14 }
 0xa60   : > { %v7286_v41 = vadd.f32 %v5670_v36, %v4332_v54  ;;  %v4361_v22 = vsel %vm2257_vm4, %v7300_v15, -inf }
 0xa62   : > { %3857 = vrot.lane.b32.xlu1 %v7136_v0, %s7710_s26  ;;  %v4364_v43 = vsel %vm2257_vm4, %v7286_v41, -inf }
 0xa63   : > { %4365 = vmax.xlane.f32.xlu0 %v4364_v43  ;;  %v4320_v3 = vpop.f32.mrb[44].mxu1  ;;  %v3871_v43 = vrot.slane %v3863_v53, %v6713_v27 }
 0xa64   : > { %v4333_v5 = vmul.f32 0.17677669, %v4320_v3  ;;  %v5953_v6 = vpop.f32.mrb[45].mxu1 }
 0xa65   : > { %v4323_v9 = vpop.f32.mrb[46].mxu1  ;;  %v4090_v6 = vrot.slane %v4083_v46, %v6713_v27 }
 0xa66   : > { %v4334_v17 = vmul.f32 0.17677669, %v4323_v9  ;;  %v5954_v19 = vpop.f32.mrb[47].mxu1  ;;  %v7292_v20 = vadd.f32 %v5670_v36, %v4333_v5  ;;  %v4098_v9 = vrot.slane %v5665_v47, %v6713_v27 }
 0xa68   : > { %v4367_v62 = vsel %vm2257_vm4, %v7292_v20, -inf  ;;  %v7296_v10 = vadd.f32 %v5670_v36, %v4334_v17  ;;  %v3963_v36 = vcombine.low %v3939_v31, %v3955_v32  ;;  %v4115_v28 = vcombine.low %v4090_v6, %v4098_v9 }
 0xa69   : > { %4368 = vmax.xlane.f32.xlu0 %v4367_v62 }
 0xa6a   : > { %v4370_v13 = vsel %vm2257_vm4, %v7296_v10, -inf  ;;  %v3971_v39 = vrot.slane %v3963_v36, %v6719_v42  ;;  %v4116_v36 = vcombine.high %v4090_v6, %v4098_v9 }
 0xa6c   : > { %v4067_v60 = vcombine.low %v3971_v39, %v3978_v21  ;;  %v5664_v7 = vcombine.high %v3971_v39, %v3978_v21 }
 0xa6d   : > { %4371 = vmax.xlane.f32.xlu0 %v4370_v13 }
 0xa6e   : > { %v4082_v5 = vrot.slane %v5664_v7, %v6713_v27 }
 0xa86   : > { %4362 = vmax.xlane.f32.xlu1 %v4361_v22 }
 0xade   : > { %v4351_v1 = vpop.xlane.xlu1 %4350 }
 0xadf   : > { %v4373_v11 = vsub.f32 %v7270_v44, %v4351_v1  ;;  %v3878_v44 = vrot.slane %v3864_v56, %v6713_v27 }
 0xae0   : > { %v4354_v49 = vpop.xlane.xlu0 %4353 }
 0xae1   : > { %v4381_v58 = vmul.f32 1.442695, %v4373_v11  ;;  %v4374_v59 = vsub.f32 %v7274_v45, %v4354_v49  ;;  %v4074_v45 = vrot.slane %v4067_v60, %v6713_v27  ;;  %v4123_v11 = vrot.slane %v4115_v28, %v6719_v42 }
 0xae2   : > { %v3858_v48 = vpop.permute.xlu1 %3857 }
 0xae3   : > { %6239 = vpow2.f32 %v4381_v58  ;;  %v4383_v2 = vmul.f32 1.442695, %v4374_v59  ;;  %v3879_v54 = vcombine.low %v3846_v23, %v3858_v48  ;;  %v3880_v33 = vcombine.high %v3846_v23, %v3858_v48 }
 0xae4   : > { %v4099_v26 = vcombine.low %v4074_v45, %v4082_v5 }
 0xae5   : > { %6241 = vpow2.f32 %v4383_v2  ;;  %v3887_v3 = vrot.slane %v3879_v54, %v6713_v27  ;;  %v3894_v0 = vrot.slane %v3880_v33, %v6713_v27 }
 0xae6   : > { %v4357_v17 = vpop.xlane.xlu0 %4356  ;;  %v4107_v1 = vrot.slane %v4099_v26, %v6719_v42 }
 0xae7   : > { %v3895_v19 = vcombine.low %v3871_v43, %v3887_v3  ;;  %v3896_v62 = vcombine.high %v3871_v43, %v3887_v3  ;;  %v3911_v13 = vcombine.low %v3878_v44, %v3894_v0  ;;  %v3912_v14 = vcombine.high %v3878_v44, %v3894_v0 }
 0xae8   : > { %v4375_v22 = vsub.f32 %v7278_v61, %v4357_v17  ;;  %v4100_v61 = vcombine.high %v4074_v45, %v4082_v5  ;;  %v4131_v2 = vcombine.low %v4107_v1, %v4123_v11  ;;  %v4130_v43 = vrot.slane %v4116_v36, %v6719_v42 }
 0xae9   : > { %v3903_v23 = vrot.slane %v3895_v19, %v6719_v42  ;;  %v3910_v63 = vrot.slane %v3896_v62, %v6719_v42  ;;  %v3919_v24 = vrot.slane %v3911_v13, %v6719_v42  ;;  %v3926_v18 = vrot.slane %v3912_v14, %v6719_v42 }
 0xaea   : > { %v4385_v51 = vmul.f32 1.442695, %v4375_v22  ;;  %v4360_v25 = vpop.xlane.xlu0 %4359  ;;  %v4114_v33 = vrot.slane %v4100_v61, %v6719_v42  ;;  %v4132_v45 = vcombine.high %v4107_v1, %v4123_v11  ;;  %v6154_v1 = vld [vmem:[%s7649_s16 + $0x18] sm:$0xff]   ;;  %v6155_v11 = vld [vmem:[%s7649_s16 + $0x20] sm:$0xff]  }
 0xaeb   : > { %v3999_v29 = vcombine.low %v3903_v23, %v3910_v63  ;;  %v5662_v31 = vcombine.high %v3903_v23, %v3910_v63  ;;  %v4015_v16 = vcombine.low %v3919_v24, %v3926_v18  ;;  %v5663_v32 = vcombine.high %v3919_v24, %v3926_v18 }
 0xaec   : > { %6243 = vpow2.f32 %v4385_v51  ;;  %v4376_v35 = vsub.f32 %v7282_v34, %v4360_v25  ;;  %v4133_v13 = vcombine.low %v4114_v33, %v4130_v43  ;;  %v4134_v51 = vcombine.high %v4114_v33, %v4130_v43 }
 0xaed   : > { %v6240_v52 = vpop.eup %6239  ;;  %v4006_v37 = vrot.slane %v3999_v29, %v6713_v27  ;;  %v4014_v38 = vrot.slane %v5662_v31, %v6713_v27  ;;  %v4022_v39 = vrot.slane %v4015_v16, %v6713_v27  ;;  %v4030_v21 = vrot.slane %v5663_v32, %v6713_v27 }
 0xaee   : > { %v4387_v50 = vmul.f32 1.442695, %v4376_v35  ;;  %v4397_v40 = vsel %vm2257_vm4, %v6240_v52, 0.0 }
 0xaef   : > { %v6242_v53 = vpop.eup %6241  ;;  %4398 = vadd.xlane.f32.xlu1 %v4397_v40  ;;  %v4031_v34 = vcombine.low %v4006_v37, %v4014_v38  ;;  %v4047_v49 = vcombine.low %v4022_v39, %v4030_v21  ;;  %v4032_v56 = vcombine.high %v4006_v37, %v4014_v38  ;;  %v4048_v58 = vcombine.high %v4022_v39, %v4030_v21  ;;  %v6153_v40 = vld [vmem:[%s7649_s16 + $0x10] sm:$0xff]  }
 0xaf0   : > { %6245 = vpow2.f32 %v4387_v50  ;;  %v4366_v59 = vpop.xlane.xlu0 %4365  ;;  %v4400_v60 = vsel %vm2257_vm4, %v6242_v53, 0.0  ;;  %v4421_v14 = vpack.c.bf16 %v6242_v53, %v6240_v52  ;;  %v6156_v53 = vld [vmem:[%s7649_s16 + $0x28] sm:$0xff]  }
 0xaf1   : > { %v4378_v7 = vsub.f32 %v7286_v41, %v4366_v59  ;;  %4401 = vadd.xlane.f32.xlu0 %v4400_v60  ;;  %v4039_v46 = vrot.slane %v4031_v34, %v6719_v42  ;;  %v4055_v47 = vrot.slane %v4047_v49, %v6719_v42  ;;  %v4046_v48 = vrot.slane %v4032_v56, %v6719_v42 }
 0xaf2   : > { %v4062_v54 = vrot.slane %v4048_v58, %v6719_v42 }
 0xaf3   : > { %v4391_v44 = vmul.f32 1.442695, %v4378_v7  ;;  %v4063_v3 = vcombine.low %v4039_v46, %v4055_v47  ;;  %v4064_v0 = vcombine.high %v4039_v46, %v4055_v47 }
 0xaf4   : > { %v4065_v6 = vcombine.low %v4046_v48, %v4062_v54  ;;  %v4066_v22 = vcombine.high %v4046_v48, %v4062_v54 }
 0xaf5   : > { %6247 = vpow2.f32 %v4391_v44  ;;  %v4135_v41 = vpack.c.bf16 %v4131_v2, %v4063_v3  ;;  %v4136_v5 = vpack.c.bf16 %v4132_v45, %v4064_v0 }
 0xaf6   : > { %v6244_v9 = vpop.eup %6243  ;;  %v4369_v17 = vpop.xlane.xlu0 %4368  ;;  %v4137_v23 = vpack.c.bf16 %v4133_v13, %v4065_v6  ;;  %v4138_v28 = vpack.c.bf16 %v4134_v51, %v4066_v22 }
 0xaf7   : > { %v4379_v19 = vsub.f32 %v7292_v20, %v4369_v17  ;;  %v4403_v62 = vsel %vm2257_vm4, %v6244_v9, 0.0  ;;  %5956 = vmatpush3.bf16.msra.mxu0 %v4135_v41  ;;  %5962 = vmatpush3.bf16.msra.mxu1 %v4136_v5 }
 0xaf8   : > { %4404 = vadd.xlane.f32.xlu1 %v4403_v62  ;;  %5967 = vmatprep.subr.bf16.mxu0 %v6345_v4 }
 0xaf9   : > { %5973 = vmatprep.subr.bf16.mxu1 %v6345_v4  ;;  %v4393_v24 = vmul.f32 1.442695, %v4379_v19 }
 0xafa   : > { %v6246_v63 = vpop.eup %6245  ;;  %v4372_v18 = vpop.xlane.xlu0 %4371  ;;  %5958 = vmatmul.mubr.msk.bf16.vlgmr.msra.gmra.mrb[20].mxu0 %vm2257_vm4, %v4421_v14 }
 0xafb   : > { %v4380_v20 = vsub.f32 %v7296_v10, %v4372_v18  ;;  %v4406_v25 = vsel %vm2257_vm4, %v6246_v63, 0.0  ;;  %5968 = vmatpush3.bf16.msra.mxu0 %v4137_v23  ;;  %v4422_v26 = vpack.c.bf16 %v6246_v63, %v6244_v9  ;;  %5969 = vmatprep.mubr.msk.bf16.mxu0 %vm6347_vm0, %v6345_v4  ;;  %6249 = vpow2.f32 %v4393_v24 }
 0xafc   : > { %4407 = vadd.xlane.f32.xlu0 %v4406_v25  ;;  %5979 = vmatprep.subr.bf16.mxu0 %v6345_v4 }
 0xafd   : > { %v4395_v29 = vmul.f32 1.442695, %v4380_v20  ;;  %5964 = vmatmul.mubr.msk.bf16.vlgmr.msra.gmra.mrb[48].mxu1 %vm2257_vm4, %v4422_v26 }
 0xafe   : > { %5974 = vmatpush3.bf16.msra.mxu1 %v4138_v28  ;;  %5975 = vmatprep.mubr.msk.bf16.mxu1 %vm6347_vm0, %v6345_v4 }
 0xaff   : > { %v6248_v10 = vpop.eup %6247  ;;  %6251 = vpow2.f32 %v4395_v29 }
 0xb00   : > { %v4412_v31 = vsel %vm2257_vm4, %v6248_v10, 0.0 }
 0xb01   : > { %4413 = vadd.xlane.f32.xlu0 %v4412_v31 }
 0xb05   : > { %v6250_v16 = vpop.eup %6249 }
 0xb06   : > { %v4415_v50 = vsel %vm2257_vm4, %v6250_v16, 0.0 }
 0xb09   : > { %v6252_v32 = vpop.eup %6251 }
 0xb0a   : > { %v4418_v35 = vsel %vm2257_vm4, %v6252_v32, 0.0  ;;  %v4424_v61 = vpack.c.bf16 %v6252_v32, %v6250_v16 }
 0xb0b   : > { %4419 = vadd.xlane.f32.xlu0 %v4418_v35 }
 0xb0c   : > { %5976 = vmatmul.mubr.msk.bf16.vlgmr.msra.gmra.mrb[52].mxu1 %vm2257_vm4, %v4424_v61 }
 0xb0d   : > { %5215 = vmatprep.mubr.bf16.mxu1 %v6346_v30  ;;  %v6151_v30 = vld [vmem:[%s7649_s16] sm:$0xff]  }
 0xb13   : > { %v4363_v36 = vpop.xlane.xlu1 %4362 }
 0xb14   : > { %v4377_v52 = vsub.f32 %v7300_v15, %v4363_v36  ;;  %v6152_v15 = vld [vmem:[%s7649_s16 + $0x8] sm:$0xff]  }
 0xb16   : > { %v4389_v37 = vmul.f32 1.442695, %v4377_v52 }
 0xb18   : > { %6253 = vpow2.f32 %v4389_v37 }
 0xb22   : > { %v6254_v38 = vpop.eup %6253 }
 0xb23   : > { %v4409_v39 = vsel %vm2257_vm4, %v6254_v38, 0.0  ;;  %v4423_v21 = vpack.c.bf16 %v6248_v10, %v6254_v38 }
 0xb24   : > { %4410 = vadd.xlane.f32.xlu1 %v4409_v39 }
 0xb25   : > { %5970 = vmatmul.mubr.msk.bf16.vlgmr.msra.gmra.mrb[24].mxu0 %vm2257_vm4, %v4423_v21 }
 0xb26   : > { %5995 = vmatprep.mubr.msk.bf16.mxu0 %vm6347_vm0, %v6345_v4  ;;  %5980 = vmatpush3.bf16.msra.mxu0 %v6151_v30 }
 0xb27   : > { %5981 = vmatprep.subr.bf16.mxu0 %v6345_v4 }
 0xb28   : > { %4416 = vadd.xlane.f32.xlu1 %v4415_v50 }
 0xb2a   : > { %5982 = vmatpush3.bf16.msra.mxu0 %v6152_v15 }
 0xb2b   : > { %5983 = vmatprep.subr.bf16.mxu0 %v6345_v4 }
 0xb2e   : > { %5984 = vmatpush3.bf16.msra.mxu0 %v6153_v40 }
 0xb2f   : > { %5985 = vmatprep.subr.bf16.mxu0 %v6345_v4 }
 0xb32   : > { %5986 = vmatpush3.bf16.msra.mxu0 %v6154_v1 }
 0xb33   : > { %5987 = vmatprep.subr.bf16.mxu0 %v6345_v4 }
 0xb36   : > { %5988 = vmatpush3.bf16.msra.mxu0 %v6155_v11 }
 0xb37   : > { %5989 = vmatprep.subr.bf16.mxu0 %v6345_v4 }
 0xb3a   : > { %5990 = vmatpush3.bf16.msra.mxu0 %v6156_v53 }
 0xb3b   : > { %5991 = vmatprep.subr.bf16.mxu0 %v6345_v4 }
 0xb7c   : > { %v4399_v34 = vpop.xlane.xlu1 %4398 }
 0xb7e   : > { %v4402_v49 = vpop.xlane.xlu0 %4401 }
 0xb85   : > { %v4405_v56 = vpop.xlane.xlu1 %4404 }
 0xb86   : > { %6255 = vrcp.f32 %v4405_v56 }
 0xb89   : > { %v4408_v58 = vpop.xlane.xlu0 %4407 }
 0xb8e   : > { %v4414_v46 = vpop.xlane.xlu0 %4413 }
 0xb90   : > { %v6256_v0 = vpop.eup %6255 }
 0xb98   : > { %v4420_v3 = vpop.xlane.xlu0 %4419 }
 0xbb1   : > { %v4411_v59 = vpop.xlane.xlu1 %4410 }
 0xbb5   : > { %v4417_v33 = vpop.xlane.xlu1 %4416 }
 0xbb6   : > { %6257 = vrcp.f32 %v4417_v33 }
 0xbb7   : > { %6259 = vrcp.f32 %v4408_v58 }
 0xbb8   : > { %6261 = vrcp.f32 %v4420_v3 }
 0xbb9   : > { %6263 = vrcp.f32 %v4399_v34 }
 0xbba   : > { %6265 = vrcp.f32 %v4411_v59 }
 0xbbb   : > { %6267 = vrcp.f32 %v4402_v49 }
 0xbbc   : > { %6269 = vrcp.f32 %v4414_v46 }
 0xbc0   : > { %v6258_v45 = vpop.eup %6257 }
 0xbc1   : > { %v6260_v5 = vpop.eup %6259 }
 0xbc2   : > { %v6262_v19 = vpop.eup %6261 }
 0xbc3   : > { %v6264_v51 = vpop.eup %6263 }
 0xbc4   : > { %v6266_v20 = vpop.eup %6265 }
 0xbc5   : > { %v6268_v26 = vpop.eup %6267 }
 0xbc6   : > { %v6270_v31 = vpop.eup %6269 }
 0xbcd   : > { %v4462_v60 = vpop.f32.mrb[20].mxu0 }
 0xbce   : > { %v5959_v7 = vpop.f32.mrb[21].mxu0  ;;  %v4609_v28 = vmul.f32 %v6264_v51, %v4462_v60 }
 0xbcf   : > { %v4465_v47 = vpop.f32.mrb[22].mxu0 }
 0xbd0   : > { %v4506_v48 = vpop.f32.mrb[48].mxu1  ;;  %v5960_v2 = vpop.f32.mrb[23].mxu0  ;;  %v4610_v32 = vmul.f32 %v6268_v26, %v4465_v47 }
 0xbd1   : > { %v5965_v54 = vpop.f32.mrb[49].mxu1  ;;  %v4611_v6 = vmul.f32 %v6256_v0, %v4506_v48 }
 0xbd2   : > { %v4509_v43 = vpop.f32.mrb[50].mxu1 }
 0xbd3   : > { %v5966_v44 = vpop.f32.mrb[51].mxu1  ;;  %v4612_v13 = vmul.f32 %v6260_v5, %v4509_v43 }
 0xbdf   : > { %v4594_v41 = vpop.f32.mrb[52].mxu1 }
 0xbe0   : > { %v4615_v9 = vmul.f32 %v6258_v45, %v4594_v41  ;;  %v5977_v17 = vpop.f32.mrb[53].mxu1 }
 0xbe1   : > { %v4597_v62 = vpop.f32.mrb[54].mxu1 }
 0xbe2   : > { %v4633_v14 = vcombine.low %v4611_v6, %v4615_v9  ;;  %v4634_v22 = vcombine.high %v4611_v6, %v4615_v9  ;;  %v4616_v23 = vmul.f32 %v6262_v19, %v4597_v62  ;;  %v5978_v63 = vpop.f32.mrb[55].mxu1 }
 0xbe4   : > { %v4701_v24 = vcombine.low %v4612_v13, %v4616_v23  ;;  %v4702_v18 = vcombine.high %v4612_v13, %v4616_v23  ;;  %v4641_v37 = vrot.slane %v4633_v14, %v6713_v27  ;;  %v4648_v38 = vrot.slane %v4634_v22, %v6713_v27 }
 0xbe6   : > { %v4709_v53 = vrot.slane %v4701_v24, %v6713_v27  ;;  %v4716_v34 = vrot.slane %v4702_v18, %v6713_v27  ;;  %v6157_v18 = vld [vmem:[%s7649_s16 + $0x30] sm:$0xff]  }
 0xbe7   : > { %5992 = vmatpush3.bf16.msra.mxu0 %v6157_v18 }
 0xbe8   : > { %5993 = vmatprep.subr.bf16.mxu0 %v6345_v4 }
 0xbf8   : > { %v4550_v25 = vpop.f32.mrb[24].mxu0 }
 0xbf9   : > { %v4613_v29 = vmul.f32 %v6266_v20, %v4550_v25  ;;  %v5971_v10 = vpop.f32.mrb[25].mxu0 }
 0xbfa   : > { %v4553_v16 = vpop.f32.mrb[26].mxu0 }
 0xbfb   : > { %v4617_v35 = vcombine.low %v4609_v28, %v4613_v29  ;;  %v4618_v61 = vcombine.high %v4609_v28, %v4613_v29  ;;  %v4614_v36 = vmul.f32 %v6270_v31, %v4553_v16  ;;  %v5972_v52 = vpop.f32.mrb[27].mxu0 }
 0xbfd   : > { %v4625_v39 = vrot.slane %v4617_v35, %v6713_v27  ;;  %v4632_v21 = vrot.slane %v4618_v61, %v6713_v27  ;;  %v4685_v50 = vcombine.low %v4610_v32, %v4614_v36  ;;  %v4686_v30 = vcombine.high %v4610_v32, %v4614_v36 }
 0xbff   : > { %v4649_v15 = vcombine.low %v4625_v39, %v4641_v37  ;;  %v4650_v40 = vcombine.high %v4625_v39, %v4641_v37  ;;  %v4665_v1 = vcombine.low %v4632_v21, %v4648_v38  ;;  %v4666_v11 = vcombine.high %v4632_v21, %v4648_v38 }
 0xc00   : > { %v4693_v49 = vrot.slane %v4685_v50, %v6713_v27  ;;  %v4700_v56 = vrot.slane %v4686_v30, %v6713_v27  ;;  %v6158_v30 = vld [vmem:[%s7649_s16 + $0x38] sm:$0xff]  }
 0xc01   : > { %v4657_v58 = vrot.slane %v4649_v15, %v6719_v42  ;;  %v4664_v59 = vrot.slane %v4650_v40, %v6719_v42  ;;  %v4673_v60 = vrot.slane %v4665_v1, %v6719_v42  ;;  %v4680_v7 = vrot.slane %v4666_v11, %v6719_v42  ;;  %5994 = vmatpush3.bf16.msra.mxu0 %v6158_v30  ;;  %v6188_v30 = vld [vmem:[%s7655_s22 + $0x10] sm:$0xff]  }
 0xc02   : > { %v4717_v46 = vcombine.low %v4693_v49, %v4709_v53  ;;  %v4718_v47 = vcombine.high %v4693_v49, %v4709_v53  ;;  %v4733_v48 = vcombine.low %v4700_v56, %v4716_v34  ;;  %v4734_v2 = vcombine.high %v4700_v56, %v4716_v34 }
 0xc03   : > { %v4753_v54 = vcombine.low %v4657_v58, %v4664_v59  ;;  %v5675_v33 = vcombine.high %v4657_v58, %v4664_v59  ;;  %v4769_v43 = vcombine.low %v4673_v60, %v4680_v7  ;;  %v5676_v44 = vcombine.high %v4673_v60, %v4680_v7 }
 0xc04   : > { %v4725_v3 = vrot.slane %v4717_v46, %v6719_v42  ;;  %v4732_v0 = vrot.slane %v4718_v47, %v6719_v42  ;;  %v4741_v45 = vrot.slane %v4733_v48, %v6719_v42  ;;  %v4748_v41 = vrot.slane %v4734_v2, %v6719_v42 }
 0xc05   : > { %v4760_v5 = vrot.slane %v4753_v54, %v6713_v27  ;;  %v4768_v6 = vrot.slane %v5675_v33, %v6713_v27  ;;  %v4776_v9 = vrot.slane %v4769_v43, %v6713_v27  ;;  %v4784_v17 = vrot.slane %v5676_v44, %v6713_v27 }
 0xc06   : > { %v4821_v19 = vcombine.low %v4725_v3, %v4732_v0  ;;  %v5677_v62 = vcombine.high %v4725_v3, %v4732_v0  ;;  %v4837_v13 = vcombine.low %v4741_v45, %v4748_v41  ;;  %v5678_v14 = vcombine.high %v4741_v45, %v4748_v41  ;;  %v5679_v0 = vld [vmem:[%s7650_s17] ss:$0 sm:$0xff] }
 0xc07   : > { %v4786_v22 = vcombine.high %v4760_v5, %v4768_v6  ;;  %v4802_v23 = vcombine.high %v4776_v9, %v4784_v17  ;;  %v4785_v63 = vcombine.low %v4760_v5, %v4768_v6  ;;  %v4801_v24 = vcombine.low %v4776_v9, %v4784_v17 }
 0xc08   : > { %v4828_v51 = vrot.slane %v4821_v19, %v6713_v27  ;;  %v4836_v20 = vrot.slane %v5677_v62, %v6713_v27  ;;  %v4844_v25 = vrot.slane %v4837_v13, %v6713_v27  ;;  %v4852_v26 = vrot.slane %v5678_v14, %v6713_v27  ;;  %v6159_v13 = vld [vmem:[%s7653_s20] ss:$8 sps:$4 sm:$0xff]   ;;  %v6161_v14 = vld [vmem:[%s7653_s20 + $0x4] ss:$8 sps:$4 sm:$0xff]  }
 0xc09   : > { %v4800_v28 = vrot.slane %v4786_v22, %v6719_v42  ;;  %v4816_v29 = vrot.slane %v4802_v23, %v6719_v42  ;;  %v4793_v10 = vrot.slane %v4785_v63, %v6719_v42  ;;  %v4809_v31 = vrot.slane %v4801_v24, %v6719_v42  ;;  %5183 = vmatprep.subr.bf16.mxu1 %v6161_v14 }
 0xc0a   : > { %v4854_v16 = vcombine.high %v4828_v51, %v4836_v20  ;;  %v4870_v32 = vcombine.high %v4844_v25, %v4852_v26  ;;  %v4853_v35 = vcombine.low %v4828_v51, %v4836_v20  ;;  %v4869_v61 = vcombine.low %v4844_v25, %v4852_v26  ;;  %5184 = vmatpush1.bf16.msra.mxu1 %v6159_v13  ;;  %v6167_v26 = vld [vmem:[%s7653_s20 + $0x24] ss:$8 sps:$4 sm:$0xff]  }
 0xc0b   : > { %v4819_v36 = vcombine.low %v4800_v28, %v4816_v29  ;;  %v4818_v52 = vcombine.high %v4793_v10, %v4809_v31  ;;  %v4817_v37 = vcombine.low %v4793_v10, %v4809_v31  ;;  %v4820_v38 = vcombine.high %v4800_v28, %v4816_v29  ;;  %v6165_v28 = vld [vmem:[%s7653_s20 + $0x20] ss:$8 sps:$4 sm:$0xff]   ;;  %v6170_v29 = vld [vmem:[%s7653_s20 + $0x34] ss:$8 sps:$4 sm:$0xff]   ;;  %v6168_v10 = vld [vmem:[%s7653_s20 + $0x30] ss:$8 sps:$4 sm:$0xff]  }
 0xc0c   : > { %v4868_v27 = vrot.slane %v4854_v16, %v6719_v42  ;;  %v4884_v39 = vrot.slane %v4870_v32, %v6719_v42  ;;  %v4861_v21 = vrot.slane %v4853_v35, %v6719_v42  ;;  %v4877_v50 = vrot.slane %v4869_v61, %v6719_v42  ;;  %v6173_v31 = vld [vmem:[%s7653_s20 + $0x44] ss:$8 sps:$4 sm:$0xff]   ;;  %v6171_v16 = vld [vmem:[%s7653_s20 + $0x40] ss:$8 sps:$4 sm:$0xff]   ;;  %v6176_v32 = vld [vmem:[%s7653_s20 + $0x54] ss:$8 sps:$4 sm:$0xff]  }
 0xc0d   : > { %v6174_v35 = vld [vmem:[%s7653_s20 + $0x50] ss:$8 sps:$4 sm:$0xff]   ;;  %v6179_v61 = vld [vmem:[%s7653_s20 + $0x64] ss:$8 sps:$4 sm:$0xff]  }
 0xc0e   : > { %v4887_v15 = vcombine.low %v4868_v27, %v4884_v39  ;;  %v4885_v40 = vcombine.low %v4861_v21, %v4877_v50  ;;  %v4886_v1 = vcombine.high %v4861_v21, %v4877_v50  ;;  %v4888_v4 = vcombine.high %v4868_v27, %v4884_v39  ;;  %v6182_v27 = vld [vmem:[%s7653_s20 + $0x74] ss:$8 sps:$4 sm:$0xff]   ;;  %v6186_v39 = vld [vmem:[%s7655_s22 + $0x8] sm:$0xff]   ;;  %v6180_v50 = vld [vmem:[%s7653_s20 + $0x70] ss:$8 sps:$4 sm:$0xff]  }
 0xc0f   : > { %v6187_v21 = vld [vmem:[%s7655_s22 + $0x50] sm:$0xff]  }
 0xc10   : > { %v6069_v11 = vpack.i.bf16 %v4887_v15, %v4819_v36  ;;  %v6064_v53 = vpack.i.bf16 %v4886_v1, %v4818_v52  ;;  %v6074_v34 = vpack.i.bf16 %v4888_v4, %v4820_v38  ;;  %v6183_v36 = vld [vmem:[%s7655_s22 + $0x40] sm:$0xff]   ;;  %v6189_v15 = vld [vmem:[%s7655_s22 + $0x58] sm:$0xff]  }
 0xc11   : > { %v6184_v52 = vld [vmem:[%s7655_s22] sm:$0xff]   ;;  %5801 = vmatprep.subr.bf16.mxu0 %v6183_v36 }
 0xc12   : > { %6070 = vrot.lane.b32.xlu0 %v6069_v11, %s7715_s27  ;;  %6065 = vrot.lane.b32.xlu1 %v6064_v53, %s7710_s26  ;;  %v6177_v38 = vld [vmem:[%s7653_s20 + $0x60] ss:$8 sps:$4 sm:$0xff]  }
 0xc13   : > { %v6191_v1 = vld [vmem:[%s7655_s22 + $0x60] sm:$0xff]   ;;  %v6193_v11 = vld [vmem:[%s7655_s22 + $0x68] sm:$0xff]  }
 0xc14   : > { %v6192_v4 = vld [vmem:[%s7655_s22 + $0x20] sm:$0xff]  }
 0xc16   : > { %6075 = vrot.lane.b32.xlu1 %v6074_v34, %s7711_s28  ;;  %s7719_s28 = sld [smem:[#allocation24_spill]] }
 0xc84   : > { %v6071_v49 = vpop.permute.xlu0 %6070  ;;  %v6066_v42 = vpop.permute.xlu1 %6065 }
 0xc85   : > { %v6068_v56 = vunpack.i.h.bf16 %v6066_v42  ;;  %v6067_v58 = vunpack.i.l.bf16 %v6066_v42  ;;  %v6073_v59 = vunpack.i.h.bf16 %v6071_v49  ;;  %v6072_v60 = vunpack.i.l.bf16 %v6071_v49 }
 0xc87   : > { %v4914_v7 = vsel %vm2052_vm1, %v4885_v40, %v6068_v56  ;;  %v4913_v46 = vsel %vm2052_vm1, %v4817_v37, %v6067_v58  ;;  %v6185_v37 = vld [vmem:[%s7655_s22 + $0x48] sm:$0xff]   ;;  %v6190_v40 = vld [vmem:[%s7655_s22 + $0x18] sm:$0xff]  }
 0xc88   : > { %v6076_v47 = vpop.permute.xlu1 %6075  ;;  %v4915_v54 = vsel %vm2824_vm5, %v4913_v46, %v6072_v60  ;;  %v4916_v33 = vsel %vm2824_vm5, %v4914_v7, %v6073_v59  ;;  %v5688_v60 = vld [vmem:[%s7651_s18] ss:$0 sm:$0xff] }
 0xc89   : > { %v6078_v48 = vunpack.i.h.bf16 %v6076_v47  ;;  %v6077_v2 = vunpack.i.l.bf16 %v6076_v47 }
 0xc8b   : > { %v4917_v43 = vsel %vm2827_vm6, %v4915_v54, %v6077_v2  ;;  %v4918_v44 = vsel %vm2827_vm6, %v4916_v33, %v6078_v48  ;;  %v5689_v2 = vld [vmem:[%s7652_s19] ss:$0 sm:$0xff] }
 0xc8c   : > { %v4919_v3 = vpack.c.bf16 %v4918_v44, %v4917_v43 }
 0xc8e   : > { %5996 = vmatmul.mubr.bf16.vlgmr.msra.gmra.mrb[28].mxu0 %v4919_v3  ;;  %v6194_v3 = vld [vmem:[%s7655_s22 + $0x28] sm:$0xff]  }
 0xc8f   : > { %5802 = vmatpush3.bf16.msra.mxu0 %v6184_v52 }
 0xc90   : > { %5803 = vmatprep.subr.bf16.mxu0 %v6185_v37 }
 0xc93   : > { %5804 = vmatpush3.bf16.msra.mxu0 %v6186_v39 }
 0xc94   : > { %5805 = vmatprep.subr.bf16.mxu0 %v6187_v21 }
 0xc97   : > { %5806 = vmatpush3.bf16.msra.mxu0 %v6188_v30 }
 0xc98   : > { %5807 = vmatprep.subr.bf16.mxu0 %v6189_v15 }
 0xc9b   : > { %5808 = vmatpush3.bf16.msra.mxu0 %v6190_v40 }
 0xc9c   : > { %5809 = vmatprep.subr.bf16.mxu0 %v6191_v1 }
 0xc9f   : > { %5810 = vmatpush3.bf16.msra.mxu0 %v6192_v4 }
 0xca0   : > { %5811 = vmatprep.subr.bf16.mxu0 %v6193_v11 }
 0xca3   : > { %5812 = vmatpush3.bf16.msra.mxu0 %v6194_v3 }
 0xd61   : > { %v5025_v45 = vpop.f32.mrb[28].mxu0 }
 0xd62   : > { %v5026_v41 = vadd.f32 %v5679_v0, %v5025_v45  ;;  %v5997_v5 = vpop.f32.mrb[29].mxu0  ;;  %v6196_v45 = vld [vmem:[%s7655_s22 + $0x30] sm:$0xff]  }
 0xd63   : > { %v5028_v6 = vpop.f32.mrb[30].mxu0  ;;  %v6198_v5 = vld [vmem:[%s7655_s22 + $0x38] sm:$0xff]  }
 0xd64   : > { %v7446_v9 = vadd.f32 %v5026_v41, %v7034_v12  ;;  %v5029_v17 = vadd.f32 %v5679_v0, %v5028_v6  ;;  %v5998_v19 = vpop.f32.mrb[31].mxu0  ;;  %v6164_v12 = vld [vmem:[%s7653_s20 + $0x14] ss:$8 sps:$4 sm:$0xff]   ;;  %v5091_v6 = vld [vmem:[%s7654_s21] sm:$0x3] }
 0xd65   : > { %5185 = vmatprep.subr.bf16.mxu1 %v6164_v12  ;;  %v6195_v0 = vld [vmem:[%s7655_s22 + $0x70] sm:$0xff]   ;;  %v6197_v41 = vld [vmem:[%s7655_s22 + $0x78] sm:$0xff]   ;;  %v5100_v19 = vrot.slane %v5091_v6, %v6669_v57 }
 0xd66   : > { %v7449_v62 = vadd.f32 %v5029_v17, %v7037_v8  ;;  %5036 = vadd.xlane.f32.xlu1 %v7446_v9  ;;  %v6162_v8 = vld [vmem:[%s7653_s20 + $0x10] ss:$8 sps:$4 sm:$0xff]   ;;  %5813 = vmatprep.subr.bf16.mxu0 %v6195_v0  ;;  %v5096_v17 = vrot.slane %v5091_v6, %v6663_v55  ;;  %v5706_v55 = vld [vmem:[%s7656_s23] ss:$0 sm:$0xff] }
 0xd67   : > { %5186 = vmatpush1.bf16.msra.mxu1 %v6162_v8  ;;  %5814 = vmatpush3.bf16.msra.mxu0 %v6196_v45 }
 0xd68   : > { %5038 = vadd.xlane.f32.xlu0 %v7449_v62  ;;  %5187 = vmatprep.subr.bf16.mxu1 %v6167_v26 }
 0xd69   : > { %5815 = vmatprep.subr.bf16.mxu0 %v6197_v41 }
 0xd6b   : > { %5188 = vmatpush1.bf16.msra.mxu1 %v6165_v28  ;;  %5816 = vmatpush3.bf16.msra.mxu0 %v6198_v5 }
 0xd6c   : > { %5189 = vmatprep.subr.bf16.mxu1 %v6170_v29 }
 0xd6f   : > { %5190 = vmatpush1.bf16.msra.mxu1 %v6168_v10 }
 0xd70   : > { %5191 = vmatprep.subr.bf16.mxu1 %v6173_v31 }
 0xd73   : > { %5192 = vmatpush1.bf16.msra.mxu1 %v6171_v16 }
 0xd74   : > { %5193 = vmatprep.subr.bf16.mxu1 %v6176_v32 }
 0xd77   : > { %5194 = vmatpush1.bf16.msra.mxu1 %v6174_v35 }
 0xd78   : > { %5195 = vmatprep.subr.bf16.mxu1 %v6179_v61 }
 0xd7b   : > { %5196 = vmatpush1.bf16.msra.mxu1 %v6177_v38 }
 0xd7c   : > { %5197 = vmatprep.subr.bf16.mxu1 %v6182_v27 }
 0xd7f   : > { %5198 = vmatpush1.bf16.msra.mxu1 %v6180_v50 }
 0xdf3   : > { %v5037_v22 = vpop.xlane.xlu1 %5036 }
 0xdf4   : > { %v5040_v23 = vmul.f32 0.0078125, %v5037_v22 }
 0xdf5   : > { %v5039_v63 = vpop.xlane.xlu0 %5038 }
 0xdf6   : > { %v7466_v24 = vsub.f32 %v7446_v9, %v5040_v23  ;;  %v5041_v18 = vmul.f32 0.0078125, %v5039_v63 }
 0xdf8   : > { %v7469_v51 = vsub.f32 %v7449_v62, %v5041_v18  ;;  %v5044_v20 = vmul.f32 %v7466_v24, %v7466_v24 }
 0xdfa   : > { %5046 = vadd.xlane.f32.xlu0 %v5044_v20  ;;  %v5045_v25 = vmul.f32 %v7469_v51, %v7469_v51 }
 0xdfc   : > { %5048 = vadd.xlane.f32.xlu1 %v5045_v25 }
 0xe87   : > { %v5047_v53 = vpop.xlane.xlu0 %5046 }
 0xe88   : > { %v5050_v34 = vmul.f32 0.0078125, %v5047_v53 }
 0xe89   : > { %v5049_v49 = vpop.xlane.xlu1 %5048 }
 0xe8a   : > { %v5052_v42 = vadd.f32 1e-05, %v5050_v34  ;;  %v5051_v56 = vmul.f32 0.0078125, %v5049_v49  ;;  %v5723_v34 = vld [vmem:[%s7718_s2] ss:$0 sm:$0xff]  ;;  %s6287_s2 = scalar_lea.vmem %s6286_s10, 512 }
 0xe8b   : > { %p6289_p1 = scmp.lt.s32.totalorder %s6287_s2, %s6281_s8 }
 0xe8c   : > { %6271 = vrsqrt.f32 %v5052_v42  ;;  %v5053_v58 = vadd.f32 1e-05, %v5051_v56  ;;  %v5724_v56 = vld [vmem:[%s7719_s28] ss:$0 sm:$0xff] }
 0xe8d   : > { %p6290_p2 = por %p6289_p1, %p6288_p0 }
 0xe8e   : > { %6273 = vrsqrt.f32 %v5053_v58 }
 0xe8f   : > { %p6291_p3 = pnand %p6290_p2, %p6284_p13 }
 0xe96   : > { %v6272_v59 = vpop.eup %6271 }
 0xe97   : > { %v5056_v7 = vmul.f32 %v6272_v59, %v7466_v24 }
 0xe98   : > { %v6274_v46 = vpop.eup %6273 }
 0xe99   : > { %v5057_v47 = vmul.f32 %v6274_v46, %v7469_v51  ;;  %v5064_v48 = vmul.f32 %v5688_v60, %v5056_v7 }
 0xe9b   : > { %v5065_v54 = vmul.f32 %v5688_v60, %v5057_v47  ;;  %v5072_v33 = vadd.f32 %v5689_v2, %v5064_v48 }
 0xe9d   : > { %v5073_v43 = vadd.f32 %v5689_v2, %v5065_v54 }
 0xe9f   : > { %v5074_v44 = vpack.c.bf16 %v5073_v43, %v5072_v33 }
 0xea1   : > { %5216 = vmatmul.mubr.bf16.vlgmr.msra.gmra.mrb[56].mxu1 %v5074_v44 }
 0xf74   : > { %v5217_v13 = vpop.f32.mrb[56].mxu1 }
 0xf75   : > { %v5218_v14 = vadd.f32 %v5217_v13, %v5096_v17  ;;  %v5219_v12 = vpop.f32.mrb[57].mxu1 }
 0xf76   : > { %v5220_v8 = vadd.f32 %v5219_v12, %v5100_v19  ;;  %v5221_v22 = vpop.f32.mrb[58].mxu1 }
 0xf77   : > { %v5222_v23 = vadd.f32 %v5221_v22, %v5096_v17  ;;  %v5223_v63 = vpop.f32.mrb[59].mxu1  ;;  %v5226_v18 = vmax.f32 %v5218_v14, 0.0 }
 0xf78   : > { %v5224_v24 = vadd.f32 %v5223_v63, %v5100_v19  ;;  %v5227_v20 = vmax.f32 %v5220_v8, 0.0 }
 0xf79   : > { %v5228_v51 = vmax.f32 %v5222_v23, 0.0 }
 0xf7a   : > { %v5229_v25 = vmax.f32 %v5224_v24, 0.0 }
 0xf7b   : > { %v5230_v26 = vpack.c.bf16 %v5228_v51, %v5226_v18 }
 0xf7c   : > { %v5231_v28 = vpack.c.bf16 %v5229_v25, %v5227_v20 }
 0xf7e   : > { %5399 = vmatprep.mubr.bf16.mxu0 %v5231_v28 }
 0xf7f   : > { %5400 = vmatmul.mubr.bf16.vlgmr.msra.gmra.mrb[32].mxu0 %v5230_v26 }
0x1052   : > { %v5817_v29 = vpop.f32.mrb[32].mxu0 }
0x1053   : > { %v5818_v57 = vpop.f32.mrb[33].mxu0 }
0x1054   : > { %v5819_v10 = vadd.f32 %v5818_v57, %v5817_v29  ;;  %v5820_v31 = vpop.f32.mrb[34].mxu0 }
0x1055   : > { %v5821_v16 = vpop.f32.mrb[35].mxu0 }
0x1056   : > { %v5402_v32 = vadd.f32 %v5819_v10, %v5706_v55  ;;  %v5822_v35 = vadd.f32 %v5821_v16, %v5820_v31 }
0x1058   : > { %v5405_v61 = vadd.f32 %v5822_v35, %v5706_v55  ;;  %v5408_v36 = vadd.f32 %v5402_v32, %v7446_v9 }
0x105a   : > { %5412 = vadd.xlane.f32.xlu0 %v5408_v36  ;;  %v5409_v52 = vadd.f32 %v5405_v61, %v7449_v62 }
0x105c   : > { %5414 = vadd.xlane.f32.xlu1 %v5409_v52 }
0x10e7   : > { %v5413_v37 = vpop.xlane.xlu0 %5412 }
0x10e8   : > { %v5416_v38 = vmul.f32 0.0078125, %v5413_v37 }
0x10e9   : > { %v5415_v27 = vpop.xlane.xlu1 %5414 }
0x10ea   : > { %v5418_v39 = vsub.f32 %v5408_v36, %v5416_v38  ;;  %v5417_v21 = vmul.f32 0.0078125, %v5415_v27 }
0x10ec   : > { %v5419_v50 = vsub.f32 %v5409_v52, %v5417_v21  ;;  %v5420_v30 = vmul.f32 %v5418_v39, %v5418_v39 }
0x10ee   : > { %5422 = vadd.xlane.f32.xlu0 %v5420_v30  ;;  %v5421_v15 = vmul.f32 %v5419_v50, %v5419_v50 }
0x10f0   : > { %5424 = vadd.xlane.f32.xlu1 %v5421_v15 }
0x117b   : > { %v5423_v40 = vpop.xlane.xlu0 %5422 }
0x117c   : > { %v5426_v1 = vmul.f32 0.0078125, %v5423_v40 }
0x117d   : > { %v5425_v4 = vpop.xlane.xlu1 %5424 }
0x117e   : > { %v5428_v9 = vadd.f32 1e-05, %v5426_v1  ;;  %v5427_v11 = vmul.f32 0.0078125, %v5425_v4 }
0x1180   : > { %6275 = vrsqrt.f32 %v5428_v9  ;;  %v5429_v62 = vadd.f32 1e-05, %v5427_v11 }
0x1182   : > { %6277 = vrsqrt.f32 %v5429_v62 }
0x118a   : > { %v6276_v53 = vpop.eup %6275 }
0x118b   : > { %v5432_v49 = vmul.f32 %v6276_v53, %v5418_v39 }
0x118c   : > { %v6278_v42 = vpop.eup %6277 }
0x118d   : > { %v5440_v58 = vmul.f32 %v5723_v34, %v5432_v49  ;;  %v5433_v59 = vmul.f32 %v6278_v42, %v5419_v50 }
0x118f   : > { %v5441_v60 = vmul.f32 %v5723_v34, %v5433_v59  ;;  %v5448_v7 = vadd.f32 %v5724_v56, %v5440_v58 }
0x1191   : > { %v5449_v46 = vadd.f32 %v5724_v56, %v5441_v60  ;;  %5450 = vst [vmem:[%s821_s4] sm:$0xff] %v5448_v7 }
0x1193   : > { %5451 = vst [vmem:[%s821_s4 + $0x8] sm:$0xff] %v5449_v46 }
0x1194   : > { %6294 = shalt.err (!%p6291_p3)
}
0x1195   : > { %s6295_s0 = scalar_lea.hbm %s7588_s5, 256  ;;  %s6299_s28 = scalar_lea.hbm %s7721_s30, 512 }
0x1196   : > { %p6296_p4 = scmp.ne.s32.totalorder %s7588_s5, %s6295_s0  ;;  %p6300_p9 = scmp.lt.u32.totalorder %s7588_s5, %s7721_s30 }
0x1197   : > { %p6301_p10 = scmp.lt.u32.totalorder %s6299_s28, %s6295_s0  ;;  %p6303_p12 = scmp.lt.u32.totalorder %s6295_s0, %s7588_s5 }
0x1198   : > { %p6297_p7 = pnand %p6296_p4, %p6530_p5 }
0x1199   : > { %p6302_p11 = por %p6301_p10, %p6300_p9 }
0x119a   : > { %p6298_p8 = pneg %p6297_p7 }
0x119b   : > { %p6304_p13 = por %p6303_p12, %p6302_p11 }
0x119d   : > { %p6305_p0 = pnand %p6304_p13, %p6298_p8 }
0x119f   : > { %6308 = shalt.err (!%p6305_p0)
}
0x11a0   : > { %s6355_s6 = smov 128   ;;  %s6356_s1 = smov 8  }
0x11a1   : > { %5999 = dma.vmem_to_hbm [thread:$0]  (%p6530_p5), %s7590_s7, 256, %s7588_s5, %s7592_s25, %s6355_s6, %s6355_s6, %s6356_s1  }
0x11a2 PF: > { %s7722_s8 = sld [smem:[#allocation7_spill]]  ;;  %s7723_s24 = sld [smem:[#allocation5_spill]] }
0x11a8   : > { %p6005_p1 = scmp.ge.s32.totalorder %s7722_s8, 2  ;;  %s5481_s2 = sand.u32 1, %s7723_s24  }
0x11a9   : > { %s5482_s0 = scalar_lea.sflag [#allocation3], %s5481_s2 }
0x11aa   : > { %p6002_p2 = pnand %p6005_p1, %p6534_p6 }
0x11ac   : > { %6326 = dma.done.wait (!%p6002_p2), %s5482_s0, 256  }
0x11ad   : > { %6328 = vsyncadd (!%p6002_p2), %s5482_s0, 4294967040  ;;  %s7725_s28 = sld [smem:[#allocation8_spill]]  ;;  %s7726_s9 = sld [smem:[#allocation6_spill]] }
0x11ae   : > { %s7727_s7 = sld [smem:[#allocation9_spill]]  ;;  %s7728_s27 = smov %s6335_s3 }
0x11b3   : > { %p36_p3 = scmp.ge.s32.totalorder %s7725_s28, 4   ;;  %s7729_s3 = smov %s7726_s9 }
0x11b5   :  { %38 = sbr.rel (!%p36_p3) target bundleno = 18 (0x12), region = 168 }
0x11bc   :  { %5487 = vsyncpa [#allocation3], 1 }
0x11bd   :  { %5489 = vsyncpa [#allocation3 + $0x1], 1 }

</bundles_post_ra>
